<compile_context>
chip_gen: v6e
topology: v6e:2x2x1
jax: 0.10.0
libtpu: 0.0.40
codegen_flags: <defaults>
</compile_context>

<pallas_src>
import functools

import jax
import jax.numpy as jnp
from jax.experimental import pallas as pl
from jax.experimental.pallas import tpu as pltpu


# ---------------------------------------------------------------------------
# Fused kernel: conv1/ReLU/conv2/ReLU/conv3/flatten/fc  +  backward GRU  +
#               txt_lin on both branches + concat + 256->85->28->1 MLP head
# ---------------------------------------------------------------------------
def _supervised_kernel(
        patches_ref, cw1_ref, cb1_ref, cw2_ref, cb2_ref, cw3_ref, cb3_ref,
        fcw_ref, fcb_ref,
        x_ref, len_ref, wih_ref, whh_ref, bih_ref, bhh_ref,
        tw_ref, tb_ref, s1w_ref, s1b_ref, s2w_ref, s2b_ref, s3w_ref, s3b_ref,
        o_ref, *, n_pos, batch, T, H):
    bf16 = jnp.bfloat16
    f32 = jnp.float32

    # ------------- image branch: 3 stride-2 convs as 3 wide-K matmuls -------
    # patches rows: (p3y, p3x, b); features: (a3y, a3x, a2y, a2x, c, ky, kx).
    # conv1: block-diagonal over the 16 (a3,a2) sub-positions, K = 64*C.
    y1 = jnp.dot(patches_ref[...], cw1_ref[...],
                 preferred_element_type=f32) + cb1_ref[...]
    y1 = jnp.maximum(y1, 0.0).astype(bf16)                    # (M, 16*NF)
    # conv2: K-stacked over (ky,kx), block-diag over (a3y,a3x), K = 16*NF.
    y2 = jnp.dot(y1, cw2_ref[...], preferred_element_type=f32) + cb2_ref[...]
    y2 = jnp.maximum(y2, 0.0).astype(bf16)                    # (M, 8*NF)
    # conv3: K-stacked over (ky,kx), K = 8*NF.  No ReLU (matches Sequential).
    y3 = (jnp.dot(y2, cw3_ref[...], preferred_element_type=f32)
          + cb3_ref[...]).astype(bf16)                        # (M, 4*NF)

    # flatten + fc: NCHW flatten permutation folded into fcw (one (4NF, 256)
    # slab per output position; y3 rows are contiguous B-row position blocks).
    h_img = fcb_ref[...]
    for p in range(n_pos):
        h_img = h_img + jnp.dot(y3[p * batch:(p + 1) * batch, :], fcw_ref[p],
                                preferred_element_type=f32)   # (B, 256) f32

    # ------------- text branch: backward-direction GRU ----------------------
    # Input projection hoisted out of the recurrence: one (T*B, E) bf16 matmul.
    gi_all = jnp.dot(x_ref[...], wih_ref[...],
                     preferred_element_type=f32) + bih_ref[...]   # (T*B, 3H)
    whh = whh_ref[...]                                            # (H, 3H) f32
    bhh = bhh_ref[...]
    lens = len_ref[...]                                           # (B, 1) int32

    h = jnp.zeros((batch, H), f32)
    # TODO(synk): for large T switch to lax.fori_loop over a VMEM gi scratch to
    # bound vreg live ranges (negligible at T=8 per the perf review).
    for i in range(T):                       # backward recurrence, unrolled
        t = T - 1 - i
        gi = gi_all[t * batch:(t + 1) * batch, :]
        gh = jnp.dot(h, whh, preferred_element_type=f32) + bhh
        r = jax.nn.sigmoid(gi[:, 0 * H:1 * H] + gh[:, 0 * H:1 * H])
        z = jax.nn.sigmoid(gi[:, 1 * H:2 * H] + gh[:, 1 * H:2 * H])
        n = jnp.tanh(gi[:, 2 * H:3 * H] + r * gh[:, 2 * H:3 * H])
        h_new = (1.0 - z) * n + z * h
        h = jnp.where(lens > t, h_new, h)    # pack_padded: update only t < len
    h_txt = h                                                     # (B, H) f32

    # ------------- head: txt_lin on both branches + concat + MLP ------------
    tw = tw_ref[...]
    tb = tb_ref[...]
    half = tw.shape[1]
    img_p = jnp.dot(h_img, tw, preferred_element_type=f32) + tb
    txt_p = jnp.dot(h_txt, tw, preferred_element_type=f32) + tb
    # cat([txt, img], 1) @ w1  ==  txt @ w1[:half] + img @ w1[half:]
    h1 = (jnp.dot(txt_p, s1w_ref[0:half, :], preferred_element_type=f32)
          + jnp.dot(img_p, s1w_ref[half:2 * half, :],
                    preferred_element_type=f32)
          + s1b_ref[...])
    h1 = jnp.maximum(h1, 0.0)
    h2 = jnp.maximum(
        jnp.dot(h1, s2w_ref[...], preferred_element_type=f32) + s2b_ref[...],
        0.0)
    o_ref[...] = (jnp.dot(h2, s3w_ref[...], preferred_element_type=f32)
                  + s3b_ref[...])


# ---------------------------------------------------------------------------
# Forward pass wrapper (one pallas_call)
# ---------------------------------------------------------------------------
def supervised_forward(params, img, seq, lengths):
    B, C, Himg, Wimg = img.shape
    S3 = Himg // 8                   # conv stack halves spatial 3 times
    n_pos = S3 * S3
    T = seq.shape[1]
    H = params["gru_whh"].shape[0]

    # Hierarchical 2x2 patch layout: rows (p3y, p3x, b), features
    # (a3y, a3x, a2y, a2x, c, ky, kx) so conv1/conv2/conv3 are single matmuls.
    x = img.reshape(B, C, S3, 2, 2, 2, S3, 2, 2, 2)
    #           dims: (B, C, y3, a3y, a2y, a1y, x3, a3x, a2x, a1x)
    x = x.transpose(2, 6, 0, 3, 7, 4, 8, 1, 5, 9)
    #           dims: (y3, x3, B, a3y, a3x, a2y, a2x, C, a1y, a1x)
    patches = x.reshape(n_pos * B, 64 * C).astype(jnp.bfloat16)

    # Text branch input: embed -> (t, b) row-major, bf16 in the wrapper.
    emb = jnp.take(params["emb"], seq, axis=0)                    # (B, T, E)
    x_tbe = (jnp.transpose(emb, (1, 0, 2))
             .reshape(T * B, -1).astype(jnp.bfloat16))            # rows (t, b)
    lens2d = lengths.reshape(B, 1).astype(jnp.int32)

    args = (patches,
            params["conv1_w"], params["conv1_b"],
            params["conv2_w"], params["conv2_b"],
            params["conv3_w"], params["conv3_b"],
            params["fc_w"], params["fc_b"],
            x_tbe, lens2d,
            params["gru_wih"], params["gru_whh"],
            params["gru_bih"], params["gru_bhh"],
            params["txt_w"], params["txt_b"],
            params["seq1_w"], params["seq1_b"],
            params["seq2_w"], params["seq2_b"],
            params["seq3_w"], params["seq3_b"])

    kern = functools.partial(_supervised_kernel,
                             n_pos=n_pos, batch=B, T=T, H=H)

    def full_spec(a):
        nd = a.ndim
        return pl.BlockSpec(a.shape, lambda *_: (0,) * nd)

    # TODO(synk): at production batch sizes, add a batch-tiled "parallel" grid
    # axis so v7x's two TensorCores split the work; at B=2 it only adds steps.
    return pl.pallas_call(
        kern,
        out_shape=jax.ShapeDtypeStruct((B, 1), jnp.float32),
        grid=(1,),
        in_specs=[full_spec(a) for a in args],
        out_specs=pl.BlockSpec((B, 1), lambda i: (0, 0)),
        compiler_params=pltpu.CompilerParams(
            dimension_semantics=("arbitrary",),
            vmem_limit_bytes=32 * 1024 * 1024),
    )(*args)


# ---------------------------------------------------------------------------
# Parameter init: generate PyTorch-layout tensors, then convert ONCE into the
# pre-transposed / block-diagonal / K-stacked (and bf16) kernel layouts.
# ---------------------------------------------------------------------------
def init_params(key, *, vocab, emb_dim, n_filters, channels, img_size, hidden):
    cout = img_size // 8
    n_pos = cout * cout
    ks = jax.random.split(key, 21)
    s = 0.1

    def rnd(k, shape):
        return jax.random.normal(k, shape, jnp.float32) * s

    NF = n_filters
    C = channels
    # raw PyTorch-layout tensors (shapes follow Supervised.__init__)
    w_c1 = rnd(ks[0], (NF, C, 2, 2));                b_c1 = rnd(ks[1], (NF,))
    w_c2 = rnd(ks[2], (NF * 2, NF, 2, 2));           b_c2 = rnd(ks[3], (NF * 2,))
    w_c3 = rnd(ks[4], (NF * 4, NF * 2, 2, 2));       b_c3 = rnd(ks[5], (NF * 4,))
    w_fc = rnd(ks[6], (hidden, NF * 4 * n_pos));     b_fc = rnd(ks[7], (hidden,))
    w_tx = rnd(ks[8], (hidden // 2, hidden));        b_tx = rnd(ks[9], (hidden // 2,))
    w_ih = rnd(ks[10], (3 * hidden, emb_dim));       b_ih = rnd(ks[11], (3 * hidden,))
    w_hh = rnd(ks[12], (3 * hidden, hidden));        b_hh = rnd(ks[13], (3 * hidden,))
    w_s1 = rnd(ks[14], (hidden // 3, hidden));       b_s1 = rnd(ks[15], (hidden // 3,))
    w_s2 = rnd(ks[16], (hidden // 9, hidden // 3));  b_s2 = rnd(ks[17], (hidden // 9,))
    w_s3 = rnd(ks[18], (1, hidden // 9));            b_s3 = rnd(ks[19], (1,))
    emb = rnd(ks[20], (vocab, emb_dim))

    bf16 = jnp.bfloat16
    eye16 = jnp.eye(16, dtype=jnp.float32)
    eye4 = jnp.eye(4, dtype=jnp.float32)

    # conv1: (4C, NF) patch matrix (feature order c,ky,kx), block-diagonal over
    # the 16 (a3y,a3x,a2y,a2x) sub-positions of a conv3 cell -> K = 64*C.
    w1p = w_c1.reshape(NF, 4 * C).T
    conv1_w = jnp.einsum("pq,kf->pkqf", eye16, w1p
                         ).reshape(16 * 4 * C, 16 * NF).astype(bf16)
    conv1_b = jnp.tile(b_c1, 16).reshape(1, -1)
    # conv2: K-stack the 4 (ky,kx) positions, block-diag over the 4 (a3y,a3x)
    # positions -> K = 16*NF.
    w2s = w_c2.transpose(2, 3, 1, 0).reshape(4 * NF, 2 * NF)
    conv2_w = jnp.einsum("pq,kf->pkqf", eye4, w2s
                         ).reshape(16 * NF, 8 * NF).astype(bf16)
    conv2_b = jnp.tile(b_c2, 4).reshape(1, -1)
    # conv3: K-stack the 4 (ky,kx) positions -> K = 8*NF.
    conv3_w = w_c3.transpose(2, 3, 1, 0).reshape(8 * NF, 4 * NF).astype(bf16)
    conv3_b = b_c3.reshape(1, -1)
    # fc with the NCHW flatten permutation folded in: (n_pos, 4NF, hidden)
    fc_w = (w_fc.reshape(hidden, NF * 4, cout, cout)
            .transpose(2, 3, 1, 0).reshape(n_pos, NF * 4, hidden).astype(bf16))
    fc_b = b_fc.reshape(1, -1)

    # TODO(synk): forward-direction GRU weights are unused by hidden[-1] and are
    # intentionally not allocated (output matches the reference exactly).
    return {
        "emb": emb,
        "conv1_w": conv1_w, "conv1_b": conv1_b,
        "conv2_w": conv2_w, "conv2_b": conv2_b,
        "conv3_w": conv3_w, "conv3_b": conv3_b,
        "fc_w": fc_w, "fc_b": fc_b,
        "txt_w": w_tx.T, "txt_b": b_tx.reshape(1, -1),
        # backward-direction GRU (gate order r,z,n) in (in, out) layout.
        # wih is bf16 (one-shot input projection); whh stays f32 so the
        # recurrent hidden state does not accumulate bf16 rounding over T.
        "gru_wih": w_ih.T.astype(bf16), "gru_bih": b_ih.reshape(1, -1),
        "gru_whh": w_hh.T, "gru_bhh": b_hh.reshape(1, -1),
        # head (number=2, width='Medium'): 256 -> 85 -> 28 -> 1
        "seq1_w": w_s1.T, "seq1_b": b_s1.reshape(1, -1),
        "seq2_w": w_s2.T, "seq2_b": b_s2.reshape(1, -1),
        "seq3_w": w_s3.T, "seq3_b": b_s3.reshape(1, -1),
    }


# ---------------------------------------------------------------------------
# Demo
# ---------------------------------------------------------------------------
if __name__ == "__main__":
    B, C, IMG = 2, 4, 16          # img_size=16 -> cout = 2
    T, VOCAB, E = 8, 20, 32       # seq length 8, embedding_dim 32
    NF, HID = 16, 256             # n_filters=16, hidden_dim=256 (fixed by module)

    key = jax.random.PRNGKey(0)
    k_p, k_img, k_seq = jax.random.split(key, 3)

    params = init_params(k_p, vocab=VOCAB, emb_dim=E, n_filters=NF,
                         channels=C, img_size=IMG, hidden=HID)

    img = jax.random.normal(k_img, (B, C, IMG, IMG), jnp.float32)
    seq = jax.random.randint(k_seq, (B, T), 0, VOCAB, dtype=jnp.int32)
    lengths = jnp.array([8, 5], dtype=jnp.int32)

    fwd = jax.jit(supervised_forward)
    out = jax.block_until_ready(fwd(params, img, seq, lengths))
    assert out.shape == (B, 1) and out.dtype == jnp.float32
    assert bool(jnp.all(jnp.isfinite(out)))
    print("KERNEL_OK")
</pallas_src>

<mosaic_0001>
module attributes {stable_mosaic.version = 11 : i64} {
  func.func @_supervised_kernel(%arg0: i32, %arg1: memref<8x256xbf16, #tpu.memory_space<vmem>>, %arg2: memref<256x256xbf16, #tpu.memory_space<vmem>>, %arg3: memref<1x256xf32, #tpu.memory_space<vmem>>, %arg4: memref<256x128xbf16, #tpu.memory_space<vmem>>, %arg5: memref<1x128xf32, #tpu.memory_space<vmem>>, %arg6: memref<128x64xbf16, #tpu.memory_space<vmem>>, %arg7: memref<1x64xf32, #tpu.memory_space<vmem>>, %arg8: memref<4x64x256xbf16, #tpu.memory_space<vmem>>, %arg9: memref<1x256xf32, #tpu.memory_space<vmem>>, %arg10: memref<16x32xbf16, #tpu.memory_space<vmem>>, %arg11: memref<2x1xi32, #tpu.memory_space<vmem>>, %arg12: memref<32x768xbf16, #tpu.memory_space<vmem>>, %arg13: memref<256x768xf32, #tpu.memory_space<vmem>>, %arg14: memref<1x768xf32, #tpu.memory_space<vmem>>, %arg15: memref<1x768xf32, #tpu.memory_space<vmem>>, %arg16: memref<256x128xf32, #tpu.memory_space<vmem>>, %arg17: memref<1x128xf32, #tpu.memory_space<vmem>>, %arg18: memref<256x85xf32, #tpu.memory_space<vmem>>, %arg19: memref<1x85xf32, #tpu.memory_space<vmem>>, %arg20: memref<85x28xf32, #tpu.memory_space<vmem>>, %arg21: memref<1x28xf32, #tpu.memory_space<vmem>>, %arg22: memref<28x1xf32, #tpu.memory_space<vmem>>, %arg23: memref<1x1xf32, #tpu.memory_space<vmem>>, %arg24: memref<2x1xf32, #tpu.memory_space<vmem>>) attributes {dimension_semantics = [#tpu.dimension_semantics<arbitrary>], iteration_bounds = array<i64: 1>, scalar_prefetch = 0 : i64, scratch_operands = 0 : i64, tpu.core_type = #tpu.core_type<tc>, window_params = [{pipeline_mode = #tpu.pipeline_mode<synchronous>, transform_indices = @transform_0, window_bounds = array<i64: 8, 256>}, {pipeline_mode = #tpu.pipeline_mode<synchronous>, transform_indices = @transform_1, window_bounds = array<i64: 256, 256>}, {pipeline_mode = #tpu.pipeline_mode<synchronous>, transform_indices = @transform_2, window_bounds = array<i64: 1, 256>}, {pipeline_mode = #tpu.pipeline_mode<synchronous>, transform_indices = @transform_3, window_bounds = array<i64: 256, 128>}, {pipeline_mode = #tpu.pipeline_mode<synchronous>, transform_indices = @transform_4, window_bounds = array<i64: 1, 128>}, {pipeline_mode = #tpu.pipeline_mode<synchronous>, transform_indices = @transform_5, window_bounds = array<i64: 128, 64>}, {pipeline_mode = #tpu.pipeline_mode<synchronous>, transform_indices = @transform_6, window_bounds = array<i64: 1, 64>}, {pipeline_mode = #tpu.pipeline_mode<synchronous>, transform_indices = @transform_7, window_bounds = array<i64: 4, 64, 256>}, {pipeline_mode = #tpu.pipeline_mode<synchronous>, transform_indices = @transform_8, window_bounds = array<i64: 1, 256>}, {pipeline_mode = #tpu.pipeline_mode<synchronous>, transform_indices = @transform_9, window_bounds = array<i64: 16, 32>}, {pipeline_mode = #tpu.pipeline_mode<synchronous>, transform_indices = @transform_10, window_bounds = array<i64: 2, 1>}, {pipeline_mode = #tpu.pipeline_mode<synchronous>, transform_indices = @transform_11, window_bounds = array<i64: 32, 768>}, {pipeline_mode = #tpu.pipeline_mode<synchronous>, transform_indices = @transform_12, window_bounds = array<i64: 256, 768>}, {pipeline_mode = #tpu.pipeline_mode<synchronous>, transform_indices = @transform_13, window_bounds = array<i64: 1, 768>}, {pipeline_mode = #tpu.pipeline_mode<synchronous>, transform_indices = @transform_14, window_bounds = array<i64: 1, 768>}, {pipeline_mode = #tpu.pipeline_mode<synchronous>, transform_indices = @transform_15, window_bounds = array<i64: 256, 128>}, {pipeline_mode = #tpu.pipeline_mode<synchronous>, transform_indices = @transform_16, window_bounds = array<i64: 1, 128>}, {pipeline_mode = #tpu.pipeline_mode<synchronous>, transform_indices = @transform_17, window_bounds = array<i64: 256, 85>}, {pipeline_mode = #tpu.pipeline_mode<synchronous>, transform_indices = @transform_18, window_bounds = array<i64: 1, 85>}, {pipeline_mode = #tpu.pipeline_mode<synchronous>, transform_indices = @transform_19, window_bounds = array<i64: 85, 28>}, {pipeline_mode = #tpu.pipeline_mode<synchronous>, transform_indices = @transform_20, window_bounds = array<i64: 1, 28>}, {pipeline_mode = #tpu.pipeline_mode<synchronous>, transform_indices = @transform_21, window_bounds = array<i64: 28, 1>}, {pipeline_mode = #tpu.pipeline_mode<synchronous>, transform_indices = @transform_22, window_bounds = array<i64: 1, 1>}, {pipeline_mode = #tpu.pipeline_mode<synchronous>, transform_indices = @transform_23, window_bounds = array<i64: 2, 1>}]} {
    %c0 = arith.constant 0 : index
    %c0_0 = arith.constant 0 : index
    %0 = vector.load %arg1[%c0, %c0_0] : memref<8x256xbf16, #tpu.memory_space<vmem>>, vector<8x256xbf16>
    %c0_1 = arith.constant 0 : index
    %c0_2 = arith.constant 0 : index
    %1 = vector.load %arg2[%c0_1, %c0_2] : memref<256x256xbf16, #tpu.memory_space<vmem>>, vector<256x256xbf16>
    %cst = arith.constant dense<0.000000e+00> : vector<8x256xf32>
    %2 = tpu.matmul %0, %1, %cst {dimension_numbers = #tpu.dot_dimension_numbers<[1], [0], [0], [1], [0, 0, 1, 1], [], []>} : vector<8x256xbf16>, vector<256x256xbf16>, vector<8x256xf32> -> vector<8x256xf32>
    %c0_3 = arith.constant 0 : index
    %c0_4 = arith.constant 0 : index
    %3 = vector.load %arg3[%c0_3, %c0_4] : memref<1x256xf32, #tpu.memory_space<vmem>>, vector<1x256xf32>
    %4 = vector.broadcast %3 : vector<1x256xf32> to vector<8x256xf32>
    %5 = arith.addf %2, %4 : vector<8x256xf32>
    %cst_5 = arith.constant 0.000000e+00 : f32
    %6 = vector.broadcast %cst_5 : f32 to vector<8x256xf32>
    %7 = arith.maximumf %5, %6 : vector<8x256xf32>
    %8 = arith.truncf %7 : vector<8x256xf32> to vector<8x256xbf16>
    %c0_6 = arith.constant 0 : index
    %c0_7 = arith.constant 0 : index
    %9 = vector.load %arg4[%c0_6, %c0_7] : memref<256x128xbf16, #tpu.memory_space<vmem>>, vector<256x128xbf16>
    %cst_8 = arith.constant dense<0.000000e+00> : vector<8x128xf32>
    %10 = tpu.matmul %8, %9, %cst_8 {dimension_numbers = #tpu.dot_dimension_numbers<[1], [0], [0], [1], [0, 0, 1, 1], [], []>} : vector<8x256xbf16>, vector<256x128xbf16>, vector<8x128xf32> -> vector<8x128xf32>
    %c0_9 = arith.constant 0 : index
    %c0_10 = arith.constant 0 : index
    %11 = vector.load %arg5[%c0_9, %c0_10] : memref<1x128xf32, #tpu.memory_space<vmem>>, vector<1x128xf32>
    %12 = vector.broadcast %11 : vector<1x128xf32> to vector<8x128xf32>
    %13 = arith.addf %10, %12 : vector<8x128xf32>
    %cst_11 = arith.constant 0.000000e+00 : f32
    %14 = vector.broadcast %cst_11 : f32 to vector<8x128xf32>
    %15 = arith.maximumf %13, %14 : vector<8x128xf32>
    %16 = arith.truncf %15 : vector<8x128xf32> to vector<8x128xbf16>
    %c0_12 = arith.constant 0 : index
    %c0_13 = arith.constant 0 : index
    %17 = vector.load %arg6[%c0_12, %c0_13] : memref<128x64xbf16, #tpu.memory_space<vmem>>, vector<128x64xbf16>
    %cst_14 = arith.constant dense<0.000000e+00> : vector<8x64xf32>
    %18 = tpu.matmul %16, %17, %cst_14 {dimension_numbers = #tpu.dot_dimension_numbers<[1], [0], [0], [1], [0, 0, 1, 1], [], []>} : vector<8x128xbf16>, vector<128x64xbf16>, vector<8x64xf32> -> vector<8x64xf32>
    %c0_15 = arith.constant 0 : index
    %c0_16 = arith.constant 0 : index
    %19 = vector.load %arg7[%c0_15, %c0_16] : memref<1x64xf32, #tpu.memory_space<vmem>>, vector<1x64xf32>
    %20 = vector.broadcast %19 : vector<1x64xf32> to vector<8x64xf32>
    %21 = arith.addf %18, %20 : vector<8x64xf32>
    %22 = arith.truncf %21 : vector<8x64xf32> to vector<8x64xbf16>
    %c0_17 = arith.constant 0 : index
    %c0_18 = arith.constant 0 : index
    %23 = vector.load %arg9[%c0_17, %c0_18] : memref<1x256xf32, #tpu.memory_space<vmem>>, vector<1x256xf32>
    %24 = vector.extract_strided_slice %22 {offsets = [0, 0], sizes = [2, 64], strides = [1, 1]} : vector<8x64xbf16> to vector<2x64xbf16>
    %c0_19 = arith.constant 0 : index
    %c0_20 = arith.constant 0 : index
    %c0_21 = arith.constant 0 : index
    %25 = vector.load %arg8[%c0_19, %c0_20, %c0_21] : memref<4x64x256xbf16, #tpu.memory_space<vmem>>, vector<1x64x256xbf16>
    %26 = vector.shape_cast %25 : vector<1x64x256xbf16> to vector<64x256xbf16>
    %cst_22 = arith.constant dense<0.000000e+00> : vector<2x256xf32>
    %27 = tpu.matmul %24, %26, %cst_22 {dimension_numbers = #tpu.dot_dimension_numbers<[1], [0], [0], [1], [0, 0, 1, 1], [], []>} : vector<2x64xbf16>, vector<64x256xbf16>, vector<2x256xf32> -> vector<2x256xf32>
    %28 = vector.broadcast %23 : vector<1x256xf32> to vector<2x256xf32>
    %29 = arith.addf %28, %27 : vector<2x256xf32>
    %30 = vector.extract_strided_slice %22 {offsets = [2, 0], sizes = [2, 64], strides = [1, 1]} : vector<8x64xbf16> to vector<2x64xbf16>
    %c1 = arith.constant 1 : index
    %c0_23 = arith.constant 0 : index
    %c0_24 = arith.constant 0 : index
    %31 = vector.load %arg8[%c1, %c0_23, %c0_24] : memref<4x64x256xbf16, #tpu.memory_space<vmem>>, vector<1x64x256xbf16>
    %32 = vector.shape_cast %31 : vector<1x64x256xbf16> to vector<64x256xbf16>
    %cst_25 = arith.constant dense<0.000000e+00> : vector<2x256xf32>
    %33 = tpu.matmul %30, %32, %cst_25 {dimension_numbers = #tpu.dot_dimension_numbers<[1], [0], [0], [1], [0, 0, 1, 1], [], []>} : vector<2x64xbf16>, vector<64x256xbf16>, vector<2x256xf32> -> vector<2x256xf32>
    %34 = arith.addf %29, %33 : vector<2x256xf32>
    %35 = vector.extract_strided_slice %22 {offsets = [4, 0], sizes = [2, 64], strides = [1, 1]} : vector<8x64xbf16> to vector<2x64xbf16>
    %c2 = arith.constant 2 : index
    %c0_26 = arith.constant 0 : index
    %c0_27 = arith.constant 0 : index
    %36 = vector.load %arg8[%c2, %c0_26, %c0_27] : memref<4x64x256xbf16, #tpu.memory_space<vmem>>, vector<1x64x256xbf16>
    %37 = vector.shape_cast %36 : vector<1x64x256xbf16> to vector<64x256xbf16>
    %cst_28 = arith.constant dense<0.000000e+00> : vector<2x256xf32>
    %38 = tpu.matmul %35, %37, %cst_28 {dimension_numbers = #tpu.dot_dimension_numbers<[1], [0], [0], [1], [0, 0, 1, 1], [], []>} : vector<2x64xbf16>, vector<64x256xbf16>, vector<2x256xf32> -> vector<2x256xf32>
    %39 = arith.addf %34, %38 : vector<2x256xf32>
    %40 = vector.extract_strided_slice %22 {offsets = [6, 0], sizes = [2, 64], strides = [1, 1]} : vector<8x64xbf16> to vector<2x64xbf16>
    %c3 = arith.constant 3 : index
    %c0_29 = arith.constant 0 : index
    %c0_30 = arith.constant 0 : index
    %41 = vector.load %arg8[%c3, %c0_29, %c0_30] : memref<4x64x256xbf16, #tpu.memory_space<vmem>>, vector<1x64x256xbf16>
    %42 = vector.shape_cast %41 : vector<1x64x256xbf16> to vector<64x256xbf16>
    %cst_31 = arith.constant dense<0.000000e+00> : vector<2x256xf32>
    %43 = tpu.matmul %40, %42, %cst_31 {dimension_numbers = #tpu.dot_dimension_numbers<[1], [0], [0], [1], [0, 0, 1, 1], [], []>} : vector<2x64xbf16>, vector<64x256xbf16>, vector<2x256xf32> -> vector<2x256xf32>
    %44 = arith.addf %39, %43 : vector<2x256xf32>
    %c0_32 = arith.constant 0 : index
    %c0_33 = arith.constant 0 : index
    %45 = vector.load %arg10[%c0_32, %c0_33] : memref<16x32xbf16, #tpu.memory_space<vmem>>, vector<16x32xbf16>
    %c0_34 = arith.constant 0 : index
    %c0_35 = arith.constant 0 : index
    %46 = vector.load %arg12[%c0_34, %c0_35] : memref<32x768xbf16, #tpu.memory_space<vmem>>, vector<32x768xbf16>
    %cst_36 = arith.constant dense<0.000000e+00> : vector<16x768xf32>
    %47 = tpu.matmul %45, %46, %cst_36 {dimension_numbers = #tpu.dot_dimension_numbers<[1], [0], [0], [1], [0, 0, 1, 1], [], []>} : vector<16x32xbf16>, vector<32x768xbf16>, vector<16x768xf32> -> vector<16x768xf32>
    %c0_37 = arith.constant 0 : index
    %c0_38 = arith.constant 0 : index
    %48 = vector.load %arg14[%c0_37, %c0_38] : memref<1x768xf32, #tpu.memory_space<vmem>>, vector<1x768xf32>
    %49 = vector.broadcast %48 : vector<1x768xf32> to vector<16x768xf32>
    %50 = arith.addf %47, %49 : vector<16x768xf32>
    %c0_39 = arith.constant 0 : index
    %c0_40 = arith.constant 0 : index
    %51 = vector.load %arg13[%c0_39, %c0_40] : memref<256x768xf32, #tpu.memory_space<vmem>>, vector<256x768xf32>
    %c0_41 = arith.constant 0 : index
    %c0_42 = arith.constant 0 : index
    %52 = vector.load %arg15[%c0_41, %c0_42] : memref<1x768xf32, #tpu.memory_space<vmem>>, vector<1x768xf32>
    %c0_43 = arith.constant 0 : index
    %c0_44 = arith.constant 0 : index
    %53 = vector.load %arg11[%c0_43, %c0_44] : memref<2x1xi32, #tpu.memory_space<vmem>>, vector<2x1xi32>
    %cst_45 = arith.constant 0.000000e+00 : f32
    %54 = vector.broadcast %cst_45 : f32 to vector<2x256xf32>
    %55 = vector.extract_strided_slice %50 {offsets = [14, 0], sizes = [2, 768], strides = [1, 1]} : vector<16x768xf32> to vector<2x768xf32>
    %cst_46 = arith.constant dense<0.000000e+00> : vector<2x768xf32>
    %56 = tpu.matmul %54, %51, %cst_46 {dimension_numbers = #tpu.dot_dimension_numbers<[1], [0], [0], [1], [0, 0, 1, 1], [], []>} : vector<2x256xf32>, vector<256x768xf32>, vector<2x768xf32> -> vector<2x768xf32>
    %57 = vector.broadcast %52 : vector<1x768xf32> to vector<2x768xf32>
    %58 = arith.addf %56, %57 : vector<2x768xf32>
    %59 = vector.extract_strided_slice %55 {offsets = [0, 0], sizes = [2, 256], strides = [1, 1]} : vector<2x768xf32> to vector<2x256xf32>
    %60 = vector.extract_strided_slice %58 {offsets = [0, 0], sizes = [2, 256], strides = [1, 1]} : vector<2x768xf32> to vector<2x256xf32>
    %61 = arith.addf %59, %60 : vector<2x256xf32>
    %62 = arith.negf %61 : vector<2x256xf32>
    %63 = math.exp %62 : vector<2x256xf32>
    %cst_47 = arith.constant 1.000000e+00 : f32
    %64 = vector.broadcast %cst_47 : f32 to vector<2x256xf32>
    %65 = arith.addf %64, %63 : vector<2x256xf32>
    %66 = arith.divf %64, %65 : vector<2x256xf32>
    %67 = vector.extract_strided_slice %55 {offsets = [0, 256], sizes = [2, 256], strides = [1, 1]} : vector<2x768xf32> to vector<2x256xf32>
    %68 = vector.extract_strided_slice %58 {offsets = [0, 256], sizes = [2, 256], strides = [1, 1]} : vector<2x768xf32> to vector<2x256xf32>
    %69 = arith.addf %67, %68 : vector<2x256xf32>
    %70 = arith.negf %69 : vector<2x256xf32>
    %71 = math.exp %70 : vector<2x256xf32>
    %cst_48 = arith.constant 1.000000e+00 : f32
    %72 = vector.broadcast %cst_48 : f32 to vector<2x256xf32>
    %73 = arith.addf %72, %71 : vector<2x256xf32>
    %74 = arith.divf %72, %73 : vector<2x256xf32>
    %75 = vector.extract_strided_slice %55 {offsets = [0, 512], sizes = [2, 256], strides = [1, 1]} : vector<2x768xf32> to vector<2x256xf32>
    %76 = vector.extract_strided_slice %58 {offsets = [0, 512], sizes = [2, 256], strides = [1, 1]} : vector<2x768xf32> to vector<2x256xf32>
    %77 = arith.mulf %66, %76 : vector<2x256xf32>
    %78 = arith.addf %75, %77 : vector<2x256xf32>
    %79 = math.tanh %78 : vector<2x256xf32>
    %cst_49 = arith.constant 1.000000e+00 : f32
    %80 = vector.broadcast %cst_49 : f32 to vector<2x256xf32>
    %81 = arith.subf %80, %74 : vector<2x256xf32>
    %82 = arith.mulf %81, %79 : vector<2x256xf32>
    %83 = arith.mulf %74, %54 : vector<2x256xf32>
    %84 = arith.addf %82, %83 : vector<2x256xf32>
    %c7_i32 = arith.constant 7 : i32
    %85 = vector.broadcast %c7_i32 : i32 to vector<2x1xi32>
    %86 = arith.cmpi sgt, %53, %85 : vector<2x1xi32>
    %87 = vector.shape_cast %86 : vector<2x1xi1> to vector<2x1xi1>
    %88 = vector.broadcast %87 : vector<2x1xi1> to vector<2x256xi1>
    %89 = arith.select %88, %84, %54 : vector<2x256xi1>, vector<2x256xf32>
    %90 = vector.extract_strided_slice %50 {offsets = [12, 0], sizes = [2, 768], strides = [1, 1]} : vector<16x768xf32> to vector<2x768xf32>
    %cst_50 = arith.constant dense<0.000000e+00> : vector<2x768xf32>
    %91 = tpu.matmul %89, %51, %cst_50 {dimension_numbers = #tpu.dot_dimension_numbers<[1], [0], [0], [1], [0, 0, 1, 1], [], []>} : vector<2x256xf32>, vector<256x768xf32>, vector<2x768xf32> -> vector<2x768xf32>
    %92 = vector.broadcast %52 : vector<1x768xf32> to vector<2x768xf32>
    %93 = arith.addf %91, %92 : vector<2x768xf32>
    %94 = vector.extract_strided_slice %90 {offsets = [0, 0], sizes = [2, 256], strides = [1, 1]} : vector<2x768xf32> to vector<2x256xf32>
    %95 = vector.extract_strided_slice %93 {offsets = [0, 0], sizes = [2, 256], strides = [1, 1]} : vector<2x768xf32> to vector<2x256xf32>
    %96 = arith.addf %94, %95 : vector<2x256xf32>
    %97 = arith.negf %96 : vector<2x256xf32>
    %98 = math.exp %97 : vector<2x256xf32>
    %cst_51 = arith.constant 1.000000e+00 : f32
    %99 = vector.broadcast %cst_51 : f32 to vector<2x256xf32>
    %100 = arith.addf %99, %98 : vector<2x256xf32>
    %101 = arith.divf %99, %100 : vector<2x256xf32>
    %102 = vector.extract_strided_slice %90 {offsets = [0, 256], sizes = [2, 256], strides = [1, 1]} : vector<2x768xf32> to vector<2x256xf32>
    %103 = vector.extract_strided_slice %93 {offsets = [0, 256], sizes = [2, 256], strides = [1, 1]} : vector<2x768xf32> to vector<2x256xf32>
    %104 = arith.addf %102, %103 : vector<2x256xf32>
    %105 = arith.negf %104 : vector<2x256xf32>
    %106 = math.exp %105 : vector<2x256xf32>
    %cst_52 = arith.constant 1.000000e+00 : f32
    %107 = vector.broadcast %cst_52 : f32 to vector<2x256xf32>
    %108 = arith.addf %107, %106 : vector<2x256xf32>
    %109 = arith.divf %107, %108 : vector<2x256xf32>
    %110 = vector.extract_strided_slice %90 {offsets = [0, 512], sizes = [2, 256], strides = [1, 1]} : vector<2x768xf32> to vector<2x256xf32>
    %111 = vector.extract_strided_slice %93 {offsets = [0, 512], sizes = [2, 256], strides = [1, 1]} : vector<2x768xf32> to vector<2x256xf32>
    %112 = arith.mulf %101, %111 : vector<2x256xf32>
    %113 = arith.addf %110, %112 : vector<2x256xf32>
    %114 = math.tanh %113 : vector<2x256xf32>
    %cst_53 = arith.constant 1.000000e+00 : f32
    %115 = vector.broadcast %cst_53 : f32 to vector<2x256xf32>
    %116 = arith.subf %115, %109 : vector<2x256xf32>
    %117 = arith.mulf %116, %114 : vector<2x256xf32>
    %118 = arith.mulf %109, %89 : vector<2x256xf32>
    %119 = arith.addf %117, %118 : vector<2x256xf32>
    %c6_i32 = arith.constant 6 : i32
    %120 = vector.broadcast %c6_i32 : i32 to vector<2x1xi32>
    %121 = arith.cmpi sgt, %53, %120 : vector<2x1xi32>
    %122 = vector.shape_cast %121 : vector<2x1xi1> to vector<2x1xi1>
    %123 = vector.broadcast %122 : vector<2x1xi1> to vector<2x256xi1>
    %124 = arith.select %123, %119, %89 : vector<2x256xi1>, vector<2x256xf32>
    %125 = vector.extract_strided_slice %50 {offsets = [10, 0], sizes = [2, 768], strides = [1, 1]} : vector<16x768xf32> to vector<2x768xf32>
    %cst_54 = arith.constant dense<0.000000e+00> : vector<2x768xf32>
    %126 = tpu.matmul %124, %51, %cst_54 {dimension_numbers = #tpu.dot_dimension_numbers<[1], [0], [0], [1], [0, 0, 1, 1], [], []>} : vector<2x256xf32>, vector<256x768xf32>, vector<2x768xf32> -> vector<2x768xf32>
    %127 = vector.broadcast %52 : vector<1x768xf32> to vector<2x768xf32>
    %128 = arith.addf %126, %127 : vector<2x768xf32>
    %129 = vector.extract_strided_slice %125 {offsets = [0, 0], sizes = [2, 256], strides = [1, 1]} : vector<2x768xf32> to vector<2x256xf32>
    %130 = vector.extract_strided_slice %128 {offsets = [0, 0], sizes = [2, 256], strides = [1, 1]} : vector<2x768xf32> to vector<2x256xf32>
    %131 = arith.addf %129, %130 : vector<2x256xf32>
    %132 = arith.negf %131 : vector<2x256xf32>
    %133 = math.exp %132 : vector<2x256xf32>
    %cst_55 = arith.constant 1.000000e+00 : f32
    %134 = vector.broadcast %cst_55 : f32 to vector<2x256xf32>
    %135 = arith.addf %134, %133 : vector<2x256xf32>
    %136 = arith.divf %134, %135 : vector<2x256xf32>
    %137 = vector.extract_strided_slice %125 {offsets = [0, 256], sizes = [2, 256], strides = [1, 1]} : vector<2x768xf32> to vector<2x256xf32>
    %138 = vector.extract_strided_slice %128 {offsets = [0, 256], sizes = [2, 256], strides = [1, 1]} : vector<2x768xf32> to vector<2x256xf32>
    %139 = arith.addf %137, %138 : vector<2x256xf32>
    %140 = arith.negf %139 : vector<2x256xf32>
    %141 = math.exp %140 : vector<2x256xf32>
    %cst_56 = arith.constant 1.000000e+00 : f32
    %142 = vector.broadcast %cst_56 : f32 to vector<2x256xf32>
    %143 = arith.addf %142, %141 : vector<2x256xf32>
    %144 = arith.divf %142, %143 : vector<2x256xf32>
    %145 = vector.extract_strided_slice %125 {offsets = [0, 512], sizes = [2, 256], strides = [1, 1]} : vector<2x768xf32> to vector<2x256xf32>
    %146 = vector.extract_strided_slice %128 {offsets = [0, 512], sizes = [2, 256], strides = [1, 1]} : vector<2x768xf32> to vector<2x256xf32>
    %147 = arith.mulf %136, %146 : vector<2x256xf32>
    %148 = arith.addf %145, %147 : vector<2x256xf32>
    %149 = math.tanh %148 : vector<2x256xf32>
    %cst_57 = arith.constant 1.000000e+00 : f32
    %150 = vector.broadcast %cst_57 : f32 to vector<2x256xf32>
    %151 = arith.subf %150, %144 : vector<2x256xf32>
    %152 = arith.mulf %151, %149 : vector<2x256xf32>
    %153 = arith.mulf %144, %124 : vector<2x256xf32>
    %154 = arith.addf %152, %153 : vector<2x256xf32>
    %c5_i32 = arith.constant 5 : i32
    %155 = vector.broadcast %c5_i32 : i32 to vector<2x1xi32>
    %156 = arith.cmpi sgt, %53, %155 : vector<2x1xi32>
    %157 = vector.shape_cast %156 : vector<2x1xi1> to vector<2x1xi1>
    %158 = vector.broadcast %157 : vector<2x1xi1> to vector<2x256xi1>
    %159 = arith.select %158, %154, %124 : vector<2x256xi1>, vector<2x256xf32>
    %160 = vector.extract_strided_slice %50 {offsets = [8, 0], sizes = [2, 768], strides = [1, 1]} : vector<16x768xf32> to vector<2x768xf32>
    %cst_58 = arith.constant dense<0.000000e+00> : vector<2x768xf32>
    %161 = tpu.matmul %159, %51, %cst_58 {dimension_numbers = #tpu.dot_dimension_numbers<[1], [0], [0], [1], [0, 0, 1, 1], [], []>} : vector<2x256xf32>, vector<256x768xf32>, vector<2x768xf32> -> vector<2x768xf32>
    %162 = vector.broadcast %52 : vector<1x768xf32> to vector<2x768xf32>
    %163 = arith.addf %161, %162 : vector<2x768xf32>
    %164 = vector.extract_strided_slice %160 {offsets = [0, 0], sizes = [2, 256], strides = [1, 1]} : vector<2x768xf32> to vector<2x256xf32>
    %165 = vector.extract_strided_slice %163 {offsets = [0, 0], sizes = [2, 256], strides = [1, 1]} : vector<2x768xf32> to vector<2x256xf32>
    %166 = arith.addf %164, %165 : vector<2x256xf32>
    %167 = arith.negf %166 : vector<2x256xf32>
    %168 = math.exp %167 : vector<2x256xf32>
    %cst_59 = arith.constant 1.000000e+00 : f32
    %169 = vector.broadcast %cst_59 : f32 to vector<2x256xf32>
    %170 = arith.addf %169, %168 : vector<2x256xf32>
    %171 = arith.divf %169, %170 : vector<2x256xf32>
    %172 = vector.extract_strided_slice %160 {offsets = [0, 256], sizes = [2, 256], strides = [1, 1]} : vector<2x768xf32> to vector<2x256xf32>
    %173 = vector.extract_strided_slice %163 {offsets = [0, 256], sizes = [2, 256], strides = [1, 1]} : vector<2x768xf32> to vector<2x256xf32>
    %174 = arith.addf %172, %173 : vector<2x256xf32>
    %175 = arith.negf %174 : vector<2x256xf32>
    %176 = math.exp %175 : vector<2x256xf32>
    %cst_60 = arith.constant 1.000000e+00 : f32
    %177 = vector.broadcast %cst_60 : f32 to vector<2x256xf32>
    %178 = arith.addf %177, %176 : vector<2x256xf32>
    %179 = arith.divf %177, %178 : vector<2x256xf32>
    %180 = vector.extract_strided_slice %160 {offsets = [0, 512], sizes = [2, 256], strides = [1, 1]} : vector<2x768xf32> to vector<2x256xf32>
    %181 = vector.extract_strided_slice %163 {offsets = [0, 512], sizes = [2, 256], strides = [1, 1]} : vector<2x768xf32> to vector<2x256xf32>
    %182 = arith.mulf %171, %181 : vector<2x256xf32>
    %183 = arith.addf %180, %182 : vector<2x256xf32>
    %184 = math.tanh %183 : vector<2x256xf32>
    %cst_61 = arith.constant 1.000000e+00 : f32
    %185 = vector.broadcast %cst_61 : f32 to vector<2x256xf32>
    %186 = arith.subf %185, %179 : vector<2x256xf32>
    %187 = arith.mulf %186, %184 : vector<2x256xf32>
    %188 = arith.mulf %179, %159 : vector<2x256xf32>
    %189 = arith.addf %187, %188 : vector<2x256xf32>
    %c4_i32 = arith.constant 4 : i32
    %190 = vector.broadcast %c4_i32 : i32 to vector<2x1xi32>
    %191 = arith.cmpi sgt, %53, %190 : vector<2x1xi32>
    %192 = vector.shape_cast %191 : vector<2x1xi1> to vector<2x1xi1>
    %193 = vector.broadcast %192 : vector<2x1xi1> to vector<2x256xi1>
    %194 = arith.select %193, %189, %159 : vector<2x256xi1>, vector<2x256xf32>
    %195 = vector.extract_strided_slice %50 {offsets = [6, 0], sizes = [2, 768], strides = [1, 1]} : vector<16x768xf32> to vector<2x768xf32>
    %cst_62 = arith.constant dense<0.000000e+00> : vector<2x768xf32>
    %196 = tpu.matmul %194, %51, %cst_62 {dimension_numbers = #tpu.dot_dimension_numbers<[1], [0], [0], [1], [0, 0, 1, 1], [], []>} : vector<2x256xf32>, vector<256x768xf32>, vector<2x768xf32> -> vector<2x768xf32>
    %197 = vector.broadcast %52 : vector<1x768xf32> to vector<2x768xf32>
    %198 = arith.addf %196, %197 : vector<2x768xf32>
    %199 = vector.extract_strided_slice %195 {offsets = [0, 0], sizes = [2, 256], strides = [1, 1]} : vector<2x768xf32> to vector<2x256xf32>
    %200 = vector.extract_strided_slice %198 {offsets = [0, 0], sizes = [2, 256], strides = [1, 1]} : vector<2x768xf32> to vector<2x256xf32>
    %201 = arith.addf %199, %200 : vector<2x256xf32>
    %202 = arith.negf %201 : vector<2x256xf32>
    %203 = math.exp %202 : vector<2x256xf32>
    %cst_63 = arith.constant 1.000000e+00 : f32
    %204 = vector.broadcast %cst_63 : f32 to vector<2x256xf32>
    %205 = arith.addf %204, %203 : vector<2x256xf32>
    %206 = arith.divf %204, %205 : vector<2x256xf32>
    %207 = vector.extract_strided_slice %195 {offsets = [0, 256], sizes = [2, 256], strides = [1, 1]} : vector<2x768xf32> to vector<2x256xf32>
    %208 = vector.extract_strided_slice %198 {offsets = [0, 256], sizes = [2, 256], strides = [1, 1]} : vector<2x768xf32> to vector<2x256xf32>
    %209 = arith.addf %207, %208 : vector<2x256xf32>
    %210 = arith.negf %209 : vector<2x256xf32>
    %211 = math.exp %210 : vector<2x256xf32>
    %cst_64 = arith.constant 1.000000e+00 : f32
    %212 = vector.broadcast %cst_64 : f32 to vector<2x256xf32>
    %213 = arith.addf %212, %211 : vector<2x256xf32>
    %214 = arith.divf %212, %213 : vector<2x256xf32>
    %215 = vector.extract_strided_slice %195 {offsets = [0, 512], sizes = [2, 256], strides = [1, 1]} : vector<2x768xf32> to vector<2x256xf32>
    %216 = vector.extract_strided_slice %198 {offsets = [0, 512], sizes = [2, 256], strides = [1, 1]} : vector<2x768xf32> to vector<2x256xf32>
    %217 = arith.mulf %206, %216 : vector<2x256xf32>
    %218 = arith.addf %215, %217 : vector<2x256xf32>
    %219 = math.tanh %218 : vector<2x256xf32>
    %cst_65 = arith.constant 1.000000e+00 : f32
    %220 = vector.broadcast %cst_65 : f32 to vector<2x256xf32>
    %221 = arith.subf %220, %214 : vector<2x256xf32>
    %222 = arith.mulf %221, %219 : vector<2x256xf32>
    %223 = arith.mulf %214, %194 : vector<2x256xf32>
    %224 = arith.addf %222, %223 : vector<2x256xf32>
    %c3_i32 = arith.constant 3 : i32
    %225 = vector.broadcast %c3_i32 : i32 to vector<2x1xi32>
    %226 = arith.cmpi sgt, %53, %225 : vector<2x1xi32>
    %227 = vector.shape_cast %226 : vector<2x1xi1> to vector<2x1xi1>
    %228 = vector.broadcast %227 : vector<2x1xi1> to vector<2x256xi1>
    %229 = arith.select %228, %224, %194 : vector<2x256xi1>, vector<2x256xf32>
    %230 = vector.extract_strided_slice %50 {offsets = [4, 0], sizes = [2, 768], strides = [1, 1]} : vector<16x768xf32> to vector<2x768xf32>
    %cst_66 = arith.constant dense<0.000000e+00> : vector<2x768xf32>
    %231 = tpu.matmul %229, %51, %cst_66 {dimension_numbers = #tpu.dot_dimension_numbers<[1], [0], [0], [1], [0, 0, 1, 1], [], []>} : vector<2x256xf32>, vector<256x768xf32>, vector<2x768xf32> -> vector<2x768xf32>
    %232 = vector.broadcast %52 : vector<1x768xf32> to vector<2x768xf32>
    %233 = arith.addf %231, %232 : vector<2x768xf32>
    %234 = vector.extract_strided_slice %230 {offsets = [0, 0], sizes = [2, 256], strides = [1, 1]} : vector<2x768xf32> to vector<2x256xf32>
    %235 = vector.extract_strided_slice %233 {offsets = [0, 0], sizes = [2, 256], strides = [1, 1]} : vector<2x768xf32> to vector<2x256xf32>
    %236 = arith.addf %234, %235 : vector<2x256xf32>
    %237 = arith.negf %236 : vector<2x256xf32>
    %238 = math.exp %237 : vector<2x256xf32>
    %cst_67 = arith.constant 1.000000e+00 : f32
    %239 = vector.broadcast %cst_67 : f32 to vector<2x256xf32>
    %240 = arith.addf %239, %238 : vector<2x256xf32>
    %241 = arith.divf %239, %240 : vector<2x256xf32>
    %242 = vector.extract_strided_slice %230 {offsets = [0, 256], sizes = [2, 256], strides = [1, 1]} : vector<2x768xf32> to vector<2x256xf32>
    %243 = vector.extract_strided_slice %233 {offsets = [0, 256], sizes = [2, 256], strides = [1, 1]} : vector<2x768xf32> to vector<2x256xf32>
    %244 = arith.addf %242, %243 : vector<2x256xf32>
    %245 = arith.negf %244 : vector<2x256xf32>
    %246 = math.exp %245 : vector<2x256xf32>
    %cst_68 = arith.constant 1.000000e+00 : f32
    %247 = vector.broadcast %cst_68 : f32 to vector<2x256xf32>
    %248 = arith.addf %247, %246 : vector<2x256xf32>
    %249 = arith.divf %247, %248 : vector<2x256xf32>
    %250 = vector.extract_strided_slice %230 {offsets = [0, 512], sizes = [2, 256], strides = [1, 1]} : vector<2x768xf32> to vector<2x256xf32>
    %251 = vector.extract_strided_slice %233 {offsets = [0, 512], sizes = [2, 256], strides = [1, 1]} : vector<2x768xf32> to vector<2x256xf32>
    %252 = arith.mulf %241, %251 : vector<2x256xf32>
    %253 = arith.addf %250, %252 : vector<2x256xf32>
    %254 = math.tanh %253 : vector<2x256xf32>
    %cst_69 = arith.constant 1.000000e+00 : f32
    %255 = vector.broadcast %cst_69 : f32 to vector<2x256xf32>
    %256 = arith.subf %255, %249 : vector<2x256xf32>
    %257 = arith.mulf %256, %254 : vector<2x256xf32>
    %258 = arith.mulf %249, %229 : vector<2x256xf32>
    %259 = arith.addf %257, %258 : vector<2x256xf32>
    %c2_i32 = arith.constant 2 : i32
    %260 = vector.broadcast %c2_i32 : i32 to vector<2x1xi32>
    %261 = arith.cmpi sgt, %53, %260 : vector<2x1xi32>
    %262 = vector.shape_cast %261 : vector<2x1xi1> to vector<2x1xi1>
    %263 = vector.broadcast %262 : vector<2x1xi1> to vector<2x256xi1>
    %264 = arith.select %263, %259, %229 : vector<2x256xi1>, vector<2x256xf32>
    %265 = vector.extract_strided_slice %50 {offsets = [2, 0], sizes = [2, 768], strides = [1, 1]} : vector<16x768xf32> to vector<2x768xf32>
    %cst_70 = arith.constant dense<0.000000e+00> : vector<2x768xf32>
    %266 = tpu.matmul %264, %51, %cst_70 {dimension_numbers = #tpu.dot_dimension_numbers<[1], [0], [0], [1], [0, 0, 1, 1], [], []>} : vector<2x256xf32>, vector<256x768xf32>, vector<2x768xf32> -> vector<2x768xf32>
    %267 = vector.broadcast %52 : vector<1x768xf32> to vector<2x768xf32>
    %268 = arith.addf %266, %267 : vector<2x768xf32>
    %269 = vector.extract_strided_slice %265 {offsets = [0, 0], sizes = [2, 256], strides = [1, 1]} : vector<2x768xf32> to vector<2x256xf32>
    %270 = vector.extract_strided_slice %268 {offsets = [0, 0], sizes = [2, 256], strides = [1, 1]} : vector<2x768xf32> to vector<2x256xf32>
    %271 = arith.addf %269, %270 : vector<2x256xf32>
    %272 = arith.negf %271 : vector<2x256xf32>
    %273 = math.exp %272 : vector<2x256xf32>
    %cst_71 = arith.constant 1.000000e+00 : f32
    %274 = vector.broadcast %cst_71 : f32 to vector<2x256xf32>
    %275 = arith.addf %274, %273 : vector<2x256xf32>
    %276 = arith.divf %274, %275 : vector<2x256xf32>
    %277 = vector.extract_strided_slice %265 {offsets = [0, 256], sizes = [2, 256], strides = [1, 1]} : vector<2x768xf32> to vector<2x256xf32>
    %278 = vector.extract_strided_slice %268 {offsets = [0, 256], sizes = [2, 256], strides = [1, 1]} : vector<2x768xf32> to vector<2x256xf32>
    %279 = arith.addf %277, %278 : vector<2x256xf32>
    %280 = arith.negf %279 : vector<2x256xf32>
    %281 = math.exp %280 : vector<2x256xf32>
    %cst_72 = arith.constant 1.000000e+00 : f32
    %282 = vector.broadcast %cst_72 : f32 to vector<2x256xf32>
    %283 = arith.addf %282, %281 : vector<2x256xf32>
    %284 = arith.divf %282, %283 : vector<2x256xf32>
    %285 = vector.extract_strided_slice %265 {offsets = [0, 512], sizes = [2, 256], strides = [1, 1]} : vector<2x768xf32> to vector<2x256xf32>
    %286 = vector.extract_strided_slice %268 {offsets = [0, 512], sizes = [2, 256], strides = [1, 1]} : vector<2x768xf32> to vector<2x256xf32>
    %287 = arith.mulf %276, %286 : vector<2x256xf32>
    %288 = arith.addf %285, %287 : vector<2x256xf32>
    %289 = math.tanh %288 : vector<2x256xf32>
    %cst_73 = arith.constant 1.000000e+00 : f32
    %290 = vector.broadcast %cst_73 : f32 to vector<2x256xf32>
    %291 = arith.subf %290, %284 : vector<2x256xf32>
    %292 = arith.mulf %291, %289 : vector<2x256xf32>
    %293 = arith.mulf %284, %264 : vector<2x256xf32>
    %294 = arith.addf %292, %293 : vector<2x256xf32>
    %c1_i32 = arith.constant 1 : i32
    %295 = vector.broadcast %c1_i32 : i32 to vector<2x1xi32>
    %296 = arith.cmpi sgt, %53, %295 : vector<2x1xi32>
    %297 = vector.shape_cast %296 : vector<2x1xi1> to vector<2x1xi1>
    %298 = vector.broadcast %297 : vector<2x1xi1> to vector<2x256xi1>
    %299 = arith.select %298, %294, %264 : vector<2x256xi1>, vector<2x256xf32>
    %300 = vector.extract_strided_slice %50 {offsets = [0, 0], sizes = [2, 768], strides = [1, 1]} : vector<16x768xf32> to vector<2x768xf32>
    %cst_74 = arith.constant dense<0.000000e+00> : vector<2x768xf32>
    %301 = tpu.matmul %299, %51, %cst_74 {dimension_numbers = #tpu.dot_dimension_numbers<[1], [0], [0], [1], [0, 0, 1, 1], [], []>} : vector<2x256xf32>, vector<256x768xf32>, vector<2x768xf32> -> vector<2x768xf32>
    %302 = vector.broadcast %52 : vector<1x768xf32> to vector<2x768xf32>
    %303 = arith.addf %301, %302 : vector<2x768xf32>
    %304 = vector.extract_strided_slice %300 {offsets = [0, 0], sizes = [2, 256], strides = [1, 1]} : vector<2x768xf32> to vector<2x256xf32>
    %305 = vector.extract_strided_slice %303 {offsets = [0, 0], sizes = [2, 256], strides = [1, 1]} : vector<2x768xf32> to vector<2x256xf32>
    %306 = arith.addf %304, %305 : vector<2x256xf32>
    %307 = arith.negf %306 : vector<2x256xf32>
    %308 = math.exp %307 : vector<2x256xf32>
    %cst_75 = arith.constant 1.000000e+00 : f32
    %309 = vector.broadcast %cst_75 : f32 to vector<2x256xf32>
    %310 = arith.addf %309, %308 : vector<2x256xf32>
    %311 = arith.divf %309, %310 : vector<2x256xf32>
    %312 = vector.extract_strided_slice %300 {offsets = [0, 256], sizes = [2, 256], strides = [1, 1]} : vector<2x768xf32> to vector<2x256xf32>
    %313 = vector.extract_strided_slice %303 {offsets = [0, 256], sizes = [2, 256], strides = [1, 1]} : vector<2x768xf32> to vector<2x256xf32>
    %314 = arith.addf %312, %313 : vector<2x256xf32>
    %315 = arith.negf %314 : vector<2x256xf32>
    %316 = math.exp %315 : vector<2x256xf32>
    %cst_76 = arith.constant 1.000000e+00 : f32
    %317 = vector.broadcast %cst_76 : f32 to vector<2x256xf32>
    %318 = arith.addf %317, %316 : vector<2x256xf32>
    %319 = arith.divf %317, %318 : vector<2x256xf32>
    %320 = vector.extract_strided_slice %300 {offsets = [0, 512], sizes = [2, 256], strides = [1, 1]} : vector<2x768xf32> to vector<2x256xf32>
    %321 = vector.extract_strided_slice %303 {offsets = [0, 512], sizes = [2, 256], strides = [1, 1]} : vector<2x768xf32> to vector<2x256xf32>
    %322 = arith.mulf %311, %321 : vector<2x256xf32>
    %323 = arith.addf %320, %322 : vector<2x256xf32>
    %324 = math.tanh %323 : vector<2x256xf32>
    %cst_77 = arith.constant 1.000000e+00 : f32
    %325 = vector.broadcast %cst_77 : f32 to vector<2x256xf32>
    %326 = arith.subf %325, %319 : vector<2x256xf32>
    %327 = arith.mulf %326, %324 : vector<2x256xf32>
    %328 = arith.mulf %319, %299 : vector<2x256xf32>
    %329 = arith.addf %327, %328 : vector<2x256xf32>
    %c0_i32 = arith.constant 0 : i32
    %330 = vector.broadcast %c0_i32 : i32 to vector<2x1xi32>
    %331 = arith.cmpi sgt, %53, %330 : vector<2x1xi32>
    %332 = vector.shape_cast %331 : vector<2x1xi1> to vector<2x1xi1>
    %333 = vector.broadcast %332 : vector<2x1xi1> to vector<2x256xi1>
    %334 = arith.select %333, %329, %299 : vector<2x256xi1>, vector<2x256xf32>
    %c0_78 = arith.constant 0 : index
    %c0_79 = arith.constant 0 : index
    %335 = vector.load %arg16[%c0_78, %c0_79] : memref<256x128xf32, #tpu.memory_space<vmem>>, vector<256x128xf32>
    %c0_80 = arith.constant 0 : index
    %c0_81 = arith.constant 0 : index
    %336 = vector.load %arg17[%c0_80, %c0_81] : memref<1x128xf32, #tpu.memory_space<vmem>>, vector<1x128xf32>
    %cst_82 = arith.constant dense<0.000000e+00> : vector<2x128xf32>
    %337 = tpu.matmul %44, %335, %cst_82 {dimension_numbers = #tpu.dot_dimension_numbers<[1], [0], [0], [1], [0, 0, 1, 1], [], []>} : vector<2x256xf32>, vector<256x128xf32>, vector<2x128xf32> -> vector<2x128xf32>
    %338 = vector.broadcast %336 : vector<1x128xf32> to vector<2x128xf32>
    %339 = arith.addf %337, %338 : vector<2x128xf32>
    %cst_83 = arith.constant dense<0.000000e+00> : vector<2x128xf32>
    %340 = tpu.matmul %334, %335, %cst_83 {dimension_numbers = #tpu.dot_dimension_numbers<[1], [0], [0], [1], [0, 0, 1, 1], [], []>} : vector<2x256xf32>, vector<256x128xf32>, vector<2x128xf32> -> vector<2x128xf32>
    %341 = vector.broadcast %336 : vector<1x128xf32> to vector<2x128xf32>
    %342 = arith.addf %340, %341 : vector<2x128xf32>
    %c0_84 = arith.constant 0 : index
    %c0_85 = arith.constant 0 : index
    %343 = vector.load %arg18[%c0_84, %c0_85] : memref<256x85xf32, #tpu.memory_space<vmem>>, vector<128x85xf32>
    %cst_86 = arith.constant dense<0.000000e+00> : vector<2x85xf32>
    %344 = tpu.matmul %342, %343, %cst_86 {dimension_numbers = #tpu.dot_dimension_numbers<[1], [0], [0], [1], [0, 0, 1, 1], [], []>} : vector<2x128xf32>, vector<128x85xf32>, vector<2x85xf32> -> vector<2x85xf32>
    %c128 = arith.constant 128 : index
    %c0_87 = arith.constant 0 : index
    %345 = vector.load %arg18[%c128, %c0_87] : memref<256x85xf32, #tpu.memory_space<vmem>>, vector<128x85xf32>
    %cst_88 = arith.constant dense<0.000000e+00> : vector<2x85xf32>
    %346 = tpu.matmul %339, %345, %cst_88 {dimension_numbers = #tpu.dot_dimension_numbers<[1], [0], [0], [1], [0, 0, 1, 1], [], []>} : vector<2x128xf32>, vector<128x85xf32>, vector<2x85xf32> -> vector<2x85xf32>
    %347 = arith.addf %344, %346 : vector<2x85xf32>
    %c0_89 = arith.constant 0 : index
    %c0_90 = arith.constant 0 : index
    %348 = vector.load %arg19[%c0_89, %c0_90] : memref<1x85xf32, #tpu.memory_space<vmem>>, vector<1x85xf32>
    %349 = vector.broadcast %348 : vector<1x85xf32> to vector<2x85xf32>
    %350 = arith.addf %347, %349 : vector<2x85xf32>
    %cst_91 = arith.constant 0.000000e+00 : f32
    %351 = vector.broadcast %cst_91 : f32 to vector<2x85xf32>
    %352 = arith.maximumf %350, %351 : vector<2x85xf32>
    %c0_92 = arith.constant 0 : index
    %c0_93 = arith.constant 0 : index
    %353 = vector.load %arg20[%c0_92, %c0_93] : memref<85x28xf32, #tpu.memory_space<vmem>>, vector<85x28xf32>
    %cst_94 = arith.constant dense<0.000000e+00> : vector<2x28xf32>
    %354 = tpu.matmul %352, %353, %cst_94 {dimension_numbers = #tpu.dot_dimension_numbers<[1], [0], [0], [1], [0, 0, 1, 1], [], []>} : vector<2x85xf32>, vector<85x28xf32>, vector<2x28xf32> -> vector<2x28xf32>
    %c0_95 = arith.constant 0 : index
    %c0_96 = arith.constant 0 : index
    %355 = vector.load %arg21[%c0_95, %c0_96] : memref<1x28xf32, #tpu.memory_space<vmem>>, vector<1x28xf32>
    %356 = vector.broadcast %355 : vector<1x28xf32> to vector<2x28xf32>
    %357 = arith.addf %354, %356 : vector<2x28xf32>
    %cst_97 = arith.constant 0.000000e+00 : f32
    %358 = vector.broadcast %cst_97 : f32 to vector<2x28xf32>
    %359 = arith.maximumf %357, %358 : vector<2x28xf32>
    %c0_98 = arith.constant 0 : index
    %c0_99 = arith.constant 0 : index
    %360 = vector.load %arg22[%c0_98, %c0_99] : memref<28x1xf32, #tpu.memory_space<vmem>>, vector<28x1xf32>
    %cst_100 = arith.constant dense<0.000000e+00> : vector<2x1xf32>
    %361 = tpu.matmul %359, %360, %cst_100 {dimension_numbers = #tpu.dot_dimension_numbers<[1], [0], [0], [1], [0, 0, 1, 1], [], []>} : vector<2x28xf32>, vector<28x1xf32>, vector<2x1xf32> -> vector<2x1xf32>
    %c0_101 = arith.constant 0 : index
    %c0_102 = arith.constant 0 : index
    %362 = vector.load %arg23[%c0_101, %c0_102] : memref<1x1xf32, #tpu.memory_space<vmem>>, vector<1x1xf32>
    %363 = vector.broadcast %362 : vector<1x1xf32> to vector<2x1xf32>
    %364 = arith.addf %361, %363 : vector<2x1xf32>
    %c0_103 = arith.constant 0 : index
    %c0_104 = arith.constant 0 : index
    %365 = vector.load %arg24[%c0_103, %c0_104] : memref<2x1xf32, #tpu.memory_space<vmem>>, vector<2x1xf32>
    tpu.vector_store %arg24[%c0_103, %c0_104], %364 {strides = array<i32>} : memref<2x1xf32, #tpu.memory_space<vmem>>, vector<2x1xf32>,
    return
  }
  func.func @transform_0(%arg0: i32) -> (i32, i32) {
    %c0_i32 = arith.constant 0 : i32
    %c0_i32_0 = arith.constant 0 : i32
    %c0_i32_1 = arith.constant 0 : i32
    return %c0_i32, %c0_i32_0 : i32, i32
  }
  func.func @transform_1(%arg0: i32) -> (i32, i32) {
    %c0_i32 = arith.constant 0 : i32
    %c0_i32_0 = arith.constant 0 : i32
    %c0_i32_1 = arith.constant 0 : i32
    return %c0_i32, %c0_i32_0 : i32, i32
  }
  func.func @transform_2(%arg0: i32) -> (i32, i32) {
    %c0_i32 = arith.constant 0 : i32
    %c0_i32_0 = arith.constant 0 : i32
    %c0_i32_1 = arith.constant 0 : i32
    return %c0_i32, %c0_i32_0 : i32, i32
  }
  func.func @transform_3(%arg0: i32) -> (i32, i32) {
    %c0_i32 = arith.constant 0 : i32
    %c0_i32_0 = arith.constant 0 : i32
    %c0_i32_1 = arith.constant 0 : i32
    return %c0_i32, %c0_i32_0 : i32, i32
  }
  func.func @transform_4(%arg0: i32) -> (i32, i32) {
    %c0_i32 = arith.constant 0 : i32
    %c0_i32_0 = arith.constant 0 : i32
    %c0_i32_1 = arith.constant 0 : i32
    return %c0_i32, %c0_i32_0 : i32, i32
  }
  func.func @transform_5(%arg0: i32) -> (i32, i32) {
    %c0_i32 = arith.constant 0 : i32
    %c0_i32_0 = arith.constant 0 : i32
    %c0_i32_1 = arith.constant 0 : i32
    return %c0_i32, %c0_i32_0 : i32, i32
  }
  func.func @transform_6(%arg0: i32) -> (i32, i32) {
    %c0_i32 = arith.constant 0 : i32
    %c0_i32_0 = arith.constant 0 : i32
    %c0_i32_1 = arith.constant 0 : i32
    return %c0_i32, %c0_i32_0 : i32, i32
  }
  func.func @transform_7(%arg0: i32) -> (i32, i32, i32) {
    %c0_i32 = arith.constant 0 : i32
    %c0_i32_0 = arith.constant 0 : i32
    %c0_i32_1 = arith.constant 0 : i32
    %c0_i32_2 = arith.constant 0 : i32
    return %c0_i32, %c0_i32_0, %c0_i32_1 : i32, i32, i32
  }
  func.func @transform_8(%arg0: i32) -> (i32, i32) {
    %c0_i32 = arith.constant 0 : i32
    %c0_i32_0 = arith.constant 0 : i32
    %c0_i32_1 = arith.constant 0 : i32
    return %c0_i32, %c0_i32_0 : i32, i32
  }
  func.func @transform_9(%arg0: i32) -> (i32, i32) {
    %c0_i32 = arith.constant 0 : i32
    %c0_i32_0 = arith.constant 0 : i32
    %c0_i32_1 = arith.constant 0 : i32
    return %c0_i32, %c0_i32_0 : i32, i32
  }
  func.func @transform_10(%arg0: i32) -> (i32, i32) {
    %c0_i32 = arith.constant 0 : i32
    %c0_i32_0 = arith.constant 0 : i32
    %c0_i32_1 = arith.constant 0 : i32
    return %c0_i32, %c0_i32_0 : i32, i32
  }
  func.func @transform_11(%arg0: i32) -> (i32, i32) {
    %c0_i32 = arith.constant 0 : i32
    %c0_i32_0 = arith.constant 0 : i32
    %c0_i32_1 = arith.constant 0 : i32
    return %c0_i32, %c0_i32_0 : i32, i32
  }
  func.func @transform_12(%arg0: i32) -> (i32, i32) {
    %c0_i32 = arith.constant 0 : i32
    %c0_i32_0 = arith.constant 0 : i32
    %c0_i32_1 = arith.constant 0 : i32
    return %c0_i32, %c0_i32_0 : i32, i32
  }
  func.func @transform_13(%arg0: i32) -> (i32, i32) {
    %c0_i32 = arith.constant 0 : i32
    %c0_i32_0 = arith.constant 0 : i32
    %c0_i32_1 = arith.constant 0 : i32
    return %c0_i32, %c0_i32_0 : i32, i32
  }
  func.func @transform_14(%arg0: i32) -> (i32, i32) {
    %c0_i32 = arith.constant 0 : i32
    %c0_i32_0 = arith.constant 0 : i32
    %c0_i32_1 = arith.constant 0 : i32
    return %c0_i32, %c0_i32_0 : i32, i32
  }
  func.func @transform_15(%arg0: i32) -> (i32, i32) {
    %c0_i32 = arith.constant 0 : i32
    %c0_i32_0 = arith.constant 0 : i32
    %c0_i32_1 = arith.constant 0 : i32
    return %c0_i32, %c0_i32_0 : i32, i32
  }
  func.func @transform_16(%arg0: i32) -> (i32, i32) {
    %c0_i32 = arith.constant 0 : i32
    %c0_i32_0 = arith.constant 0 : i32
    %c0_i32_1 = arith.constant 0 : i32
    return %c0_i32, %c0_i32_0 : i32, i32
  }
  func.func @transform_17(%arg0: i32) -> (i32, i32) {
    %c0_i32 = arith.constant 0 : i32
    %c0_i32_0 = arith.constant 0 : i32
    %c0_i32_1 = arith.constant 0 : i32
    return %c0_i32, %c0_i32_0 : i32, i32
  }
  func.func @transform_18(%arg0: i32) -> (i32, i32) {
    %c0_i32 = arith.constant 0 : i32
    %c0_i32_0 = arith.constant 0 : i32
    %c0_i32_1 = arith.constant 0 : i32
    return %c0_i32, %c0_i32_0 : i32, i32
  }
  func.func @transform_19(%arg0: i32) -> (i32, i32) {
    %c0_i32 = arith.constant 0 : i32
    %c0_i32_0 = arith.constant 0 : i32
    %c0_i32_1 = arith.constant 0 : i32
    return %c0_i32, %c0_i32_0 : i32, i32
  }
  func.func @transform_20(%arg0: i32) -> (i32, i32) {
    %c0_i32 = arith.constant 0 : i32
    %c0_i32_0 = arith.constant 0 : i32
    %c0_i32_1 = arith.constant 0 : i32
    return %c0_i32, %c0_i32_0 : i32, i32
  }
  func.func @transform_21(%arg0: i32) -> (i32, i32) {
    %c0_i32 = arith.constant 0 : i32
    %c0_i32_0 = arith.constant 0 : i32
    %c0_i32_1 = arith.constant 0 : i32
    return %c0_i32, %c0_i32_0 : i32, i32
  }
  func.func @transform_22(%arg0: i32) -> (i32, i32) {
    %c0_i32 = arith.constant 0 : i32
    %c0_i32_0 = arith.constant 0 : i32
    %c0_i32_1 = arith.constant 0 : i32
    return %c0_i32, %c0_i32_0 : i32, i32
  }
  func.func @transform_23(%arg0: i32) -> (i32, i32) {
    %c0_i32 = arith.constant 0 : i32
    %c0_i32_0 = arith.constant 0 : i32
    %c0_i32_1 = arith.constant 0 : i32
    return %c0_i32, %c0_i32_0 : i32, i32
  }
}

</mosaic_0001>

<bundles_post_ra>
// kernel: supervised_forward.1
= control target key start
LH: loop header
LB: loop body
LE: loop exit
PB: predicated region body
PF: predicated region fallthrough
CT: control target
= control target key end

     0   :  { %s12437_s0 = inlined_call_operand.vmem [shape: bf16[8,256], index: 0, kind: input, shape index: {}]   ;;  %s12438_s1 = inlined_call_operand.vmem [shape: bf16[256,256], index: 1, kind: input, shape index: {}]   ;;  %s12439_s2 = inlined_call_operand.vmem [shape: f32[1,256], index: 2, kind: input, shape index: {}]   ;;  %s12440_s3 = inlined_call_operand.hbm [shape: bf16[256,128], index: 3, kind: input, shape index: {}]   ;;  %s12441_s4 = inlined_call_operand.vmem [shape: f32[1,128], index: 4, kind: input, shape index: {}]   ;;  %s12442_s5 = inlined_call_operand.vmem [shape: bf16[128,64], index: 5, kind: input, shape index: {}]   ;;  %s12443_s6 = inlined_call_operand.hbm [shape: f32[1,64], index: 6, kind: input, shape index: {}]   ;;  %s12444_s7 = inlined_call_operand.vmem [shape: bf16[4,64,256], index: 7, kind: input, shape index: {}]   ;;  %s12445_s8 = inlined_call_operand.hbm [shape: f32[1,256], index: 8, kind: input, shape index: {}]   ;;  %s12446_s9 = inlined_call_operand.vmem [shape: bf16[16,32], index: 9, kind: input, shape index: {}]   ;;  %s12447_s10 = inlined_call_operand.vmem [shape: s32[2,1], index: 10, kind: input, shape index: {}]   ;;  %s12448_s11 = inlined_call_operand.hbm [shape: bf16[32,768], index: 11, kind: input, shape index: {}]   ;;  %s12449_s12 = inlined_call_operand.vmem [shape: f32[256,768], index: 12, kind: input, shape index: {}]   ;;  %s12450_s13 = inlined_call_operand.vmem [shape: f32[1,768], index: 13, kind: input, shape index: {}]   ;;  %s12451_s14 = inlined_call_operand.vmem [shape: f32[1,768], index: 14, kind: input, shape index: {}]   ;;  %s12452_s15 = inlined_call_operand.vmem [shape: f32[256,128], index: 15, kind: input, shape index: {}]   ;;  %s12453_s16 = inlined_call_operand.hbm [shape: f32[1,128], index: 16, kind: input, shape index: {}]   ;;  %s12454_s17 = inlined_call_operand.vmem [shape: f32[256,85], index: 17, kind: input, shape index: {}]   ;;  %s12455_s18 = inlined_call_operand.hbm [shape: f32[1,85], index: 18, kind: input, shape index: {}]   ;;  %s12456_s19 = inlined_call_operand.vmem [shape: f32[85,28], index: 19, kind: input, shape index: {}]   ;;  %s12457_s20 = inlined_call_operand.hbm [shape: f32[1,28], index: 20, kind: input, shape index: {}]   ;;  %s12458_s21 = inlined_call_operand.vmem [shape: f32[28,1], index: 21, kind: input, shape index: {}]   ;;  %s12459_s22 = inlined_call_operand.<no memory space> [shape: f32[1,1], index: 22, kind: input, shape index: {}]   ;;  %s12460_s23 = inlined_call_operand.vmem [shape: f32[2,1], index: 23, kind: output, shape index: {}]  }
   0x1   :  { %12956 = sst [smem:[#allocation131_spill]] %s12437_s0  ;;  %v28_v0 = vstv %s12459_s22 }
   0x2   :  { %12957 = sst [smem:[#allocation132_spill]] %s12438_s1  ;;  %29 = vst [vmem:[#allocation2] sm:$0x1] %v28_v0 }
   0x3   :  { %12958 = sst [smem:[#allocation133_spill]] %s12439_s2 }
   0x4   :  { %12959 = sst [smem:[#allocation134_spill]] %s12440_s3 }
   0x5   :  { %12960 = sst [smem:[#allocation135_spill]] %s12441_s4 }
   0x6   :  { %12961 = sst [smem:[#allocation136_spill]] %s12442_s5 }
   0x7   :  { %12962 = sst [smem:[#allocation137_spill]] %s12443_s6 }
   0x8   :  { %12963 = sst [smem:[#allocation138_spill]] %s12444_s7 }
   0x9   :  { %30 = vsyncpa [#allocation4], 0 }
   0xa   :  { %31 = vsyncpa [#allocation6], 0 }
   0xb   :  { %32 = vsyncpa [#allocation9], 0 }
   0xc   :  { %33 = vsyncpa [#allocation12], 0  ;;  %s5909_s24 = smov [#allocation5]   ;;  %s5910_s5 = smov [#allocation8]  }
   0xd   :  { %s62_s25 = sshll.u32 %s5909_s24, 4  ;;  %s87_s1 = sshll.u32 %s5910_s5, 4  ;;  %s63_s25 = int_to_ptr.vmem [resolvable:$true] %s62_s25  ;;  %s88_s1 = int_to_ptr.vmem [resolvable:$true] %s87_s1 }
   0xe   :  { %s5769_s26 = scalar_lea.vmem %s63_s25, 16  ;;  %s5773_s2 = scalar_lea.vmem %s63_s25, 32 }
   0xf   :  { %p5770_p0 = scmp.ne.s32.totalorder %s63_s25, %s5769_s26  ;;  %p5774_p1 = scmp.lt.s32.totalorder %s63_s25, %s63_s25 }
  0x10   :  { %p5775_p2 = scmp.lt.s32.totalorder %s5773_s2, %s5769_s26 }
  0x12   :  { %p5776_p3 = por %p5775_p2, %p5774_p1 }
  0x14   :  { %p5777_p4 = pnand %p5776_p3, %p5770_p0 }
  0x16   :  { %5780 = shalt.err (!%p5777_p4)
}
  0x17   :  { %s12964_s27 = sld [smem:[#allocation137_spill]]  ;;  %s5789_s7 = scalar_lea.vmem %s88_s1, 1536 }
  0x18   :  { %p5790_p5 = scmp.ne.s32.totalorder %s88_s1, %s5789_s7  ;;  %p5794_p6 = scmp.lt.s32.totalorder %s88_s1, %s88_s1 }
  0x19   :  { %p5795_p7 = scmp.lt.s32.totalorder %s5789_s7, %s5789_s7 }
  0x1b   :  { %p5796_p8 = por %p5795_p7, %p5794_p6 }
  0x1d   :  { %65 = dma.hbm_to_vmem [thread:$0]  %s12964_s27, 16, %s63_s25, [#allocation6]  }
  0x1e   :  { %p5797_p9 = pnand %p5796_p8, %p5790_p5 }
  0x20   :  { %5800 = shalt.err (!%p5797_p9)
}
  0x21   :  { %s5911_s28 = smov 384   ;;  %s5912_s29 = smov 24  }
  0x22   :  { %93 = dma.hbm_to_vmem [thread:$0]  %s12448_s11, 1536, %s88_s1, [#allocation9], %s5911_s28, %s5911_s28, %s5912_s29  }
  0x23   :  { %s5913_s4 = smov [#allocation11]   ;;  %s5914_s24 = smov [#allocation3]  }
  0x24   :  { %s120_s30 = sshll.u32 %s5913_s4, 4  ;;  %s45_s5 = sshll.u32 %s5914_s24, 4  ;;  %s121_s30 = int_to_ptr.vmem [resolvable:$true] %s120_s30  ;;  %s46_s5 = int_to_ptr.vmem [resolvable:$true] %s45_s5 }
  0x25   :  { %s5809_s25 = scalar_lea.vmem %s121_s30, 16  ;;  %s5813_s26 = scalar_lea.vmem %s121_s30, 32 }
  0x26   :  { %p5810_p10 = scmp.ne.s32.totalorder %s121_s30, %s5809_s25  ;;  %p5814_p11 = scmp.lt.s32.totalorder %s121_s30, %s121_s30 }
  0x27   :  { %p5815_p12 = scmp.lt.s32.totalorder %s5813_s26, %s5809_s25 }
  0x29   :  { %p5816_p13 = por %p5815_p12, %p5814_p11 }
  0x2b   :  { %p5817_p0 = pnand %p5816_p13, %p5810_p10 }
  0x2d   :  { %5820 = shalt.err (!%p5817_p0)
}
  0x2e   :  { %123 = dma.hbm_to_vmem [thread:$0]  %s12455_s18, 16, %s121_s30, [#allocation12]  }
  0x2f   :  { %s5829_s6 = scalar_lea.vmem %s46_s5, 2048  ;;  %p5834_p2 = scmp.lt.s32.totalorder %s46_s5, %s46_s5 }
  0x30   :  { %p5830_p1 = scmp.ne.s32.totalorder %s46_s5, %s5829_s6  ;;  %p5835_p3 = scmp.lt.s32.totalorder %s5829_s6, %s5829_s6 }
  0x32   :  { %p5836_p4 = por %p5835_p3, %p5834_p2 }
  0x34   :  { %p5837_p5 = pnand %p5836_p4, %p5830_p1 }
  0x36   :  { %5840 = shalt.err (!%p5837_p5)
}
  0x37   :  { %s5915_s11 = smov 64   ;;  %s5916_s1 = smov 4  }
  0x38   :  { %s12965_s28 = sld [smem:[#allocation134_spill]]  ;;  %s5917_s29 = smov [#allocation7]  }
  0x39   :  { %s74_s3 = sshll.u32 %s5917_s29, 4  ;;  %s5918_s0 = smov [#allocation10]   ;;  %s75_s3 = int_to_ptr.vmem [resolvable:$true] %s74_s3 }
  0x3a   :  { %s108_s4 = sshll.u32 %s5918_s0, 4  ;;  %s5849_s18 = scalar_lea.vmem %s75_s3, 32  ;;  %s109_s4 = int_to_ptr.vmem [resolvable:$true] %s108_s4 }
  0x3b   :  { %p5850_p6 = scmp.ne.s32.totalorder %s75_s3, %s5849_s18  ;;  %p5854_p7 = scmp.lt.s32.totalorder %s75_s3, %s75_s3 }
  0x3c   :  { %p5855_p8 = scmp.lt.s32.totalorder %s5849_s18, %s5849_s18 }
  0x3e   :  { %51 = dma.hbm_to_vmem [thread:$0]  %s12965_s28, 2048, %s46_s5, [#allocation4], %s5915_s11, %s5915_s11, %s5916_s1  }
  0x3f   :  { %p5856_p9 = por %p5855_p8, %p5854_p7 }
  0x41   :  { %p5857_p10 = pnand %p5856_p9, %p5850_p6 }
  0x43   :  { %5860 = shalt.err (!%p5857_p10)
}
  0x44   :  { %77 = dma.hbm_to_vmem [thread:$0]  %s12445_s8, 32, %s75_s3, [#allocation6]  }
  0x45   :  { %s5869_s25 = scalar_lea.vmem %s109_s4, 16  ;;  %s5873_s5 = scalar_lea.vmem %s109_s4, 32 }
  0x46   :  { %p5870_p11 = scmp.ne.s32.totalorder %s109_s4, %s5869_s25  ;;  %p5874_p12 = scmp.lt.s32.totalorder %s109_s4, %s109_s4 }
  0x47   :  { %p5875_p13 = scmp.lt.s32.totalorder %s5873_s5, %s5869_s25 }
  0x49   :  { %p5876_p0 = por %p5875_p13, %p5874_p12 }
  0x4b   :  { %p5877_p1 = pnand %p5876_p0, %p5870_p11 }
  0x4d   :  { %5880 = shalt.err (!%p5877_p1)
}
  0x4e   :  { %111 = dma.hbm_to_vmem [thread:$0]  %s12453_s16, 16, %s109_s4, [#allocation9]  }
  0x4f   :  { %s5919_s22 = smov [#allocation13]  }
  0x50   :  { %s132_s6 = sshll.u32 %s5919_s22, 4  ;;  %s133_s6 = int_to_ptr.vmem [resolvable:$true] %s132_s6 }
  0x51   :  { %s5889_s11 = scalar_lea.vmem %s133_s6, 16  ;;  %s5893_s1 = scalar_lea.vmem %s133_s6, 32 }
  0x52   :  { %p5890_p2 = scmp.ne.s32.totalorder %s133_s6, %s5889_s11  ;;  %p5894_p3 = scmp.lt.s32.totalorder %s133_s6, %s133_s6 }
  0x53   :  { %p5895_p4 = scmp.lt.s32.totalorder %s5893_s1, %s5889_s11 }
  0x55   :  { %p5896_p5 = por %p5895_p4, %p5894_p3 }
  0x57   :  { %p5897_p6 = pnand %p5896_p5, %p5890_p2 }
  0x59   :  { %5900 = shalt.err (!%p5897_p6)
}
  0x5a   :  { %135 = dma.hbm_to_vmem [thread:$0]  %s12457_s20, 16, %s133_s6, [#allocation12]  }
  0x5b   :  { %5901 = dma.done.wait [#allocation4], 2048  }
  0x5c   :  { %5902 = vsyncadd [#allocation4], 4294965248 }
  0x5d   :  { %5903 = dma.done.wait [#allocation6], 48  }
  0x5e   :  { %5904 = vsyncadd [#allocation6], 4294967248 }
  0x5f   :  { %5905 = dma.done.wait [#allocation9], 1552  }
  0x60   :  { %5906 = vsyncadd [#allocation9], 4294965744 }
  0x61   :  { %5907 = dma.done.wait [#allocation12], 32  }
  0x62   :  { %5908 = vsyncadd [#allocation12], 4294967264  ;;  %s12966_s28 = sld [smem:[#allocation132_spill]]  ;;  %v4933_v18 = vld [vmem:[#allocation3 + $0x78] sm:$0xff]   ;;  %v4935_v20 = vld [vmem:[#allocation3 + $0x70] sm:$0xff]   ;;  %v12466_v52 = vmov 0.0   ;;  %v197_v53 = vlaneseq }
  0x63   :  { %s12967_s25 = sld [smem:[#allocation131_spill]]  ;;  %v4934_v19 = vld [vmem:[#allocation3 + $0x38] sm:$0xff]   ;;  %4589 = vmatprep.subr.bf16.mxu1 %v4933_v18  ;;  %v4936_v22 = vld [vmem:[#allocation3 + $0x30] sm:$0xff]   ;;  %v4937_v23 = vld [vmem:[#allocation3 + $0x68] sm:$0xff]   ;;  %vm5921_vm0 = vmmov 0   ;;  %vm757_vm1 = vcmask 523264  }
  0x64   :  { %4590 = vmatpush3.bf16.msra.mxu1 %v4934_v19  ;;  %v4938_v26 = vld [vmem:[#allocation3 + $0x28] sm:$0xff]   ;;  %v4939_v27 = vld [vmem:[#allocation3 + $0x60] sm:$0xff]   ;;  %v4941_v31 = vld [vmem:[#allocation3 + $0x58] sm:$0xff]   ;;  %v6173_v54 = vshrl.u32 %v197_v53, 7  ;;  %s12970_s30 = sld [smem:[#allocation133_spill]]  ;;  %vm1215_vm2 = vcmask 261120  }
  0x65   :  { %4591 = vmatprep.subr.bf16.mxu1 %v4935_v20  ;;  %v4940_v30 = vld [vmem:[#allocation3 + $0x20] sm:$0xff]   ;;  %v4942_v33 = vld [vmem:[#allocation3 + $0x18] sm:$0xff]   ;;  %v4943_v35 = vld [vmem:[#allocation3 + $0x50] sm:$0xff]   ;;  %s12972_s5 = sld [smem:[#allocation136_spill]] }
  0x66   :  { %v4944_v37 = vld [vmem:[#allocation3 + $0x10] sm:$0xff]   ;;  %v4945_v48 = vld [vmem:[#allocation3 + $0x48] sm:$0xff]   ;;  %v4947_v50 = vld [vmem:[#allocation3 + $0x40] sm:$0xff]   ;;  %12968 = vst [vmem:[#allocation18_spill] sm:$0xff] %v6173_v54  ;;  %v6176_v55 = vsub.s32 0, %v6173_v54  ;;  %v6182_v57 = vsub.s32 1, %v6173_v54 }
  0x67   :  { %v4946_v49 = vld [vmem:[#allocation3 + $0x8] sm:$0xff]   ;;  %v4948_v51 = vld [vmem:[#allocation3] sm:$0xff]   ;;  %s12973_s18 = sld [smem:[#allocation138_spill]] }
  0x68   :  { %v4883_v1 = vld [vmem:[%s12966_s28 + $0x74] ss:$8 sps:$4 sm:$0xff]   ;;  %v4885_v2 = vld [vmem:[%s12966_s28 + $0x70] ss:$8 sps:$4 sm:$0xff]   ;;  %v4886_v3 = vld [vmem:[%s12966_s28 + $0x64] ss:$8 sps:$4 sm:$0xff]   ;;  %4592 = vmatpush3.bf16.msra.mxu1 %v4936_v22 }
  0x69   :  { %374 = vmatprep.subr.bf16.mxu0 %v4883_v1  ;;  %v4888_v4 = vld [vmem:[%s12966_s28 + $0x60] ss:$8 sps:$4 sm:$0xff]   ;;  %v4889_v5 = vld [vmem:[%s12966_s28 + $0x54] ss:$8 sps:$4 sm:$0xff]   ;;  %v4891_v6 = vld [vmem:[%s12966_s28 + $0x50] ss:$8 sps:$4 sm:$0xff]   ;;  %4593 = vmatprep.subr.bf16.mxu1 %v4937_v23 }
  0x6a   :  { %375 = vmatpush1.bf16.msra.mxu0 %v4885_v2  ;;  %v4892_v7 = vld [vmem:[%s12966_s28 + $0x44] ss:$8 sps:$4 sm:$0xff]   ;;  %v4894_v8 = vld [vmem:[%s12966_s28 + $0x40] ss:$8 sps:$4 sm:$0xff]   ;;  %v4895_v9 = vld [vmem:[%s12966_s28 + $0x34] ss:$8 sps:$4 sm:$0xff]  }
  0x6b   :  { %376 = vmatprep.subr.bf16.mxu0 %v4886_v3  ;;  %v4897_v10 = vld [vmem:[%s12966_s28 + $0x30] ss:$8 sps:$4 sm:$0xff]   ;;  %v4898_v11 = vld [vmem:[%s12966_s28 + $0x24] ss:$8 sps:$4 sm:$0xff]   ;;  %v4900_v12 = vld [vmem:[%s12966_s28 + $0x20] ss:$8 sps:$4 sm:$0xff]  }
  0x6c   :  { %v4901_v13 = vld [vmem:[%s12966_s28 + $0x14] ss:$8 sps:$4 sm:$0xff]   ;;  %v4903_v14 = vld [vmem:[%s12966_s28 + $0x10] ss:$8 sps:$4 sm:$0xff]   ;;  %v6112_v15 = vld [vmem:[%s12967_s25] sm:$0xff]  ;;  %4594 = vmatpush3.bf16.msra.mxu1 %v4938_v26  ;;  %12969 = vst [vmem:[#allocation19_spill] sm:$0xff] %v6176_v55 }
  0x6d   :  { %v4904_v16 = vld [vmem:[%s12966_s28 + $0x4] ss:$8 sps:$4 sm:$0xff]   ;;  %v4408_v17 = vcombine.high %v6112_v15, %v6112_v15  ;;  %v4906_v21 = vld [vmem:[%s12966_s28] ss:$8 sps:$4 sm:$0xff]   ;;  %v4907_v24 = vld [vmem:[%s12966_s28 + $0xf4] ss:$8 sps:$4 sm:$0xff]   ;;  %4595 = vmatprep.subr.bf16.mxu1 %v4939_v27  ;;  %v4407_v47 = vcombine.low %v6112_v15, %v6112_v15 }
  0x6e   :  { %377 = vmatpush1.bf16.msra.mxu0 %v4888_v4  ;;  %v4909_v25 = vld [vmem:[%s12966_s28 + $0xf0] ss:$8 sps:$4 sm:$0xff]   ;;  %v4910_v28 = vld [vmem:[%s12966_s28 + $0xe4] ss:$8 sps:$4 sm:$0xff]   ;;  %v4912_v29 = vld [vmem:[%s12966_s28 + $0xe0] ss:$8 sps:$4 sm:$0xff]  }
  0x6f   :  { %378 = vmatprep.subr.bf16.mxu0 %v4889_v5  ;;  %406 = vmatprep.mubr.bf16.mxu0 %v4408_v17  ;;  %v4913_v32 = vld [vmem:[%s12966_s28 + $0xd4] ss:$8 sps:$4 sm:$0xff]   ;;  %v4915_v34 = vld [vmem:[%s12966_s28 + $0xd0] ss:$8 sps:$4 sm:$0xff]   ;;  %v4916_v36 = vld [vmem:[%s12966_s28 + $0xc4] ss:$8 sps:$4 sm:$0xff]  }
  0x70   :  { %4596 = vmatpush3.bf16.msra.mxu1 %v4940_v30  ;;  %v4918_v38 = vld [vmem:[%s12966_s28 + $0xc0] ss:$8 sps:$4 sm:$0xff]   ;;  %v4919_v39 = vld [vmem:[%s12966_s28 + $0xb4] ss:$8 sps:$4 sm:$0xff]   ;;  %v4921_v40 = vld [vmem:[%s12966_s28 + $0xb0] ss:$8 sps:$4 sm:$0xff]  }
  0x71   :  { %4597 = vmatprep.subr.bf16.mxu1 %v4941_v31  ;;  %v4922_v41 = vld [vmem:[%s12966_s28 + $0xa4] ss:$8 sps:$4 sm:$0xff]   ;;  %v4924_v42 = vld [vmem:[%s12966_s28 + $0xa0] ss:$8 sps:$4 sm:$0xff]   ;;  %v4925_v43 = vld [vmem:[%s12966_s28 + $0x94] ss:$8 sps:$4 sm:$0xff]  }
  0x72   :  { %379 = vmatpush1.bf16.msra.mxu0 %v4891_v6  ;;  %v4927_v44 = vld [vmem:[%s12966_s28 + $0x90] ss:$8 sps:$4 sm:$0xff]   ;;  %v4928_v45 = vld [vmem:[%s12966_s28 + $0x84] ss:$8 sps:$4 sm:$0xff]   ;;  %v4930_v46 = vld [vmem:[%s12966_s28 + $0x80] ss:$8 sps:$4 sm:$0xff]  }
  0x73   :  { %380 = vmatprep.subr.bf16.mxu0 %v4892_v7  ;;  %v195_v56 = vld [vmem:[%s12970_s30] sm:$0x3]  ;;  %12971 = vst [vmem:[#allocation20_spill] sm:$0xff] %v6182_v57  ;;  %v4949_v5 = vld [vmem:[%s12972_s5 + $0x38] sm:$0xff]   ;;  %v4950_v7 = vld [vmem:[%s12972_s5 + $0x30] sm:$0xff]   ;;  %s12974_s29 = sld [smem:[#allocation135_spill]] }
  0x74   :  { %4598 = vmatpush3.bf16.msra.mxu1 %v4942_v33  ;;  %v200_v58 = vrot.slane %v195_v56, %v6176_v55  ;;  %v204_v59 = vrot.slane %v195_v56, %v6182_v57  ;;  %v4959_v15 = vld [vmem:[%s12973_s18 + $0x34] ss:$8 sps:$4 sm:$0xff]   ;;  %v4965_v17 = vld [vmem:[%s12973_s18 + $0x24] ss:$8 sps:$4 sm:$0xff]   ;;  %v4963_v18 = vld [vmem:[%s12973_s18 + $0x20] ss:$8 sps:$4 sm:$0xff]  }
  0x75   :  { %4599 = vmatprep.subr.bf16.mxu1 %v4943_v35  ;;  %v4971_v19 = vld [vmem:[%s12973_s18 + $0x14] ss:$8 sps:$4 sm:$0xff]   ;;  %v4969_v20 = vld [vmem:[%s12973_s18 + $0x10] ss:$8 sps:$4 sm:$0xff]   ;;  %v4968_v31 = vld [vmem:[%s12973_s18 + $0x64] ss:$8 sps:$4 sm:$0xff]  }
  0x76   :  { %381 = vmatpush1.bf16.msra.mxu0 %v4894_v8  ;;  %v4951_v8 = vld [vmem:[%s12972_s5 + $0x28] sm:$0xff]   ;;  %v4974_v33 = vld [vmem:[%s12973_s18 + $0x54] ss:$8 sps:$4 sm:$0xff]  }
  0x77   :  { %382 = vmatprep.subr.bf16.mxu0 %v4895_v9  ;;  %v4952_v9 = vld [vmem:[%s12972_s5 + $0x20] sm:$0xff]   ;;  %v6702_v54 = vld [vmem:[%s12449_s12 + $0x70] sm:$0xff]  ;;  %v6709_v57 = vld [vmem:[%s12449_s12 + $0x5a8] sm:$0xff] }
  0x78   :  { %4600 = vmatpush3.bf16.msra.mxu1 %v4944_v37  ;;  %v4977_v35 = vld [vmem:[%s12973_s18 + $0x4] ss:$8 sps:$4 sm:$0xff]   ;;  %13000 = vst [vmem:[#allocation46_spill] sm:$0xff] %v6702_v54 }
  0x79   :  { %4601 = vmatprep.subr.bf16.mxu1 %v4945_v48  ;;  %v4441_v22 = vld [vmem:[%s12974_s29] ss:$0 sm:$0xff]  ;;  %v4980_v37 = vld [vmem:[%s12973_s18 + $0x44] ss:$8 sps:$4 sm:$0xff]  }
  0x7a   :  { %383 = vmatpush1.bf16.msra.mxu0 %v4897_v10  ;;  %v4953_v10 = vld [vmem:[%s12972_s5 + $0x18] sm:$0xff]   ;;  %v4989_v48 = vld [vmem:[%s12973_s18 + $0xa4] ss:$8 sps:$4 sm:$0xff]  }
  0x7b   :  { %384 = vmatprep.subr.bf16.mxu0 %v4898_v11  ;;  %v4954_v11 = vld [vmem:[%s12972_s5 + $0x10] sm:$0xff]   ;;  %v4992_v53 = vld [vmem:[%s12973_s18 + $0xe4] ss:$8 sps:$4 sm:$0xff]  }
  0x7c   :  { %4602 = vmatpush3.bf16.msra.mxu1 %v4946_v49  ;;  %v6714_v55 = vld [vmem:[%s12449_s12 + $0x48] sm:$0xff] }
  0x7d   :  { %4603 = vmatprep.subr.bf16.mxu1 %v4947_v50  ;;  %v4984_v50 = vld [vmem:[%s12973_s18 + $0xf0] ss:$8 sps:$4 sm:$0xff]   ;;  %13001 = vst [vmem:[#allocation47_spill] sm:$0xff] %v6714_v55 }
  0x7e   :  { %385 = vmatpush1.bf16.msra.mxu0 %v4900_v12  ;;  %v4955_v12 = vld [vmem:[%s12972_s5 + $0x8] sm:$0xff]  }
  0x7f   :  { %386 = vmatprep.subr.bf16.mxu0 %v4901_v13  ;;  %v4956_v13 = vld [vmem:[%s12972_s5] sm:$0xff]  }
  0x80   :  { %4604 = vmatpush3.bf16.msra.mxu1 %v4948_v51 }
  0x81   :  { %4741 = vmatprep.subr.bf16.mxu1 %v12466_v52 }
  0x82   :  { %387 = vmatpush1.bf16.msra.mxu0 %v4903_v14  ;;  %v4957_v14 = vld [vmem:[%s12973_s18 + $0x30] ss:$8 sps:$4 sm:$0xff]  }
  0x83   :  { %388 = vmatprep.subr.bf16.mxu0 %v4904_v16  ;;  %v4962_v16 = vld [vmem:[%s12973_s18 + $0x74] ss:$8 sps:$4 sm:$0xff]  }
  0x86   :  { %389 = vmatpush1.bf16.msra.mxu0 %v4906_v21 }
  0x87   :  { %390 = vmatprep.subr.bf16.mxu0 %v4907_v24 }
  0x8a   :  { %391 = vmatpush2.bf16.msra.mxu0 %v4909_v25 }
  0x8b   :  { %392 = vmatprep.subr.bf16.mxu0 %v4910_v28 }
  0x8e   :  { %393 = vmatpush2.bf16.msra.mxu0 %v4912_v29  ;;  %v4960_v29 = vld [vmem:[%s12973_s18 + $0x70] ss:$8 sps:$4 sm:$0xff]  }
  0x8f   :  { %394 = vmatprep.subr.bf16.mxu0 %v4913_v32  ;;  %v4966_v32 = vld [vmem:[%s12973_s18 + $0x60] ss:$8 sps:$4 sm:$0xff]  }
  0x92   :  { %395 = vmatpush2.bf16.msra.mxu0 %v4915_v34  ;;  %v4972_v34 = vld [vmem:[%s12973_s18 + $0x50] ss:$8 sps:$4 sm:$0xff]  }
  0x93   :  { %396 = vmatprep.subr.bf16.mxu0 %v4916_v36  ;;  %v4975_v36 = vld [vmem:[%s12973_s18] ss:$8 sps:$4 sm:$0xff]  }
  0x96   :  { %397 = vmatpush2.bf16.msra.mxu0 %v4918_v38  ;;  %v4978_v38 = vld [vmem:[%s12973_s18 + $0x40] ss:$8 sps:$4 sm:$0xff]  }
  0x97   :  { %398 = vmatprep.subr.bf16.mxu0 %v4919_v39  ;;  %v4983_v39 = vld [vmem:[%s12973_s18 + $0xb4] ss:$8 sps:$4 sm:$0xff]  }
  0x9a   :  { %399 = vmatpush2.bf16.msra.mxu0 %v4921_v40  ;;  %v12464_v40 = vmov 0  }
  0x9b   :  { %400 = vmatprep.subr.bf16.mxu0 %v4922_v41  ;;  %v4986_v41 = vld [vmem:[%s12973_s18 + $0xf4] ss:$8 sps:$4 sm:$0xff]   ;;  %4881 = vset.pattern.permute.xlu0 %v12464_v40 }
  0x9c   :  { %4882 = vset.pattern.permute.xlu1 %v12464_v40 }
  0x9e   :  { %401 = vmatpush2.bf16.msra.mxu0 %v4924_v42  ;;  %v4458_v42 = vld [vmem:[#allocation5] ss:$0 sm:$0xff] }
  0x9f   :  { %402 = vmatprep.subr.bf16.mxu0 %v4925_v43 }
  0xa2   :  { %403 = vmatpush2.bf16.msra.mxu0 %v4927_v44 }
  0xa3   :  { %404 = vmatprep.subr.bf16.mxu0 %v4928_v45 }
  0xa6   :  { %405 = vmatpush2.bf16.msra.mxu0 %v4930_v46  ;;  %v4981_v46 = vld [vmem:[%s12973_s18 + $0xb0] ss:$8 sps:$4 sm:$0xff]  }
  0xa7   :  { %769 = vmatprep.subr.bf16.mxu0 %v4959_v15  ;;  %v5020_v15 = vld [vmem:[%s12446_s9] sm:$0xff]  }
  0xa9   :  { %407 = vmatmul.mubr.bf16.vlgmr.msra.gmra.mxu0 %v4407_v47 }
  0xaa   :  { %770 = vmatpush1.bf16.msra.mxu0 %v4957_v14  ;;  %793 = vmatprep.mubr.bf16.mxu0 %v12464_v40  ;;  %v5014_v14 = vld [vmem:[#allocation8 + $0x8] ss:$24 sps:$4 sm:$0xff]  }
  0xab   :  { %771 = vmatprep.subr.bf16.mxu0 %v4965_v17  ;;  %v6336_v17 = vld [vmem:[%s12449_s12 + $0x2d8] sm:$0xff] }
  0xae   :  { %772 = vmatpush1.bf16.msra.mxu0 %v4963_v18  ;;  %v5023_v18 = vld [vmem:[#allocation8 + $0x14] ss:$24 sps:$4 sm:$0xff]  }
  0xaf   :  { %773 = vmatprep.subr.bf16.mxu0 %v4971_v19  ;;  %v6343_v19 = vld [vmem:[%s12449_s12 + $0x2d0] sm:$0xff] }
  0xb2   :  { %774 = vmatpush1.bf16.msra.mxu0 %v4969_v20  ;;  %v5021_v20 = vld [vmem:[#allocation8 + $0x10] ss:$24 sps:$4 sm:$0xff]  }
  0xb3   :  { %775 = vmatprep.subr.bf16.mxu0 %v4977_v35  ;;  %v6433_v35 = vld [vmem:[%s12449_s12 + $0x1e0] sm:$0xff] }
  0xb6   :  { %776 = vmatpush1.bf16.msra.mxu0 %v4975_v36  ;;  %v6438_v36 = vld [vmem:[%s12449_s12 + $0x280] sm:$0xff] }
  0xb7   :  { %973 = vmatprep.subr.bf16.mxu0 %v4983_v39  ;;  %12978 = vst [vmem:[#allocation24_spill] sm:$0xff] %v6438_v36  ;;  %v6457_v39 = vld [vmem:[%s12449_s12 + $0x1b0] sm:$0xff] }
 0x169   :  { %v408_v60 = vpop.f32.mrf.mxu0 }
 0x16a   :  { %v409_v61 = vadd.f32 %v408_v60, %v200_v58  ;;  %v4987_v58 = vld [vmem:[%s12973_s18 + $0xa0] ss:$8 sps:$4 sm:$0xff]  }
 0x16b   :  { %v410_v62 = vpop.f32.mrf.mxu0  ;;  %v4990_v60 = vld [vmem:[%s12973_s18 + $0xe0] ss:$8 sps:$4 sm:$0xff]  }
 0x16c   :  { %v411_v63 = vadd.f32 %v410_v62, %v204_v59  ;;  %v415_v0 = vmax.f32 %v409_v61, 0.0  ;;  %v4995_v59 = vld [vmem:[%s12973_s18 + $0x94] ss:$8 sps:$4 sm:$0xff]   ;;  %v4993_v62 = vld [vmem:[%s12973_s18 + $0x90] ss:$8 sps:$4 sm:$0xff]  }
 0x16d   :  { %v412_v1 = vpop.f32.mrf.mxu0  ;;  %v4998_v61 = vld [vmem:[%s12973_s18 + $0xd4] ss:$8 sps:$4 sm:$0xff]  }
 0x16e   :  { %v416_v2 = vmax.f32 %v411_v63, 0.0  ;;  %v417_v6 = vpack.c.bf16 %v415_v0, %v415_v0  ;;  %v5001_v63 = vld [vmem:[%s12973_s18 + $0x84] ss:$8 sps:$4 sm:$0xff]   ;;  %v4996_v0 = vld [vmem:[%s12973_s18 + $0xd0] ss:$8 sps:$4 sm:$0xff]  }
 0x16f   :  { %v413_v3 = vpop.f32.mrf.mxu0  ;;  %v5004_v1 = vld [vmem:[%s12973_s18 + $0xc4] ss:$8 sps:$4 sm:$0xff]  }
 0x170   :  { %v418_v4 = vpack.c.bf16 %v416_v2, %v416_v2  ;;  %v4999_v2 = vld [vmem:[%s12973_s18 + $0x80] ss:$8 sps:$4 sm:$0xff]   ;;  %v5007_v3 = vld [vmem:[#allocation8 + $0x34] ss:$24 sps:$4 sm:$0xff]  }
 0x172   :  { %586 = vmatprep.mubr.bf16.mxu1 %v418_v4  ;;  %v5002_v4 = vld [vmem:[%s12973_s18 + $0xc0] ss:$8 sps:$4 sm:$0xff]  }
 0x173   :  { %587 = vmatmul.mubr.bf16.vlgmr.msra.gmra.mxu1 %v417_v6  ;;  %v5005_v6 = vld [vmem:[#allocation8 + $0x30] ss:$24 sps:$4 sm:$0xff]  }
 0x174   :  { %4742 = vmatpush3.bf16.msra.mxu1 %v4949_v5  ;;  %4757 = vmatprep.mubr.msk.bf16.mxu1 %vm5921_vm0, %v12466_v52  ;;  %v5010_v5 = vld [vmem:[#allocation8 + $0x3c] ss:$24 sps:$4 sm:$0xff]  }
 0x175   :  { %4743 = vmatprep.subr.bf16.mxu1 %v12466_v52 }
 0x178   :  { %4744 = vmatpush3.bf16.msra.mxu1 %v4950_v7 }
 0x179   :  { %4745 = vmatprep.subr.bf16.mxu1 %v12466_v52 }
 0x17c   :  { %4746 = vmatpush3.bf16.msra.mxu1 %v4951_v8  ;;  %v5013_v8 = vld [vmem:[#allocation8 + $0x4] ss:$24 sps:$4 sm:$0xff]  }
 0x17d   :  { %4747 = vmatprep.subr.bf16.mxu1 %v12466_v52 }
 0x180   :  { %4748 = vmatpush3.bf16.msra.mxu1 %v4952_v9  ;;  %v5008_v9 = vld [vmem:[#allocation8 + $0x38] ss:$24 sps:$4 sm:$0xff]  }
 0x181   :  { %4749 = vmatprep.subr.bf16.mxu1 %v12466_v52 }
 0x184   :  { %4750 = vmatpush3.bf16.msra.mxu1 %v4953_v10 }
 0x185   :  { %4751 = vmatprep.subr.bf16.mxu1 %v12466_v52 }
 0x188   :  { %4752 = vmatpush3.bf16.msra.mxu1 %v4954_v11  ;;  %v5016_v11 = vld [vmem:[#allocation8 + $0xc] ss:$24 sps:$4 sm:$0xff]  }
 0x189   :  { %4753 = vmatprep.subr.bf16.mxu1 %v12466_v52 }
 0x18c   :  { %4754 = vmatpush3.bf16.msra.mxu1 %v4955_v12  ;;  %v5011_v12 = vld [vmem:[#allocation8] ss:$24 sps:$4 sm:$0xff]  }
 0x18d   :  { %4755 = vmatprep.subr.bf16.mxu1 %v12466_v52 }
 0x190   :  { %4756 = vmatpush3.bf16.msra.mxu1 %v4956_v13  ;;  %v5019_v13 = vld [vmem:[#allocation8 + $0x44] ss:$24 sps:$4 sm:$0xff]  }
 0x191   :  { %877 = vmatprep.subr.bf16.mxu1 %v4962_v16  ;;  %v5017_v16 = vld [vmem:[#allocation8 + $0x40] ss:$24 sps:$4 sm:$0xff]  }
 0x233   :  { %v4605_v21 = vpop.f32.mrf.mxu1 }
 0x235   :  { %v4606_v23 = vpop.f32.mrf.mxu1 }
 0x236   :  { %v4607_v24 = vadd.f32 %v4606_v23, %v4605_v21  ;;  %v6348_v21 = vld [vmem:[%s12449_s12 + $0x2a8] sm:$0xff]  ;;  %v6361_v23 = vld [vmem:[%s12449_s12 + $0x278] sm:$0xff] }
 0x237   :  { %v4608_v25 = vpop.f32.mrf.mxu1 }
 0x238   :  { %v589_v26 = vadd.f32 %v4607_v24, %v4441_v22  ;;  %v6355_v22 = vld [vmem:[%s12449_s12 + $0x2a0] sm:$0xff]  ;;  %v6366_v24 = vld [vmem:[%s12449_s12 + $0x2e8] sm:$0xff]  ;;  %v6373_v25 = vld [vmem:[%s12449_s12 + $0x270] sm:$0xff] }
 0x239   :  { %v4609_v27 = vpop.f32.mrf.mxu1 }
 0x23a   :  { %v594_v28 = vmax.f32 %v589_v26, 0.0  ;;  %v6379_v26 = vld [vmem:[%s12449_s12 + $0x248] sm:$0xff]  ;;  %v6386_v27 = vld [vmem:[%s12449_s12 + $0x240] sm:$0xff] }
 0x23c   :  { %v595_v30 = vpack.c.bf16 %v594_v28, %v594_v28  ;;  %v6391_v28 = vld [vmem:[%s12449_s12 + $0x2e0] sm:$0xff] }
 0x23e   :  { %4758 = vmatmul.mubr.bf16.vlgmr.msra.gmra.mxu1 %v595_v30  ;;  %v6402_v30 = vld [vmem:[%s12449_s12 + $0x2b8] sm:$0xff] }
 0x23f   :  { %878 = vmatpush1.bf16.msra.mxu1 %v4960_v29  ;;  %901 = vmatprep.mubr.bf16.mxu1 %v12464_v40  ;;  %v6397_v29 = vld [vmem:[%s12449_s12 + $0x218] sm:$0xff]  ;;  %12975 = vst [vmem:[#allocation21_spill] sm:$0xff] %v6402_v30 }
 0x240   :  { %879 = vmatprep.subr.bf16.mxu1 %v4968_v31  ;;  %v6409_v31 = vld [vmem:[%s12449_s12 + $0x210] sm:$0xff] }
 0x243   :  { %880 = vmatpush1.bf16.msra.mxu1 %v4966_v32  ;;  %v6414_v32 = vld [vmem:[%s12449_s12 + $0x2b0] sm:$0xff] }
 0x244   :  { %881 = vmatprep.subr.bf16.mxu1 %v4974_v33  ;;  %12976 = vst [vmem:[#allocation22_spill] sm:$0xff] %v6414_v32  ;;  %v6421_v33 = vld [vmem:[%s12449_s12 + $0x1e8] sm:$0xff] }
 0x247   :  { %882 = vmatpush1.bf16.msra.mxu1 %v4972_v34  ;;  %v6426_v34 = vld [vmem:[%s12449_s12 + $0x288] sm:$0xff] }
 0x248   :  { %883 = vmatprep.subr.bf16.mxu1 %v4980_v37  ;;  %12977 = vst [vmem:[#allocation23_spill] sm:$0xff] %v6426_v34  ;;  %v6445_v37 = vld [vmem:[%s12449_s12 + $0x1b8] sm:$0xff] }
 0x24b   :  { %884 = vmatpush1.bf16.msra.mxu1 %v4978_v38  ;;  %v6450_v38 = vld [vmem:[%s12449_s12 + $0x258] sm:$0xff] }
 0x24c   :  { %1069 = vmatprep.subr.bf16.mxu1 %v4986_v41  ;;  %12979 = vst [vmem:[#allocation25_spill] sm:$0xff] %v6450_v38  ;;  %v6462_v41 = vld [vmem:[%s12449_s12 + $0x250] sm:$0xff] }
 0x24d   :  { %12980 = vst [vmem:[#allocation26_spill] sm:$0xff] %v6462_v41 }
 0x2fe   :  { %v701_v43 = vpop.f32.mrf.mxu1 }
 0x2ff   :  { %v702_v44 = vadd.f32 %v4458_v42, %v701_v43  ;;  %v6469_v42 = vld [vmem:[%s12449_s12 + $0x188] sm:$0xff] }
 0x300   :  { %v4759_v45 = vpop.f32.mrf.mxu1  ;;  %v6474_v43 = vld [vmem:[%s12449_s12 + $0x228] sm:$0xff] }
 0x301   :  { %v707_v47 = vpack.c.bf16 %v702_v44, %v702_v44  ;;  %12981 = vst [vmem:[#allocation27_spill] sm:$0xff] %v6474_v43  ;;  %v6481_v44 = vld [vmem:[%s12449_s12 + $0x180] sm:$0xff] }
 0x302   :  { %v704_v49 = vpop.f32.mrf.mxu1  ;;  %v6486_v45 = vld [vmem:[%s12449_s12 + $0x220] sm:$0xff] }
 0x303   :  { %v825_v51 = vrot.slane %v707_v47, 1  ;;  %4475 = vmatmul.mubr.msk.bf16.vlgmr.msra.gmra.mxu0 %vm757_vm1, %v707_v47  ;;  %v921_v7 = vrot.slane %v707_v47, 2  ;;  %v1017_v10 = vrot.slane %v707_v47, 3  ;;  %12982 = vst [vmem:[#allocation28_spill] sm:$0xff] %v6486_v45  ;;  %v6498_v47 = vld [vmem:[%s12449_s12 + $0x1f8] sm:$0xff]  ;;  %v6510_v49 = vld [vmem:[%s12449_s12 + $0x1f0] sm:$0xff] }
 0x304   :  { %974 = vmatpush1.bf16.msra.mxu0 %v4981_v46  ;;  %v4760_v56 = vpop.f32.mrf.mxu1  ;;  %997 = vmatprep.mubr.bf16.mxu0 %v12464_v40  ;;  %v6493_v46 = vld [vmem:[%s12449_s12 + $0x158] sm:$0xff]  ;;  %12983 = vst [vmem:[#allocation29_spill] sm:$0xff] %v6498_v47  ;;  %12984 = vst [vmem:[#allocation30_spill] sm:$0xff] %v6510_v49 }
 0x305   :  { %4492 = vmatmul.mubr.msk.bf16.vlgmr.msra.gmra.mxu1 %vm757_vm1, %v825_v51  ;;  %975 = vmatprep.subr.bf16.mxu0 %v4989_v48  ;;  %v6505_v48 = vld [vmem:[%s12449_s12 + $0x150] sm:$0xff]  ;;  %v6522_v51 = vld [vmem:[%s12449_s12 + $0x1c8] sm:$0xff]  ;;  %v6534_v56 = vld [vmem:[%s12449_s12 + $0x1c0] sm:$0xff] }
 0x306   :  { %1070 = vmatpush1.bf16.msra.mxu1 %v4984_v50  ;;  %1093 = vmatprep.mubr.bf16.mxu1 %v12464_v40  ;;  %v6517_v50 = vld [vmem:[%s12449_s12 + $0x128] sm:$0xff]  ;;  %12985 = vst [vmem:[#allocation31_spill] sm:$0xff] %v6522_v51  ;;  %12986 = vst [vmem:[#allocation32_spill] sm:$0xff] %v6534_v56 }
 0x307   :  { %1071 = vmatprep.subr.bf16.mxu1 %v4992_v53  ;;  %v6529_v53 = vld [vmem:[%s12449_s12 + $0x120] sm:$0xff] }
 0x308   :  { %976 = vmatpush1.bf16.msra.mxu0 %v4987_v58  ;;  %v6541_v58 = vld [vmem:[%s12449_s12 + $0xf8] sm:$0xff] }
 0x309   :  { %977 = vmatprep.subr.bf16.mxu0 %v4995_v59  ;;  %v6546_v59 = vld [vmem:[%s12449_s12 + $0x198] sm:$0xff] }
 0x30a   :  { %1072 = vmatpush1.bf16.msra.mxu1 %v4990_v60  ;;  %12987 = vst [vmem:[#allocation33_spill] sm:$0xff] %v6546_v59  ;;  %v6553_v60 = vld [vmem:[%s12449_s12 + $0xf0] sm:$0xff] }
 0x30b   :  { %1073 = vmatprep.subr.bf16.mxu1 %v4998_v61  ;;  %v6558_v61 = vld [vmem:[%s12449_s12 + $0x190] sm:$0xff] }
 0x30c   :  { %978 = vmatpush1.bf16.msra.mxu0 %v4993_v62  ;;  %12988 = vst [vmem:[#allocation34_spill] sm:$0xff] %v6558_v61  ;;  %v6565_v62 = vld [vmem:[%s12449_s12 + $0xc8] sm:$0xff] }
 0x30d   :  { %979 = vmatprep.subr.bf16.mxu0 %v5001_v63  ;;  %v6570_v63 = vld [vmem:[%s12449_s12 + $0x168] sm:$0xff] }
 0x30e   :  { %1074 = vmatpush1.bf16.msra.mxu1 %v4996_v0  ;;  %12989 = vst [vmem:[#allocation35_spill] sm:$0xff] %v6570_v63  ;;  %v6577_v0 = vld [vmem:[%s12449_s12 + $0xc0] sm:$0xff] }
 0x30f   :  { %1075 = vmatprep.subr.bf16.mxu1 %v5004_v1  ;;  %v6582_v1 = vld [vmem:[%s12449_s12 + $0x160] sm:$0xff] }
 0x310   :  { %980 = vmatpush1.bf16.msra.mxu0 %v4999_v2  ;;  %12990 = vst [vmem:[#allocation36_spill] sm:$0xff] %v6582_v1  ;;  %v6589_v2 = vld [vmem:[%s12449_s12 + $0x98] sm:$0xff] }
 0x311   :  { %1231 = vmatprep.subr.bf16.mxu0 %v5007_v3  ;;  %v6594_v3 = vld [vmem:[%s12449_s12 + $0x138] sm:$0xff] }
 0x312   :  { %1076 = vmatpush1.bf16.msra.mxu1 %v5002_v4  ;;  %12991 = vst [vmem:[#allocation37_spill] sm:$0xff] %v6594_v3  ;;  %v6601_v4 = vld [vmem:[%s12449_s12 + $0x90] sm:$0xff] }
 0x313   :  { %4509 = vmatmul.mubr.msk.bf16.vlgmr.msra.gmra.mxu0 %vm757_vm1, %v921_v7  ;;  %1274 = vmatprep.subr.bf16.mxu1 %v5010_v5  ;;  %v6606_v5 = vld [vmem:[%s12449_s12 + $0x130] sm:$0xff]  ;;  %v6618_v7 = vld [vmem:[%s12449_s12 + $0x108] sm:$0xff] }
 0x314   :  { %1232 = vmatpush1.bf16.msra.mxu0 %v5005_v6  ;;  %1251 = vmatprep.mubr.bf16.mxu0 %v12464_v40  ;;  %12992 = vst [vmem:[#allocation38_spill] sm:$0xff] %v6606_v5  ;;  %v6613_v6 = vld [vmem:[%s12449_s12 + $0x68] sm:$0xff]  ;;  %12993 = vst [vmem:[#allocation39_spill] sm:$0xff] %v6618_v7 }
 0x315   :  { %4526 = vmatmul.mubr.msk.bf16.vlgmr.msra.gmra.mxu1 %vm757_vm1, %v1017_v10  ;;  %1233 = vmatprep.subr.bf16.mxu0 %v5013_v8  ;;  %v6625_v8 = vld [vmem:[%s12449_s12 + $0x60] sm:$0xff]  ;;  %v6637_v10 = vld [vmem:[%s12449_s12 + $0x38] sm:$0xff] }
 0x316   :  { %1275 = vmatpush1.bf16.msra.mxu1 %v5008_v9  ;;  %1294 = vmatprep.mubr.bf16.mxu1 %v12464_v40  ;;  %v6630_v9 = vld [vmem:[%s12449_s12 + $0x100] sm:$0xff] }
 0x317   :  { %1276 = vmatprep.subr.bf16.mxu1 %v5016_v11  ;;  %12994 = vst [vmem:[#allocation40_spill] sm:$0xff] %v6630_v9  ;;  %v6642_v11 = vld [vmem:[%s12449_s12 + $0xd8] sm:$0xff] }
 0x318   :  { %1234 = vmatpush1.bf16.msra.mxu0 %v5011_v12  ;;  %12995 = vst [vmem:[#allocation41_spill] sm:$0xff] %v6642_v11  ;;  %v6649_v12 = vld [vmem:[%s12449_s12 + $0x30] sm:$0xff] }
 0x319   :  { %1317 = vmatprep.subr.bf16.mxu0 %v5019_v13  ;;  %v6654_v13 = vld [vmem:[%s12449_s12 + $0xd0] sm:$0xff] }
 0x31a   :  { %1277 = vmatpush1.bf16.msra.mxu1 %v5014_v14  ;;  %12996 = vst [vmem:[#allocation42_spill] sm:$0xff] %v6654_v13  ;;  %v6661_v14 = vld [vmem:[%s12449_s12 + $0x8] sm:$0xff] }
 0x31b   :  { %4540 = vmatmul.mubr.msk.bf16.vlgmr.msra.gmra.mxu0 %vm1215_vm2, %v5020_v15  ;;  %1573 = vmatprep.subr.mxu1 %v6336_v17 }
 0x31c   :  { %1318 = vmatpush1.bf16.msra.mxu0 %v5017_v16  ;;  %1337 = vmatprep.mubr.bf16.mxu0 %v12464_v40  ;;  %v6673_v16 = vld [vmem:[%s12449_s12] sm:$0xff]  ;;  %v6690_v40 = vld [vmem:[%s12449_s12 + $0x78] sm:$0xff] }
 0x31d   :  { %4541 = vmatmul.mubr.msk.bf16.vlgmr.msra.gmra.mxu1 %vm1215_vm2, %v5020_v15  ;;  %1319 = vmatprep.subr.bf16.mxu0 %v5023_v18  ;;  %v6678_v18 = vld [vmem:[%s12449_s12 + $0xa0] sm:$0xff]  ;;  %12999 = vst [vmem:[#allocation45_spill] sm:$0xff] %v6690_v40 }
 0x31e   :  { %1574 = vmatpush1.msra.mxu1 %v6343_v19  ;;  %1637 = vmatprep.mubr.f32.mxu1 %v12466_v52  ;;  %12998 = vst [vmem:[#allocation44_spill] sm:$0xff] %v6678_v18  ;;  %v6697_v52 = vld [vmem:[%s12449_s12 + $0x5d0] sm:$0xff] }
 0x31f   :  { %1575 = vmatprep.subr.mxu1 %v6348_v21 }
 0x320   :  { %1320 = vmatpush1.bf16.msra.mxu0 %v5021_v20  ;;  %1576 = vmatpush1.msra.mxu1 %v6355_v22  ;;  %v6685_v20 = vld [vmem:[%s12449_s12 + $0x5d8] sm:$0xff] }
 0x321   :  { %1577 = vmatprep.subr.mxu1 %v6361_v23  ;;  %1644 = vmatprep.subr.mxu0 %v6366_v24 }
 0x322   :  { %1578 = vmatpush1.msra.mxu1 %v6373_v25 }
 0x323   :  { %1579 = vmatprep.subr.mxu1 %v6379_v26  ;;  %4542 = vmatmul.mubr.msk.bf16.vlgmr.msra.gmra.mxu0 %vm1215_vm2, %v5020_v15  ;;  %v6666_v15 = vld [vmem:[%s12449_s12 + $0xa8] sm:$0xff] }
 0x324   :  { %1580 = vmatpush1.msra.mxu1 %v6386_v27  ;;  %1645 = vmatpush1.msra.mxu0 %v6391_v28  ;;  %12997 = vst [vmem:[#allocation43_spill] sm:$0xff] %v6666_v15 }
 0x325   :  { %1581 = vmatprep.subr.mxu1 %v6397_v29  ;;  %1646 = vmatprep.subr.mxu0 %v6402_v30  ;;  %v7112_v30 = vld [vmem:[%s12449_s12 + $0x2c0] sm:$0xff] }
 0x326   :  { %1582 = vmatpush1.msra.mxu1 %v6409_v31  ;;  %1647 = vmatpush1.msra.mxu0 %v6414_v32  ;;  %v6973_v32 = vld [vmem:[%s12449_s12 + $0x398] sm:$0xff]  ;;  %13051 = vst [vmem:[#allocation96_spill] sm:$0xff] %v7112_v30 }
 0x327   :  { %1583 = vmatprep.subr.mxu1 %v6421_v33  ;;  %1648 = vmatprep.subr.mxu0 %v6426_v34  ;;  %v6961_v34 = vld [vmem:[%s12449_s12 + $0x3c0] sm:$0xff]  ;;  %13027 = vst [vmem:[#allocation73_spill] sm:$0xff] %v6973_v32 }
 0x328   :  { %1584 = vmatpush1.msra.mxu1 %v6433_v35  ;;  %1649 = vmatpush1.msra.mxu0 %v6438_v36  ;;  %v6949_v36 = vld [vmem:[%s12449_s12 + $0x3c8] sm:$0xff]  ;;  %13025 = vst [vmem:[#allocation71_spill] sm:$0xff] %v6961_v34 }
 0x329   :  { %1585 = vmatprep.subr.mxu1 %v6445_v37  ;;  %1650 = vmatprep.subr.mxu0 %v6450_v38  ;;  %v6937_v38 = vld [vmem:[%s12449_s12 + $0x3f0] sm:$0xff]  ;;  %13023 = vst [vmem:[#allocation69_spill] sm:$0xff] %v6949_v36 }
 0x32a   :  { %1586 = vmatpush1.msra.mxu1 %v6457_v39  ;;  %1651 = vmatpush1.msra.mxu0 %v6462_v41  ;;  %v6925_v41 = vld [vmem:[%s12449_s12 + $0x3f8] sm:$0xff]  ;;  %13021 = vst [vmem:[#allocation67_spill] sm:$0xff] %v6937_v38 }
 0x32b   :  { %1587 = vmatprep.subr.mxu1 %v6469_v42  ;;  %1652 = vmatprep.subr.mxu0 %v6474_v43  ;;  %v6913_v43 = vld [vmem:[%s12449_s12 + $0x420] sm:$0xff]  ;;  %13019 = vst [vmem:[#allocation65_spill] sm:$0xff] %v6925_v41 }
 0x32c   :  { %1588 = vmatpush1.msra.mxu1 %v6481_v44  ;;  %1653 = vmatpush1.msra.mxu0 %v6486_v45  ;;  %v6901_v45 = vld [vmem:[%s12449_s12 + $0x428] sm:$0xff] }
 0x32d   :  { %1589 = vmatprep.subr.mxu1 %v6493_v46  ;;  %1654 = vmatprep.subr.mxu0 %v6498_v47  ;;  %v6889_v47 = vld [vmem:[%s12449_s12 + $0x450] sm:$0xff] }
 0x32e   :  { %1590 = vmatpush1.msra.mxu1 %v6505_v48  ;;  %1655 = vmatpush1.msra.mxu0 %v6510_v49  ;;  %v6877_v49 = vld [vmem:[%s12449_s12 + $0x458] sm:$0xff] }
 0x32f   :  { %1591 = vmatprep.subr.mxu1 %v6517_v50  ;;  %1656 = vmatprep.subr.mxu0 %v6522_v51  ;;  %v6865_v51 = vld [vmem:[%s12449_s12 + $0x480] sm:$0xff] }
 0x330   :  { %1592 = vmatpush1.msra.mxu1 %v6529_v53  ;;  %1657 = vmatpush1.msra.mxu0 %v6534_v56  ;;  %v6853_v56 = vld [vmem:[%s12449_s12 + $0x488] sm:$0xff] }
 0x331   :  { %1593 = vmatprep.subr.mxu1 %v6541_v58  ;;  %1658 = vmatprep.subr.mxu0 %v6546_v59  ;;  %v6841_v59 = vld [vmem:[%s12449_s12 + $0x4b0] sm:$0xff] }
 0x332   :  { %1594 = vmatpush1.msra.mxu1 %v6553_v60  ;;  %1659 = vmatpush1.msra.mxu0 %v6558_v61  ;;  %v6829_v61 = vld [vmem:[%s12449_s12 + $0x4b8] sm:$0xff] }
 0x333   :  { %1595 = vmatprep.subr.mxu1 %v6565_v62  ;;  %1660 = vmatprep.subr.mxu0 %v6570_v63  ;;  %v6817_v63 = vld [vmem:[%s12449_s12 + $0x4e0] sm:$0xff] }
 0x334   :  { %1596 = vmatpush1.msra.mxu1 %v6577_v0  ;;  %1661 = vmatpush1.msra.mxu0 %v6582_v1  ;;  %v6805_v1 = vld [vmem:[%s12449_s12 + $0x4e8] sm:$0xff] }
 0x335   :  { %1597 = vmatprep.subr.mxu1 %v6589_v2  ;;  %1662 = vmatprep.subr.mxu0 %v6594_v3  ;;  %v6793_v3 = vld [vmem:[%s12449_s12 + $0x510] sm:$0xff] }
 0x336   :  { %1598 = vmatpush1.msra.mxu1 %v6601_v4  ;;  %1663 = vmatpush1.msra.mxu0 %v6606_v5  ;;  %v6781_v5 = vld [vmem:[%s12449_s12 + $0x518] sm:$0xff] }
 0x337   :  { %1599 = vmatprep.subr.mxu1 %v6613_v6  ;;  %1664 = vmatprep.subr.mxu0 %v6618_v7  ;;  %v6769_v7 = vld [vmem:[%s12449_s12 + $0x540] sm:$0xff] }
 0x338   :  { %1600 = vmatpush1.msra.mxu1 %v6625_v8  ;;  %1665 = vmatpush1.msra.mxu0 %v6630_v9  ;;  %v6757_v9 = vld [vmem:[%s12449_s12 + $0x548] sm:$0xff] }
 0x339   :  { %1601 = vmatprep.subr.mxu1 %v6637_v10  ;;  %1666 = vmatprep.subr.mxu0 %v6642_v11  ;;  %v6745_v11 = vld [vmem:[%s12449_s12 + $0x570] sm:$0xff] }
 0x33a   :  { %1602 = vmatpush1.msra.mxu1 %v6649_v12  ;;  %1667 = vmatpush1.msra.mxu0 %v6654_v13  ;;  %v6733_v13 = vld [vmem:[%s12449_s12 + $0x578] sm:$0xff] }
 0x33b   :  { %1603 = vmatprep.subr.mxu1 %v6661_v14  ;;  %1668 = vmatprep.subr.mxu0 %v6666_v15  ;;  %v6721_v15 = vld [vmem:[%s12449_s12 + $0x5a0] sm:$0xff] }
 0x33c   :  { %1604 = vmatpush1.msra.mxu1 %v6673_v16  ;;  %1669 = vmatpush1.msra.mxu0 %v6678_v18  ;;  %v6726_v18 = vld [vmem:[%s12449_s12 + $0x40] sm:$0xff] }
 0x33d   :  { %1605 = vmatprep.subr.mxu1 %v6685_v20  ;;  %1670 = vmatprep.subr.mxu0 %v6690_v40  ;;  %13002 = vst [vmem:[#allocation48_spill] sm:$0xff] %v6726_v18  ;;  %v6738_v40 = vld [vmem:[%s12449_s12 + $0x18] sm:$0xff] }
 0x33e   :  { %1606 = vmatpush2.msra.mxu1 %v6697_v52  ;;  %1671 = vmatpush1.msra.mxu0 %v6702_v54  ;;  %13003 = vst [vmem:[#allocation49_spill] sm:$0xff] %v6738_v40  ;;  %v6750_v54 = vld [vmem:[%s12449_s12 + $0x10] sm:$0xff] }
 0x33f   :  { %1607 = vmatprep.subr.mxu1 %v6709_v57  ;;  %1672 = vmatprep.subr.mxu0 %v6714_v55  ;;  %13004 = vst [vmem:[#allocation50_spill] sm:$0xff] %v6750_v54  ;;  %v6762_v55 = vld [vmem:[%s12449_s12 + $0x5e8] sm:$0xff] }
 0x340   :  { %1608 = vmatpush2.msra.mxu1 %v6721_v15  ;;  %1673 = vmatpush1.msra.mxu0 %v6726_v18  ;;  %13005 = vst [vmem:[#allocation51_spill] sm:$0xff] %v6762_v55  ;;  %v6774_v18 = vld [vmem:[%s12449_s12 + $0x5e0] sm:$0xff] }
 0x341   :  { %1609 = vmatprep.subr.mxu1 %v6733_v13  ;;  %1674 = vmatprep.subr.mxu0 %v6738_v40  ;;  %13006 = vst [vmem:[#allocation52_spill] sm:$0xff] %v6774_v18  ;;  %v6786_v40 = vld [vmem:[%s12449_s12 + $0x5b8] sm:$0xff] }
 0x342   :  { %1610 = vmatpush2.msra.mxu1 %v6745_v11  ;;  %1675 = vmatpush1.msra.mxu0 %v6750_v54  ;;  %13007 = vst [vmem:[#allocation53_spill] sm:$0xff] %v6786_v40  ;;  %v6798_v54 = vld [vmem:[%s12449_s12 + $0x5b0] sm:$0xff] }
 0x343   :  { %1611 = vmatprep.subr.mxu1 %v6757_v9  ;;  %1676 = vmatprep.subr.mxu0 %v6762_v55  ;;  %13008 = vst [vmem:[#allocation54_spill] sm:$0xff] %v6798_v54  ;;  %v6810_v55 = vld [vmem:[%s12449_s12 + $0x588] sm:$0xff] }
 0x344   :  { %1612 = vmatpush2.msra.mxu1 %v6769_v7  ;;  %1677 = vmatpush2.msra.mxu0 %v6774_v18  ;;  %13009 = vst [vmem:[#allocation55_spill] sm:$0xff] %v6810_v55  ;;  %v6822_v18 = vld [vmem:[%s12449_s12 + $0x580] sm:$0xff] }
 0x345   :  { %1613 = vmatprep.subr.mxu1 %v6781_v5  ;;  %1678 = vmatprep.subr.mxu0 %v6786_v40  ;;  %13010 = vst [vmem:[#allocation56_spill] sm:$0xff] %v6822_v18  ;;  %v6834_v40 = vld [vmem:[%s12449_s12 + $0x558] sm:$0xff] }
 0x346   :  { %1614 = vmatpush2.msra.mxu1 %v6793_v3  ;;  %1679 = vmatpush2.msra.mxu0 %v6798_v54  ;;  %13011 = vst [vmem:[#allocation57_spill] sm:$0xff] %v6834_v40  ;;  %v6846_v54 = vld [vmem:[%s12449_s12 + $0x550] sm:$0xff] }
 0x347   :  { %1615 = vmatprep.subr.mxu1 %v6805_v1  ;;  %1680 = vmatprep.subr.mxu0 %v6810_v55  ;;  %13012 = vst [vmem:[#allocation58_spill] sm:$0xff] %v6846_v54  ;;  %v6858_v55 = vld [vmem:[%s12449_s12 + $0x528] sm:$0xff] }
 0x348   :  { %1616 = vmatpush2.msra.mxu1 %v6817_v63  ;;  %1681 = vmatpush2.msra.mxu0 %v6822_v18  ;;  %13013 = vst [vmem:[#allocation59_spill] sm:$0xff] %v6858_v55  ;;  %v6870_v18 = vld [vmem:[%s12449_s12 + $0x520] sm:$0xff] }
 0x349   :  { %1617 = vmatprep.subr.mxu1 %v6829_v61  ;;  %1682 = vmatprep.subr.mxu0 %v6834_v40  ;;  %13014 = vst [vmem:[#allocation60_spill] sm:$0xff] %v6870_v18  ;;  %v6882_v40 = vld [vmem:[%s12449_s12 + $0x4f8] sm:$0xff] }
 0x34a   :  { %1618 = vmatpush2.msra.mxu1 %v6841_v59  ;;  %1683 = vmatpush2.msra.mxu0 %v6846_v54  ;;  %13015 = vst [vmem:[#allocation61_spill] sm:$0xff] %v6882_v40  ;;  %v6894_v54 = vld [vmem:[%s12449_s12 + $0x4f0] sm:$0xff] }
 0x34b   :  { %1619 = vmatprep.subr.mxu1 %v6853_v56  ;;  %1684 = vmatprep.subr.mxu0 %v6858_v55  ;;  %13016 = vst [vmem:[#allocation62_spill] sm:$0xff] %v6894_v54  ;;  %v6906_v55 = vld [vmem:[%s12449_s12 + $0x4c8] sm:$0xff] }
 0x34c   :  { %1620 = vmatpush2.msra.mxu1 %v6865_v51  ;;  %1685 = vmatpush2.msra.mxu0 %v6870_v18  ;;  %13017 = vst [vmem:[#allocation63_spill] sm:$0xff] %v6906_v55  ;;  %v6918_v18 = vld [vmem:[%s12449_s12 + $0x4c0] sm:$0xff] }
 0x34d   :  { %1621 = vmatprep.subr.mxu1 %v6877_v49  ;;  %1686 = vmatprep.subr.mxu0 %v6882_v40  ;;  %13018 = vst [vmem:[#allocation64_spill] sm:$0xff] %v6918_v18  ;;  %v6930_v40 = vld [vmem:[%s12449_s12 + $0x498] sm:$0xff] }
 0x34e   :  { %1622 = vmatpush2.msra.mxu1 %v6889_v47  ;;  %1687 = vmatpush2.msra.mxu0 %v6894_v54  ;;  %13020 = vst [vmem:[#allocation66_spill] sm:$0xff] %v6930_v40  ;;  %v6942_v54 = vld [vmem:[%s12449_s12 + $0x490] sm:$0xff] }
 0x34f   :  { %1623 = vmatprep.subr.mxu1 %v6901_v45  ;;  %1688 = vmatprep.subr.mxu0 %v6906_v55  ;;  %13022 = vst [vmem:[#allocation68_spill] sm:$0xff] %v6942_v54  ;;  %v6954_v55 = vld [vmem:[%s12449_s12 + $0x468] sm:$0xff] }
 0x350   :  { %1624 = vmatpush2.msra.mxu1 %v6913_v43  ;;  %1689 = vmatpush2.msra.mxu0 %v6918_v18  ;;  %13024 = vst [vmem:[#allocation70_spill] sm:$0xff] %v6954_v55  ;;  %v6966_v18 = vld [vmem:[%s12449_s12 + $0x460] sm:$0xff] }
 0x351   :  { %1625 = vmatprep.subr.mxu1 %v6925_v41  ;;  %1690 = vmatprep.subr.mxu0 %v6930_v40  ;;  %13026 = vst [vmem:[#allocation72_spill] sm:$0xff] %v6966_v18  ;;  %v6978_v40 = vld [vmem:[%s12449_s12 + $0x438] sm:$0xff] }
 0x352   :  { %1626 = vmatpush2.msra.mxu1 %v6937_v38  ;;  %1691 = vmatpush2.msra.mxu0 %v6942_v54  ;;  %13028 = vst [vmem:[#allocation74_spill] sm:$0xff] %v6978_v40  ;;  %v6985_v38 = vld [vmem:[%s12449_s12 + $0x390] sm:$0xff] }
 0x353   :  { %1627 = vmatprep.subr.mxu1 %v6949_v36  ;;  %1692 = vmatprep.subr.mxu0 %v6954_v55  ;;  %13029 = vst [vmem:[#allocation75_spill] sm:$0xff] %v6985_v38  ;;  %v6990_v54 = vld [vmem:[%s12449_s12 + $0x430] sm:$0xff]  ;;  %v6997_v36 = vld [vmem:[%s12449_s12 + $0x368] sm:$0xff] }
 0x354   :  { %13030 = vst [vmem:[#allocation76_spill] sm:$0xff] %v6990_v54  ;;  %1628 = vmatpush2.msra.mxu1 %v6961_v34  ;;  %1693 = vmatpush2.msra.mxu0 %v6966_v18  ;;  %13031 = vst [vmem:[#allocation77_spill] sm:$0xff] %v6997_v36  ;;  %v7002_v55 = vld [vmem:[%s12449_s12 + $0x408] sm:$0xff]  ;;  %v7009_v34 = vld [vmem:[%s12449_s12 + $0x360] sm:$0xff] }
 0x355   :  { %13032 = vst [vmem:[#allocation78_spill] sm:$0xff] %v7002_v55  ;;  %1629 = vmatprep.subr.mxu1 %v6973_v32  ;;  %1694 = vmatprep.subr.mxu0 %v6978_v40  ;;  %13033 = vst [vmem:[#allocation79_spill] sm:$0xff] %v7009_v34  ;;  %v7014_v18 = vld [vmem:[%s12449_s12 + $0x400] sm:$0xff]  ;;  %v7021_v32 = vld [vmem:[%s12449_s12 + $0x338] sm:$0xff] }
 0x356   :  { %13034 = vst [vmem:[#allocation80_spill] sm:$0xff] %v7014_v18  ;;  %1630 = vmatpush2.msra.mxu1 %v6985_v38  ;;  %1695 = vmatpush2.msra.mxu0 %v6990_v54  ;;  %13035 = vst [vmem:[#allocation81_spill] sm:$0xff] %v7021_v32  ;;  %v7026_v40 = vld [vmem:[%s12449_s12 + $0x3d8] sm:$0xff]  ;;  %v7033_v38 = vld [vmem:[%s12449_s12 + $0x330] sm:$0xff] }
 0x357   :  { %13036 = vst [vmem:[#allocation82_spill] sm:$0xff] %v7026_v40  ;;  %1631 = vmatprep.subr.mxu1 %v6997_v36  ;;  %1696 = vmatprep.subr.mxu0 %v7002_v55  ;;  %13037 = vst [vmem:[#allocation83_spill] sm:$0xff] %v7033_v38  ;;  %v7038_v54 = vld [vmem:[%s12449_s12 + $0x3d0] sm:$0xff]  ;;  %v7045_v36 = vld [vmem:[%s12449_s12 + $0x308] sm:$0xff] }
 0x358   :  { %13038 = vst [vmem:[#allocation84_spill] sm:$0xff] %v7038_v54  ;;  %1632 = vmatpush2.msra.mxu1 %v7009_v34  ;;  %1697 = vmatpush2.msra.mxu0 %v7014_v18  ;;  %13039 = vst [vmem:[#allocation85_spill] sm:$0xff] %v7045_v36  ;;  %v7050_v55 = vld [vmem:[%s12449_s12 + $0x3a8] sm:$0xff]  ;;  %v7057_v34 = vld [vmem:[%s12449_s12 + $0x300] sm:$0xff] }
 0x359   :  { %13040 = vst [vmem:[#allocation86_spill] sm:$0xff] %v7050_v55  ;;  %1633 = vmatprep.subr.mxu1 %v7021_v32  ;;  %1698 = vmatprep.subr.mxu0 %v7026_v40  ;;  %13041 = vst [vmem:[#allocation87_spill] sm:$0xff] %v7057_v34  ;;  %v7062_v18 = vld [vmem:[%s12449_s12 + $0x3a0] sm:$0xff]  ;;  %v7069_v32 = vld [vmem:[%s12449_s12 + $0x378] sm:$0xff] }
 0x35a   :  { %13042 = vst [vmem:[#allocation88_spill] sm:$0xff] %v7062_v18  ;;  %1634 = vmatpush2.msra.mxu1 %v7033_v38  ;;  %1699 = vmatpush2.msra.mxu0 %v7038_v54  ;;  %13043 = vst [vmem:[#allocation89_spill] sm:$0xff] %v7069_v32  ;;  %v7076_v40 = vld [vmem:[%s12449_s12 + $0x2f8] sm:$0xff]  ;;  %v7081_v38 = vld [vmem:[%s12449_s12 + $0x370] sm:$0xff] }
 0x35b   :  { %1635 = vmatprep.subr.mxu1 %v7045_v36  ;;  %1700 = vmatprep.subr.mxu0 %v7050_v55  ;;  %13044 = vst [vmem:[#allocation90_spill] sm:$0xff] %v7076_v40  ;;  %13045 = vst [vmem:[#allocation91_spill] sm:$0xff] %v7081_v38  ;;  %v7088_v54 = vld [vmem:[%s12449_s12 + $0x2f0] sm:$0xff]  ;;  %v7093_v55 = vld [vmem:[%s12449_s12 + $0x348] sm:$0xff]  ;;  %v13048_v36 = vmov 0.0  }
 0x35c   :  { %1636 = vmatpush2.msra.mxu1 %v7057_v34  ;;  %1701 = vmatpush2.msra.mxu0 %v7062_v18  ;;  %13046 = vst [vmem:[#allocation92_spill] sm:$0xff] %v7088_v54  ;;  %13047 = vst [vmem:[#allocation93_spill] sm:$0xff] %v7093_v55  ;;  %v7100_v34 = vld [vmem:[%s12449_s12 + $0x2c8] sm:$0xff]  ;;  %v7105_v18 = vld [vmem:[%s12449_s12 + $0x340] sm:$0xff] }
 0x35d   :  { %1638 = vmatmul.mubr.f32.vlgmr.msra.gmra.mxu1 %v13048_v36  ;;  %1702 = vmatprep.subr.mxu0 %v7069_v32  ;;  %13049 = vst [vmem:[#allocation94_spill] sm:$0xff] %v7100_v34  ;;  %13050 = vst [vmem:[#allocation95_spill] sm:$0xff] %v7105_v18  ;;  %v7117_v32 = vld [vmem:[%s12449_s12 + $0x318] sm:$0xff] }
 0x35e   :  { %1715 = vmatprep.subr.mxu1 %v7076_v40  ;;  %1703 = vmatpush2.msra.mxu0 %v7081_v38  ;;  %13052 = vst [vmem:[#allocation97_spill] sm:$0xff] %v7117_v32  ;;  %v7124_v40 = vld [vmem:[%s12449_s12 + $0x298] sm:$0xff]  ;;  %v7129_v38 = vld [vmem:[%s12449_s12 + $0x310] sm:$0xff] }
 0x35f   :  { %1716 = vmatpush1.msra.mxu1 %v7088_v54  ;;  %1704 = vmatprep.subr.mxu0 %v7093_v55  ;;  %13053 = vst [vmem:[#allocation98_spill] sm:$0xff] %v7124_v40  ;;  %13054 = vst [vmem:[#allocation99_spill] sm:$0xff] %v7129_v38  ;;  %v7136_v54 = vld [vmem:[%s12449_s12 + $0x290] sm:$0xff]  ;;  %v7143_v55 = vld [vmem:[%s12449_s12 + $0x268] sm:$0xff] }
 0x360   :  { %1717 = vmatprep.subr.mxu1 %v7100_v34  ;;  %1705 = vmatpush2.msra.mxu0 %v7105_v18  ;;  %13055 = vst [vmem:[#allocation100_spill] sm:$0xff] %v7136_v54  ;;  %13056 = vst [vmem:[#allocation101_spill] sm:$0xff] %v7143_v55  ;;  %v7150_v34 = vld [vmem:[%s12449_s12 + $0x260] sm:$0xff] }
 0x361   :  { %1718 = vmatpush1.msra.mxu1 %v7112_v30  ;;  %1706 = vmatprep.subr.mxu0 %v7117_v32  ;;  %13057 = vst [vmem:[#allocation102_spill] sm:$0xff] %v7150_v34  ;;  %v7157_v30 = vld [vmem:[%s12449_s12 + $0x238] sm:$0xff]  ;;  %v13059_v32 = vmov 0  }
 0x362   :  { %1719 = vmatprep.subr.mxu1 %v7124_v40  ;;  %1707 = vmatpush2.msra.mxu0 %v7129_v38  ;;  %13058 = vst [vmem:[#allocation103_spill] sm:$0xff] %v7157_v30  ;;  %v7164_v40 = vld [vmem:[%s12449_s12 + $0x230] sm:$0xff]  ;;  %v1541_v38 = vld [vmem:[%s12447_s10] sm:$0x3] }
 0x363   :  { %1708 = vmatprep.mubr.f32.mxu0 %v13048_v36  ;;  %1720 = vmatpush1.msra.mxu1 %v7136_v54  ;;  %v7173_v54 = vld [vmem:[%s12449_s12 + $0x208] sm:$0xff]  ;;  %vm1846_vm3 = vcmp.gt.s32.totalorder %v1541_v38, 7  ;;  %vm2139_vm4 = vcmp.gt.s32.totalorder %v1541_v38, 6  ;;  %vm2988_vm5 = vcmp.gt.s32.totalorder %v1541_v38, 3  ;;  %vm3574_vm6 = vcmp.gt.s32.totalorder %v1541_v38, 1 }
 0x364   :  { %1709 = vmatmul.mubr.f32.vlgmr.msra.gmra.mxu0 %v13048_v36  ;;  %1721 = vmatprep.subr.mxu1 %v7143_v55  ;;  %v7180_v55 = vld [vmem:[%s12449_s12 + $0x200] sm:$0xff]  ;;  %v1847_v18 = vsel %vm1846_vm3, 1, %v13059_v32  ;;  %v2140_v41 = vsel %vm2139_vm4, 1, %v13059_v32  ;;  %v3575_v38 = vsel %vm3574_vm6, 1, %v13059_v32  ;;  %vm4233_vm4 = vcmask 1044480  }
 0x365   :  { %1722 = vmatpush1.msra.mxu1 %v7150_v34  ;;  %1779 = vmatprep.mubr.f32.mxu1 %v13048_v36  ;;  %v7188_v34 = vld [vmem:[%s12449_s12 + $0x1d8] sm:$0xff]  ;;  %vm4319_vm6 = vcmask 228352  }
 0x366   :  { %1723 = vmatprep.subr.mxu1 %v7157_v30  ;;  %1860 = vmatprep.subr.mxu0 %v6336_v17  ;;  %13060 = vst [vmem:[#allocation104_spill] sm:$0xff] %v7188_v34  ;;  %v7194_v30 = vld [vmem:[%s12449_s12 + $0x1d0] sm:$0xff]  ;;  %v7202_v17 = vld [vmem:[%s12449_s12 + $0x1a8] sm:$0xff] }
 0x367   :  { %1724 = vmatpush1.msra.mxu1 %v7164_v40  ;;  %1849 = vperm.xlu0 %4881, %v1847_v18   ;;  %v7209_v18 = vld [vmem:[%s12449_s12 + $0x1a0] sm:$0xff] }
 0x368   :  { %1725 = vmatprep.subr.mxu1 %v7173_v54  ;;  %1861 = vmatpush1.msra.mxu0 %v6343_v19  ;;  %v7216_v19 = vld [vmem:[%s12449_s12 + $0x178] sm:$0xff] }
 0x369   :  { %1726 = vmatpush1.msra.mxu1 %v7180_v55  ;;  %1862 = vmatprep.subr.mxu0 %v6348_v21  ;;  %v7222_v21 = vld [vmem:[%s12449_s12 + $0x170] sm:$0xff] }
 0x36a   :  { %1727 = vmatprep.subr.mxu1 %v7188_v34  ;;  %1863 = vmatpush1.msra.mxu0 %v6355_v22  ;;  %v2989_v34 = vsel %vm2988_vm5, 1, %v13059_v32  ;;  %v7230_v22 = vld [vmem:[%s12449_s12 + $0x148] sm:$0xff]  ;;  %vm4229_vm5 = vcmask 695296  }
 0x36b   :  { %1728 = vmatpush1.msra.mxu1 %v7194_v30  ;;  %2142 = vperm.xlu0 %4881, %v2140_v41   ;;  %v7237_v41 = vld [vmem:[%s12449_s12 + $0x140] sm:$0xff] }
 0x36c   :  { %1729 = vmatprep.subr.mxu1 %v7202_v17  ;;  %1864 = vmatprep.subr.mxu0 %v6361_v23  ;;  %v7244_v23 = vld [vmem:[%s12449_s12 + $0x118] sm:$0xff]  ;;  %v13087_v32 = vld [vmem:[#allocation69_spill] sm:$0xff] }
 0x36d   :  { %1730 = vmatpush1.msra.mxu1 %v7209_v18  ;;  %1865 = vmatpush1.msra.mxu0 %v6373_v25  ;;  %v7250_v25 = vld [vmem:[%s12449_s12 + $0x110] sm:$0xff] }
 0x36e   :  { %1731 = vmatprep.subr.mxu1 %v7216_v19  ;;  %1866 = vmatprep.subr.mxu0 %v6379_v26  ;;  %v7258_v26 = vld [vmem:[%s12449_s12 + $0xe8] sm:$0xff] }
 0x36f   :  { %1732 = vmatpush1.msra.mxu1 %v7222_v21  ;;  %2991 = vperm.xlu0 %4881, %v2989_v34   ;;  %v7265_v34 = vld [vmem:[%s12449_s12 + $0xe0] sm:$0xff] }
 0x370   :  { %1733 = vmatprep.subr.mxu1 %v7230_v22  ;;  %1867 = vmatpush1.msra.mxu0 %v6386_v27  ;;  %v7272_v27 = vld [vmem:[%s12449_s12 + $0xb8] sm:$0xff] }
 0x371   :  { %1734 = vmatpush1.msra.mxu1 %v7237_v41  ;;  %1868 = vmatprep.subr.mxu0 %v6397_v29  ;;  %v7278_v29 = vld [vmem:[%s12449_s12 + $0xb0] sm:$0xff] }
 0x372   :  { %1735 = vmatprep.subr.mxu1 %v7244_v23  ;;  %1869 = vmatpush1.msra.mxu0 %v6409_v31  ;;  %v7285_v31 = vld [vmem:[%s12449_s12 + $0x88] sm:$0xff] }
 0x373   :  { %1736 = vmatpush1.msra.mxu1 %v7250_v25  ;;  %3577 = vperm.xlu0 %4881, %v3575_v38   ;;  %v7292_v38 = vld [vmem:[%s12449_s12 + $0x80] sm:$0xff] }
 0x374   :  { %1737 = vmatprep.subr.mxu1 %v7258_v26  ;;  %1870 = vmatprep.subr.mxu0 %v6421_v33  ;;  %v7299_v33 = vld [vmem:[%s12449_s12 + $0x58] sm:$0xff] }
 0x375   :  { %1738 = vmatpush1.msra.mxu1 %v7265_v34  ;;  %1871 = vmatpush1.msra.mxu0 %v6433_v35  ;;  %v7306_v35 = vld [vmem:[%s12449_s12 + $0x50] sm:$0xff] }
 0x376   :  { %1739 = vmatprep.subr.mxu1 %v7272_v27  ;;  %1872 = vmatprep.subr.mxu0 %v6445_v37  ;;  %v7313_v37 = vld [vmem:[%s12449_s12 + $0x28] sm:$0xff] }
 0x377   :  { %1740 = vmatpush1.msra.mxu1 %v7278_v29  ;;  %1873 = vmatpush1.msra.mxu0 %v6457_v39  ;;  %v7320_v39 = vld [vmem:[%s12449_s12 + $0x20] sm:$0xff] }
 0x378   :  { %1741 = vmatprep.subr.mxu1 %v7285_v31  ;;  %1874 = vmatprep.subr.mxu0 %v6469_v42  ;;  %v7327_v42 = vld [vmem:[%s12449_s12 + $0x5f8] sm:$0xff] }
 0x379   :  { %1742 = vmatpush1.msra.mxu1 %v7292_v38  ;;  %1875 = vmatpush1.msra.mxu0 %v6481_v44  ;;  %v7334_v44 = vld [vmem:[%s12449_s12 + $0x5f0] sm:$0xff] }
 0x37a   :  { %1743 = vmatprep.subr.mxu1 %v7299_v33  ;;  %1876 = vmatprep.subr.mxu0 %v6493_v46  ;;  %v7341_v46 = vld [vmem:[%s12449_s12 + $0x5c8] sm:$0xff] }
 0x37b   :  { %1744 = vmatpush1.msra.mxu1 %v7306_v35  ;;  %1877 = vmatpush1.msra.mxu0 %v6505_v48  ;;  %v7348_v48 = vld [vmem:[%s12449_s12 + $0x5c0] sm:$0xff] }
 0x37c   :  { %1745 = vmatprep.subr.mxu1 %v7313_v37  ;;  %1878 = vmatprep.subr.mxu0 %v6517_v50  ;;  %v7355_v50 = vld [vmem:[%s12449_s12 + $0x598] sm:$0xff] }
 0x37d   :  { %1746 = vmatpush1.msra.mxu1 %v7320_v39  ;;  %1879 = vmatpush1.msra.mxu0 %v6529_v53  ;;  %v7362_v53 = vld [vmem:[%s12449_s12 + $0x590] sm:$0xff] }
 0x37e   :  { %1747 = vmatprep.subr.mxu1 %v7327_v42  ;;  %1880 = vmatprep.subr.mxu0 %v6541_v58  ;;  %v7369_v58 = vld [vmem:[%s12449_s12 + $0x568] sm:$0xff] }
 0x37f   :  { %1748 = vmatpush2.msra.mxu1 %v7334_v44  ;;  %1881 = vmatpush1.msra.mxu0 %v6553_v60  ;;  %v7376_v60 = vld [vmem:[%s12449_s12 + $0x560] sm:$0xff] }
 0x380   :  { %1749 = vmatprep.subr.mxu1 %v7341_v46  ;;  %1882 = vmatprep.subr.mxu0 %v6565_v62  ;;  %v7383_v62 = vld [vmem:[%s12449_s12 + $0x538] sm:$0xff] }
 0x381   :  { %1750 = vmatpush2.msra.mxu1 %v7348_v48  ;;  %1883 = vmatpush1.msra.mxu0 %v6577_v0  ;;  %v7390_v0 = vld [vmem:[%s12449_s12 + $0x530] sm:$0xff] }
 0x382   :  { %1751 = vmatprep.subr.mxu1 %v7355_v50  ;;  %1884 = vmatprep.subr.mxu0 %v6589_v2  ;;  %v7397_v2 = vld [vmem:[%s12449_s12 + $0x508] sm:$0xff] }
 0x383   :  { %1752 = vmatpush2.msra.mxu1 %v7362_v53  ;;  %1885 = vmatpush1.msra.mxu0 %v6601_v4  ;;  %13061 = vst [vmem:[#allocation105_spill] sm:$0xff] %v7397_v2  ;;  %v7404_v4 = vld [vmem:[%s12449_s12 + $0x500] sm:$0xff] }
 0x384   :  { %1753 = vmatprep.subr.mxu1 %v7369_v58  ;;  %1886 = vmatprep.subr.mxu0 %v6613_v6  ;;  %13062 = vst [vmem:[#allocation106_spill] sm:$0xff] %v7404_v4  ;;  %v7411_v6 = vld [vmem:[%s12449_s12 + $0x4d8] sm:$0xff] }
 0x385   :  { %1754 = vmatpush2.msra.mxu1 %v7376_v60  ;;  %1887 = vmatpush1.msra.mxu0 %v6625_v8  ;;  %13063 = vst [vmem:[#allocation107_spill] sm:$0xff] %v7411_v6  ;;  %v7418_v8 = vld [vmem:[%s12449_s12 + $0x4d0] sm:$0xff] }
 0x386   :  { %1755 = vmatprep.subr.mxu1 %v7383_v62  ;;  %1888 = vmatprep.subr.mxu0 %v6637_v10  ;;  %13064 = vst [vmem:[#allocation108_spill] sm:$0xff] %v7418_v8  ;;  %v7425_v10 = vld [vmem:[%s12449_s12 + $0x4a8] sm:$0xff] }
 0x387   :  { %1756 = vmatpush2.msra.mxu1 %v7390_v0  ;;  %1889 = vmatpush1.msra.mxu0 %v6649_v12  ;;  %13065 = vst [vmem:[#allocation109_spill] sm:$0xff] %v7425_v10  ;;  %v7432_v12 = vld [vmem:[%s12449_s12 + $0x4a0] sm:$0xff] }
 0x388   :  { %1757 = vmatprep.subr.mxu1 %v7397_v2  ;;  %1890 = vmatprep.subr.mxu0 %v6661_v14  ;;  %13066 = vst [vmem:[#allocation110_spill] sm:$0xff] %v7432_v12  ;;  %v7439_v14 = vld [vmem:[%s12449_s12 + $0x478] sm:$0xff] }
 0x389   :  { %1758 = vmatpush2.msra.mxu1 %v7404_v4  ;;  %1891 = vmatpush1.msra.mxu0 %v6673_v16  ;;  %13067 = vst [vmem:[#allocation111_spill] sm:$0xff] %v7439_v14  ;;  %v7446_v16 = vld [vmem:[%s12449_s12 + $0x470] sm:$0xff] }
 0x38a   :  { %1759 = vmatprep.subr.mxu1 %v7411_v6  ;;  %1892 = vmatprep.subr.mxu0 %v6685_v20  ;;  %13068 = vst [vmem:[#allocation112_spill] sm:$0xff] %v7446_v16  ;;  %v7453_v20 = vld [vmem:[%s12449_s12 + $0x448] sm:$0xff] }
 0x38b   :  { %1760 = vmatpush2.msra.mxu1 %v7418_v8  ;;  %1893 = vmatpush2.msra.mxu0 %v6697_v52  ;;  %13069 = vst [vmem:[#allocation113_spill] sm:$0xff] %v7453_v20  ;;  %v7460_v52 = vld [vmem:[%s12449_s12 + $0x440] sm:$0xff] }
 0x38c   :  { %1761 = vmatprep.subr.mxu1 %v7425_v10  ;;  %1894 = vmatprep.subr.mxu0 %v6709_v57  ;;  %13070 = vst [vmem:[#allocation114_spill] sm:$0xff] %v7460_v52  ;;  %v7467_v57 = vld [vmem:[%s12449_s12 + $0x418] sm:$0xff] }
 0x38d   :  { %1762 = vmatpush2.msra.mxu1 %v7432_v12  ;;  %1895 = vmatpush2.msra.mxu0 %v6721_v15  ;;  %13071 = vst [vmem:[#allocation115_spill] sm:$0xff] %v7467_v57  ;;  %v7474_v15 = vld [vmem:[%s12449_s12 + $0x410] sm:$0xff] }
 0x38e   :  { %1763 = vmatprep.subr.mxu1 %v7439_v14  ;;  %1896 = vmatprep.subr.mxu0 %v6733_v13  ;;  %13072 = vst [vmem:[#allocation116_spill] sm:$0xff] %v7474_v15  ;;  %v7481_v13 = vld [vmem:[%s12449_s12 + $0x3e8] sm:$0xff] }
 0x38f   :  { %1764 = vmatpush2.msra.mxu1 %v7446_v16  ;;  %1897 = vmatpush2.msra.mxu0 %v6745_v11  ;;  %13073 = vst [vmem:[#allocation117_spill] sm:$0xff] %v7481_v13  ;;  %v7488_v11 = vld [vmem:[%s12449_s12 + $0x3e0] sm:$0xff] }
 0x390   :  { %1765 = vmatprep.subr.mxu1 %v7453_v20  ;;  %1898 = vmatprep.subr.mxu0 %v6757_v9  ;;  %13074 = vst [vmem:[#allocation118_spill] sm:$0xff] %v7488_v11  ;;  %v7495_v9 = vld [vmem:[%s12449_s12 + $0x3b8] sm:$0xff] }
 0x391   :  { %1766 = vmatpush2.msra.mxu1 %v7460_v52  ;;  %1899 = vmatpush2.msra.mxu0 %v6769_v7  ;;  %13075 = vst [vmem:[#allocation119_spill] sm:$0xff] %v7495_v9  ;;  %v7502_v7 = vld [vmem:[%s12449_s12 + $0x3b0] sm:$0xff] }
 0x392   :  { %1767 = vmatprep.subr.mxu1 %v7467_v57  ;;  %1900 = vmatprep.subr.mxu0 %v6781_v5  ;;  %13076 = vst [vmem:[#allocation120_spill] sm:$0xff] %v7502_v7  ;;  %v7509_v5 = vld [vmem:[%s12449_s12 + $0x388] sm:$0xff] }
 0x393   :  { %1768 = vmatpush2.msra.mxu1 %v7474_v15  ;;  %1901 = vmatpush2.msra.mxu0 %v6793_v3  ;;  %13077 = vst [vmem:[#allocation121_spill] sm:$0xff] %v7509_v5  ;;  %v7516_v3 = vld [vmem:[%s12449_s12 + $0x380] sm:$0xff] }
 0x394   :  { %1769 = vmatprep.subr.mxu1 %v7481_v13  ;;  %1902 = vmatprep.subr.mxu0 %v6805_v1  ;;  %13078 = vst [vmem:[#allocation122_spill] sm:$0xff] %v7516_v3  ;;  %v7523_v1 = vld [vmem:[%s12449_s12 + $0x358] sm:$0xff] }
 0x395   :  { %1770 = vmatpush2.msra.mxu1 %v7488_v11  ;;  %1903 = vmatpush2.msra.mxu0 %v6817_v63  ;;  %13079 = vst [vmem:[#allocation123_spill] sm:$0xff] %v7523_v1  ;;  %v7530_v63 = vld [vmem:[%s12449_s12 + $0x350] sm:$0xff]  ;;  %v13137_v11 = vld [vmem:[#allocation60_spill] sm:$0xff] }
 0x396   :  { %1771 = vmatprep.subr.mxu1 %v7495_v9  ;;  %1904 = vmatprep.subr.mxu0 %v6829_v61  ;;  %13080 = vst [vmem:[#allocation124_spill] sm:$0xff] %v7530_v63  ;;  %v7537_v61 = vld [vmem:[%s12449_s12 + $0x328] sm:$0xff]  ;;  %v13136_v9 = vld [vmem:[#allocation59_spill] sm:$0xff]  ;;  %v13141_v15 = vld [vmem:[#allocation64_spill] sm:$0xff] }
 0x397   :  { %1772 = vmatpush2.msra.mxu1 %v7502_v7  ;;  %1905 = vmatpush2.msra.mxu0 %v6841_v59  ;;  %13081 = vst [vmem:[#allocation125_spill] sm:$0xff] %v7537_v61  ;;  %v7544_v59 = vld [vmem:[%s12449_s12 + $0x320] sm:$0xff] }
 0x398   :  { %1773 = vmatprep.subr.mxu1 %v7509_v5  ;;  %1906 = vmatprep.subr.mxu0 %v6853_v56  ;;  %13082 = vst [vmem:[#allocation126_spill] sm:$0xff] %v7544_v59  ;;  %v13085_v56 = vld [vmem:[#allocation67_spill] sm:$0xff]  ;;  %v13135_v5 = vld [vmem:[#allocation58_spill] sm:$0xff] }
 0x399   :  { %1774 = vmatpush2.msra.mxu1 %v7516_v3  ;;  %1907 = vmatpush2.msra.mxu0 %v6865_v51  ;;  %v13083_v51 = vld [vmem:[#allocation65_spill] sm:$0xff] }
 0x39a   :  { %1775 = vmatprep.subr.mxu1 %v7523_v1  ;;  %1908 = vmatprep.subr.mxu0 %v6877_v49  ;;  %v13084_v49 = vld [vmem:[#allocation21_spill] sm:$0xff]  ;;  %v13133_v1 = vld [vmem:[#allocation56_spill] sm:$0xff] }
 0x39b   :  { %1776 = vmatpush2.msra.mxu1 %v7530_v63  ;;  %1909 = vmatpush2.msra.mxu0 %v6889_v47  ;;  %v13086_v47 = vld [vmem:[#allocation22_spill] sm:$0xff]  ;;  %v13134_v3 = vld [vmem:[#allocation57_spill] sm:$0xff] }
 0x39c   :  { %1777 = vmatprep.subr.mxu1 %v7537_v61  ;;  %1910 = vmatprep.subr.mxu0 %v6901_v45  ;;  %v13088_v45 = vld [vmem:[#allocation23_spill] sm:$0xff] }
 0x39d   :  { %1778 = vmatpush2.msra.mxu1 %v7544_v59  ;;  %1911 = vmatpush2.msra.mxu0 %v6913_v43  ;;  %v13089_v59 = vld [vmem:[#allocation71_spill] sm:$0xff]  ;;  %v13090_v43 = vld [vmem:[#allocation24_spill] sm:$0xff] }
 0x39e   :  { %1780 = vmatmul.mubr.f32.vlgmr.msra.gmra.mxu1 %v13048_v36  ;;  %1931 = vmatprep.subr.mxu1 %v6366_v24  ;;  %v13091_v36 = vld [vmem:[#allocation73_spill] sm:$0xff] }
 0x39f   :  { %1932 = vmatpush1.msra.mxu1 %v6391_v28  ;;  %1912 = vmatprep.subr.mxu0 %v13083_v51  ;;  %v13092_v24 = vld [vmem:[#allocation25_spill] sm:$0xff]  ;;  %v13093_v28 = vld [vmem:[#allocation75_spill] sm:$0xff]  ;;  %v13094_v51 = vld [vmem:[#allocation26_spill] sm:$0xff] }
 0x3a0   :  { %1933 = vmatprep.subr.mxu1 %v13084_v49  ;;  %1913 = vmatpush2.msra.mxu0 %v13085_v56  ;;  %v13095_v49 = vld [vmem:[#allocation77_spill] sm:$0xff]  ;;  %v13096_v56 = vld [vmem:[#allocation27_spill] sm:$0xff] }
 0x3a1   :  { %1934 = vmatpush1.msra.mxu1 %v13086_v47  ;;  %1914 = vmatprep.subr.mxu0 %v13087_v32  ;;  %v13097_v47 = vld [vmem:[#allocation79_spill] sm:$0xff]  ;;  %v13098_v32 = vld [vmem:[#allocation28_spill] sm:$0xff] }
 0x3a2   :  { %1935 = vmatprep.subr.mxu1 %v13088_v45  ;;  %1915 = vmatpush2.msra.mxu0 %v13089_v59  ;;  %v13099_v45 = vld [vmem:[#allocation81_spill] sm:$0xff] }
 0x3a3   :  { %1936 = vmatpush1.msra.mxu1 %v13090_v43  ;;  %1916 = vmatprep.subr.mxu0 %v13091_v36  ;;  %v13100_v59 = vld [vmem:[#allocation29_spill] sm:$0xff]  ;;  %v13101_v43 = vld [vmem:[#allocation83_spill] sm:$0xff]  ;;  %v13102_v36 = vld [vmem:[#allocation30_spill] sm:$0xff] }
 0x3a4   :  { %1937 = vmatprep.subr.mxu1 %v13092_v24  ;;  %1917 = vmatpush2.msra.mxu0 %v13093_v28  ;;  %v13103_v24 = vld [vmem:[#allocation85_spill] sm:$0xff]  ;;  %v13104_v28 = vld [vmem:[#allocation31_spill] sm:$0xff] }
 0x3a5   :  { %1938 = vmatpush1.msra.mxu1 %v13094_v51  ;;  %1918 = vmatprep.subr.mxu0 %v13095_v49  ;;  %v13105_v51 = vld [vmem:[#allocation87_spill] sm:$0xff]  ;;  %v13106_v49 = vld [vmem:[#allocation32_spill] sm:$0xff] }
 0x3a6   :  { %1939 = vmatprep.subr.mxu1 %v13096_v56  ;;  %1919 = vmatpush2.msra.mxu0 %v13097_v47  ;;  %v13107_v56 = vld [vmem:[#allocation90_spill] sm:$0xff]  ;;  %v13108_v47 = vld [vmem:[#allocation33_spill] sm:$0xff] }
 0x3a7   :  { %1940 = vmatpush1.msra.mxu1 %v13098_v32  ;;  %1920 = vmatprep.subr.mxu0 %v13099_v45  ;;  %v13109_v32 = vld [vmem:[#allocation34_spill] sm:$0xff]  ;;  %v13110_v45 = vld [vmem:[#allocation35_spill] sm:$0xff] }
 0x3a8   :  { %1941 = vmatprep.subr.mxu1 %v13100_v59  ;;  %1921 = vmatpush2.msra.mxu0 %v13101_v43  ;;  %v13111_v59 = vld [vmem:[#allocation36_spill] sm:$0xff]  ;;  %v13112_v43 = vld [vmem:[#allocation37_spill] sm:$0xff] }
 0x3a9   :  { %1942 = vmatpush1.msra.mxu1 %v13102_v36  ;;  %1922 = vmatprep.subr.mxu0 %v13103_v24  ;;  %v13113_v36 = vld [vmem:[#allocation38_spill] sm:$0xff]  ;;  %v13114_v24 = vld [vmem:[#allocation39_spill] sm:$0xff] }
 0x3aa   :  { %1943 = vmatprep.subr.mxu1 %v13104_v28  ;;  %1923 = vmatpush2.msra.mxu0 %v13105_v51  ;;  %v13115_v28 = vld [vmem:[#allocation40_spill] sm:$0xff]  ;;  %v13116_v51 = vld [vmem:[#allocation41_spill] sm:$0xff] }
 0x3ab   :  { %1944 = vmatpush1.msra.mxu1 %v13106_v49  ;;  %2002 = vmatprep.subr.mxu0 %v13107_v56  ;;  %v13117_v49 = vld [vmem:[#allocation42_spill] sm:$0xff]  ;;  %v13118_v56 = vld [vmem:[#allocation43_spill] sm:$0xff] }
 0x3ac   :  { %1945 = vmatprep.subr.mxu1 %v13108_v47  ;;  %v13119_v47 = vld [vmem:[#allocation44_spill] sm:$0xff] }
 0x3ad   :  { %1946 = vmatpush1.msra.mxu1 %v13109_v32  ;;  %v13120_v32 = vld [vmem:[#allocation45_spill] sm:$0xff] }
 0x3ae   :  { %1947 = vmatprep.subr.mxu1 %v13110_v45  ;;  %v13121_v45 = vld [vmem:[#allocation46_spill] sm:$0xff] }
 0x3af   :  { %1948 = vmatpush1.msra.mxu1 %v13111_v59  ;;  %v13122_v59 = vld [vmem:[#allocation47_spill] sm:$0xff] }
 0x3b0   :  { %1949 = vmatprep.subr.mxu1 %v13112_v43  ;;  %v13123_v43 = vld [vmem:[#allocation48_spill] sm:$0xff] }
 0x3b1   :  { %1950 = vmatpush1.msra.mxu1 %v13113_v36  ;;  %v13124_v36 = vld [vmem:[#allocation49_spill] sm:$0xff] }
 0x3b2   :  { %1951 = vmatprep.subr.mxu1 %v13114_v24  ;;  %v708_v24 = vld [vmem:[#allocation7] sm:$0x3] }
 0x3b3   :  { %1952 = vmatpush1.msra.mxu1 %v13115_v28  ;;  %v13125_v28 = vld [vmem:[#allocation50_spill] sm:$0xff] }
 0x3b4   :  { %1953 = vmatprep.subr.mxu1 %v13116_v51  ;;  %v13126_v51 = vld [vmem:[#allocation51_spill] sm:$0xff] }
 0x3b5   :  { %1954 = vmatpush1.msra.mxu1 %v13117_v49  ;;  %v13127_v49 = vld [vmem:[#allocation52_spill] sm:$0xff] }
 0x3b6   :  { %1955 = vmatprep.subr.mxu1 %v13118_v56  ;;  %v13128_v56 = vld [vmem:[#allocation19_spill] sm:$0xff] }
 0x3b7   :  { %1956 = vmatpush1.msra.mxu1 %v13119_v47  ;;  %v806_v61 = vrot.slane %v708_v24, %v13128_v56  ;;  %v13129_v47 = vld [vmem:[#allocation53_spill] sm:$0xff] }
 0x3b8   :  { %1957 = vmatprep.subr.mxu1 %v13120_v32  ;;  %v13130_v32 = vld [vmem:[#allocation54_spill] sm:$0xff] }
 0x3b9   :  { %1958 = vmatpush1.msra.mxu1 %v13121_v45  ;;  %v13131_v45 = vld [vmem:[#allocation20_spill] sm:$0xff] }
 0x3ba   :  { %1959 = vmatprep.subr.mxu1 %v13122_v59  ;;  %v810_v63 = vrot.slane %v708_v24, %v13131_v45  ;;  %v13132_v59 = vld [vmem:[#allocation55_spill] sm:$0xff] }
 0x3bb   :  { %1960 = vmatpush1.msra.mxu1 %v13123_v43 }
 0x3bc   :  { %1961 = vmatprep.subr.mxu1 %v13124_v36 }
 0x3bd   :  { %1962 = vmatpush1.msra.mxu1 %v13125_v28 }
 0x3be   :  { %1963 = vmatprep.subr.mxu1 %v13126_v51 }
 0x3bf   :  { %1964 = vmatpush2.msra.mxu1 %v13127_v49 }
 0x3c0   :  { %1965 = vmatprep.subr.mxu1 %v13129_v47 }
 0x3c1   :  { %1966 = vmatpush2.msra.mxu1 %v13130_v32 }
 0x3c2   :  { %1967 = vmatprep.subr.mxu1 %v13132_v59  ;;  %v13138_v59 = vld [vmem:[#allocation61_spill] sm:$0xff] }
 0x3c3   :  { %v795_v43 = vpop.f32.mrf.mxu0  ;;  %1968 = vmatpush2.msra.mxu1 %v13133_v1 }
 0x3c4   :  { %v813_v36 = vadd.f32 %v806_v61, %v795_v43  ;;  %1969 = vmatprep.subr.mxu1 %v13134_v3  ;;  %v13139_v61 = vld [vmem:[#allocation62_spill] sm:$0xff]  ;;  %v13140_v3 = vld [vmem:[#allocation63_spill] sm:$0xff] }
 0x3c5   :  { %v797_v28 = vpop.f32.mrf.mxu0  ;;  %v903_v51 = vpop.f32.mrf.mxu1  ;;  %1970 = vmatpush2.msra.mxu1 %v13135_v5  ;;  %v13142_v5 = vld [vmem:[#allocation66_spill] sm:$0xff] }
 0x3c6   :  { %v814_v49 = vadd.f32 %v810_v63, %v797_v28  ;;  %v910_v7 = vadd.f32 %v903_v51, %v813_v36  ;;  %1971 = vmatprep.subr.mxu1 %v13136_v9  ;;  %v13143_v63 = vld [vmem:[#allocation68_spill] sm:$0xff]  ;;  %v13144_v9 = vld [vmem:[#allocation70_spill] sm:$0xff] }
 0x3c7   :  { %v799_v47 = vpop.f32.mrf.mxu0  ;;  %v905_v32 = vpop.f32.mrf.mxu1  ;;  %1972 = vmatpush2.msra.mxu1 %v13137_v11  ;;  %v13145_v36 = vld [vmem:[#allocation72_spill] sm:$0xff]  ;;  %v13146_v11 = vld [vmem:[#allocation74_spill] sm:$0xff] }
 0x3c8   :  { %v911_v24 = vadd.f32 %v905_v32, %v814_v49  ;;  %1973 = vmatprep.subr.mxu1 %v13138_v59  ;;  %v13147_v28 = vld [vmem:[#allocation76_spill] sm:$0xff]  ;;  %v13150_v32 = vld [vmem:[#allocation82_spill] sm:$0xff] }
 0x3c9   :  { %v800_v13 = vpop.f32.mrf.mxu0  ;;  %v907_v1 = vpop.f32.mrf.mxu1  ;;  %1974 = vmatpush2.msra.mxu1 %v13139_v61  ;;  %v13149_v49 = vld [vmem:[#allocation80_spill] sm:$0xff] }
 0x3ca   :  { %1975 = vmatprep.subr.mxu1 %v13140_v3  ;;  %v13148_v13 = vld [vmem:[#allocation78_spill] sm:$0xff]  ;;  %v13151_v1 = vld [vmem:[#allocation84_spill] sm:$0xff] }
 0x3cb   :  { %v908_v43 = vpop.f32.mrf.mxu1  ;;  %1976 = vmatpush2.msra.mxu1 %v13141_v15 }
 0x3cc   :  { %1977 = vmatprep.subr.mxu1 %v13142_v5  ;;  %v13153_v43 = vld [vmem:[#allocation18_spill] sm:$0xff] }
 0x3cd   :  { %1978 = vmatpush2.msra.mxu1 %v13143_v63  ;;  %v1130_v5 = vsub.s32 2, %v13153_v43  ;;  %v13154_v63 = vld [vmem:[#allocation86_spill] sm:$0xff] }
 0x3ce   :  { %1979 = vmatprep.subr.mxu1 %v13144_v9 }
 0x3cf   :  { %1980 = vmatpush2.msra.mxu1 %v13145_v36 }
 0x3d0   :  { %1981 = vmatprep.subr.mxu1 %v13146_v11  ;;  %v1118_v11 = vld [vmem:[%s12450_s13] sm:$0x3f] }
 0x3d1   :  { %1982 = vmatpush2.msra.mxu1 %v13147_v28 }
 0x3d2   :  { %1983 = vmatprep.subr.mxu1 %v13148_v13  ;;  %v1134_v13 = vsub.s32 3, %v13153_v43 }
 0x3d3   :  { %v999_v51 = vpop.f32.mrf.mxu0  ;;  %1984 = vmatpush2.msra.mxu1 %v13149_v49 }
 0x3d4   :  { %v1006_v47 = vadd.f32 %v999_v51, %v910_v7  ;;  %1985 = vmatprep.subr.mxu1 %v13150_v32  ;;  %v13155_v7 = vld [vmem:[#allocation88_spill] sm:$0xff]  ;;  %v13157_v51 = vld [vmem:[#allocation89_spill] sm:$0xff]  ;;  %v13158_v32 = vld [vmem:[#allocation91_spill] sm:$0xff] }
 0x3d5   :  { %v1001_v15 = vpop.f32.mrf.mxu0  ;;  %v1095_v59 = vpop.f32.mrf.mxu1  ;;  %1986 = vmatpush2.msra.mxu1 %v13151_v1  ;;  %v13159_v1 = vld [vmem:[#allocation93_spill] sm:$0xff] }
 0x3d6   :  { %v1007_v61 = vadd.f32 %v1001_v15, %v911_v24  ;;  %v7625_v3 = vadd.f32 %v1095_v59, %v1006_v47  ;;  %1987 = vmatprep.subr.mxu1 %v13154_v63  ;;  %v1123_v24 = vrot.slane %v1118_v11, %v13128_v56  ;;  %v1131_v15 = vrot.slane %v1118_v11, %v1130_v5 }
 0x3d7   :  { %v1003_v9 = vpop.f32.mrf.mxu0  ;;  %v1097_v36 = vpop.f32.mrf.mxu1  ;;  %1988 = vmatpush2.msra.mxu1 %v13155_v7  ;;  %v1127_v59 = vrot.slane %v1118_v11, %v13131_v45  ;;  %v13160_v7 = vld [vmem:[#allocation95_spill] sm:$0xff] }
 0x3d8   :  { %13152 = vst [vmem:[#allocation65_spill] sm:$0xff] %v7625_v3  ;;  %v7633_v28 = vadd.f32 %v1097_v36, %v1007_v61  ;;  %1989 = vmatprep.subr.mxu1 %v13157_v51  ;;  %v1135_v61 = vrot.slane %v1118_v11, %v1134_v13  ;;  %v12580_v3 = vsub.s32 4, %v13153_v43 }
 0x3d9   :  { %v1004_v49 = vpop.f32.mrf.mxu0  ;;  %v1099_v47 = vpop.f32.mrf.mxu1  ;;  %1990 = vmatpush2.msra.mxu1 %v13158_v32 }
 0x3da   :  { %13156 = vst [vmem:[#allocation21_spill] sm:$0xff] %v7633_v28  ;;  %1991 = vmatprep.subr.mxu1 %v13159_v1  ;;  %v13162_v28 = vld [vmem:[#allocation97_spill] sm:$0xff]  ;;  %v13163_v47 = vld [vmem:[#allocation99_spill] sm:$0xff]  ;;  %v1142_v1 = vsub.s32 5, %v13153_v43 }
 0x3db   :  { %v1100_v63 = vpop.f32.mrf.mxu1  ;;  %v1253_v9 = vpop.f32.mrf.mxu0  ;;  %1992 = vmatpush2.msra.mxu1 %v13160_v7 }
 0x3dc   :  { %v7642_v36 = vadd.f32 %v1253_v9, %v1123_v24  ;;  %1993 = vmatprep.subr.mxu1 %v13162_v28  ;;  %v7655_v63 = vld [vmem:[%s12449_s12 + $0x2d8] sm:$0xff] }
 0x3dd   :  { %v1296_v51 = vpop.f32.mrf.mxu1  ;;  %v1255_v49 = vpop.f32.mrf.mxu0  ;;  %1994 = vmatpush2.msra.mxu1 %v13163_v47  ;;  %13166 = vst [vmem:[#allocation23_spill] sm:$0xff] %v7655_v63  ;;  %v1139_v47 = vrot.slane %v1118_v11, %v12580_v3 }
 0x3de   :  { %13161 = vst [vmem:[#allocation67_spill] sm:$0xff] %v7642_v36  ;;  %v7647_v32 = vadd.f32 %v1296_v51, %v1131_v15  ;;  %v7649_v57 = vadd.f32 %v1255_v49, %v1127_v59  ;;  %2153 = vmatprep.subr.mxu1 %v7655_v63  ;;  %v1540_v63 = vld [vmem:[%s12451_s14] sm:$0x3f] }
 0x3df   :  { %v1298_v9 = vpop.f32.mrf.mxu1  ;;  %v1257_v7 = vpop.f32.mrf.mxu0  ;;  %v7673_v16 = vrot.slane %v1540_v63, %v13128_v56  ;;  %v7685_v4 = vrot.slane %v1540_v63, %v1130_v5  ;;  %v7688_v2 = vrot.slane %v1540_v63, %v1134_v13 }
 0x3e0   :  { %13164 = vst [vmem:[#allocation22_spill] sm:$0xff] %v7647_v32  ;;  %13165 = vst [vmem:[#allocation69_spill] sm:$0xff] %v7649_v57  ;;  %v7658_v28 = vadd.f32 %v1298_v9, %v1135_v61  ;;  %v7662_v32 = vrot.slane %v1118_v11, %v1142_v1  ;;  %v7676_v11 = vrot.slane %v1540_v63, %v13131_v45 }
 0x3e1   :  { %v1259_v51 = vpop.f32.mrf.mxu0  ;;  %v1300_v20 = vpop.f32.mrf.mxu1  ;;  %13170 = vst [vmem:[#allocation25_spill] sm:$0xff] %v7673_v16  ;;  %v7680_v14 = vadd.f32 %v1257_v7, %v1123_v24  ;;  %13174 = vst [vmem:[#allocation27_spill] sm:$0xff] %v7685_v4 }
 0x3e2   :  { %13167 = vst [vmem:[#allocation71_spill] sm:$0xff] %v7658_v28  ;;  %13171 = vst [vmem:[#allocation75_spill] sm:$0xff] %v7676_v11  ;;  %v7682_v8 = vadd.f32 %v1259_v51, %v1127_v59  ;;  %v7692_v59 = vadd.f32 %v1300_v20, %v1131_v15 }
 0x3e3   :  { %v1339_v49 = vpop.f32.mrf.mxu0  ;;  %v1302_v9 = vpop.f32.mrf.mxu1  ;;  %13172 = vst [vmem:[#allocation26_spill] sm:$0xff] %v7680_v14  ;;  %13175 = vst [vmem:[#allocation79_spill] sm:$0xff] %v7688_v2 }
 0x3e4   :  { %v7664_v57 = vadd.f32 %v1339_v49, %v1139_v47  ;;  %13173 = vst [vmem:[#allocation77_spill] sm:$0xff] %v7682_v8  ;;  %v7694_v7 = vadd.f32 %v1302_v9, %v1135_v61  ;;  %v7702_v61 = vrot.slane %v1540_v63, %v1142_v1 }
 0x3e5   :  { %v1341_v36 = vpop.f32.mrf.mxu0 }
 0x3e6   :  { %13168 = vst [vmem:[#allocation24_spill] sm:$0xff] %v7664_v57  ;;  %v7667_v52 = vadd.f32 %v1341_v36, %v7662_v32  ;;  %13176 = vst [vmem:[#allocation28_spill] sm:$0xff] %v7694_v7 }
 0x3e7   :  { %v1343_v36 = vpop.f32.mrf.mxu0  ;;  %13179 = vst [vmem:[#allocation29_spill] sm:$0xff] %v7702_v61 }
 0x3e8   :  { %13169 = vst [vmem:[#allocation73_spill] sm:$0xff] %v7667_v52 }
 0x3e9   :  { %v1345_v10 = vpop.f32.mrf.mxu0 }
 0x3ea   :  { %v7709_v1 = vadd.f32 %v1345_v10, %v7662_v32 }
 0x3ec   :  { %13181 = vst [vmem:[#allocation30_spill] sm:$0xff] %v7709_v1 }
 0x41d   :  { %v1639_v28 = vpop.f32.mrf.mxu1 }
 0x41e   :  { %v1640_v49 = vadd.f32 %v1639_v28, %v7673_v16 }
 0x41f   :  { %v1641_v3 = vpop.f32.mrf.mxu1 }
 0x420   :  { %v1642_v57 = vadd.f32 %v1641_v3, %v7676_v11  ;;  %v1788_v52 = vrot.slane %v1640_v49, 2 }
 0x422   :  { %v1789_v12 = vrot.slane %v1642_v57, 2  ;;  %v1792_v6 = vadd.f32 %v1788_v52, %v7680_v14 }
 0x424   :  { %v1710_v56 = vpop.f32.mrf.mxu0  ;;  %v1793_v45 = vadd.f32 %v1789_v12, %v7682_v8  ;;  %v4543_v28 = vmul.f32 -1.442695, %v1792_v6 }
 0x425   :  { %v1711_v49 = vadd.f32 %v1710_v56, %v7685_v4 }
 0x426   :  { %v1712_v16 = vpop.f32.mrf.mxu0  ;;  %v4544_v3 = vmul.f32 -1.442695, %v1793_v45  ;;  %5024 = vpow2.f32 %v4543_v28 }
 0x427   :  { %v1713_v57 = vadd.f32 %v1712_v16, %v7688_v2  ;;  %v1808_v24 = vrot.slane %v1711_v49, 2  ;;  %v13177_v16 = vsub.s32 4, %v13153_v43 }
 0x428   :  { %5026 = vpow2.f32 %v4544_v3 }
 0x429   :  { %v1809_v52 = vrot.slane %v1713_v57, 2  ;;  %v1812_v5 = vadd.f32 %v1808_v24, %v7692_v59  ;;  %v7700_v20 = vrot.slane %v1540_v63, %v13177_v16 }
 0x42b   :  { %v1813_v12 = vadd.f32 %v1809_v52, %v7694_v7  ;;  %v4545_v13 = vmul.f32 -1.442695, %v1812_v5  ;;  %13178 = vst [vmem:[#allocation81_spill] sm:$0xff] %v7700_v20 }
 0x42d   :  { %v4546_v6 = vmul.f32 -1.442695, %v1813_v12  ;;  %5028 = vpow2.f32 %v4545_v13 }
 0x42f   :  { %5030 = vpow2.f32 %v4546_v6  ;;  %v7706_v6 = vadd.f32 %v1343_v36, %v1139_v47 }
 0x431   :  { %13180 = vst [vmem:[#allocation83_spill] sm:$0xff] %v7706_v6 }
 0x433   :  { %v5025_v51 = vpop.eup %5024 }
 0x434   :  { %v1800_v56 = vadd.f32 1.0, %v5025_v51 }
 0x435   :  { %v5027_v45 = vpop.eup %5026 }
 0x436   :  { %v1801_v28 = vadd.f32 1.0, %v5027_v45  ;;  %5032 = vrcp.f32 %v1800_v56 }
 0x438   :  { %5034 = vrcp.f32 %v1801_v28 }
 0x43a   :  { %v5029_v15 = vpop.eup %5028 }
 0x43b   :  { %v1820_v49 = vadd.f32 1.0, %v5029_v15 }
 0x43c   :  { %v5031_v9 = vpop.eup %5030 }
 0x43d   :  { %v1821_v52 = vadd.f32 1.0, %v5031_v9  ;;  %5036 = vrcp.f32 %v1820_v49 }
 0x43f   :  { %5038 = vrcp.f32 %v1821_v52  ;;  %v7713_v52 = vpop.permute.xlu0 %1849 }
 0x440   :  { %vm1851_vm7 = vcmp.eq.s32.totalorder %v7713_v52, 1 }
 0x443   :  { %v5033_v13 = vpop.eup %5032 }
 0x445   :  { %v5035_v45 = vpop.eup %5034 }
 0x44a   :  { %v5037_v16 = vpop.eup %5036 }
 0x44b   :  { %v1838_v9 = vsub.f32 1.0, %v5037_v16 }
 0x44c   :  { %v5039_v15 = vpop.eup %5038 }
 0x44d   :  { %v1839_v36 = vsub.f32 1.0, %v5039_v15 }
 0x45e   :  { %v1781_v3 = vpop.f32.mrf.mxu1 }
 0x45f   :  { %v1782_v57 = vadd.f32 %v1781_v3, %v7700_v20 }
 0x460   :  { %v1783_v24 = vpop.f32.mrf.mxu1 }
 0x461   :  { %v1828_v5 = vrot.slane %v1782_v57, 2  ;;  %v1784_v12 = vadd.f32 %v1783_v24, %v7702_v61  ;;  %v1842_v57 = vmul.f32 0.0, %v5037_v16  ;;  %v7754_v16 = vld [vmem:[%s12449_s12 + $0x2a0] sm:$0xff] }
 0x463   :  { %v1832_v43 = vmul.f32 %v5033_v13, %v1828_v5  ;;  %v1829_v51 = vrot.slane %v1784_v12, 2  ;;  %v1843_v5 = vmul.f32 0.0, %v5039_v15  ;;  %v13186_v15 = vld [vmem:[#allocation100_spill] sm:$0xff] }
 0x465   :  { %v1834_v63 = vadd.f32 %v1832_v43, %v7706_v6  ;;  %v1833_v56 = vmul.f32 %v5035_v45, %v1829_v51  ;;  %v13182_v43 = vld [vmem:[#allocation92_spill] sm:$0xff]  ;;  %v13183_v51 = vld [vmem:[#allocation94_spill] sm:$0xff] }
 0x466   :  { %v7740_v45 = vld [vmem:[%s12449_s12 + $0x2d0] sm:$0xff] }
 0x467   :  { %5040 = vtanh.f32 %v1834_v63  ;;  %v1835_v28 = vadd.f32 %v1833_v56, %v7709_v1  ;;  %v13184_v63 = vld [vmem:[#allocation96_spill] sm:$0xff]  ;;  %v7747_v56 = vld [vmem:[%s12449_s12 + $0x2a8] sm:$0xff] }
 0x469   :  { %5042 = vtanh.f32 %v1835_v28  ;;  %v13185_v28 = vld [vmem:[#allocation98_spill] sm:$0xff] }
 0x474   :  { %v5041_v47 = vpop.eup %5040 }
 0x475   :  { %v1840_v3 = vmul.f32 %v5041_v47, %v1838_v9  ;;  %v7761_v9 = vld [vmem:[%s12449_s12 + $0x278] sm:$0xff]  ;;  %v13187_v47 = vld [vmem:[#allocation101_spill] sm:$0xff] }
 0x476   :  { %v5043_v49 = vpop.eup %5042 }
 0x477   :  { %v1841_v24 = vmul.f32 %v5043_v49, %v1839_v36  ;;  %v1844_v10 = vadd.f32 %v1842_v57, %v1840_v3  ;;  %v7768_v36 = vld [vmem:[%s12449_s12 + $0x270] sm:$0xff]  ;;  %v7775_v49 = vld [vmem:[%s12449_s12 + $0x248] sm:$0xff] }
 0x478   :  { %v13188_v3 = vld [vmem:[#allocation102_spill] sm:$0xff]  ;;  %v13189_v57 = vld [vmem:[#allocation103_spill] sm:$0xff] }
 0x479   :  { %v1845_v32 = vadd.f32 %v1843_v5, %v1841_v24  ;;  %v7718_v13 = vrot.slane %v1844_v10, 6  ;;  %v7782_v24 = vld [vmem:[%s12449_s12 + $0x240] sm:$0xff]  ;;  %v7789_v5 = vld [vmem:[%s12449_s12 + $0x218] sm:$0xff]  ;;  %v7796_v10 = vld [vmem:[%s12449_s12 + $0x210] sm:$0xff] }
 0x47b   :  { %v7715_v12 = vrot.slane %v1845_v32, 6  ;;  %v13190_v32 = vld [vmem:[#allocation104_spill] sm:$0xff] }
 0x47d   :  { %4547 = vmatprep.mubr.msk.f32.mxu0 %vm1851_vm7, %v7715_v12  ;;  %4549 = vmatprep.mubr.msk.f32.mxu1 %vm1851_vm7, %v7715_v12 }
 0x47e   :  { %4548 = vmatmul.mubr.msk.f32.vlgmr.msra.gmra.mxu0 %vm1851_vm7, %v7718_v13  ;;  %4550 = vmatmul.mubr.msk.f32.vlgmr.msra.gmra.mxu1 %vm1851_vm7, %v7718_v13 }
 0x47f   :  { %2003 = vmatpush1.msra.mxu0 %v13182_v43  ;;  %4551 = vmatprep.mubr.msk.f32.mxu0 %vm1851_vm7, %v7715_v12  ;;  %v7824_v43 = vld [vmem:[%s12449_s12 + $0x1b0] sm:$0xff] }
 0x480   :  { %2004 = vmatprep.subr.mxu0 %v13183_v51  ;;  %2154 = vmatpush1.msra.mxu1 %v7740_v45  ;;  %v13196_v51 = vld [vmem:[#allocation105_spill] sm:$0xff] }
 0x481   :  { %2005 = vmatpush1.msra.mxu0 %v13184_v63  ;;  %2155 = vmatprep.subr.mxu1 %v7747_v56  ;;  %v13198_v63 = vld [vmem:[#allocation106_spill] sm:$0xff] }
 0x482   :  { %2006 = vmatprep.subr.mxu0 %v13185_v28  ;;  %2156 = vmatpush1.msra.mxu1 %v7754_v16  ;;  %v13200_v28 = vld [vmem:[#allocation107_spill] sm:$0xff] }
 0x483   :  { %2007 = vmatpush1.msra.mxu0 %v13186_v15  ;;  %2157 = vmatprep.subr.mxu1 %v7761_v9  ;;  %v8034_v15 = vld [vmem:[%s12449_s12 + $0x4e0] sm:$0xff] }
 0x484   :  { %2008 = vmatprep.subr.mxu0 %v13187_v47  ;;  %2158 = vmatpush1.msra.mxu1 %v7768_v36  ;;  %13201 = vst [vmem:[#allocation35_spill] sm:$0xff] %v8034_v15  ;;  %v13202_v47 = vld [vmem:[#allocation108_spill] sm:$0xff] }
 0x485   :  { %2009 = vmatpush1.msra.mxu0 %v13188_v3  ;;  %2159 = vmatprep.subr.mxu1 %v7775_v49  ;;  %v8041_v3 = vld [vmem:[%s12449_s12 + $0x4b8] sm:$0xff] }
 0x486   :  { %2010 = vmatprep.subr.mxu0 %v13189_v57  ;;  %2160 = vmatpush1.msra.mxu1 %v7782_v24  ;;  %13203 = vst [vmem:[#allocation36_spill] sm:$0xff] %v8041_v3  ;;  %v13204_v57 = vld [vmem:[#allocation109_spill] sm:$0xff] }
 0x487   :  { %2011 = vmatpush1.msra.mxu0 %v7164_v40  ;;  %2161 = vmatprep.subr.mxu1 %v7789_v5  ;;  %v7803_v40 = vld [vmem:[%s12449_s12 + $0x1e8] sm:$0xff] }
 0x488   :  { %2012 = vmatprep.subr.mxu0 %v7173_v54  ;;  %2162 = vmatpush1.msra.mxu1 %v7796_v10  ;;  %v7810_v54 = vld [vmem:[%s12449_s12 + $0x1e0] sm:$0xff] }
 0x489   :  { %2013 = vmatpush1.msra.mxu0 %v7180_v55  ;;  %2163 = vmatprep.subr.mxu1 %v7803_v40  ;;  %v7817_v55 = vld [vmem:[%s12449_s12 + $0x1b8] sm:$0xff] }
 0x48a   :  { %2014 = vmatprep.subr.mxu0 %v13190_v32  ;;  %2164 = vmatpush1.msra.mxu1 %v7810_v54  ;;  %v8048_v32 = vld [vmem:[%s12449_s12 + $0x4b0] sm:$0xff] }
 0x48b   :  { %2015 = vmatpush1.msra.mxu0 %v7194_v30  ;;  %2165 = vmatprep.subr.mxu1 %v7817_v55  ;;  %v7831_v30 = vld [vmem:[%s12449_s12 + $0x188] sm:$0xff]  ;;  %13205 = vst [vmem:[#allocation37_spill] sm:$0xff] %v8048_v32 }
 0x48c   :  { %2016 = vmatprep.subr.mxu0 %v7202_v17  ;;  %2166 = vmatpush1.msra.mxu1 %v7824_v43  ;;  %v7838_v17 = vld [vmem:[%s12449_s12 + $0x180] sm:$0xff] }
 0x48d   :  { %2017 = vmatpush1.msra.mxu0 %v7209_v18  ;;  %2167 = vmatprep.subr.mxu1 %v7831_v30  ;;  %v7845_v18 = vld [vmem:[%s12449_s12 + $0x158] sm:$0xff] }
 0x48e   :  { %2018 = vmatprep.subr.mxu0 %v7216_v19  ;;  %2168 = vmatpush1.msra.mxu1 %v7838_v17  ;;  %v7852_v19 = vld [vmem:[%s12449_s12 + $0x150] sm:$0xff] }
 0x48f   :  { %2019 = vmatpush1.msra.mxu0 %v7222_v21  ;;  %2169 = vmatprep.subr.mxu1 %v7845_v18  ;;  %v7859_v21 = vld [vmem:[%s12449_s12 + $0x128] sm:$0xff] }
 0x490   :  { %2020 = vmatprep.subr.mxu0 %v7230_v22  ;;  %2170 = vmatpush1.msra.mxu1 %v7852_v19  ;;  %v7866_v22 = vld [vmem:[%s12449_s12 + $0x120] sm:$0xff] }
 0x491   :  { %2021 = vmatpush1.msra.mxu0 %v7237_v41  ;;  %2171 = vmatprep.subr.mxu1 %v7859_v21  ;;  %v7873_v41 = vld [vmem:[%s12449_s12 + $0xf8] sm:$0xff] }
 0x492   :  { %2022 = vmatprep.subr.mxu0 %v7244_v23  ;;  %2172 = vmatpush1.msra.mxu1 %v7866_v22  ;;  %v7880_v23 = vld [vmem:[%s12449_s12 + $0xf0] sm:$0xff] }
 0x493   :  { %2023 = vmatpush1.msra.mxu0 %v7250_v25  ;;  %2173 = vmatprep.subr.mxu1 %v7873_v41  ;;  %v7887_v25 = vld [vmem:[%s12449_s12 + $0xc8] sm:$0xff] }
 0x494   :  { %2024 = vmatprep.subr.mxu0 %v7258_v26  ;;  %2174 = vmatpush1.msra.mxu1 %v7880_v23  ;;  %v7894_v26 = vld [vmem:[%s12449_s12 + $0xc0] sm:$0xff] }
 0x495   :  { %2025 = vmatpush1.msra.mxu0 %v7265_v34  ;;  %2175 = vmatprep.subr.mxu1 %v7887_v25  ;;  %v7901_v34 = vld [vmem:[%s12449_s12 + $0x98] sm:$0xff] }
 0x496   :  { %2026 = vmatprep.subr.mxu0 %v7272_v27  ;;  %2176 = vmatpush1.msra.mxu1 %v7894_v26  ;;  %v7908_v27 = vld [vmem:[%s12449_s12 + $0x90] sm:$0xff] }
 0x497   :  { %2027 = vmatpush1.msra.mxu0 %v7278_v29  ;;  %2177 = vmatprep.subr.mxu1 %v7901_v34  ;;  %v7915_v29 = vld [vmem:[%s12449_s12 + $0x68] sm:$0xff] }
 0x498   :  { %2028 = vmatprep.subr.mxu0 %v7285_v31  ;;  %2178 = vmatpush1.msra.mxu1 %v7908_v27  ;;  %v7922_v31 = vld [vmem:[%s12449_s12 + $0x60] sm:$0xff] }
 0x499   :  { %2029 = vmatpush1.msra.mxu0 %v7292_v38  ;;  %2179 = vmatprep.subr.mxu1 %v7915_v29  ;;  %v7929_v38 = vld [vmem:[%s12449_s12 + $0x38] sm:$0xff] }
 0x49a   :  { %2030 = vmatprep.subr.mxu0 %v7299_v33  ;;  %2180 = vmatpush1.msra.mxu1 %v7922_v31  ;;  %v7936_v33 = vld [vmem:[%s12449_s12 + $0x30] sm:$0xff] }
 0x49b   :  { %2031 = vmatpush1.msra.mxu0 %v7306_v35  ;;  %2181 = vmatprep.subr.mxu1 %v7929_v38  ;;  %v7943_v35 = vld [vmem:[%s12449_s12 + $0x8] sm:$0xff] }
 0x49c   :  { %2032 = vmatprep.subr.mxu0 %v7313_v37  ;;  %2182 = vmatpush1.msra.mxu1 %v7936_v33  ;;  %v7950_v37 = vld [vmem:[%s12449_s12] sm:$0xff] }
 0x49d   :  { %2033 = vmatpush1.msra.mxu0 %v7320_v39  ;;  %2183 = vmatprep.subr.mxu1 %v7943_v35  ;;  %v7957_v39 = vld [vmem:[%s12449_s12 + $0x5d8] sm:$0xff] }
 0x49e   :  { %2034 = vmatprep.subr.mxu0 %v7327_v42  ;;  %2184 = vmatpush1.msra.mxu1 %v7950_v37  ;;  %v7964_v42 = vld [vmem:[%s12449_s12 + $0x5d0] sm:$0xff] }
 0x49f   :  { %2035 = vmatpush2.msra.mxu0 %v7334_v44  ;;  %2185 = vmatprep.subr.mxu1 %v7957_v39  ;;  %v7971_v44 = vld [vmem:[%s12449_s12 + $0x5a8] sm:$0xff] }
 0x4a0   :  { %2036 = vmatprep.subr.mxu0 %v7341_v46  ;;  %2186 = vmatpush2.msra.mxu1 %v7964_v42  ;;  %v7978_v46 = vld [vmem:[%s12449_s12 + $0x5a0] sm:$0xff] }
 0x4a1   :  { %2037 = vmatpush2.msra.mxu0 %v7348_v48  ;;  %2187 = vmatprep.subr.mxu1 %v7971_v44  ;;  %v7985_v48 = vld [vmem:[%s12449_s12 + $0x578] sm:$0xff] }
 0x4a2   :  { %2038 = vmatprep.subr.mxu0 %v7355_v50  ;;  %2188 = vmatpush2.msra.mxu1 %v7978_v46  ;;  %13191 = vst [vmem:[#allocation85_spill] sm:$0xff] %v7985_v48  ;;  %v7992_v50 = vld [vmem:[%s12449_s12 + $0x570] sm:$0xff] }
 0x4a3   :  { %2039 = vmatpush2.msra.mxu0 %v7362_v53  ;;  %2189 = vmatprep.subr.mxu1 %v7985_v48  ;;  %13192 = vst [vmem:[#allocation31_spill] sm:$0xff] %v7992_v50  ;;  %v7999_v53 = vld [vmem:[%s12449_s12 + $0x548] sm:$0xff] }
 0x4a4   :  { %2040 = vmatprep.subr.mxu0 %v7369_v58  ;;  %2190 = vmatpush2.msra.mxu1 %v7992_v50  ;;  %13193 = vst [vmem:[#allocation87_spill] sm:$0xff] %v7999_v53  ;;  %v8006_v58 = vld [vmem:[%s12449_s12 + $0x540] sm:$0xff] }
 0x4a5   :  { %2041 = vmatpush2.msra.mxu0 %v7376_v60  ;;  %2191 = vmatprep.subr.mxu1 %v7999_v53  ;;  %13194 = vst [vmem:[#allocation32_spill] sm:$0xff] %v8006_v58  ;;  %v8013_v60 = vld [vmem:[%s12449_s12 + $0x518] sm:$0xff] }
 0x4a6   :  { %2042 = vmatprep.subr.mxu0 %v7383_v62  ;;  %2192 = vmatpush2.msra.mxu1 %v8006_v58  ;;  %13195 = vst [vmem:[#allocation90_spill] sm:$0xff] %v8013_v60  ;;  %v8020_v62 = vld [vmem:[%s12449_s12 + $0x510] sm:$0xff] }
 0x4a7   :  { %2043 = vmatpush2.msra.mxu0 %v7390_v0  ;;  %2193 = vmatprep.subr.mxu1 %v8013_v60  ;;  %13197 = vst [vmem:[#allocation33_spill] sm:$0xff] %v8020_v62  ;;  %v8027_v0 = vld [vmem:[%s12449_s12 + $0x4e8] sm:$0xff] }
 0x4a8   :  { %2044 = vmatprep.subr.mxu0 %v13196_v51  ;;  %2194 = vmatpush2.msra.mxu1 %v8020_v62  ;;  %13199 = vst [vmem:[#allocation34_spill] sm:$0xff] %v8027_v0  ;;  %v13206_v51 = vld [vmem:[#allocation110_spill] sm:$0xff] }
 0x4a9   :  { %2045 = vmatpush2.msra.mxu0 %v13198_v63  ;;  %2195 = vmatprep.subr.mxu1 %v8027_v0  ;;  %v8055_v63 = vld [vmem:[%s12449_s12 + $0x488] sm:$0xff] }
 0x4aa   :  { %2046 = vmatprep.subr.mxu0 %v13200_v28  ;;  %2196 = vmatpush2.msra.mxu1 %v8034_v15  ;;  %13207 = vst [vmem:[#allocation38_spill] sm:$0xff] %v8055_v63  ;;  %v13208_v28 = vld [vmem:[#allocation111_spill] sm:$0xff] }
 0x4ab   :  { %2047 = vmatpush2.msra.mxu0 %v13202_v47  ;;  %2197 = vmatprep.subr.mxu1 %v8041_v3  ;;  %v8062_v47 = vld [vmem:[%s12449_s12 + $0x480] sm:$0xff] }
 0x4ac   :  { %2048 = vmatprep.subr.mxu0 %v13204_v57  ;;  %2198 = vmatpush2.msra.mxu1 %v8048_v32  ;;  %13209 = vst [vmem:[#allocation39_spill] sm:$0xff] %v8062_v47  ;;  %v13210_v57 = vld [vmem:[#allocation112_spill] sm:$0xff]  ;;  %v13212_v32 = vld [vmem:[#allocation113_spill] sm:$0xff] }
 0x4ad   :  { %2049 = vmatpush2.msra.mxu0 %v13206_v51  ;;  %2199 = vmatprep.subr.mxu1 %v8055_v63  ;;  %v8069_v51 = vld [vmem:[%s12449_s12 + $0x458] sm:$0xff]  ;;  %v13214_v63 = vld [vmem:[#allocation114_spill] sm:$0xff]  ;;  %v13307_v3 = vld [vmem:[#allocation25_spill] sm:$0xff] }
 0x4ae   :  { %2050 = vmatprep.subr.mxu0 %v13208_v28  ;;  %2200 = vmatpush2.msra.mxu1 %v8062_v47  ;;  %13211 = vst [vmem:[#allocation40_spill] sm:$0xff] %v8069_v51  ;;  %v8076_v28 = vld [vmem:[%s12449_s12 + $0x450] sm:$0xff] }
 0x4af   :  { %2051 = vmatpush2.msra.mxu0 %v13210_v57  ;;  %2201 = vmatprep.subr.mxu1 %v8069_v51  ;;  %13213 = vst [vmem:[#allocation41_spill] sm:$0xff] %v8076_v28  ;;  %v8083_v57 = vld [vmem:[%s12449_s12 + $0x428] sm:$0xff]  ;;  %v13216_v47 = vld [vmem:[#allocation115_spill] sm:$0xff]  ;;  %v13218_v51 = vld [vmem:[#allocation116_spill] sm:$0xff] }
 0x4b0   :  { %2052 = vmatprep.subr.mxu0 %v13212_v32  ;;  %2202 = vmatpush2.msra.mxu1 %v8076_v28  ;;  %13215 = vst [vmem:[#allocation42_spill] sm:$0xff] %v8083_v57  ;;  %v8090_v32 = vld [vmem:[%s12449_s12 + $0x420] sm:$0xff] }
 0x4b1   :  { %2053 = vmatpush2.msra.mxu0 %v13214_v63  ;;  %2203 = vmatprep.subr.mxu1 %v8083_v57  ;;  %13217 = vst [vmem:[#allocation43_spill] sm:$0xff] %v8090_v32  ;;  %v8097_v63 = vld [vmem:[%s12449_s12 + $0x3f8] sm:$0xff]  ;;  %v13220_v28 = vld [vmem:[#allocation117_spill] sm:$0xff]  ;;  %v13222_v57 = vld [vmem:[#allocation118_spill] sm:$0xff] }
 0x4b2   :  { %2054 = vmatprep.subr.mxu0 %v13216_v47  ;;  %2204 = vmatpush2.msra.mxu1 %v8090_v32  ;;  %13219 = vst [vmem:[#allocation44_spill] sm:$0xff] %v8097_v63  ;;  %v8104_v47 = vld [vmem:[%s12449_s12 + $0x3f0] sm:$0xff] }
 0x4b3   :  { %2055 = vmatpush2.msra.mxu0 %v13218_v51  ;;  %2205 = vmatprep.subr.mxu1 %v8097_v63  ;;  %13221 = vst [vmem:[#allocation45_spill] sm:$0xff] %v8104_v47  ;;  %v8111_v51 = vld [vmem:[%s12449_s12 + $0x3c8] sm:$0xff]  ;;  %v13224_v32 = vld [vmem:[#allocation119_spill] sm:$0xff]  ;;  %v13226_v63 = vld [vmem:[#allocation120_spill] sm:$0xff] }
 0x4b4   :  { %2056 = vmatprep.subr.mxu0 %v13220_v28  ;;  %2206 = vmatpush2.msra.mxu1 %v8104_v47  ;;  %13223 = vst [vmem:[#allocation46_spill] sm:$0xff] %v8111_v51  ;;  %v8118_v28 = vld [vmem:[%s12449_s12 + $0x3c0] sm:$0xff] }
 0x4b5   :  { %2057 = vmatpush2.msra.mxu0 %v13222_v57  ;;  %2207 = vmatprep.subr.mxu1 %v8111_v51  ;;  %13225 = vst [vmem:[#allocation47_spill] sm:$0xff] %v8118_v28  ;;  %v8125_v57 = vld [vmem:[%s12449_s12 + $0x398] sm:$0xff]  ;;  %v13228_v47 = vld [vmem:[#allocation121_spill] sm:$0xff]  ;;  %v13230_v51 = vld [vmem:[#allocation122_spill] sm:$0xff] }
 0x4b6   :  { %2058 = vmatprep.subr.mxu0 %v13224_v32  ;;  %2208 = vmatpush2.msra.mxu1 %v8118_v28  ;;  %13227 = vst [vmem:[#allocation48_spill] sm:$0xff] %v8125_v57  ;;  %v8132_v32 = vld [vmem:[%s12449_s12 + $0x390] sm:$0xff] }
 0x4b7   :  { %2059 = vmatpush2.msra.mxu0 %v13226_v63  ;;  %2209 = vmatprep.subr.mxu1 %v8125_v57  ;;  %13229 = vst [vmem:[#allocation49_spill] sm:$0xff] %v8132_v32  ;;  %v8139_v63 = vld [vmem:[%s12449_s12 + $0x368] sm:$0xff]  ;;  %v13232_v28 = vld [vmem:[#allocation123_spill] sm:$0xff]  ;;  %v13234_v57 = vld [vmem:[#allocation124_spill] sm:$0xff] }
 0x4b8   :  { %2060 = vmatprep.subr.mxu0 %v13228_v47  ;;  %2210 = vmatpush2.msra.mxu1 %v8132_v32  ;;  %13231 = vst [vmem:[#allocation50_spill] sm:$0xff] %v8139_v63  ;;  %v8146_v47 = vld [vmem:[%s12449_s12 + $0x360] sm:$0xff] }
 0x4b9   :  { %2061 = vmatpush2.msra.mxu0 %v13230_v51  ;;  %2211 = vmatprep.subr.mxu1 %v8139_v63  ;;  %13233 = vst [vmem:[#allocation51_spill] sm:$0xff] %v8146_v47  ;;  %v8153_v51 = vld [vmem:[%s12449_s12 + $0x338] sm:$0xff]  ;;  %v13236_v32 = vld [vmem:[#allocation125_spill] sm:$0xff]  ;;  %v13238_v63 = vld [vmem:[#allocation126_spill] sm:$0xff] }
 0x4ba   :  { %2062 = vmatprep.subr.mxu0 %v13232_v28  ;;  %2212 = vmatpush2.msra.mxu1 %v8146_v47  ;;  %13235 = vst [vmem:[#allocation52_spill] sm:$0xff] %v8153_v51  ;;  %v8160_v28 = vld [vmem:[%s12449_s12 + $0x330] sm:$0xff] }
 0x4bb   :  { %2063 = vmatpush2.msra.mxu0 %v13234_v57  ;;  %2213 = vmatprep.subr.mxu1 %v8153_v51  ;;  %13237 = vst [vmem:[#allocation19_spill] sm:$0xff] %v8160_v28  ;;  %v8167_v57 = vld [vmem:[%s12449_s12 + $0x308] sm:$0xff] }
 0x4bc   :  { %2064 = vmatprep.subr.mxu0 %v13236_v32  ;;  %2214 = vmatpush2.msra.mxu1 %v8160_v28  ;;  %13239 = vst [vmem:[#allocation53_spill] sm:$0xff] %v8167_v57  ;;  %v8176_v32 = vld [vmem:[%s12449_s12 + $0x2e8] sm:$0xff]  ;;  %v8194_v28 = vld [vmem:[%s12449_s12 + $0x2b8] sm:$0xff] }
 0x4bd   :  { %2065 = vmatpush2.msra.mxu0 %v13238_v63  ;;  %2215 = vmatprep.subr.mxu1 %v8167_v57  ;;  %13240 = vst [vmem:[#allocation54_spill] sm:$0xff] %v8176_v32  ;;  %v8182_v63 = vld [vmem:[%s12449_s12 + $0x2e0] sm:$0xff]  ;;  %13243 = vst [vmem:[#allocation56_spill] sm:$0xff] %v8194_v28 }
 0x4be   :  { %4552 = vmatmul.mubr.msk.f32.vlgmr.msra.gmra.mxu0 %vm1851_vm7, %v7718_v13  ;;  %2224 = vmatprep.subr.mxu0 %v8176_v32  ;;  %13241 = vst [vmem:[#allocation20_spill] sm:$0xff] %v8182_v63  ;;  %v8188_v57 = vld [vmem:[%s12449_s12 + $0x300] sm:$0xff]  ;;  %v8200_v32 = vld [vmem:[%s12449_s12 + $0x2f8] sm:$0xff] }
 0x4bf   :  { %2225 = vmatpush1.msra.mxu0 %v8182_v63  ;;  %13242 = vst [vmem:[#allocation55_spill] sm:$0xff] %v8188_v57  ;;  %2216 = vmatpush2.msra.mxu1 %v8188_v57  ;;  %13244 = vst [vmem:[#allocation57_spill] sm:$0xff] %v8200_v32  ;;  %v8206_v63 = vld [vmem:[%s12449_s12 + $0x2b0] sm:$0xff]  ;;  %v8212_v57 = vld [vmem:[%s12449_s12 + $0x288] sm:$0xff] }
 0x4c0   :  { %2226 = vmatprep.subr.mxu0 %v8194_v28  ;;  %2295 = vmatprep.subr.mxu1 %v8200_v32  ;;  %13245 = vst [vmem:[#allocation58_spill] sm:$0xff] %v8206_v63  ;;  %13246 = vst [vmem:[#allocation59_spill] sm:$0xff] %v8212_v57  ;;  %v8218_v28 = vld [vmem:[%s12449_s12 + $0x280] sm:$0xff]  ;;  %v8224_v32 = vld [vmem:[%s12449_s12 + $0x258] sm:$0xff] }
 0x4c1   :  { %2227 = vmatpush1.msra.mxu0 %v8206_v63  ;;  %13247 = vst [vmem:[#allocation60_spill] sm:$0xff] %v8218_v28  ;;  %13248 = vst [vmem:[#allocation61_spill] sm:$0xff] %v8224_v32  ;;  %v8230_v63 = vld [vmem:[%s12449_s12 + $0x250] sm:$0xff] }
 0x4c2   :  { %2228 = vmatprep.subr.mxu0 %v8212_v57  ;;  %13249 = vst [vmem:[#allocation62_spill] sm:$0xff] %v8230_v63  ;;  %v8236_v57 = vld [vmem:[%s12449_s12 + $0x228] sm:$0xff] }
 0x4c3   :  { %2229 = vmatpush1.msra.mxu0 %v8218_v28  ;;  %13250 = vst [vmem:[#allocation63_spill] sm:$0xff] %v8236_v57  ;;  %v8242_v28 = vld [vmem:[%s12449_s12 + $0x220] sm:$0xff] }
 0x4c4   :  { %2230 = vmatprep.subr.mxu0 %v8224_v32  ;;  %13251 = vst [vmem:[#allocation64_spill] sm:$0xff] %v8242_v28  ;;  %v8248_v32 = vld [vmem:[%s12449_s12 + $0x1f8] sm:$0xff] }
 0x4c5   :  { %2231 = vmatpush1.msra.mxu0 %v8230_v63  ;;  %13252 = vst [vmem:[#allocation66_spill] sm:$0xff] %v8248_v32  ;;  %v8254_v63 = vld [vmem:[%s12449_s12 + $0x1f0] sm:$0xff] }
 0x4c6   :  { %2232 = vmatprep.subr.mxu0 %v8236_v57  ;;  %13253 = vst [vmem:[#allocation68_spill] sm:$0xff] %v8254_v63  ;;  %v8260_v57 = vld [vmem:[%s12449_s12 + $0x1c8] sm:$0xff] }
 0x4c7   :  { %2233 = vmatpush1.msra.mxu0 %v8242_v28  ;;  %13254 = vst [vmem:[#allocation70_spill] sm:$0xff] %v8260_v57  ;;  %v8266_v28 = vld [vmem:[%s12449_s12 + $0x1c0] sm:$0xff] }
 0x4c8   :  { %2234 = vmatprep.subr.mxu0 %v8248_v32  ;;  %13255 = vst [vmem:[#allocation72_spill] sm:$0xff] %v8266_v28  ;;  %v8272_v32 = vld [vmem:[%s12449_s12 + $0x198] sm:$0xff] }
 0x4c9   :  { %2235 = vmatpush1.msra.mxu0 %v8254_v63  ;;  %13256 = vst [vmem:[#allocation74_spill] sm:$0xff] %v8272_v32  ;;  %v8278_v63 = vld [vmem:[%s12449_s12 + $0x190] sm:$0xff] }
 0x4ca   :  { %2236 = vmatprep.subr.mxu0 %v8260_v57  ;;  %13257 = vst [vmem:[#allocation76_spill] sm:$0xff] %v8278_v63  ;;  %v8284_v57 = vld [vmem:[%s12449_s12 + $0x168] sm:$0xff] }
 0x4cb   :  { %2237 = vmatpush1.msra.mxu0 %v8266_v28  ;;  %13258 = vst [vmem:[#allocation78_spill] sm:$0xff] %v8284_v57  ;;  %v8290_v28 = vld [vmem:[%s12449_s12 + $0x160] sm:$0xff] }
 0x4cc   :  { %2238 = vmatprep.subr.mxu0 %v8272_v32  ;;  %13259 = vst [vmem:[#allocation80_spill] sm:$0xff] %v8290_v28  ;;  %v8296_v32 = vld [vmem:[%s12449_s12 + $0x138] sm:$0xff] }
 0x4cd   :  { %2239 = vmatpush1.msra.mxu0 %v8278_v63  ;;  %13260 = vst [vmem:[#allocation82_spill] sm:$0xff] %v8296_v32  ;;  %v8302_v63 = vld [vmem:[%s12449_s12 + $0x130] sm:$0xff] }
 0x4ce   :  { %2240 = vmatprep.subr.mxu0 %v8284_v57  ;;  %13261 = vst [vmem:[#allocation84_spill] sm:$0xff] %v8302_v63  ;;  %v8308_v57 = vld [vmem:[%s12449_s12 + $0x108] sm:$0xff] }
 0x4cf   :  { %2241 = vmatpush1.msra.mxu0 %v8290_v28  ;;  %13262 = vst [vmem:[#allocation18_spill] sm:$0xff] %v8308_v57  ;;  %v8314_v28 = vld [vmem:[%s12449_s12 + $0x100] sm:$0xff] }
 0x4d0   :  { %2242 = vmatprep.subr.mxu0 %v8296_v32  ;;  %13263 = vst [vmem:[#allocation86_spill] sm:$0xff] %v8314_v28  ;;  %v8320_v32 = vld [vmem:[%s12449_s12 + $0xd8] sm:$0xff] }
 0x4d1   :  { %2243 = vmatpush1.msra.mxu0 %v8302_v63  ;;  %13264 = vst [vmem:[#allocation88_spill] sm:$0xff] %v8320_v32  ;;  %v8326_v63 = vld [vmem:[%s12449_s12 + $0xd0] sm:$0xff] }
 0x4d2   :  { %2244 = vmatprep.subr.mxu0 %v8308_v57  ;;  %13265 = vst [vmem:[#allocation89_spill] sm:$0xff] %v8326_v63  ;;  %v8332_v57 = vld [vmem:[%s12449_s12 + $0xa8] sm:$0xff] }
 0x4d3   :  { %2245 = vmatpush1.msra.mxu0 %v8314_v28  ;;  %13266 = vst [vmem:[#allocation91_spill] sm:$0xff] %v8332_v57  ;;  %v8338_v28 = vld [vmem:[%s12449_s12 + $0xa0] sm:$0xff] }
 0x4d4   :  { %2246 = vmatprep.subr.mxu0 %v8320_v32  ;;  %13267 = vst [vmem:[#allocation93_spill] sm:$0xff] %v8338_v28  ;;  %v8344_v32 = vld [vmem:[%s12449_s12 + $0x78] sm:$0xff] }
 0x4d5   :  { %2247 = vmatpush1.msra.mxu0 %v8326_v63  ;;  %13268 = vst [vmem:[#allocation95_spill] sm:$0xff] %v8344_v32  ;;  %v8350_v63 = vld [vmem:[%s12449_s12 + $0x70] sm:$0xff] }
 0x4d6   :  { %2248 = vmatprep.subr.mxu0 %v8332_v57  ;;  %13269 = vst [vmem:[#allocation97_spill] sm:$0xff] %v8350_v63  ;;  %v8356_v57 = vld [vmem:[%s12449_s12 + $0x48] sm:$0xff] }
 0x4d7   :  { %2249 = vmatpush1.msra.mxu0 %v8338_v28  ;;  %13270 = vst [vmem:[#allocation99_spill] sm:$0xff] %v8356_v57  ;;  %v8362_v28 = vld [vmem:[%s12449_s12 + $0x40] sm:$0xff] }
 0x4d8   :  { %2250 = vmatprep.subr.mxu0 %v8344_v32  ;;  %13271 = vst [vmem:[#allocation92_spill] sm:$0xff] %v8362_v28  ;;  %v8368_v32 = vld [vmem:[%s12449_s12 + $0x18] sm:$0xff] }
 0x4d9   :  { %2251 = vmatpush1.msra.mxu0 %v8350_v63  ;;  %13272 = vst [vmem:[#allocation94_spill] sm:$0xff] %v8368_v32  ;;  %v8374_v63 = vld [vmem:[%s12449_s12 + $0x10] sm:$0xff] }
 0x4da   :  { %2252 = vmatprep.subr.mxu0 %v8356_v57  ;;  %13273 = vst [vmem:[#allocation96_spill] sm:$0xff] %v8374_v63  ;;  %v8380_v57 = vld [vmem:[%s12449_s12 + $0x5e8] sm:$0xff] }
 0x4db   :  { %2253 = vmatpush1.msra.mxu0 %v8362_v28  ;;  %13274 = vst [vmem:[#allocation98_spill] sm:$0xff] %v8380_v57  ;;  %v8386_v28 = vld [vmem:[%s12449_s12 + $0x5e0] sm:$0xff] }
 0x4dc   :  { %2254 = vmatprep.subr.mxu0 %v8368_v32  ;;  %13275 = vst [vmem:[#allocation100_spill] sm:$0xff] %v8386_v28  ;;  %v8392_v32 = vld [vmem:[%s12449_s12 + $0x5b8] sm:$0xff] }
 0x4dd   :  { %2255 = vmatpush1.msra.mxu0 %v8374_v63  ;;  %13276 = vst [vmem:[#allocation101_spill] sm:$0xff] %v8392_v32  ;;  %v8398_v63 = vld [vmem:[%s12449_s12 + $0x5b0] sm:$0xff] }
 0x4de   :  { %2256 = vmatprep.subr.mxu0 %v8380_v57  ;;  %13277 = vst [vmem:[#allocation102_spill] sm:$0xff] %v8398_v63  ;;  %v8404_v57 = vld [vmem:[%s12449_s12 + $0x588] sm:$0xff] }
 0x4df   :  { %2257 = vmatpush2.msra.mxu0 %v8386_v28  ;;  %13278 = vst [vmem:[#allocation103_spill] sm:$0xff] %v8404_v57  ;;  %v8410_v28 = vld [vmem:[%s12449_s12 + $0x580] sm:$0xff] }
 0x4e0   :  { %2258 = vmatprep.subr.mxu0 %v8392_v32  ;;  %13279 = vst [vmem:[#allocation104_spill] sm:$0xff] %v8410_v28  ;;  %v8416_v32 = vld [vmem:[%s12449_s12 + $0x558] sm:$0xff] }
 0x4e1   :  { %2259 = vmatpush2.msra.mxu0 %v8398_v63  ;;  %13280 = vst [vmem:[#allocation105_spill] sm:$0xff] %v8416_v32  ;;  %v8422_v63 = vld [vmem:[%s12449_s12 + $0x550] sm:$0xff] }
 0x4e2   :  { %2260 = vmatprep.subr.mxu0 %v8404_v57  ;;  %13281 = vst [vmem:[#allocation106_spill] sm:$0xff] %v8422_v63  ;;  %v8428_v57 = vld [vmem:[%s12449_s12 + $0x528] sm:$0xff] }
 0x4e3   :  { %2261 = vmatpush2.msra.mxu0 %v8410_v28  ;;  %13282 = vst [vmem:[#allocation107_spill] sm:$0xff] %v8428_v57  ;;  %v8434_v28 = vld [vmem:[%s12449_s12 + $0x520] sm:$0xff] }
 0x4e4   :  { %2262 = vmatprep.subr.mxu0 %v8416_v32  ;;  %13283 = vst [vmem:[#allocation108_spill] sm:$0xff] %v8434_v28  ;;  %v8440_v32 = vld [vmem:[%s12449_s12 + $0x4f8] sm:$0xff] }
 0x4e5   :  { %2263 = vmatpush2.msra.mxu0 %v8422_v63  ;;  %13284 = vst [vmem:[#allocation109_spill] sm:$0xff] %v8440_v32  ;;  %v8446_v63 = vld [vmem:[%s12449_s12 + $0x4f0] sm:$0xff] }
 0x4e6   :  { %2264 = vmatprep.subr.mxu0 %v8428_v57  ;;  %13285 = vst [vmem:[#allocation110_spill] sm:$0xff] %v8446_v63  ;;  %v8452_v57 = vld [vmem:[%s12449_s12 + $0x4c8] sm:$0xff] }
 0x4e7   :  { %2265 = vmatpush2.msra.mxu0 %v8434_v28  ;;  %13286 = vst [vmem:[#allocation111_spill] sm:$0xff] %v8452_v57  ;;  %v8458_v28 = vld [vmem:[%s12449_s12 + $0x4c0] sm:$0xff] }
 0x4e8   :  { %2266 = vmatprep.subr.mxu0 %v8440_v32  ;;  %13287 = vst [vmem:[#allocation112_spill] sm:$0xff] %v8458_v28  ;;  %v8464_v32 = vld [vmem:[%s12449_s12 + $0x498] sm:$0xff] }
 0x4e9   :  { %2267 = vmatpush2.msra.mxu0 %v8446_v63  ;;  %13288 = vst [vmem:[#allocation113_spill] sm:$0xff] %v8464_v32  ;;  %v8470_v63 = vld [vmem:[%s12449_s12 + $0x490] sm:$0xff] }
 0x4ea   :  { %2268 = vmatprep.subr.mxu0 %v8452_v57  ;;  %13289 = vst [vmem:[#allocation114_spill] sm:$0xff] %v8470_v63  ;;  %v8476_v57 = vld [vmem:[%s12449_s12 + $0x468] sm:$0xff] }
 0x4eb   :  { %2269 = vmatpush2.msra.mxu0 %v8458_v28  ;;  %13290 = vst [vmem:[#allocation115_spill] sm:$0xff] %v8476_v57  ;;  %v8482_v28 = vld [vmem:[%s12449_s12 + $0x460] sm:$0xff] }
 0x4ec   :  { %2270 = vmatprep.subr.mxu0 %v8464_v32  ;;  %13291 = vst [vmem:[#allocation116_spill] sm:$0xff] %v8482_v28  ;;  %v8488_v32 = vld [vmem:[%s12449_s12 + $0x438] sm:$0xff] }
 0x4ed   :  { %2271 = vmatpush2.msra.mxu0 %v8470_v63  ;;  %13292 = vst [vmem:[#allocation117_spill] sm:$0xff] %v8488_v32  ;;  %v8494_v63 = vld [vmem:[%s12449_s12 + $0x430] sm:$0xff] }
 0x4ee   :  { %2272 = vmatprep.subr.mxu0 %v8476_v57  ;;  %13293 = vst [vmem:[#allocation118_spill] sm:$0xff] %v8494_v63  ;;  %v8500_v57 = vld [vmem:[%s12449_s12 + $0x408] sm:$0xff] }
 0x4ef   :  { %2273 = vmatpush2.msra.mxu0 %v8482_v28  ;;  %13294 = vst [vmem:[#allocation119_spill] sm:$0xff] %v8500_v57  ;;  %v8506_v28 = vld [vmem:[%s12449_s12 + $0x400] sm:$0xff] }
 0x4f0   :  { %2274 = vmatprep.subr.mxu0 %v8488_v32  ;;  %13295 = vst [vmem:[#allocation120_spill] sm:$0xff] %v8506_v28  ;;  %v8512_v32 = vld [vmem:[%s12449_s12 + $0x3d8] sm:$0xff] }
 0x4f1   :  { %2275 = vmatpush2.msra.mxu0 %v8494_v63  ;;  %13296 = vst [vmem:[#allocation121_spill] sm:$0xff] %v8512_v32  ;;  %v8518_v63 = vld [vmem:[%s12449_s12 + $0x3d0] sm:$0xff] }
 0x4f2   :  { %2276 = vmatprep.subr.mxu0 %v8500_v57  ;;  %13297 = vst [vmem:[#allocation122_spill] sm:$0xff] %v8518_v63  ;;  %v8524_v57 = vld [vmem:[%s12449_s12 + $0x3a8] sm:$0xff] }
 0x4f3   :  { %2277 = vmatpush2.msra.mxu0 %v8506_v28  ;;  %13298 = vst [vmem:[#allocation123_spill] sm:$0xff] %v8524_v57  ;;  %v8530_v28 = vld [vmem:[%s12449_s12 + $0x3a0] sm:$0xff] }
 0x4f4   :  { %2278 = vmatprep.subr.mxu0 %v8512_v32  ;;  %13299 = vst [vmem:[#allocation124_spill] sm:$0xff] %v8530_v28  ;;  %v8536_v32 = vld [vmem:[%s12449_s12 + $0x378] sm:$0xff] }
 0x4f5   :  { %2279 = vmatpush2.msra.mxu0 %v8518_v63  ;;  %13300 = vst [vmem:[#allocation125_spill] sm:$0xff] %v8536_v32  ;;  %v8542_v63 = vld [vmem:[%s12449_s12 + $0x370] sm:$0xff] }
 0x4f6   :  { %2280 = vmatprep.subr.mxu0 %v8524_v57  ;;  %13301 = vst [vmem:[#allocation126_spill] sm:$0xff] %v8542_v63  ;;  %v8548_v57 = vld [vmem:[%s12449_s12 + $0x348] sm:$0xff] }
 0x4f7   :  { %2281 = vmatpush2.msra.mxu0 %v8530_v28  ;;  %13302 = vst [vmem:[#allocation127_spill] sm:$0xff] %v8548_v57  ;;  %v8554_v28 = vld [vmem:[%s12449_s12 + $0x340] sm:$0xff] }
 0x4f8   :  { %2282 = vmatprep.subr.mxu0 %v8536_v32  ;;  %13303 = vst [vmem:[#allocation128_spill] sm:$0xff] %v8554_v28  ;;  %v8560_v32 = vld [vmem:[%s12449_s12 + $0x318] sm:$0xff] }
 0x4f9   :  { %2283 = vmatpush2.msra.mxu0 %v8542_v63  ;;  %13304 = vst [vmem:[#allocation129_spill] sm:$0xff] %v8560_v32  ;;  %v8566_v63 = vld [vmem:[%s12449_s12 + $0x310] sm:$0xff] }
 0x4fa   :  { %2284 = vmatprep.subr.mxu0 %v8548_v57  ;;  %13305 = vst [vmem:[#allocation130_spill] sm:$0xff] %v8566_v63  ;;  %v13306_v57 = vld [vmem:[#allocation23_spill] sm:$0xff] }
 0x4fb   :  { %2285 = vmatpush2.msra.mxu0 %v8554_v28 }
 0x4fc   :  { %2286 = vmatprep.subr.mxu0 %v8560_v32 }
 0x4fd   :  { %2287 = vmatpush2.msra.mxu0 %v8566_v63 }
 0x4fe   :  { %2446 = vmatprep.subr.mxu0 %v13306_v57  ;;  %v5313_v57 = vld [vmem:[%s12447_s10] sm:$0x3] }
 0x4ff   :  { %vm2432_vm8 = vcmp.gt.s32.totalorder %v5313_v57, 5  ;;  %vm2701_vm9 = vcmp.gt.s32.totalorder %v5313_v57, 4  ;;  %vm3281_vm10 = vcmp.gt.s32.totalorder %v5313_v57, 2  ;;  %vm3843_vm11 = vcmp.gt.s32.totalorder %v5313_v57, 0 }
 0x53e   :  { %v1926_v51 = vpop.f32.mrf.mxu0  ;;  %v1997_v32 = vpop.f32.mrf.mxu1 }
 0x53f   :  { %v1927_v28 = vadd.f32 %v1926_v51, %v13307_v3  ;;  %v1998_v48 = vadd.f32 %v1997_v32, %v7685_v4  ;;  %v13308_v51 = vmov 0  }
 0x540   :  { %v1928_v47 = vpop.f32.mrf.mxu0  ;;  %v1999_v50 = vpop.f32.mrf.mxu1 }
 0x541   :  { %v1929_v15 = vadd.f32 %v1928_v47, %v7676_v11  ;;  %v2075_v0 = vrot.slane %v1927_v28, 4  ;;  %v2433_v47 = vsel %vm2432_vm8, 1, %v13308_v51 }
 0x542   :  { %2435 = vperm.xlu1 %4882, %v2433_v47  }
 0x543   :  { %v2076_v62 = vrot.slane %v1929_v15, 4  ;;  %v2079_v60 = vadd.f32 %v2075_v0, %v7680_v14  ;;  %v2000_v15 = vadd.f32 %v1999_v50, %v7688_v2  ;;  %v2702_v0 = vsel %vm2701_vm9, 1, %v13308_v51 }
 0x545   :  { %v2080_v58 = vadd.f32 %v2076_v62, %v7682_v8  ;;  %v4553_v53 = vmul.f32 -1.442695, %v2079_v60  ;;  %v2095_v62 = vrot.slane %v1998_v48, 4  ;;  %v2096_v60 = vrot.slane %v2000_v15, 4 }
 0x546   :  { %2704 = vperm.xlu1 %4882, %v2702_v0  }
 0x547   :  { %v4554_v63 = vmul.f32 -1.442695, %v2080_v58  ;;  %5044 = vpow2.f32 %v4553_v53  ;;  %v3282_v58 = vsel %vm3281_vm10, 1, %v13308_v51  ;;  %v2099_v28 = vadd.f32 %v2095_v62, %v7692_v59 }
 0x548   :  { %v2100_v32 = vadd.f32 %v2096_v60, %v7694_v7  ;;  %v3844_v53 = vsel %vm3843_vm11, 1, %v13308_v51 }
 0x549   :  { %5046 = vpow2.f32 %v4554_v63  ;;  %v4555_v4 = vmul.f32 -1.442695, %v2099_v28 }
 0x54a   :  { %3284 = vperm.xlu1 %4882, %v3282_v58   ;;  %v4556_v50 = vmul.f32 -1.442695, %v2100_v32 }
 0x54b   :  { %5048 = vpow2.f32 %v4555_v4 }
 0x54c   :  { %5050 = vpow2.f32 %v4556_v50 }
 0x54e   :  { %3846 = vperm.xlu1 %4882, %v3844_v53  }
 0x554   :  { %v5045_v47 = vpop.eup %5044 }
 0x555   :  { %v2087_v63 = vadd.f32 1.0, %v5045_v47 }
 0x556   :  { %v5047_v48 = vpop.eup %5046 }
 0x557   :  { %v2088_v15 = vadd.f32 1.0, %v5047_v48  ;;  %5052 = vrcp.f32 %v2087_v63 }
 0x558   :  { %v5049_v0 = vpop.eup %5048 }
 0x559   :  { %5054 = vrcp.f32 %v2088_v15  ;;  %v5051_v2 = vpop.eup %5050  ;;  %v2107_v57 = vadd.f32 1.0, %v5049_v0 }
 0x55a   :  { %v2108_v7 = vadd.f32 1.0, %v5051_v2  ;;  %v1858_v2 = vsel %vm1851_vm7, %v7718_v13, 0.0 }
 0x55b   :  { %5056 = vrcp.f32 %v2107_v57 }
 0x55c   :  { %5058 = vrcp.f32 %v2108_v7 }
 0x564   :  { %v5053_v32 = vpop.eup %5052 }
 0x566   :  { %v5055_v47 = vpop.eup %5054 }
 0x568   :  { %v5057_v15 = vpop.eup %5056 }
 0x569   :  { %v5059_v0 = vpop.eup %5058  ;;  %v2125_v57 = vsub.f32 1.0, %v5057_v15 }
 0x57e   :  { %v2068_v62 = vpop.f32.mrf.mxu0 }
 0x57f   :  { %v2069_v60 = vadd.f32 %v2068_v62, %v7700_v20  ;;  %v1859_v62 = vsel %vm1851_vm7, %v7715_v12, 0.0  ;;  %v8606_v12 = vld [vmem:[%s12449_s12 + $0x2f0] sm:$0xff]  ;;  %vm4397_vm7 = vcmask 1024  }
 0x580   :  { %v2070_v58 = vpop.f32.mrf.mxu0 }
 0x581   :  { %v2115_v51 = vrot.slane %v2069_v60, 4  ;;  %v2071_v28 = vadd.f32 %v2070_v58, %v7702_v61  ;;  %v2131_v60 = vrot.slane %v1858_v2, 4  ;;  %v2126_v58 = vsub.f32 1.0, %v5059_v0 }
 0x583   :  { %v2119_v4 = vmul.f32 %v5053_v32, %v2115_v51  ;;  %v2116_v53 = vrot.slane %v2071_v28, 4  ;;  %v2132_v51 = vrot.slane %v1859_v62, 4  ;;  %v2135_v32 = vmul.f32 %v5057_v15, %v2131_v60  ;;  %v8620_v15 = vld [vmem:[%s12449_s12 + $0x2c0] sm:$0xff]  ;;  %v8879_v60 = vld [vmem:[%s12449_s12 + $0x538] sm:$0xff] }
 0x585   :  { %v2121_v50 = vadd.f32 %v2119_v4, %v7706_v6  ;;  %v2120_v48 = vmul.f32 %v5055_v47, %v2116_v53  ;;  %v2136_v47 = vmul.f32 %v5059_v0, %v2132_v51  ;;  %v13309_v0 = vld [vmem:[#allocation85_spill] sm:$0xff]  ;;  %v13316_v51 = vld [vmem:[#allocation90_spill] sm:$0xff] }
 0x586   :  { %13313 = vst [vmem:[#allocation85_spill] sm:$0xff] %v8879_v60 }
 0x587   :  { %5060 = vtanh.f32 %v2121_v50  ;;  %v2122_v63 = vadd.f32 %v2120_v48, %v7709_v1  ;;  %v2143_v1 = vpop.permute.xlu0 %2142 }
 0x588   :  { %vm2144_vm12 = vcmp.eq.s32.totalorder %v2143_v1, 1  ;;  %v8613_v1 = vld [vmem:[%s12449_s12 + $0x2c8] sm:$0xff] }
 0x589   :  { %5062 = vtanh.f32 %v2122_v63 }
 0x594   :  { %v5061_v7 = vpop.eup %5060 }
 0x595   :  { %v2127_v28 = vmul.f32 %v5061_v7, %v2125_v57  ;;  %v13312_v57 = vld [vmem:[#allocation87_spill] sm:$0xff]  ;;  %v13314_v7 = vld [vmem:[#allocation32_spill] sm:$0xff] }
 0x596   :  { %v5063_v4 = vpop.eup %5062 }
 0x597   :  { %v2128_v53 = vmul.f32 %v5063_v4, %v2126_v58  ;;  %v2137_v50 = vadd.f32 %v2135_v32, %v2127_v28  ;;  %v8886_v58 = vld [vmem:[%s12449_s12 + $0x530] sm:$0xff]  ;;  %v8893_v28 = vld [vmem:[%s12449_s12 + $0x508] sm:$0xff]  ;;  %v8900_v4 = vld [vmem:[%s12449_s12 + $0x500] sm:$0xff] }
 0x598   :  { %13317 = vst [vmem:[#allocation87_spill] sm:$0xff] %v8893_v28  ;;  %v13318_v32 = vld [vmem:[#allocation33_spill] sm:$0xff]  ;;  %13319 = vst [vmem:[#allocation32_spill] sm:$0xff] %v8900_v4 }
 0x599   :  { %v2138_v48 = vadd.f32 %v2136_v47, %v2128_v53  ;;  %v2147_v63 = vrot.slane %v2137_v50, 4  ;;  %v13320_v53 = vld [vmem:[#allocation34_spill] sm:$0xff]  ;;  %v8907_v47 = vld [vmem:[%s12449_s12 + $0x4d8] sm:$0xff] }
 0x59a   :  { %13321 = vst [vmem:[#allocation90_spill] sm:$0xff] %v8907_v47  ;;  %v13322_v50 = vld [vmem:[#allocation35_spill] sm:$0xff] }
 0x59b   :  { %v2148_v13 = vrot.slane %v2138_v48, 4  ;;  %v8599_v52 = vsel %vm2144_vm12, %v2147_v63, %v1858_v2  ;;  %v8627_v2 = vld [vmem:[%s12449_s12 + $0x298] sm:$0xff]  ;;  %v8914_v48 = vld [vmem:[%s12449_s12 + $0x4d0] sm:$0xff] }
 0x59c   :  { %13323 = vst [vmem:[#allocation33_spill] sm:$0xff] %v8914_v48  ;;  %v13324_v63 = vld [vmem:[#allocation36_spill] sm:$0xff] }
 0x59d   :  { %v8595_v6 = vsel %vm2144_vm12, %v2148_v13, %v1859_v62  ;;  %v13310_v62 = vld [vmem:[#allocation31_spill] sm:$0xff]  ;;  %v8921_v13 = vld [vmem:[%s12449_s12 + $0x4a8] sm:$0xff] }
 0x59e   :  { %2217 = vmatprep.mubr.f32.mxu1 %v8595_v6  ;;  %2288 = vmatprep.mubr.f32.mxu0 %v8595_v6  ;;  %13315 = vst [vmem:[#allocation31_spill] sm:$0xff] %v8886_v58  ;;  %13325 = vst [vmem:[#allocation34_spill] sm:$0xff] %v8921_v13 }
 0x59f   :  { %2218 = vmatmul.mubr.f32.vlgmr.msra.gmra.mxu1 %v8599_v52  ;;  %2289 = vmatmul.mubr.f32.vlgmr.msra.gmra.mxu0 %v8599_v52 }
 0x5a0   :  { %2296 = vmatpush1.msra.mxu1 %v8606_v12  ;;  %2359 = vmatprep.mubr.f32.mxu1 %v8595_v6 }
 0x5a1   :  { %2297 = vmatprep.subr.mxu1 %v8613_v1  ;;  %2447 = vmatpush1.msra.mxu0 %v7740_v45  ;;  %v8634_v45 = vld [vmem:[%s12449_s12 + $0x290] sm:$0xff] }
 0x5a2   :  { %2298 = vmatpush1.msra.mxu1 %v8620_v15  ;;  %2448 = vmatprep.subr.mxu0 %v7747_v56  ;;  %v8641_v56 = vld [vmem:[%s12449_s12 + $0x268] sm:$0xff] }
 0x5a3   :  { %2299 = vmatprep.subr.mxu1 %v8627_v2  ;;  %2449 = vmatpush1.msra.mxu0 %v7754_v16  ;;  %v8648_v16 = vld [vmem:[%s12449_s12 + $0x260] sm:$0xff] }
 0x5a4   :  { %2300 = vmatpush1.msra.mxu1 %v8634_v45  ;;  %2450 = vmatprep.subr.mxu0 %v7761_v9  ;;  %v8655_v9 = vld [vmem:[%s12449_s12 + $0x238] sm:$0xff] }
 0x5a5   :  { %2301 = vmatprep.subr.mxu1 %v8641_v56  ;;  %2451 = vmatpush1.msra.mxu0 %v7768_v36  ;;  %v8662_v36 = vld [vmem:[%s12449_s12 + $0x230] sm:$0xff] }
 0x5a6   :  { %2302 = vmatpush1.msra.mxu1 %v8648_v16  ;;  %2452 = vmatprep.subr.mxu0 %v7775_v49  ;;  %v8669_v49 = vld [vmem:[%s12449_s12 + $0x208] sm:$0xff] }
 0x5a7   :  { %2303 = vmatprep.subr.mxu1 %v8655_v9  ;;  %2453 = vmatpush1.msra.mxu0 %v7782_v24  ;;  %v8676_v24 = vld [vmem:[%s12449_s12 + $0x200] sm:$0xff] }
 0x5a8   :  { %2304 = vmatpush1.msra.mxu1 %v8662_v36  ;;  %2454 = vmatprep.subr.mxu0 %v7789_v5  ;;  %v8683_v5 = vld [vmem:[%s12449_s12 + $0x1d8] sm:$0xff] }
 0x5a9   :  { %2305 = vmatprep.subr.mxu1 %v8669_v49  ;;  %2455 = vmatpush1.msra.mxu0 %v7796_v10  ;;  %v8690_v10 = vld [vmem:[%s12449_s12 + $0x1d0] sm:$0xff] }
 0x5aa   :  { %2306 = vmatpush1.msra.mxu1 %v8676_v24  ;;  %2456 = vmatprep.subr.mxu0 %v7803_v40  ;;  %v8697_v40 = vld [vmem:[%s12449_s12 + $0x1a8] sm:$0xff] }
 0x5ab   :  { %2307 = vmatprep.subr.mxu1 %v8683_v5  ;;  %2457 = vmatpush1.msra.mxu0 %v7810_v54  ;;  %v8704_v54 = vld [vmem:[%s12449_s12 + $0x1a0] sm:$0xff] }
 0x5ac   :  { %2308 = vmatpush1.msra.mxu1 %v8690_v10  ;;  %2458 = vmatprep.subr.mxu0 %v7817_v55  ;;  %v8711_v55 = vld [vmem:[%s12449_s12 + $0x178] sm:$0xff] }
 0x5ad   :  { %2309 = vmatprep.subr.mxu1 %v8697_v40  ;;  %2459 = vmatpush1.msra.mxu0 %v7824_v43  ;;  %v8718_v43 = vld [vmem:[%s12449_s12 + $0x170] sm:$0xff] }
 0x5ae   :  { %2310 = vmatpush1.msra.mxu1 %v8704_v54  ;;  %2460 = vmatprep.subr.mxu0 %v7831_v30  ;;  %v8725_v30 = vld [vmem:[%s12449_s12 + $0x148] sm:$0xff] }
 0x5af   :  { %2311 = vmatprep.subr.mxu1 %v8711_v55  ;;  %2461 = vmatpush1.msra.mxu0 %v7838_v17  ;;  %v8732_v17 = vld [vmem:[%s12449_s12 + $0x140] sm:$0xff] }
 0x5b0   :  { %2312 = vmatpush1.msra.mxu1 %v8718_v43  ;;  %2462 = vmatprep.subr.mxu0 %v7845_v18  ;;  %v8739_v18 = vld [vmem:[%s12449_s12 + $0x118] sm:$0xff] }
 0x5b1   :  { %2313 = vmatprep.subr.mxu1 %v8725_v30  ;;  %2463 = vmatpush1.msra.mxu0 %v7852_v19  ;;  %v8746_v19 = vld [vmem:[%s12449_s12 + $0x110] sm:$0xff] }
 0x5b2   :  { %2314 = vmatpush1.msra.mxu1 %v8732_v17  ;;  %2464 = vmatprep.subr.mxu0 %v7859_v21  ;;  %v8753_v21 = vld [vmem:[%s12449_s12 + $0xe8] sm:$0xff] }
 0x5b3   :  { %2315 = vmatprep.subr.mxu1 %v8739_v18  ;;  %2465 = vmatpush1.msra.mxu0 %v7866_v22  ;;  %v8760_v22 = vld [vmem:[%s12449_s12 + $0xe0] sm:$0xff] }
 0x5b4   :  { %2316 = vmatpush1.msra.mxu1 %v8746_v19  ;;  %2466 = vmatprep.subr.mxu0 %v7873_v41  ;;  %v8767_v41 = vld [vmem:[%s12449_s12 + $0xb8] sm:$0xff] }
 0x5b5   :  { %2317 = vmatprep.subr.mxu1 %v8753_v21  ;;  %2467 = vmatpush1.msra.mxu0 %v7880_v23  ;;  %v8774_v23 = vld [vmem:[%s12449_s12 + $0xb0] sm:$0xff] }
 0x5b6   :  { %2318 = vmatpush1.msra.mxu1 %v8760_v22  ;;  %2468 = vmatprep.subr.mxu0 %v7887_v25  ;;  %v8781_v25 = vld [vmem:[%s12449_s12 + $0x88] sm:$0xff] }
 0x5b7   :  { %2319 = vmatprep.subr.mxu1 %v8767_v41  ;;  %2469 = vmatpush1.msra.mxu0 %v7894_v26  ;;  %v8788_v26 = vld [vmem:[%s12449_s12 + $0x80] sm:$0xff] }
 0x5b8   :  { %2320 = vmatpush1.msra.mxu1 %v8774_v23  ;;  %2470 = vmatprep.subr.mxu0 %v7901_v34  ;;  %v8795_v34 = vld [vmem:[%s12449_s12 + $0x58] sm:$0xff] }
 0x5b9   :  { %2321 = vmatprep.subr.mxu1 %v8781_v25  ;;  %2471 = vmatpush1.msra.mxu0 %v7908_v27  ;;  %v8802_v27 = vld [vmem:[%s12449_s12 + $0x50] sm:$0xff] }
 0x5ba   :  { %2322 = vmatpush1.msra.mxu1 %v8788_v26  ;;  %2472 = vmatprep.subr.mxu0 %v7915_v29  ;;  %v8809_v29 = vld [vmem:[%s12449_s12 + $0x28] sm:$0xff] }
 0x5bb   :  { %2323 = vmatprep.subr.mxu1 %v8795_v34  ;;  %2473 = vmatpush1.msra.mxu0 %v7922_v31  ;;  %v8816_v31 = vld [vmem:[%s12449_s12 + $0x20] sm:$0xff] }
 0x5bc   :  { %2324 = vmatpush1.msra.mxu1 %v8802_v27  ;;  %2474 = vmatprep.subr.mxu0 %v7929_v38  ;;  %v8823_v38 = vld [vmem:[%s12449_s12 + $0x5f8] sm:$0xff] }
 0x5bd   :  { %2325 = vmatprep.subr.mxu1 %v8809_v29  ;;  %2475 = vmatpush1.msra.mxu0 %v7936_v33  ;;  %v8830_v33 = vld [vmem:[%s12449_s12 + $0x5f0] sm:$0xff] }
 0x5be   :  { %2326 = vmatpush1.msra.mxu1 %v8816_v31  ;;  %2476 = vmatprep.subr.mxu0 %v7943_v35  ;;  %v8837_v35 = vld [vmem:[%s12449_s12 + $0x5c8] sm:$0xff] }
 0x5bf   :  { %2327 = vmatprep.subr.mxu1 %v8823_v38  ;;  %2477 = vmatpush1.msra.mxu0 %v7950_v37  ;;  %v8844_v37 = vld [vmem:[%s12449_s12 + $0x5c0] sm:$0xff] }
 0x5c0   :  { %2328 = vmatpush2.msra.mxu1 %v8830_v33  ;;  %2478 = vmatprep.subr.mxu0 %v7957_v39  ;;  %v8851_v39 = vld [vmem:[%s12449_s12 + $0x598] sm:$0xff] }
 0x5c1   :  { %2329 = vmatprep.subr.mxu1 %v8837_v35  ;;  %2479 = vmatpush2.msra.mxu0 %v7964_v42  ;;  %v8858_v42 = vld [vmem:[%s12449_s12 + $0x590] sm:$0xff] }
 0x5c2   :  { %2330 = vmatpush2.msra.mxu1 %v8844_v37  ;;  %2480 = vmatprep.subr.mxu0 %v7971_v44  ;;  %v8865_v44 = vld [vmem:[%s12449_s12 + $0x568] sm:$0xff] }
 0x5c3   :  { %2331 = vmatprep.subr.mxu1 %v8851_v39  ;;  %2481 = vmatpush2.msra.mxu0 %v7978_v46  ;;  %v8872_v46 = vld [vmem:[%s12449_s12 + $0x560] sm:$0xff] }
 0x5c4   :  { %2332 = vmatpush2.msra.mxu1 %v8858_v42  ;;  %2482 = vmatprep.subr.mxu0 %v13309_v0  ;;  %13311 = vst [vmem:[#allocation23_spill] sm:$0xff] %v8872_v46  ;;  %v13326_v0 = vld [vmem:[#allocation37_spill] sm:$0xff] }
 0x5c5   :  { %2333 = vmatprep.subr.mxu1 %v8865_v44  ;;  %2483 = vmatpush2.msra.mxu0 %v13310_v62  ;;  %v8928_v62 = vld [vmem:[%s12449_s12 + $0x4a0] sm:$0xff] }
 0x5c6   :  { %2334 = vmatpush2.msra.mxu1 %v8872_v46  ;;  %2484 = vmatprep.subr.mxu0 %v13312_v57  ;;  %13327 = vst [vmem:[#allocation35_spill] sm:$0xff] %v8928_v62  ;;  %v13328_v57 = vld [vmem:[#allocation38_spill] sm:$0xff] }
 0x5c7   :  { %2335 = vmatprep.subr.mxu1 %v8879_v60  ;;  %2485 = vmatpush2.msra.mxu0 %v13314_v7  ;;  %v8935_v7 = vld [vmem:[%s12449_s12 + $0x478] sm:$0xff] }
 0x5c8   :  { %2336 = vmatpush2.msra.mxu1 %v8886_v58  ;;  %2486 = vmatprep.subr.mxu0 %v13316_v51  ;;  %13329 = vst [vmem:[#allocation36_spill] sm:$0xff] %v8935_v7  ;;  %v13330_v51 = vld [vmem:[#allocation39_spill] sm:$0xff] }
 0x5c9   :  { %2337 = vmatprep.subr.mxu1 %v8893_v28  ;;  %2487 = vmatpush2.msra.mxu0 %v13318_v32  ;;  %v8942_v32 = vld [vmem:[%s12449_s12 + $0x470] sm:$0xff] }
 0x5ca   :  { %2338 = vmatpush2.msra.mxu1 %v8900_v4  ;;  %2488 = vmatprep.subr.mxu0 %v13320_v53  ;;  %13331 = vst [vmem:[#allocation37_spill] sm:$0xff] %v8942_v32  ;;  %v13332_v53 = vld [vmem:[#allocation40_spill] sm:$0xff]  ;;  %v13428_v4 = vld [vmem:[#allocation27_spill] sm:$0xff] }
 0x5cb   :  { %2339 = vmatprep.subr.mxu1 %v8907_v47  ;;  %2489 = vmatpush2.msra.mxu0 %v13322_v50  ;;  %v8949_v50 = vld [vmem:[%s12449_s12 + $0x448] sm:$0xff] }
 0x5cc   :  { %2340 = vmatpush2.msra.mxu1 %v8914_v48  ;;  %2490 = vmatprep.subr.mxu0 %v13324_v63  ;;  %13333 = vst [vmem:[#allocation38_spill] sm:$0xff] %v8949_v50  ;;  %v13334_v63 = vld [vmem:[#allocation41_spill] sm:$0xff]  ;;  %v13371_v48 = vld [vmem:[#allocation63_spill] sm:$0xff] }
 0x5cd   :  { %2341 = vmatprep.subr.mxu1 %v8921_v13  ;;  %2491 = vmatpush2.msra.mxu0 %v13326_v0  ;;  %v8956_v0 = vld [vmem:[%s12449_s12 + $0x440] sm:$0xff] }
 0x5ce   :  { %2342 = vmatpush2.msra.mxu1 %v8928_v62  ;;  %2492 = vmatprep.subr.mxu0 %v13328_v57  ;;  %13335 = vst [vmem:[#allocation39_spill] sm:$0xff] %v8956_v0  ;;  %v13336_v57 = vld [vmem:[#allocation42_spill] sm:$0xff]  ;;  %v13367_v62 = vld [vmem:[#allocation59_spill] sm:$0xff]  ;;  %v13368_v13 = vld [vmem:[#allocation60_spill] sm:$0xff] }
 0x5cf   :  { %2343 = vmatprep.subr.mxu1 %v8935_v7  ;;  %2493 = vmatpush2.msra.mxu0 %v13330_v51  ;;  %v8963_v51 = vld [vmem:[%s12449_s12 + $0x418] sm:$0xff]  ;;  %v13366_v7 = vld [vmem:[#allocation58_spill] sm:$0xff] }
 0x5d0   :  { %2344 = vmatpush2.msra.mxu1 %v8942_v32  ;;  %2494 = vmatprep.subr.mxu0 %v13332_v53  ;;  %13337 = vst [vmem:[#allocation40_spill] sm:$0xff] %v8963_v51  ;;  %v13338_v53 = vld [vmem:[#allocation43_spill] sm:$0xff] }
 0x5d1   :  { %2345 = vmatprep.subr.mxu1 %v8949_v50  ;;  %2495 = vmatpush2.msra.mxu0 %v13334_v63  ;;  %v8970_v63 = vld [vmem:[%s12449_s12 + $0x410] sm:$0xff]  ;;  %v13340_v50 = vld [vmem:[#allocation44_spill] sm:$0xff] }
 0x5d2   :  { %2346 = vmatpush2.msra.mxu1 %v8956_v0  ;;  %2496 = vmatprep.subr.mxu0 %v13336_v57  ;;  %13339 = vst [vmem:[#allocation41_spill] sm:$0xff] %v8970_v63  ;;  %v8977_v57 = vld [vmem:[%s12449_s12 + $0x3e8] sm:$0xff]  ;;  %v13363_v32 = vld [vmem:[#allocation55_spill] sm:$0xff] }
 0x5d3   :  { %2347 = vmatprep.subr.mxu1 %v8963_v51  ;;  %2497 = vmatpush2.msra.mxu0 %v13338_v53  ;;  %13341 = vst [vmem:[#allocation42_spill] sm:$0xff] %v8977_v57  ;;  %v13342_v0 = vld [vmem:[#allocation45_spill] sm:$0xff]  ;;  %v13344_v51 = vld [vmem:[#allocation46_spill] sm:$0xff] }
 0x5d4   :  { %2348 = vmatpush2.msra.mxu1 %v8970_v63  ;;  %2498 = vmatprep.subr.mxu0 %v13340_v50  ;;  %v8984_v53 = vld [vmem:[%s12449_s12 + $0x3e0] sm:$0xff]  ;;  %v8991_v50 = vld [vmem:[%s12449_s12 + $0x3b8] sm:$0xff] }
 0x5d5   :  { %2349 = vmatprep.subr.mxu1 %v8977_v57  ;;  %2499 = vmatpush2.msra.mxu0 %v13342_v0  ;;  %13343 = vst [vmem:[#allocation43_spill] sm:$0xff] %v8984_v53  ;;  %13345 = vst [vmem:[#allocation44_spill] sm:$0xff] %v8991_v50  ;;  %v13346_v63 = vld [vmem:[#allocation47_spill] sm:$0xff]  ;;  %v13348_v57 = vld [vmem:[#allocation48_spill] sm:$0xff] }
 0x5d6   :  { %2350 = vmatpush2.msra.mxu1 %v8984_v53  ;;  %2500 = vmatprep.subr.mxu0 %v13344_v51  ;;  %v8998_v0 = vld [vmem:[%s12449_s12 + $0x3b0] sm:$0xff]  ;;  %v9005_v51 = vld [vmem:[%s12449_s12 + $0x388] sm:$0xff] }
 0x5d7   :  { %2351 = vmatprep.subr.mxu1 %v8991_v50  ;;  %2501 = vmatpush2.msra.mxu0 %v13346_v63  ;;  %13347 = vst [vmem:[#allocation45_spill] sm:$0xff] %v8998_v0  ;;  %13349 = vst [vmem:[#allocation46_spill] sm:$0xff] %v9005_v51  ;;  %v13350_v53 = vld [vmem:[#allocation49_spill] sm:$0xff]  ;;  %v13352_v50 = vld [vmem:[#allocation50_spill] sm:$0xff] }
 0x5d8   :  { %2352 = vmatpush2.msra.mxu1 %v8998_v0  ;;  %2502 = vmatprep.subr.mxu0 %v13348_v57  ;;  %v9012_v63 = vld [vmem:[%s12449_s12 + $0x380] sm:$0xff]  ;;  %v9019_v57 = vld [vmem:[%s12449_s12 + $0x358] sm:$0xff] }
 0x5d9   :  { %2353 = vmatprep.subr.mxu1 %v9005_v51  ;;  %2503 = vmatpush2.msra.mxu0 %v13350_v53  ;;  %13351 = vst [vmem:[#allocation47_spill] sm:$0xff] %v9012_v63  ;;  %13353 = vst [vmem:[#allocation48_spill] sm:$0xff] %v9019_v57  ;;  %v13354_v0 = vld [vmem:[#allocation51_spill] sm:$0xff]  ;;  %v13356_v51 = vld [vmem:[#allocation52_spill] sm:$0xff] }
 0x5da   :  { %2354 = vmatpush2.msra.mxu1 %v9012_v63  ;;  %2504 = vmatprep.subr.mxu0 %v13352_v50  ;;  %v9026_v53 = vld [vmem:[%s12449_s12 + $0x350] sm:$0xff]  ;;  %v9033_v50 = vld [vmem:[%s12449_s12 + $0x328] sm:$0xff] }
 0x5db   :  { %2355 = vmatprep.subr.mxu1 %v9019_v57  ;;  %2505 = vmatpush2.msra.mxu0 %v13354_v0  ;;  %13355 = vst [vmem:[#allocation49_spill] sm:$0xff] %v9026_v53  ;;  %13357 = vst [vmem:[#allocation50_spill] sm:$0xff] %v9033_v50  ;;  %v13358_v63 = vld [vmem:[#allocation19_spill] sm:$0xff]  ;;  %v9040_v0 = vld [vmem:[%s12449_s12 + $0x320] sm:$0xff] }
 0x5dc   :  { %2356 = vmatpush2.msra.mxu1 %v9026_v53  ;;  %2506 = vmatprep.subr.mxu0 %v13356_v51  ;;  %13359 = vst [vmem:[#allocation51_spill] sm:$0xff] %v9040_v0  ;;  %v13360_v57 = vld [vmem:[#allocation53_spill] sm:$0xff]  ;;  %v13361_v51 = vld [vmem:[#allocation54_spill] sm:$0xff]  ;;  %v13362_v53 = vld [vmem:[#allocation20_spill] sm:$0xff] }
 0x5dd   :  { %2357 = vmatprep.subr.mxu1 %v9033_v50  ;;  %2507 = vmatpush2.msra.mxu0 %v13358_v63  ;;  %v13364_v50 = vld [vmem:[#allocation56_spill] sm:$0xff]  ;;  %v13365_v63 = vld [vmem:[#allocation57_spill] sm:$0xff] }
 0x5de   :  { %2358 = vmatpush2.msra.mxu1 %v9040_v0  ;;  %2508 = vmatprep.subr.mxu0 %v13360_v57  ;;  %v13369_v0 = vld [vmem:[#allocation61_spill] sm:$0xff]  ;;  %v13370_v57 = vld [vmem:[#allocation62_spill] sm:$0xff] }
 0x5df   :  { %2360 = vmatmul.mubr.f32.vlgmr.msra.gmra.mxu1 %v8599_v52  ;;  %2517 = vmatprep.subr.mxu1 %v13361_v51  ;;  %v13372_v51 = vld [vmem:[#allocation64_spill] sm:$0xff] }
 0x5e0   :  { %2518 = vmatpush1.msra.mxu1 %v13362_v53  ;;  %2509 = vmatpush2.msra.mxu0 %v13363_v32  ;;  %v13373_v53 = vld [vmem:[#allocation66_spill] sm:$0xff]  ;;  %v13374_v32 = vld [vmem:[#allocation68_spill] sm:$0xff] }
 0x5e1   :  { %2519 = vmatprep.subr.mxu1 %v13364_v50  ;;  %2588 = vmatprep.subr.mxu0 %v13365_v63  ;;  %v13375_v50 = vld [vmem:[#allocation70_spill] sm:$0xff]  ;;  %v13376_v63 = vld [vmem:[#allocation72_spill] sm:$0xff] }
 0x5e2   :  { %2520 = vmatpush1.msra.mxu1 %v13366_v7  ;;  %v13377_v7 = vld [vmem:[#allocation74_spill] sm:$0xff] }
 0x5e3   :  { %2521 = vmatprep.subr.mxu1 %v13367_v62  ;;  %v13378_v62 = vld [vmem:[#allocation76_spill] sm:$0xff] }
 0x5e4   :  { %2522 = vmatpush1.msra.mxu1 %v13368_v13  ;;  %v13379_v13 = vld [vmem:[#allocation78_spill] sm:$0xff] }
 0x5e5   :  { %2523 = vmatprep.subr.mxu1 %v13369_v0  ;;  %v13380_v0 = vld [vmem:[#allocation80_spill] sm:$0xff] }
 0x5e6   :  { %2524 = vmatpush1.msra.mxu1 %v13370_v57  ;;  %v13381_v57 = vld [vmem:[#allocation82_spill] sm:$0xff] }
 0x5e7   :  { %2525 = vmatprep.subr.mxu1 %v13371_v48  ;;  %v13382_v48 = vld [vmem:[#allocation84_spill] sm:$0xff] }
 0x5e8   :  { %2526 = vmatpush1.msra.mxu1 %v13372_v51  ;;  %v13383_v51 = vld [vmem:[#allocation18_spill] sm:$0xff] }
 0x5e9   :  { %2527 = vmatprep.subr.mxu1 %v13373_v53  ;;  %v13384_v53 = vld [vmem:[#allocation86_spill] sm:$0xff] }
 0x5ea   :  { %2528 = vmatpush1.msra.mxu1 %v13374_v32  ;;  %v13385_v32 = vld [vmem:[#allocation88_spill] sm:$0xff] }
 0x5eb   :  { %2529 = vmatprep.subr.mxu1 %v13375_v50  ;;  %v13386_v50 = vld [vmem:[#allocation89_spill] sm:$0xff] }
 0x5ec   :  { %2530 = vmatpush1.msra.mxu1 %v13376_v63  ;;  %v13387_v63 = vld [vmem:[#allocation91_spill] sm:$0xff] }
 0x5ed   :  { %2531 = vmatprep.subr.mxu1 %v13377_v7  ;;  %v13388_v7 = vld [vmem:[#allocation93_spill] sm:$0xff] }
 0x5ee   :  { %2532 = vmatpush1.msra.mxu1 %v13378_v62  ;;  %v13389_v62 = vld [vmem:[#allocation95_spill] sm:$0xff] }
 0x5ef   :  { %2533 = vmatprep.subr.mxu1 %v13379_v13  ;;  %v13390_v13 = vld [vmem:[#allocation97_spill] sm:$0xff] }
 0x5f0   :  { %2534 = vmatpush1.msra.mxu1 %v13380_v0  ;;  %v13391_v0 = vld [vmem:[#allocation99_spill] sm:$0xff] }
 0x5f1   :  { %2535 = vmatprep.subr.mxu1 %v13381_v57  ;;  %v13392_v57 = vld [vmem:[#allocation92_spill] sm:$0xff] }
 0x5f2   :  { %2536 = vmatpush1.msra.mxu1 %v13382_v48  ;;  %v13393_v48 = vld [vmem:[#allocation94_spill] sm:$0xff] }
 0x5f3   :  { %2537 = vmatprep.subr.mxu1 %v13383_v51  ;;  %v13394_v51 = vld [vmem:[#allocation96_spill] sm:$0xff] }
 0x5f4   :  { %2538 = vmatpush1.msra.mxu1 %v13384_v53  ;;  %v13395_v53 = vld [vmem:[#allocation98_spill] sm:$0xff] }
 0x5f5   :  { %2539 = vmatprep.subr.mxu1 %v13385_v32  ;;  %v13396_v32 = vld [vmem:[#allocation100_spill] sm:$0xff] }
 0x5f6   :  { %2540 = vmatpush1.msra.mxu1 %v13386_v50  ;;  %v13397_v50 = vld [vmem:[#allocation101_spill] sm:$0xff] }
 0x5f7   :  { %2541 = vmatprep.subr.mxu1 %v13387_v63  ;;  %v13398_v63 = vld [vmem:[#allocation102_spill] sm:$0xff] }
 0x5f8   :  { %2542 = vmatpush1.msra.mxu1 %v13388_v7  ;;  %v13399_v7 = vld [vmem:[#allocation103_spill] sm:$0xff] }
 0x5f9   :  { %2543 = vmatprep.subr.mxu1 %v13389_v62  ;;  %v13400_v62 = vld [vmem:[#allocation104_spill] sm:$0xff] }
 0x5fa   :  { %2544 = vmatpush1.msra.mxu1 %v13390_v13  ;;  %v13401_v13 = vld [vmem:[#allocation105_spill] sm:$0xff] }
 0x5fb   :  { %2545 = vmatprep.subr.mxu1 %v13391_v0  ;;  %v13402_v0 = vld [vmem:[#allocation106_spill] sm:$0xff] }
 0x5fc   :  { %2546 = vmatpush1.msra.mxu1 %v13392_v57  ;;  %v13403_v57 = vld [vmem:[#allocation107_spill] sm:$0xff] }
 0x5fd   :  { %2547 = vmatprep.subr.mxu1 %v13393_v48  ;;  %v13404_v48 = vld [vmem:[#allocation108_spill] sm:$0xff] }
 0x5fe   :  { %2548 = vmatpush1.msra.mxu1 %v13394_v51  ;;  %v13405_v51 = vld [vmem:[#allocation109_spill] sm:$0xff] }
 0x5ff   :  { %2549 = vmatprep.subr.mxu1 %v13395_v53  ;;  %v13406_v53 = vld [vmem:[#allocation110_spill] sm:$0xff] }
 0x600   :  { %2550 = vmatpush2.msra.mxu1 %v13396_v32  ;;  %v13407_v32 = vld [vmem:[#allocation111_spill] sm:$0xff] }
 0x601   :  { %2551 = vmatprep.subr.mxu1 %v13397_v50  ;;  %v13408_v50 = vld [vmem:[#allocation112_spill] sm:$0xff] }
 0x602   :  { %2552 = vmatpush2.msra.mxu1 %v13398_v63  ;;  %v13409_v63 = vld [vmem:[#allocation113_spill] sm:$0xff] }
 0x603   :  { %2553 = vmatprep.subr.mxu1 %v13399_v7  ;;  %v13410_v7 = vld [vmem:[#allocation114_spill] sm:$0xff] }
 0x604   :  { %2554 = vmatpush2.msra.mxu1 %v13400_v62  ;;  %v13411_v62 = vld [vmem:[#allocation115_spill] sm:$0xff] }
 0x605   :  { %2555 = vmatprep.subr.mxu1 %v13401_v13  ;;  %v13412_v13 = vld [vmem:[#allocation116_spill] sm:$0xff] }
 0x606   :  { %2556 = vmatpush2.msra.mxu1 %v13402_v0  ;;  %v13413_v0 = vld [vmem:[#allocation117_spill] sm:$0xff] }
 0x607   :  { %2557 = vmatprep.subr.mxu1 %v13403_v57  ;;  %v13414_v57 = vld [vmem:[#allocation118_spill] sm:$0xff] }
 0x608   :  { %2558 = vmatpush2.msra.mxu1 %v13404_v48  ;;  %v13415_v48 = vld [vmem:[#allocation119_spill] sm:$0xff] }
 0x609   :  { %2559 = vmatprep.subr.mxu1 %v13405_v51  ;;  %v13416_v51 = vld [vmem:[#allocation120_spill] sm:$0xff] }
 0x60a   :  { %2560 = vmatpush2.msra.mxu1 %v13406_v53  ;;  %v13417_v53 = vld [vmem:[#allocation121_spill] sm:$0xff] }
 0x60b   :  { %2561 = vmatprep.subr.mxu1 %v13407_v32  ;;  %v13418_v32 = vld [vmem:[#allocation122_spill] sm:$0xff] }
 0x60c   :  { %2562 = vmatpush2.msra.mxu1 %v13408_v50  ;;  %v13419_v50 = vld [vmem:[#allocation123_spill] sm:$0xff] }
 0x60d   :  { %2563 = vmatprep.subr.mxu1 %v13409_v63  ;;  %v13420_v63 = vld [vmem:[#allocation124_spill] sm:$0xff] }
 0x60e   :  { %2564 = vmatpush2.msra.mxu1 %v13410_v7  ;;  %v13421_v7 = vld [vmem:[#allocation125_spill] sm:$0xff] }
 0x60f   :  { %2565 = vmatprep.subr.mxu1 %v13411_v62  ;;  %v13422_v62 = vld [vmem:[#allocation126_spill] sm:$0xff] }
 0x610   :  { %2566 = vmatpush2.msra.mxu1 %v13412_v13  ;;  %v13423_v13 = vld [vmem:[#allocation127_spill] sm:$0xff] }
 0x611   :  { %2567 = vmatprep.subr.mxu1 %v13413_v0  ;;  %v13424_v0 = vld [vmem:[#allocation128_spill] sm:$0xff] }
 0x612   :  { %2568 = vmatpush2.msra.mxu1 %v13414_v57  ;;  %v13425_v57 = vld [vmem:[#allocation129_spill] sm:$0xff] }
 0x613   :  { %2569 = vmatprep.subr.mxu1 %v13415_v48  ;;  %v13426_v48 = vld [vmem:[#allocation130_spill] sm:$0xff] }
 0x614   :  { %2570 = vmatpush2.msra.mxu1 %v13416_v51  ;;  %v9114_v51 = vld [vmem:[%s12449_s12 + $0x2d8] sm:$0xff] }
 0x615   :  { %2571 = vmatprep.subr.mxu1 %v13417_v53  ;;  %13427 = vst [vmem:[#allocation52_spill] sm:$0xff] %v9114_v51 }
 0x616   :  { %2572 = vmatpush2.msra.mxu1 %v13418_v32 }
 0x617   :  { %2573 = vmatprep.subr.mxu1 %v13419_v50 }
 0x618   :  { %2574 = vmatpush2.msra.mxu1 %v13420_v63 }
 0x619   :  { %2575 = vmatprep.subr.mxu1 %v13421_v7 }
 0x61a   :  { %2576 = vmatpush2.msra.mxu1 %v13422_v62 }
 0x61b   :  { %2577 = vmatprep.subr.mxu1 %v13423_v13 }
 0x61c   :  { %2578 = vmatpush2.msra.mxu1 %v13424_v0 }
 0x61d   :  { %2579 = vmatprep.subr.mxu1 %v13425_v57 }
 0x61e   :  { %2580 = vmatpush2.msra.mxu1 %v13426_v48 }
 0x61f   :  { %2709 = vmatprep.subr.mxu1 %v9114_v51  ;;  %v13429_v51 = vld [vmem:[#allocation79_spill] sm:$0xff] }
 0x65f   :  { %v2219_v53 = vpop.f32.mrf.mxu1  ;;  %v2290_v0 = vpop.f32.mrf.mxu0 }
 0x660   :  { %v2220_v50 = vadd.f32 %v2219_v53, %v13307_v3  ;;  %v2291_v28 = vadd.f32 %v2290_v0, %v13428_v4 }
 0x661   :  { %v2221_v32 = vpop.f32.mrf.mxu1  ;;  %v2292_v47 = vpop.f32.mrf.mxu0 }
 0x662   :  { %v2222_v63 = vadd.f32 %v2221_v32, %v7676_v11  ;;  %v2368_v7 = vrot.slane %v2220_v50, 6  ;;  %v2293_v60 = vadd.f32 %v2292_v47, %v13429_v51  ;;  %v2388_v46 = vrot.slane %v2291_v28, 6  ;;  %v13430_v50 = vld [vmem:[#allocation28_spill] sm:$0xff] }
 0x664   :  { %v2369_v62 = vrot.slane %v2222_v63, 6  ;;  %v2372_v13 = vadd.f32 %v2368_v7, %v7680_v14  ;;  %v2389_v53 = vrot.slane %v2293_v60, 6  ;;  %v2392_v32 = vadd.f32 %v2388_v46, %v7692_v59 }
 0x666   :  { %v2373_v57 = vadd.f32 %v2369_v62, %v7682_v8  ;;  %v4557_v48 = vmul.f32 -1.442695, %v2372_v13  ;;  %v2393_v63 = vadd.f32 %v2389_v53, %v13430_v50  ;;  %v4559_v11 = vmul.f32 -1.442695, %v2392_v32 }
 0x668   :  { %v4558_v58 = vmul.f32 -1.442695, %v2373_v57  ;;  %5064 = vpow2.f32 %v4557_v48  ;;  %v4560_v7 = vmul.f32 -1.442695, %v2393_v63 }
 0x66a   :  { %5066 = vpow2.f32 %v4558_v58 }
 0x66b   :  { %5068 = vpow2.f32 %v4559_v11 }
 0x66c   :  { %5070 = vpow2.f32 %v4560_v7  ;;  %v13431_v7 = vld [vmem:[#allocation83_spill] sm:$0xff] }
 0x675   :  { %v5065_v14 = vpop.eup %5064 }
 0x676   :  { %v2380_v13 = vadd.f32 1.0, %v5065_v14 }
 0x677   :  { %v5067_v62 = vpop.eup %5066 }
 0x678   :  { %v2381_v8 = vadd.f32 1.0, %v5067_v62  ;;  %5072 = vrcp.f32 %v2380_v13  ;;  %v5069_v0 = vpop.eup %5068  ;;  %v13432_v13 = vld [vmem:[#allocation30_spill] sm:$0xff] }
 0x679   :  { %v5071_v57 = vpop.eup %5070  ;;  %v2400_v28 = vadd.f32 1.0, %v5069_v0 }
 0x67a   :  { %5074 = vrcp.f32 %v2381_v8  ;;  %v2401_v46 = vadd.f32 1.0, %v5071_v57  ;;  %v2424_v57 = vrot.slane %v8599_v52, 6 }
 0x67b   :  { %5076 = vrcp.f32 %v2400_v28  ;;  %v2425_v28 = vrot.slane %v8595_v6, 6 }
 0x67c   :  { %5078 = vrcp.f32 %v2401_v46 }
 0x685   :  { %v5073_v32 = vpop.eup %5072 }
 0x687   :  { %v5075_v14 = vpop.eup %5074 }
 0x688   :  { %v5077_v0 = vpop.eup %5076 }
 0x69f   :  { %v2361_v47 = vpop.f32.mrf.mxu1 }
 0x6a0   :  { %v2362_v60 = vadd.f32 %v2361_v47, %v7700_v20  ;;  %v5079_v47 = vpop.eup %5078  ;;  %v2418_v20 = vsub.f32 1.0, %v5077_v0 }
 0x6a1   :  { %v2363_v58 = vpop.f32.mrf.mxu1 }
 0x6a2   :  { %v2408_v48 = vrot.slane %v2362_v60, 6  ;;  %v2364_v53 = vadd.f32 %v2363_v58, %v7702_v61  ;;  %v2419_v58 = vsub.f32 1.0, %v5079_v47 }
 0x6a4   :  { %v2412_v11 = vmul.f32 %v5073_v32, %v2408_v48  ;;  %v2409_v63 = vrot.slane %v2364_v53, 6  ;;  %v2428_v48 = vmul.f32 %v5077_v0, %v2424_v57  ;;  %v2429_v32 = vmul.f32 %v5079_v47, %v2425_v28  ;;  %v9420_v0 = vld [vmem:[%s12449_s12 + $0x518] sm:$0xff]  ;;  %v9427_v57 = vld [vmem:[%s12449_s12 + $0x510] sm:$0xff] }
 0x6a5   :  { %v13436_v47 = vld [vmem:[#allocation87_spill] sm:$0xff]  ;;  %13437 = vst [vmem:[#allocation19_spill] sm:$0xff] %v9427_v57  ;;  %v13440_v28 = vld [vmem:[#allocation90_spill] sm:$0xff] }
 0x6a6   :  { %v2414_v62 = vadd.f32 %v2412_v11, %v13431_v7  ;;  %v2413_v8 = vmul.f32 %v5075_v14, %v2409_v63  ;;  %v2436_v14 = vpop.permute.xlu1 %2435 }
 0x6a7   :  { %vm2437_vm13 = vcmp.eq.s32.totalorder %v2436_v14, 1  ;;  %v9462_v14 = vld [vmem:[%s12449_s12 + $0x488] sm:$0xff] }
 0x6a8   :  { %5080 = vtanh.f32 %v2414_v62  ;;  %v2415_v50 = vadd.f32 %v2413_v8, %v13432_v13  ;;  %13447 = vst [vmem:[#allocation56_spill] sm:$0xff] %v9462_v14 }
 0x6aa   :  { %5082 = vtanh.f32 %v2415_v50 }
 0x6b5   :  { %v5081_v60 = vpop.eup %5080 }
 0x6b6   :  { %v2420_v61 = vmul.f32 %v5081_v60, %v2418_v20  ;;  %v9147_v20 = vld [vmem:[%s12449_s12 + $0x2d0] sm:$0xff]  ;;  %v13438_v60 = vld [vmem:[#allocation32_spill] sm:$0xff] }
 0x6b7   :  { %v5083_v53 = vpop.eup %5082 }
 0x6b8   :  { %v2421_v46 = vmul.f32 %v5083_v53, %v2419_v58  ;;  %v2430_v11 = vadd.f32 %v2428_v48, %v2420_v61  ;;  %v9154_v61 = vld [vmem:[%s12449_s12 + $0x2a8] sm:$0xff]  ;;  %v9441_v48 = vld [vmem:[%s12449_s12 + $0x4e0] sm:$0xff] }
 0x6b9   :  { %v9434_v58 = vld [vmem:[%s12449_s12 + $0x4e8] sm:$0xff]  ;;  %13441 = vst [vmem:[#allocation54_spill] sm:$0xff] %v9441_v48 }
 0x6ba   :  { %v2431_v63 = vadd.f32 %v2429_v32, %v2421_v46  ;;  %v2440_v62 = vrot.slane %v2430_v11, 2  ;;  %13439 = vst [vmem:[#allocation53_spill] sm:$0xff] %v9434_v58  ;;  %v13442_v53 = vld [vmem:[#allocation33_spill] sm:$0xff]  ;;  %v9448_v46 = vld [vmem:[%s12449_s12 + $0x4b8] sm:$0xff]  ;;  %v13444_v32 = vld [vmem:[#allocation34_spill] sm:$0xff] }
 0x6bb   :  { %13443 = vst [vmem:[#allocation20_spill] sm:$0xff] %v9448_v46  ;;  %v9455_v11 = vld [vmem:[%s12449_s12 + $0x4b0] sm:$0xff] }
 0x6bc   :  { %v2441_v50 = vrot.slane %v2431_v63, 2  ;;  %v9135_v13 = vsel %vm2437_vm13, %v2440_v62, %v8599_v52  ;;  %v9168_v52 = vld [vmem:[%s12449_s12 + $0x278] sm:$0xff]  ;;  %13445 = vst [vmem:[#allocation55_spill] sm:$0xff] %v9455_v11 }
 0x6bd   :  { %v13446_v63 = vld [vmem:[#allocation35_spill] sm:$0xff]  ;;  %v13448_v62 = vld [vmem:[#allocation36_spill] sm:$0xff] }
 0x6be   :  { %v9132_v8 = vsel %vm2437_vm13, %v2441_v50, %v8595_v6  ;;  %v9161_v6 = vld [vmem:[%s12449_s12 + $0x2a0] sm:$0xff] }
 0x6bf   :  { %2510 = vmatprep.mubr.f32.mxu0 %v9132_v8  ;;  %2581 = vmatprep.mubr.f32.mxu1 %v9132_v8  ;;  %v9469_v50 = vld [vmem:[%s12449_s12 + $0x480] sm:$0xff] }
 0x6c0   :  { %2511 = vmatmul.mubr.f32.vlgmr.msra.gmra.mxu0 %v9135_v13  ;;  %2582 = vmatmul.mubr.f32.vlgmr.msra.gmra.mxu1 %v9135_v13  ;;  %13449 = vst [vmem:[#allocation57_spill] sm:$0xff] %v9469_v50 }
 0x6c1   :  { %2589 = vmatpush1.msra.mxu0 %v8606_v12  ;;  %2652 = vmatprep.mubr.f32.mxu0 %v9132_v8  ;;  %v9175_v12 = vld [vmem:[%s12449_s12 + $0x270] sm:$0xff] }
 0x6c2   :  { %2590 = vmatprep.subr.mxu0 %v8613_v1  ;;  %2710 = vmatpush1.msra.mxu1 %v9147_v20  ;;  %v9182_v1 = vld [vmem:[%s12449_s12 + $0x248] sm:$0xff] }
 0x6c3   :  { %2591 = vmatpush1.msra.mxu0 %v8620_v15  ;;  %2711 = vmatprep.subr.mxu1 %v9154_v61  ;;  %v9189_v15 = vld [vmem:[%s12449_s12 + $0x240] sm:$0xff] }
 0x6c4   :  { %2592 = vmatprep.subr.mxu0 %v8627_v2  ;;  %2712 = vmatpush1.msra.mxu1 %v9161_v6  ;;  %v9196_v2 = vld [vmem:[%s12449_s12 + $0x218] sm:$0xff] }
 0x6c5   :  { %2593 = vmatpush1.msra.mxu0 %v8634_v45  ;;  %2713 = vmatprep.subr.mxu1 %v9168_v52  ;;  %v9203_v45 = vld [vmem:[%s12449_s12 + $0x210] sm:$0xff] }
 0x6c6   :  { %2594 = vmatprep.subr.mxu0 %v8641_v56  ;;  %2714 = vmatpush1.msra.mxu1 %v9175_v12  ;;  %v9210_v56 = vld [vmem:[%s12449_s12 + $0x1e8] sm:$0xff] }
 0x6c7   :  { %2595 = vmatpush1.msra.mxu0 %v8648_v16  ;;  %2715 = vmatprep.subr.mxu1 %v9182_v1  ;;  %v9217_v16 = vld [vmem:[%s12449_s12 + $0x1e0] sm:$0xff] }
 0x6c8   :  { %2596 = vmatprep.subr.mxu0 %v8655_v9  ;;  %2716 = vmatpush1.msra.mxu1 %v9189_v15  ;;  %v9224_v9 = vld [vmem:[%s12449_s12 + $0x1b8] sm:$0xff] }
 0x6c9   :  { %2597 = vmatpush1.msra.mxu0 %v8662_v36  ;;  %2717 = vmatprep.subr.mxu1 %v9196_v2  ;;  %v9231_v36 = vld [vmem:[%s12449_s12 + $0x1b0] sm:$0xff] }
 0x6ca   :  { %2598 = vmatprep.subr.mxu0 %v8669_v49  ;;  %2718 = vmatpush1.msra.mxu1 %v9203_v45  ;;  %v9238_v49 = vld [vmem:[%s12449_s12 + $0x188] sm:$0xff] }
 0x6cb   :  { %2599 = vmatpush1.msra.mxu0 %v8676_v24  ;;  %2719 = vmatprep.subr.mxu1 %v9210_v56  ;;  %v9245_v24 = vld [vmem:[%s12449_s12 + $0x180] sm:$0xff] }
 0x6cc   :  { %2600 = vmatprep.subr.mxu0 %v8683_v5  ;;  %2720 = vmatpush1.msra.mxu1 %v9217_v16  ;;  %v9252_v5 = vld [vmem:[%s12449_s12 + $0x158] sm:$0xff] }
 0x6cd   :  { %2601 = vmatpush1.msra.mxu0 %v8690_v10  ;;  %2721 = vmatprep.subr.mxu1 %v9224_v9  ;;  %v9259_v10 = vld [vmem:[%s12449_s12 + $0x150] sm:$0xff] }
 0x6ce   :  { %2602 = vmatprep.subr.mxu0 %v8697_v40  ;;  %2722 = vmatpush1.msra.mxu1 %v9231_v36  ;;  %v9266_v40 = vld [vmem:[%s12449_s12 + $0x128] sm:$0xff] }
 0x6cf   :  { %2603 = vmatpush1.msra.mxu0 %v8704_v54  ;;  %2723 = vmatprep.subr.mxu1 %v9238_v49  ;;  %v9273_v54 = vld [vmem:[%s12449_s12 + $0x120] sm:$0xff] }
 0x6d0   :  { %2604 = vmatprep.subr.mxu0 %v8711_v55  ;;  %2724 = vmatpush1.msra.mxu1 %v9245_v24  ;;  %v9280_v55 = vld [vmem:[%s12449_s12 + $0xf8] sm:$0xff] }
 0x6d1   :  { %2605 = vmatpush1.msra.mxu0 %v8718_v43  ;;  %2725 = vmatprep.subr.mxu1 %v9252_v5  ;;  %v9287_v43 = vld [vmem:[%s12449_s12 + $0xf0] sm:$0xff] }
 0x6d2   :  { %2606 = vmatprep.subr.mxu0 %v8725_v30  ;;  %2726 = vmatpush1.msra.mxu1 %v9259_v10  ;;  %v9294_v30 = vld [vmem:[%s12449_s12 + $0xc8] sm:$0xff] }
 0x6d3   :  { %2607 = vmatpush1.msra.mxu0 %v8732_v17  ;;  %2727 = vmatprep.subr.mxu1 %v9266_v40  ;;  %v9301_v17 = vld [vmem:[%s12449_s12 + $0xc0] sm:$0xff] }
 0x6d4   :  { %2608 = vmatprep.subr.mxu0 %v8739_v18  ;;  %2728 = vmatpush1.msra.mxu1 %v9273_v54  ;;  %v9308_v18 = vld [vmem:[%s12449_s12 + $0x98] sm:$0xff] }
 0x6d5   :  { %2609 = vmatpush1.msra.mxu0 %v8746_v19  ;;  %2729 = vmatprep.subr.mxu1 %v9280_v55  ;;  %v9315_v19 = vld [vmem:[%s12449_s12 + $0x90] sm:$0xff] }
 0x6d6   :  { %2610 = vmatprep.subr.mxu0 %v8753_v21  ;;  %2730 = vmatpush1.msra.mxu1 %v9287_v43  ;;  %v9322_v21 = vld [vmem:[%s12449_s12 + $0x68] sm:$0xff] }
 0x6d7   :  { %2611 = vmatpush1.msra.mxu0 %v8760_v22  ;;  %2731 = vmatprep.subr.mxu1 %v9294_v30  ;;  %v9329_v22 = vld [vmem:[%s12449_s12 + $0x60] sm:$0xff] }
 0x6d8   :  { %2612 = vmatprep.subr.mxu0 %v8767_v41  ;;  %2732 = vmatpush1.msra.mxu1 %v9301_v17  ;;  %v9336_v41 = vld [vmem:[%s12449_s12 + $0x38] sm:$0xff] }
 0x6d9   :  { %2613 = vmatpush1.msra.mxu0 %v8774_v23  ;;  %2733 = vmatprep.subr.mxu1 %v9308_v18  ;;  %v9343_v23 = vld [vmem:[%s12449_s12 + $0x30] sm:$0xff] }
 0x6da   :  { %2614 = vmatprep.subr.mxu0 %v8781_v25  ;;  %2734 = vmatpush1.msra.mxu1 %v9315_v19  ;;  %v9350_v25 = vld [vmem:[%s12449_s12 + $0x8] sm:$0xff] }
 0x6db   :  { %2615 = vmatpush1.msra.mxu0 %v8788_v26  ;;  %2735 = vmatprep.subr.mxu1 %v9322_v21  ;;  %v9357_v26 = vld [vmem:[%s12449_s12] sm:$0xff] }
 0x6dc   :  { %2616 = vmatprep.subr.mxu0 %v8795_v34  ;;  %2736 = vmatpush1.msra.mxu1 %v9329_v22  ;;  %v9364_v34 = vld [vmem:[%s12449_s12 + $0x5d8] sm:$0xff] }
 0x6dd   :  { %2617 = vmatpush1.msra.mxu0 %v8802_v27  ;;  %2737 = vmatprep.subr.mxu1 %v9336_v41  ;;  %v9371_v27 = vld [vmem:[%s12449_s12 + $0x5d0] sm:$0xff] }
 0x6de   :  { %2618 = vmatprep.subr.mxu0 %v8809_v29  ;;  %2738 = vmatpush1.msra.mxu1 %v9343_v23  ;;  %v9378_v29 = vld [vmem:[%s12449_s12 + $0x5a8] sm:$0xff] }
 0x6df   :  { %2619 = vmatpush1.msra.mxu0 %v8816_v31  ;;  %2739 = vmatprep.subr.mxu1 %v9350_v25  ;;  %v9385_v31 = vld [vmem:[%s12449_s12 + $0x5a0] sm:$0xff] }
 0x6e0   :  { %2620 = vmatprep.subr.mxu0 %v8823_v38  ;;  %2740 = vmatpush1.msra.mxu1 %v9357_v26  ;;  %v9392_v38 = vld [vmem:[%s12449_s12 + $0x578] sm:$0xff] }
 0x6e1   :  { %2621 = vmatpush2.msra.mxu0 %v8830_v33  ;;  %2741 = vmatprep.subr.mxu1 %v9364_v34  ;;  %v9399_v33 = vld [vmem:[%s12449_s12 + $0x570] sm:$0xff] }
 0x6e2   :  { %2622 = vmatprep.subr.mxu0 %v8837_v35  ;;  %2742 = vmatpush2.msra.mxu1 %v9371_v27  ;;  %v13433_v35 = vld [vmem:[#allocation23_spill] sm:$0xff] }
 0x6e3   :  { %2623 = vmatpush2.msra.mxu0 %v8844_v37  ;;  %2743 = vmatprep.subr.mxu1 %v9378_v29  ;;  %v9406_v37 = vld [vmem:[%s12449_s12 + $0x548] sm:$0xff] }
 0x6e4   :  { %2624 = vmatprep.subr.mxu0 %v8851_v39  ;;  %2744 = vmatpush2.msra.mxu1 %v9385_v31  ;;  %v13434_v39 = vld [vmem:[#allocation85_spill] sm:$0xff] }
 0x6e5   :  { %2625 = vmatpush2.msra.mxu0 %v8858_v42  ;;  %2745 = vmatprep.subr.mxu1 %v9392_v38  ;;  %v9413_v42 = vld [vmem:[%s12449_s12 + $0x540] sm:$0xff] }
 0x6e6   :  { %2626 = vmatprep.subr.mxu0 %v8865_v44  ;;  %2746 = vmatpush2.msra.mxu1 %v9399_v33  ;;  %v13435_v44 = vld [vmem:[#allocation31_spill] sm:$0xff] }
 0x6e7   :  { %2627 = vmatpush2.msra.mxu0 %v13433_v35  ;;  %2747 = vmatprep.subr.mxu1 %v9406_v37  ;;  %v13450_v35 = vld [vmem:[#allocation37_spill] sm:$0xff] }
 0x6e8   :  { %2628 = vmatprep.subr.mxu0 %v13434_v39  ;;  %2748 = vmatpush2.msra.mxu1 %v9413_v42  ;;  %v9476_v39 = vld [vmem:[%s12449_s12 + $0x458] sm:$0xff] }
 0x6e9   :  { %2629 = vmatpush2.msra.mxu0 %v13435_v44  ;;  %2749 = vmatprep.subr.mxu1 %v9420_v0  ;;  %13451 = vst [vmem:[#allocation58_spill] sm:$0xff] %v9476_v39  ;;  %v13452_v44 = vld [vmem:[#allocation38_spill] sm:$0xff] }
 0x6ea   :  { %2630 = vmatprep.subr.mxu0 %v13436_v47  ;;  %2750 = vmatpush2.msra.mxu1 %v9427_v57  ;;  %v9483_v47 = vld [vmem:[%s12449_s12 + $0x450] sm:$0xff]  ;;  %v13550_v57 = vld [vmem:[#allocation28_spill] sm:$0xff] }
 0x6eb   :  { %2631 = vmatpush2.msra.mxu0 %v13438_v60  ;;  %2751 = vmatprep.subr.mxu1 %v9434_v58  ;;  %13453 = vst [vmem:[#allocation59_spill] sm:$0xff] %v9483_v47  ;;  %v13454_v60 = vld [vmem:[#allocation39_spill] sm:$0xff] }
 0x6ec   :  { %2632 = vmatprep.subr.mxu0 %v13440_v28  ;;  %2752 = vmatpush2.msra.mxu1 %v9441_v48  ;;  %v9490_v28 = vld [vmem:[%s12449_s12 + $0x428] sm:$0xff] }
 0x6ed   :  { %2633 = vmatpush2.msra.mxu0 %v13442_v53  ;;  %2753 = vmatprep.subr.mxu1 %v9448_v46  ;;  %13455 = vst [vmem:[#allocation60_spill] sm:$0xff] %v9490_v28  ;;  %v13456_v53 = vld [vmem:[#allocation40_spill] sm:$0xff] }
 0x6ee   :  { %2634 = vmatprep.subr.mxu0 %v13444_v32  ;;  %2754 = vmatpush2.msra.mxu1 %v9455_v11  ;;  %v9497_v32 = vld [vmem:[%s12449_s12 + $0x420] sm:$0xff] }
 0x6ef   :  { %2635 = vmatpush2.msra.mxu0 %v13446_v63  ;;  %2755 = vmatprep.subr.mxu1 %v9462_v14  ;;  %13457 = vst [vmem:[#allocation61_spill] sm:$0xff] %v9497_v32  ;;  %v13458_v63 = vld [vmem:[#allocation41_spill] sm:$0xff] }
 0x6f0   :  { %2636 = vmatprep.subr.mxu0 %v13448_v62  ;;  %2756 = vmatpush2.msra.mxu1 %v9469_v50  ;;  %v9504_v62 = vld [vmem:[%s12449_s12 + $0x3f8] sm:$0xff]  ;;  %v13549_v50 = vld [vmem:[#allocation77_spill] sm:$0xff] }
 0x6f1   :  { %2637 = vmatpush2.msra.mxu0 %v13450_v35  ;;  %2757 = vmatprep.subr.mxu1 %v9476_v39  ;;  %13459 = vst [vmem:[#allocation62_spill] sm:$0xff] %v9504_v62  ;;  %v13460_v35 = vld [vmem:[#allocation42_spill] sm:$0xff] }
 0x6f2   :  { %2638 = vmatprep.subr.mxu0 %v13452_v44  ;;  %2758 = vmatpush2.msra.mxu1 %v9483_v47  ;;  %v9511_v44 = vld [vmem:[%s12449_s12 + $0x3f0] sm:$0xff] }
 0x6f3   :  { %2639 = vmatpush2.msra.mxu0 %v13454_v60  ;;  %2759 = vmatprep.subr.mxu1 %v9490_v28  ;;  %13461 = vst [vmem:[#allocation63_spill] sm:$0xff] %v9511_v44  ;;  %v13462_v60 = vld [vmem:[#allocation43_spill] sm:$0xff]  ;;  %v13548_v47 = vld [vmem:[#allocation26_spill] sm:$0xff] }
 0x6f4   :  { %2640 = vmatprep.subr.mxu0 %v13456_v53  ;;  %2760 = vmatpush2.msra.mxu1 %v9497_v32  ;;  %v9518_v53 = vld [vmem:[%s12449_s12 + $0x3c8] sm:$0xff]  ;;  %v13547_v32 = vld [vmem:[#allocation75_spill] sm:$0xff] }
 0x6f5   :  { %2641 = vmatpush2.msra.mxu0 %v13458_v63  ;;  %2761 = vmatprep.subr.mxu1 %v9504_v62  ;;  %13463 = vst [vmem:[#allocation64_spill] sm:$0xff] %v9518_v53  ;;  %v13464_v63 = vld [vmem:[#allocation44_spill] sm:$0xff]  ;;  %v13466_v62 = vld [vmem:[#allocation45_spill] sm:$0xff] }
 0x6f6   :  { %2642 = vmatprep.subr.mxu0 %v13460_v35  ;;  %2762 = vmatpush2.msra.mxu1 %v9511_v44  ;;  %v9525_v35 = vld [vmem:[%s12449_s12 + $0x3c0] sm:$0xff]  ;;  %v13468_v44 = vld [vmem:[#allocation46_spill] sm:$0xff] }
 0x6f7   :  { %2643 = vmatpush2.msra.mxu0 %v13462_v60  ;;  %2763 = vmatprep.subr.mxu1 %v9518_v53  ;;  %13465 = vst [vmem:[#allocation66_spill] sm:$0xff] %v9525_v35  ;;  %v9532_v60 = vld [vmem:[%s12449_s12 + $0x398] sm:$0xff] }
 0x6f8   :  { %2644 = vmatprep.subr.mxu0 %v13464_v63  ;;  %2764 = vmatpush2.msra.mxu1 %v9525_v35  ;;  %13467 = vst [vmem:[#allocation68_spill] sm:$0xff] %v9532_v60  ;;  %v9539_v63 = vld [vmem:[%s12449_s12 + $0x390] sm:$0xff]  ;;  %v13472_v35 = vld [vmem:[#allocation48_spill] sm:$0xff] }
 0x6f9   :  { %2645 = vmatpush2.msra.mxu0 %v13466_v62  ;;  %2765 = vmatprep.subr.mxu1 %v9532_v60  ;;  %13469 = vst [vmem:[#allocation70_spill] sm:$0xff] %v9539_v63  ;;  %v13470_v53 = vld [vmem:[#allocation47_spill] sm:$0xff]  ;;  %v9546_v62 = vld [vmem:[%s12449_s12 + $0x368] sm:$0xff] }
 0x6fa   :  { %2646 = vmatprep.subr.mxu0 %v13468_v44  ;;  %2766 = vmatpush2.msra.mxu1 %v9539_v63  ;;  %13471 = vst [vmem:[#allocation72_spill] sm:$0xff] %v9546_v62  ;;  %v9553_v44 = vld [vmem:[%s12449_s12 + $0x360] sm:$0xff]  ;;  %v13476_v63 = vld [vmem:[#allocation50_spill] sm:$0xff] }
 0x6fb   :  { %2647 = vmatpush2.msra.mxu0 %v13470_v53  ;;  %2767 = vmatprep.subr.mxu1 %v9546_v62  ;;  %13473 = vst [vmem:[#allocation74_spill] sm:$0xff] %v9553_v44  ;;  %v13474_v60 = vld [vmem:[#allocation49_spill] sm:$0xff]  ;;  %v9560_v53 = vld [vmem:[%s12449_s12 + $0x338] sm:$0xff] }
 0x6fc   :  { %2648 = vmatprep.subr.mxu0 %v13472_v35  ;;  %2768 = vmatpush2.msra.mxu1 %v9553_v44  ;;  %13475 = vst [vmem:[#allocation76_spill] sm:$0xff] %v9560_v53  ;;  %v9567_v35 = vld [vmem:[%s12449_s12 + $0x330] sm:$0xff] }
 0x6fd   :  { %2649 = vmatpush2.msra.mxu0 %v13474_v60  ;;  %2769 = vmatprep.subr.mxu1 %v9560_v53  ;;  %13477 = vst [vmem:[#allocation78_spill] sm:$0xff] %v9567_v35  ;;  %v13478_v62 = vld [vmem:[#allocation51_spill] sm:$0xff]  ;;  %v9574_v60 = vld [vmem:[%s12449_s12 + $0x308] sm:$0xff] }
 0x6fe   :  { %2650 = vmatprep.subr.mxu0 %v13476_v63  ;;  %2770 = vmatpush2.msra.mxu1 %v9567_v35  ;;  %13479 = vst [vmem:[#allocation80_spill] sm:$0xff] %v9574_v60  ;;  %v9581_v63 = vld [vmem:[%s12449_s12 + $0x2e8] sm:$0xff]  ;;  %v9599_v35 = vld [vmem:[%s12449_s12 + $0x2b8] sm:$0xff] }
 0x6ff   :  { %2651 = vmatpush2.msra.mxu0 %v13478_v62  ;;  %2771 = vmatprep.subr.mxu1 %v9574_v60  ;;  %13480 = vst [vmem:[#allocation82_spill] sm:$0xff] %v9581_v63  ;;  %v9587_v62 = vld [vmem:[%s12449_s12 + $0x2e0] sm:$0xff]  ;;  %13483 = vst [vmem:[#allocation86_spill] sm:$0xff] %v9599_v35 }
 0x700   :  { %2653 = vmatmul.mubr.f32.vlgmr.msra.gmra.mxu0 %v9135_v13  ;;  %2780 = vmatprep.subr.mxu0 %v9581_v63  ;;  %13481 = vst [vmem:[#allocation84_spill] sm:$0xff] %v9587_v62  ;;  %v9593_v60 = vld [vmem:[%s12449_s12 + $0x300] sm:$0xff]  ;;  %v9605_v63 = vld [vmem:[%s12449_s12 + $0x2f8] sm:$0xff] }
 0x701   :  { %2781 = vmatpush1.msra.mxu0 %v9587_v62  ;;  %13482 = vst [vmem:[#allocation18_spill] sm:$0xff] %v9593_v60  ;;  %2772 = vmatpush2.msra.mxu1 %v9593_v60  ;;  %13484 = vst [vmem:[#allocation88_spill] sm:$0xff] %v9605_v63  ;;  %v9611_v62 = vld [vmem:[%s12449_s12 + $0x2b0] sm:$0xff]  ;;  %v9617_v60 = vld [vmem:[%s12449_s12 + $0x288] sm:$0xff] }
 0x702   :  { %2782 = vmatprep.subr.mxu0 %v9599_v35  ;;  %2851 = vmatprep.subr.mxu1 %v9605_v63  ;;  %13485 = vst [vmem:[#allocation89_spill] sm:$0xff] %v9611_v62  ;;  %13486 = vst [vmem:[#allocation91_spill] sm:$0xff] %v9617_v60  ;;  %v9623_v35 = vld [vmem:[%s12449_s12 + $0x280] sm:$0xff]  ;;  %v9629_v63 = vld [vmem:[%s12449_s12 + $0x258] sm:$0xff] }
 0x703   :  { %2783 = vmatpush1.msra.mxu0 %v9611_v62  ;;  %13487 = vst [vmem:[#allocation93_spill] sm:$0xff] %v9623_v35  ;;  %13488 = vst [vmem:[#allocation95_spill] sm:$0xff] %v9629_v63  ;;  %v9635_v62 = vld [vmem:[%s12449_s12 + $0x250] sm:$0xff] }
 0x704   :  { %2784 = vmatprep.subr.mxu0 %v9617_v60  ;;  %13489 = vst [vmem:[#allocation97_spill] sm:$0xff] %v9635_v62  ;;  %v9641_v60 = vld [vmem:[%s12449_s12 + $0x228] sm:$0xff] }
 0x705   :  { %2785 = vmatpush1.msra.mxu0 %v9623_v35  ;;  %13490 = vst [vmem:[#allocation99_spill] sm:$0xff] %v9641_v60  ;;  %v9647_v35 = vld [vmem:[%s12449_s12 + $0x220] sm:$0xff] }
 0x706   :  { %2786 = vmatprep.subr.mxu0 %v9629_v63  ;;  %13491 = vst [vmem:[#allocation92_spill] sm:$0xff] %v9647_v35  ;;  %v9653_v63 = vld [vmem:[%s12449_s12 + $0x1f8] sm:$0xff] }
 0x707   :  { %2787 = vmatpush1.msra.mxu0 %v9635_v62  ;;  %13492 = vst [vmem:[#allocation94_spill] sm:$0xff] %v9653_v63  ;;  %v9659_v62 = vld [vmem:[%s12449_s12 + $0x1f0] sm:$0xff] }
 0x708   :  { %2788 = vmatprep.subr.mxu0 %v9641_v60  ;;  %13493 = vst [vmem:[#allocation96_spill] sm:$0xff] %v9659_v62  ;;  %v9665_v60 = vld [vmem:[%s12449_s12 + $0x1c8] sm:$0xff] }
 0x709   :  { %2789 = vmatpush1.msra.mxu0 %v9647_v35  ;;  %13494 = vst [vmem:[#allocation98_spill] sm:$0xff] %v9665_v60  ;;  %v9671_v35 = vld [vmem:[%s12449_s12 + $0x1c0] sm:$0xff] }
 0x70a   :  { %2790 = vmatprep.subr.mxu0 %v9653_v63  ;;  %13495 = vst [vmem:[#allocation100_spill] sm:$0xff] %v9671_v35  ;;  %v9677_v63 = vld [vmem:[%s12449_s12 + $0x198] sm:$0xff] }
 0x70b   :  { %2791 = vmatpush1.msra.mxu0 %v9659_v62  ;;  %13496 = vst [vmem:[#allocation101_spill] sm:$0xff] %v9677_v63  ;;  %v9683_v62 = vld [vmem:[%s12449_s12 + $0x190] sm:$0xff] }
 0x70c   :  { %2792 = vmatprep.subr.mxu0 %v9665_v60  ;;  %13497 = vst [vmem:[#allocation102_spill] sm:$0xff] %v9683_v62  ;;  %v9689_v60 = vld [vmem:[%s12449_s12 + $0x168] sm:$0xff] }
 0x70d   :  { %2793 = vmatpush1.msra.mxu0 %v9671_v35  ;;  %13498 = vst [vmem:[#allocation103_spill] sm:$0xff] %v9689_v60  ;;  %v9695_v35 = vld [vmem:[%s12449_s12 + $0x160] sm:$0xff] }
 0x70e   :  { %2794 = vmatprep.subr.mxu0 %v9677_v63  ;;  %13499 = vst [vmem:[#allocation104_spill] sm:$0xff] %v9695_v35  ;;  %v9701_v63 = vld [vmem:[%s12449_s12 + $0x138] sm:$0xff] }
 0x70f   :  { %2795 = vmatpush1.msra.mxu0 %v9683_v62  ;;  %13500 = vst [vmem:[#allocation105_spill] sm:$0xff] %v9701_v63  ;;  %v9707_v62 = vld [vmem:[%s12449_s12 + $0x130] sm:$0xff] }
 0x710   :  { %2796 = vmatprep.subr.mxu0 %v9689_v60  ;;  %13501 = vst [vmem:[#allocation106_spill] sm:$0xff] %v9707_v62  ;;  %v9713_v60 = vld [vmem:[%s12449_s12 + $0x108] sm:$0xff] }
 0x711   :  { %2797 = vmatpush1.msra.mxu0 %v9695_v35  ;;  %13502 = vst [vmem:[#allocation107_spill] sm:$0xff] %v9713_v60  ;;  %v9719_v35 = vld [vmem:[%s12449_s12 + $0x100] sm:$0xff] }
 0x712   :  { %2798 = vmatprep.subr.mxu0 %v9701_v63  ;;  %13503 = vst [vmem:[#allocation108_spill] sm:$0xff] %v9719_v35  ;;  %v9725_v63 = vld [vmem:[%s12449_s12 + $0xd8] sm:$0xff] }
 0x713   :  { %2799 = vmatpush1.msra.mxu0 %v9707_v62  ;;  %13504 = vst [vmem:[#allocation109_spill] sm:$0xff] %v9725_v63  ;;  %v9731_v62 = vld [vmem:[%s12449_s12 + $0xd0] sm:$0xff] }
 0x714   :  { %2800 = vmatprep.subr.mxu0 %v9713_v60  ;;  %13505 = vst [vmem:[#allocation110_spill] sm:$0xff] %v9731_v62  ;;  %v9737_v60 = vld [vmem:[%s12449_s12 + $0xa8] sm:$0xff] }
 0x715   :  { %2801 = vmatpush1.msra.mxu0 %v9719_v35  ;;  %13506 = vst [vmem:[#allocation111_spill] sm:$0xff] %v9737_v60  ;;  %v9743_v35 = vld [vmem:[%s12449_s12 + $0xa0] sm:$0xff] }
 0x716   :  { %2802 = vmatprep.subr.mxu0 %v9725_v63  ;;  %13507 = vst [vmem:[#allocation112_spill] sm:$0xff] %v9743_v35  ;;  %v9749_v63 = vld [vmem:[%s12449_s12 + $0x78] sm:$0xff] }
 0x717   :  { %2803 = vmatpush1.msra.mxu0 %v9731_v62  ;;  %13508 = vst [vmem:[#allocation113_spill] sm:$0xff] %v9749_v63  ;;  %v9755_v62 = vld [vmem:[%s12449_s12 + $0x70] sm:$0xff] }
 0x718   :  { %2804 = vmatprep.subr.mxu0 %v9737_v60  ;;  %13509 = vst [vmem:[#allocation114_spill] sm:$0xff] %v9755_v62  ;;  %v9761_v60 = vld [vmem:[%s12449_s12 + $0x48] sm:$0xff] }
 0x719   :  { %2805 = vmatpush1.msra.mxu0 %v9743_v35  ;;  %13510 = vst [vmem:[#allocation115_spill] sm:$0xff] %v9761_v60  ;;  %v9767_v35 = vld [vmem:[%s12449_s12 + $0x40] sm:$0xff] }
 0x71a   :  { %2806 = vmatprep.subr.mxu0 %v9749_v63  ;;  %13511 = vst [vmem:[#allocation116_spill] sm:$0xff] %v9767_v35  ;;  %v9773_v63 = vld [vmem:[%s12449_s12 + $0x18] sm:$0xff] }
 0x71b   :  { %2807 = vmatpush1.msra.mxu0 %v9755_v62  ;;  %13512 = vst [vmem:[#allocation117_spill] sm:$0xff] %v9773_v63  ;;  %v9779_v62 = vld [vmem:[%s12449_s12 + $0x10] sm:$0xff] }
 0x71c   :  { %2808 = vmatprep.subr.mxu0 %v9761_v60  ;;  %13513 = vst [vmem:[#allocation118_spill] sm:$0xff] %v9779_v62  ;;  %v9785_v60 = vld [vmem:[%s12449_s12 + $0x5e8] sm:$0xff] }
 0x71d   :  { %2809 = vmatpush1.msra.mxu0 %v9767_v35  ;;  %13514 = vst [vmem:[#allocation119_spill] sm:$0xff] %v9785_v60  ;;  %v9791_v35 = vld [vmem:[%s12449_s12 + $0x5e0] sm:$0xff] }
 0x71e   :  { %2810 = vmatprep.subr.mxu0 %v9773_v63  ;;  %13515 = vst [vmem:[#allocation120_spill] sm:$0xff] %v9791_v35  ;;  %v9797_v63 = vld [vmem:[%s12449_s12 + $0x5b8] sm:$0xff] }
 0x71f   :  { %2811 = vmatpush1.msra.mxu0 %v9779_v62  ;;  %13516 = vst [vmem:[#allocation121_spill] sm:$0xff] %v9797_v63  ;;  %v9803_v62 = vld [vmem:[%s12449_s12 + $0x5b0] sm:$0xff] }
 0x720   :  { %2812 = vmatprep.subr.mxu0 %v9785_v60  ;;  %13517 = vst [vmem:[#allocation122_spill] sm:$0xff] %v9803_v62  ;;  %v9809_v60 = vld [vmem:[%s12449_s12 + $0x588] sm:$0xff] }
 0x721   :  { %2813 = vmatpush2.msra.mxu0 %v9791_v35  ;;  %13518 = vst [vmem:[#allocation123_spill] sm:$0xff] %v9809_v60  ;;  %v9815_v35 = vld [vmem:[%s12449_s12 + $0x580] sm:$0xff] }
 0x722   :  { %2814 = vmatprep.subr.mxu0 %v9797_v63  ;;  %13519 = vst [vmem:[#allocation124_spill] sm:$0xff] %v9815_v35  ;;  %v9821_v63 = vld [vmem:[%s12449_s12 + $0x558] sm:$0xff] }
 0x723   :  { %2815 = vmatpush2.msra.mxu0 %v9803_v62  ;;  %13520 = vst [vmem:[#allocation125_spill] sm:$0xff] %v9821_v63  ;;  %v9827_v62 = vld [vmem:[%s12449_s12 + $0x550] sm:$0xff] }
 0x724   :  { %2816 = vmatprep.subr.mxu0 %v9809_v60  ;;  %13521 = vst [vmem:[#allocation126_spill] sm:$0xff] %v9827_v62  ;;  %v9833_v60 = vld [vmem:[%s12449_s12 + $0x528] sm:$0xff] }
 0x725   :  { %2817 = vmatpush2.msra.mxu0 %v9815_v35  ;;  %13522 = vst [vmem:[#allocation127_spill] sm:$0xff] %v9833_v60  ;;  %v9839_v35 = vld [vmem:[%s12449_s12 + $0x520] sm:$0xff] }
 0x726   :  { %2818 = vmatprep.subr.mxu0 %v9821_v63  ;;  %13523 = vst [vmem:[#allocation128_spill] sm:$0xff] %v9839_v35  ;;  %v9845_v63 = vld [vmem:[%s12449_s12 + $0x4f8] sm:$0xff] }
 0x727   :  { %2819 = vmatpush2.msra.mxu0 %v9827_v62  ;;  %13524 = vst [vmem:[#allocation129_spill] sm:$0xff] %v9845_v63  ;;  %v9851_v62 = vld [vmem:[%s12449_s12 + $0x4f0] sm:$0xff] }
 0x728   :  { %2820 = vmatprep.subr.mxu0 %v9833_v60  ;;  %13525 = vst [vmem:[#allocation130_spill] sm:$0xff] %v9851_v62  ;;  %v9857_v60 = vld [vmem:[%s12449_s12 + $0x4c8] sm:$0xff] }
 0x729   :  { %2821 = vmatpush2.msra.mxu0 %v9839_v35  ;;  %13526 = vst [vmem:[#allocation27_spill] sm:$0xff] %v9857_v60  ;;  %v9863_v35 = vld [vmem:[%s12449_s12 + $0x4c0] sm:$0xff] }
 0x72a   :  { %2822 = vmatprep.subr.mxu0 %v9845_v63  ;;  %13527 = vst [vmem:[#allocation83_spill] sm:$0xff] %v9863_v35  ;;  %v9869_v63 = vld [vmem:[%s12449_s12 + $0x498] sm:$0xff] }
 0x72b   :  { %2823 = vmatpush2.msra.mxu0 %v9851_v62  ;;  %13528 = vst [vmem:[#allocation23_spill] sm:$0xff] %v9869_v63  ;;  %v9875_v62 = vld [vmem:[%s12449_s12 + $0x490] sm:$0xff] }
 0x72c   :  { %2824 = vmatprep.subr.mxu0 %v9857_v60  ;;  %13529 = vst [vmem:[#allocation85_spill] sm:$0xff] %v9875_v62  ;;  %v9881_v60 = vld [vmem:[%s12449_s12 + $0x468] sm:$0xff] }
 0x72d   :  { %2825 = vmatpush2.msra.mxu0 %v9863_v35  ;;  %13530 = vst [vmem:[#allocation31_spill] sm:$0xff] %v9881_v60  ;;  %v9887_v35 = vld [vmem:[%s12449_s12 + $0x460] sm:$0xff] }
 0x72e   :  { %2826 = vmatprep.subr.mxu0 %v9869_v63  ;;  %13531 = vst [vmem:[#allocation87_spill] sm:$0xff] %v9887_v35  ;;  %v9893_v63 = vld [vmem:[%s12449_s12 + $0x438] sm:$0xff] }
 0x72f   :  { %2827 = vmatpush2.msra.mxu0 %v9875_v62  ;;  %13532 = vst [vmem:[#allocation32_spill] sm:$0xff] %v9893_v63  ;;  %v9899_v62 = vld [vmem:[%s12449_s12 + $0x430] sm:$0xff] }
 0x730   :  { %2828 = vmatprep.subr.mxu0 %v9881_v60  ;;  %13533 = vst [vmem:[#allocation90_spill] sm:$0xff] %v9899_v62  ;;  %v9905_v60 = vld [vmem:[%s12449_s12 + $0x408] sm:$0xff] }
 0x731   :  { %2829 = vmatpush2.msra.mxu0 %v9887_v35  ;;  %13534 = vst [vmem:[#allocation33_spill] sm:$0xff] %v9905_v60  ;;  %v9911_v35 = vld [vmem:[%s12449_s12 + $0x400] sm:$0xff] }
 0x732   :  { %2830 = vmatprep.subr.mxu0 %v9893_v63  ;;  %13535 = vst [vmem:[#allocation34_spill] sm:$0xff] %v9911_v35  ;;  %v9917_v63 = vld [vmem:[%s12449_s12 + $0x3d8] sm:$0xff] }
 0x733   :  { %2831 = vmatpush2.msra.mxu0 %v9899_v62  ;;  %13536 = vst [vmem:[#allocation35_spill] sm:$0xff] %v9917_v63  ;;  %v9923_v62 = vld [vmem:[%s12449_s12 + $0x3d0] sm:$0xff] }
 0x734   :  { %2832 = vmatprep.subr.mxu0 %v9905_v60  ;;  %13537 = vst [vmem:[#allocation36_spill] sm:$0xff] %v9923_v62  ;;  %v9929_v60 = vld [vmem:[%s12449_s12 + $0x3a8] sm:$0xff] }
 0x735   :  { %2833 = vmatpush2.msra.mxu0 %v9911_v35  ;;  %13538 = vst [vmem:[#allocation37_spill] sm:$0xff] %v9929_v60  ;;  %v9935_v35 = vld [vmem:[%s12449_s12 + $0x3a0] sm:$0xff] }
 0x736   :  { %2834 = vmatprep.subr.mxu0 %v9917_v63  ;;  %13539 = vst [vmem:[#allocation38_spill] sm:$0xff] %v9935_v35  ;;  %v9941_v63 = vld [vmem:[%s12449_s12 + $0x378] sm:$0xff] }
 0x737   :  { %2835 = vmatpush2.msra.mxu0 %v9923_v62  ;;  %13540 = vst [vmem:[#allocation39_spill] sm:$0xff] %v9941_v63  ;;  %v9947_v62 = vld [vmem:[%s12449_s12 + $0x370] sm:$0xff] }
 0x738   :  { %2836 = vmatprep.subr.mxu0 %v9929_v60  ;;  %13541 = vst [vmem:[#allocation40_spill] sm:$0xff] %v9947_v62  ;;  %v9953_v60 = vld [vmem:[%s12449_s12 + $0x348] sm:$0xff] }
 0x739   :  { %2837 = vmatpush2.msra.mxu0 %v9935_v35  ;;  %13542 = vst [vmem:[#allocation41_spill] sm:$0xff] %v9953_v60  ;;  %v9959_v35 = vld [vmem:[%s12449_s12 + $0x340] sm:$0xff] }
 0x73a   :  { %2838 = vmatprep.subr.mxu0 %v9941_v63  ;;  %13543 = vst [vmem:[#allocation42_spill] sm:$0xff] %v9959_v35  ;;  %v9965_v63 = vld [vmem:[%s12449_s12 + $0x318] sm:$0xff] }
 0x73b   :  { %2839 = vmatpush2.msra.mxu0 %v9947_v62  ;;  %13544 = vst [vmem:[#allocation43_spill] sm:$0xff] %v9965_v63  ;;  %v9971_v62 = vld [vmem:[%s12449_s12 + $0x310] sm:$0xff] }
 0x73c   :  { %2840 = vmatprep.subr.mxu0 %v9953_v60  ;;  %13545 = vst [vmem:[#allocation44_spill] sm:$0xff] %v9971_v62  ;;  %v13546_v60 = vld [vmem:[#allocation52_spill] sm:$0xff] }
 0x73d   :  { %2841 = vmatpush2.msra.mxu0 %v9959_v35 }
 0x73e   :  { %2842 = vmatprep.subr.mxu0 %v9965_v63 }
 0x73f   :  { %2843 = vmatpush2.msra.mxu0 %v9971_v62 }
 0x740   :  { %3002 = vmatprep.subr.mxu0 %v13546_v60 }
 0x780   :  { %v2512_v53 = vpop.f32.mrf.mxu0  ;;  %v2583_v11 = vpop.f32.mrf.mxu1 }
 0x781   :  { %v2513_v35 = vadd.f32 %v2512_v53, %v13307_v3  ;;  %v2584_v58 = vadd.f32 %v2583_v11, %v13428_v4 }
 0x782   :  { %v2514_v44 = vpop.f32.mrf.mxu0  ;;  %v2585_v48 = vpop.f32.mrf.mxu1 }
 0x783   :  { %v2515_v28 = vadd.f32 %v2514_v44, %v13547_v32  ;;  %v2659_v39 = vadd.f32 %v2513_v35, %v13548_v47  ;;  %v2586_v60 = vadd.f32 %v2585_v48, %v13429_v51  ;;  %v2673_v62 = vadd.f32 %v2584_v58, %v7692_v59  ;;  %v13551_v48 = vld [vmem:[#allocation81_spill] sm:$0xff] }
 0x785   :  { %v2660_v14 = vadd.f32 %v2515_v28, %v13549_v50  ;;  %v4561_v63 = vmul.f32 -1.442695, %v2659_v39  ;;  %v2674_v53 = vadd.f32 %v2586_v60, %v13550_v57  ;;  %v4563_v3 = vmul.f32 -1.442695, %v2673_v62  ;;  %v13552_v62 = vld [vmem:[#allocation29_spill] sm:$0xff] }
 0x787   :  { %v4562_v46 = vmul.f32 -1.442695, %v2660_v14  ;;  %5084 = vpow2.f32 %v4561_v63  ;;  %v4564_v44 = vmul.f32 -1.442695, %v2674_v53 }
 0x789   :  { %5086 = vpow2.f32 %v4562_v46 }
 0x78a   :  { %5088 = vpow2.f32 %v4563_v3 }
 0x78b   :  { %5090 = vpow2.f32 %v4564_v44  ;;  %v13553_v44 = vld [vmem:[#allocation30_spill] sm:$0xff] }
 0x794   :  { %v5085_v32 = vpop.eup %5084 }
 0x795   :  { %v2667_v50 = vadd.f32 1.0, %v5085_v32 }
 0x796   :  { %v5087_v47 = vpop.eup %5086 }
 0x797   :  { %v2668_v39 = vadd.f32 1.0, %v5087_v47  ;;  %5092 = vrcp.f32 %v2667_v50  ;;  %v5089_v14 = vpop.eup %5088 }
 0x798   :  { %v5091_v28 = vpop.eup %5090  ;;  %v2681_v11 = vadd.f32 1.0, %v5089_v14 }
 0x799   :  { %5094 = vrcp.f32 %v2668_v39  ;;  %v2682_v35 = vadd.f32 1.0, %v5091_v28 }
 0x79a   :  { %5096 = vrcp.f32 %v2681_v11 }
 0x79b   :  { %5098 = vrcp.f32 %v2682_v35 }
 0x7a4   :  { %v5093_v59 = vpop.eup %5092 }
 0x7a6   :  { %v5095_v3 = vpop.eup %5094 }
 0x7a7   :  { %v5097_v50 = vpop.eup %5096 }
 0x7a8   :  { %v5099_v39 = vpop.eup %5098  ;;  %v2693_v14 = vsub.f32 1.0, %v5097_v50  ;;  %v2697_v11 = vmul.f32 %v5097_v50, %v9135_v13  ;;  %v10317_v50 = vld [vmem:[%s12449_s12 + $0x4a8] sm:$0xff] }
 0x7a9   :  { %13563 = vst [vmem:[#allocation50_spill] sm:$0xff] %v10317_v50 }
 0x7c0   :  { %v2654_v46 = vpop.f32.mrf.mxu0 }
 0x7c1   :  { %v2655_v63 = vadd.f32 %v2654_v46, %v13551_v48  ;;  %v2694_v46 = vsub.f32 1.0, %v5099_v39 }
 0x7c2   :  { %v2656_v58 = vpop.f32.mrf.mxu0 }
 0x7c3   :  { %v2687_v57 = vmul.f32 %v5093_v59, %v2655_v63  ;;  %v2657_v60 = vadd.f32 %v2656_v58, %v13552_v62  ;;  %v2698_v59 = vmul.f32 %v5099_v39, %v9132_v8  ;;  %v2705_v58 = vpop.permute.xlu1 %2704  ;;  %v13564_v39 = vld [vmem:[#allocation55_spill] sm:$0xff] }
 0x7c4   :  { %vm2706_vm14 = vcmp.eq.s32.totalorder %v2705_v58, 1  ;;  %v13572_v58 = vld [vmem:[#allocation59_spill] sm:$0xff] }
 0x7c5   :  { %v2689_v32 = vadd.f32 %v2687_v57, %v13431_v7  ;;  %v2688_v53 = vmul.f32 %v5095_v3, %v2657_v60  ;;  %v13556_v3 = vld [vmem:[#allocation19_spill] sm:$0xff] }
 0x7c7   :  { %5100 = vtanh.f32 %v2689_v32  ;;  %v2690_v47 = vadd.f32 %v2688_v53, %v13553_v44  ;;  %v13558_v32 = vld [vmem:[#allocation53_spill] sm:$0xff]  ;;  %v13560_v53 = vld [vmem:[#allocation54_spill] sm:$0xff] }
 0x7c8   :  { %v10310_v44 = vld [vmem:[%s12449_s12 + $0x4d0] sm:$0xff] }
 0x7c9   :  { %5102 = vtanh.f32 %v2690_v47  ;;  %13561 = vst [vmem:[#allocation49_spill] sm:$0xff] %v10310_v44  ;;  %v13562_v47 = vld [vmem:[#allocation20_spill] sm:$0xff] }
 0x7d4   :  { %v5101_v28 = vpop.eup %5100 }
 0x7d5   :  { %v2695_v48 = vmul.f32 %v5101_v28, %v2693_v14  ;;  %v10324_v14 = vld [vmem:[%s12449_s12 + $0x4a0] sm:$0xff] }
 0x7d6   :  { %v5103_v51 = vpop.eup %5102  ;;  %13565 = vst [vmem:[#allocation51_spill] sm:$0xff] %v10324_v14  ;;  %v13566_v28 = vld [vmem:[#allocation56_spill] sm:$0xff] }
 0x7d7   :  { %v2696_v63 = vmul.f32 %v5103_v51, %v2694_v46  ;;  %v2699_v35 = vadd.f32 %v2697_v11, %v2695_v48  ;;  %v10002_v51 = vld [vmem:[%s12449_s12 + $0x2f0] sm:$0xff]  ;;  %v10023_v48 = vld [vmem:[%s12449_s12 + $0x298] sm:$0xff]  ;;  %v13568_v11 = vld [vmem:[#allocation57_spill] sm:$0xff] }
 0x7d8   :  { %v10331_v46 = vld [vmem:[%s12449_s12 + $0x478] sm:$0xff] }
 0x7d9   :  { %v2700_v7 = vadd.f32 %v2698_v59, %v2696_v63  ;;  %v9995_v60 = vsel %vm2706_vm14, %v2699_v35, %v9135_v13  ;;  %v10016_v13 = vld [vmem:[%s12449_s12 + $0x2c0] sm:$0xff]  ;;  %13567 = vst [vmem:[#allocation52_spill] sm:$0xff] %v10331_v46  ;;  %v10338_v63 = vld [vmem:[%s12449_s12 + $0x470] sm:$0xff]  ;;  %v10345_v35 = vld [vmem:[%s12449_s12 + $0x448] sm:$0xff] }
 0x7da   :  { %13569 = vst [vmem:[#allocation26_spill] sm:$0xff] %v10338_v63  ;;  %v13570_v59 = vld [vmem:[#allocation58_spill] sm:$0xff]  ;;  %13571 = vst [vmem:[#allocation77_spill] sm:$0xff] %v10345_v35 }
 0x7db   :  { %v9990_v57 = vsel %vm2706_vm14, %v2700_v7, %v9132_v8  ;;  %v10009_v8 = vld [vmem:[%s12449_s12 + $0x2c8] sm:$0xff]  ;;  %v10352_v7 = vld [vmem:[%s12449_s12 + $0x440] sm:$0xff] }
 0x7dc   :  { %2773 = vmatprep.mubr.f32.mxu1 %v9990_v57  ;;  %2844 = vmatprep.mubr.f32.mxu0 %v9990_v57  ;;  %13573 = vst [vmem:[#allocation28_spill] sm:$0xff] %v10352_v7 }
 0x7dd   :  { %2774 = vmatmul.mubr.f32.vlgmr.msra.gmra.mxu1 %v9995_v60  ;;  %2845 = vmatmul.mubr.f32.vlgmr.msra.gmra.mxu0 %v9995_v60 }
 0x7de   :  { %2852 = vmatpush1.msra.mxu1 %v10002_v51  ;;  %2915 = vmatprep.mubr.f32.mxu1 %v9990_v57 }
 0x7df   :  { %2853 = vmatprep.subr.mxu1 %v10009_v8  ;;  %3003 = vmatpush1.msra.mxu0 %v9147_v20  ;;  %v10030_v20 = vld [vmem:[%s12449_s12 + $0x290] sm:$0xff] }
 0x7e0   :  { %2854 = vmatpush1.msra.mxu1 %v10016_v13  ;;  %3004 = vmatprep.subr.mxu0 %v9154_v61  ;;  %v10037_v61 = vld [vmem:[%s12449_s12 + $0x268] sm:$0xff] }
 0x7e1   :  { %2855 = vmatprep.subr.mxu1 %v10023_v48  ;;  %3005 = vmatpush1.msra.mxu0 %v9161_v6  ;;  %v10044_v6 = vld [vmem:[%s12449_s12 + $0x260] sm:$0xff] }
 0x7e2   :  { %2856 = vmatpush1.msra.mxu1 %v10030_v20  ;;  %3006 = vmatprep.subr.mxu0 %v9168_v52  ;;  %v10051_v52 = vld [vmem:[%s12449_s12 + $0x238] sm:$0xff] }
 0x7e3   :  { %2857 = vmatprep.subr.mxu1 %v10037_v61  ;;  %3007 = vmatpush1.msra.mxu0 %v9175_v12  ;;  %v10058_v12 = vld [vmem:[%s12449_s12 + $0x230] sm:$0xff] }
 0x7e4   :  { %2858 = vmatpush1.msra.mxu1 %v10044_v6  ;;  %3008 = vmatprep.subr.mxu0 %v9182_v1  ;;  %v10065_v1 = vld [vmem:[%s12449_s12 + $0x208] sm:$0xff] }
 0x7e5   :  { %2859 = vmatprep.subr.mxu1 %v10051_v52  ;;  %3009 = vmatpush1.msra.mxu0 %v9189_v15  ;;  %v10072_v15 = vld [vmem:[%s12449_s12 + $0x200] sm:$0xff] }
 0x7e6   :  { %2860 = vmatpush1.msra.mxu1 %v10058_v12  ;;  %3010 = vmatprep.subr.mxu0 %v9196_v2  ;;  %v10079_v2 = vld [vmem:[%s12449_s12 + $0x1d8] sm:$0xff] }
 0x7e7   :  { %2861 = vmatprep.subr.mxu1 %v10065_v1  ;;  %3011 = vmatpush1.msra.mxu0 %v9203_v45  ;;  %v10086_v45 = vld [vmem:[%s12449_s12 + $0x1d0] sm:$0xff] }
 0x7e8   :  { %2862 = vmatpush1.msra.mxu1 %v10072_v15  ;;  %3012 = vmatprep.subr.mxu0 %v9210_v56  ;;  %v10093_v56 = vld [vmem:[%s12449_s12 + $0x1a8] sm:$0xff] }
 0x7e9   :  { %2863 = vmatprep.subr.mxu1 %v10079_v2  ;;  %3013 = vmatpush1.msra.mxu0 %v9217_v16  ;;  %v10100_v16 = vld [vmem:[%s12449_s12 + $0x1a0] sm:$0xff] }
 0x7ea   :  { %2864 = vmatpush1.msra.mxu1 %v10086_v45  ;;  %3014 = vmatprep.subr.mxu0 %v9224_v9  ;;  %v10107_v9 = vld [vmem:[%s12449_s12 + $0x178] sm:$0xff] }
 0x7eb   :  { %2865 = vmatprep.subr.mxu1 %v10093_v56  ;;  %3015 = vmatpush1.msra.mxu0 %v9231_v36  ;;  %v10114_v36 = vld [vmem:[%s12449_s12 + $0x170] sm:$0xff] }
 0x7ec   :  { %2866 = vmatpush1.msra.mxu1 %v10100_v16  ;;  %3016 = vmatprep.subr.mxu0 %v9238_v49  ;;  %v10121_v49 = vld [vmem:[%s12449_s12 + $0x148] sm:$0xff] }
 0x7ed   :  { %2867 = vmatprep.subr.mxu1 %v10107_v9  ;;  %3017 = vmatpush1.msra.mxu0 %v9245_v24  ;;  %v10128_v24 = vld [vmem:[%s12449_s12 + $0x140] sm:$0xff] }
 0x7ee   :  { %2868 = vmatpush1.msra.mxu1 %v10114_v36  ;;  %3018 = vmatprep.subr.mxu0 %v9252_v5  ;;  %v10135_v5 = vld [vmem:[%s12449_s12 + $0x118] sm:$0xff] }
 0x7ef   :  { %2869 = vmatprep.subr.mxu1 %v10121_v49  ;;  %3019 = vmatpush1.msra.mxu0 %v9259_v10  ;;  %v10142_v10 = vld [vmem:[%s12449_s12 + $0x110] sm:$0xff] }
 0x7f0   :  { %2870 = vmatpush1.msra.mxu1 %v10128_v24  ;;  %3020 = vmatprep.subr.mxu0 %v9266_v40  ;;  %v10149_v40 = vld [vmem:[%s12449_s12 + $0xe8] sm:$0xff] }
 0x7f1   :  { %2871 = vmatprep.subr.mxu1 %v10135_v5  ;;  %3021 = vmatpush1.msra.mxu0 %v9273_v54  ;;  %v10156_v54 = vld [vmem:[%s12449_s12 + $0xe0] sm:$0xff] }
 0x7f2   :  { %2872 = vmatpush1.msra.mxu1 %v10142_v10  ;;  %3022 = vmatprep.subr.mxu0 %v9280_v55  ;;  %v10163_v55 = vld [vmem:[%s12449_s12 + $0xb8] sm:$0xff] }
 0x7f3   :  { %2873 = vmatprep.subr.mxu1 %v10149_v40  ;;  %3023 = vmatpush1.msra.mxu0 %v9287_v43  ;;  %v10170_v43 = vld [vmem:[%s12449_s12 + $0xb0] sm:$0xff] }
 0x7f4   :  { %2874 = vmatpush1.msra.mxu1 %v10156_v54  ;;  %3024 = vmatprep.subr.mxu0 %v9294_v30  ;;  %v10177_v30 = vld [vmem:[%s12449_s12 + $0x88] sm:$0xff] }
 0x7f5   :  { %2875 = vmatprep.subr.mxu1 %v10163_v55  ;;  %3025 = vmatpush1.msra.mxu0 %v9301_v17  ;;  %v10184_v17 = vld [vmem:[%s12449_s12 + $0x80] sm:$0xff] }
 0x7f6   :  { %2876 = vmatpush1.msra.mxu1 %v10170_v43  ;;  %3026 = vmatprep.subr.mxu0 %v9308_v18  ;;  %v10191_v18 = vld [vmem:[%s12449_s12 + $0x58] sm:$0xff] }
 0x7f7   :  { %2877 = vmatprep.subr.mxu1 %v10177_v30  ;;  %3027 = vmatpush1.msra.mxu0 %v9315_v19  ;;  %v10198_v19 = vld [vmem:[%s12449_s12 + $0x50] sm:$0xff] }
 0x7f8   :  { %2878 = vmatpush1.msra.mxu1 %v10184_v17  ;;  %3028 = vmatprep.subr.mxu0 %v9322_v21  ;;  %v10205_v21 = vld [vmem:[%s12449_s12 + $0x28] sm:$0xff] }
 0x7f9   :  { %2879 = vmatprep.subr.mxu1 %v10191_v18  ;;  %3029 = vmatpush1.msra.mxu0 %v9329_v22  ;;  %v10212_v22 = vld [vmem:[%s12449_s12 + $0x20] sm:$0xff] }
 0x7fa   :  { %2880 = vmatpush1.msra.mxu1 %v10198_v19  ;;  %3030 = vmatprep.subr.mxu0 %v9336_v41  ;;  %v10219_v41 = vld [vmem:[%s12449_s12 + $0x5f8] sm:$0xff] }
 0x7fb   :  { %2881 = vmatprep.subr.mxu1 %v10205_v21  ;;  %3031 = vmatpush1.msra.mxu0 %v9343_v23  ;;  %v10226_v23 = vld [vmem:[%s12449_s12 + $0x5f0] sm:$0xff] }
 0x7fc   :  { %2882 = vmatpush1.msra.mxu1 %v10212_v22  ;;  %3032 = vmatprep.subr.mxu0 %v9350_v25  ;;  %v10233_v25 = vld [vmem:[%s12449_s12 + $0x5c8] sm:$0xff] }
 0x7fd   :  { %2883 = vmatprep.subr.mxu1 %v10219_v41  ;;  %3033 = vmatpush1.msra.mxu0 %v9357_v26  ;;  %v10240_v26 = vld [vmem:[%s12449_s12 + $0x5c0] sm:$0xff] }
 0x7fe   :  { %2884 = vmatpush2.msra.mxu1 %v10226_v23  ;;  %3034 = vmatprep.subr.mxu0 %v9364_v34  ;;  %v10247_v34 = vld [vmem:[%s12449_s12 + $0x598] sm:$0xff] }
 0x7ff   :  { %2885 = vmatprep.subr.mxu1 %v10233_v25  ;;  %3035 = vmatpush2.msra.mxu0 %v9371_v27  ;;  %v10254_v27 = vld [vmem:[%s12449_s12 + $0x590] sm:$0xff] }
 0x800   :  { %2886 = vmatpush2.msra.mxu1 %v10240_v26  ;;  %3036 = vmatprep.subr.mxu0 %v9378_v29  ;;  %v10261_v29 = vld [vmem:[%s12449_s12 + $0x568] sm:$0xff] }
 0x801   :  { %2887 = vmatprep.subr.mxu1 %v10247_v34  ;;  %3037 = vmatpush2.msra.mxu0 %v9385_v31  ;;  %v10268_v31 = vld [vmem:[%s12449_s12 + $0x560] sm:$0xff] }
 0x802   :  { %2888 = vmatpush2.msra.mxu1 %v10254_v27  ;;  %3038 = vmatprep.subr.mxu0 %v9392_v38  ;;  %v10275_v38 = vld [vmem:[%s12449_s12 + $0x538] sm:$0xff] }
 0x803   :  { %2889 = vmatprep.subr.mxu1 %v10261_v29  ;;  %3039 = vmatpush2.msra.mxu0 %v9399_v33  ;;  %v10282_v33 = vld [vmem:[%s12449_s12 + $0x530] sm:$0xff] }
 0x804   :  { %2890 = vmatpush2.msra.mxu1 %v10268_v31  ;;  %3040 = vmatprep.subr.mxu0 %v9406_v37  ;;  %13554 = vst [vmem:[#allocation45_spill] sm:$0xff] %v10282_v33  ;;  %v10289_v37 = vld [vmem:[%s12449_s12 + $0x508] sm:$0xff] }
 0x805   :  { %2891 = vmatprep.subr.mxu1 %v10275_v38  ;;  %3041 = vmatpush2.msra.mxu0 %v9413_v42  ;;  %13555 = vst [vmem:[#allocation46_spill] sm:$0xff] %v10289_v37  ;;  %v10296_v42 = vld [vmem:[%s12449_s12 + $0x500] sm:$0xff] }
 0x806   :  { %2892 = vmatpush2.msra.mxu1 %v10282_v33  ;;  %3042 = vmatprep.subr.mxu0 %v9420_v0  ;;  %13557 = vst [vmem:[#allocation47_spill] sm:$0xff] %v10296_v42  ;;  %v10303_v0 = vld [vmem:[%s12449_s12 + $0x4d8] sm:$0xff] }
 0x807   :  { %2893 = vmatprep.subr.mxu1 %v10289_v37  ;;  %3043 = vmatpush2.msra.mxu0 %v13556_v3  ;;  %13559 = vst [vmem:[#allocation48_spill] sm:$0xff] %v10303_v0  ;;  %v13574_v3 = vld [vmem:[#allocation60_spill] sm:$0xff] }
 0x808   :  { %2894 = vmatpush2.msra.mxu1 %v10296_v42  ;;  %3044 = vmatprep.subr.mxu0 %v13558_v32  ;;  %v10359_v32 = vld [vmem:[%s12449_s12 + $0x418] sm:$0xff] }
 0x809   :  { %2895 = vmatprep.subr.mxu1 %v10303_v0  ;;  %3045 = vmatpush2.msra.mxu0 %v13560_v53  ;;  %13575 = vst [vmem:[#allocation30_spill] sm:$0xff] %v10359_v32  ;;  %v13576_v53 = vld [vmem:[#allocation61_spill] sm:$0xff] }
 0x80a   :  { %2896 = vmatpush2.msra.mxu1 %v10310_v44  ;;  %3046 = vmatprep.subr.mxu0 %v13562_v47  ;;  %v10366_v47 = vld [vmem:[%s12449_s12 + $0x410] sm:$0xff] }
 0x80b   :  { %2897 = vmatprep.subr.mxu1 %v10317_v50  ;;  %3047 = vmatpush2.msra.mxu0 %v13564_v39  ;;  %13577 = vst [vmem:[#allocation19_spill] sm:$0xff] %v10366_v47  ;;  %v13578_v39 = vld [vmem:[#allocation62_spill] sm:$0xff] }
 0x80c   :  { %2898 = vmatpush2.msra.mxu1 %v10324_v14  ;;  %3048 = vmatprep.subr.mxu0 %v13566_v28  ;;  %v10373_v28 = vld [vmem:[%s12449_s12 + $0x3e8] sm:$0xff] }
 0x80d   :  { %2899 = vmatprep.subr.mxu1 %v10331_v46  ;;  %3049 = vmatpush2.msra.mxu0 %v13568_v11  ;;  %13579 = vst [vmem:[#allocation53_spill] sm:$0xff] %v10373_v28  ;;  %v13580_v11 = vld [vmem:[#allocation63_spill] sm:$0xff]  ;;  %v13669_v14 = vld [vmem:[#allocation69_spill] sm:$0xff] }
 0x80e   :  { %2900 = vmatpush2.msra.mxu1 %v10338_v63  ;;  %3050 = vmatprep.subr.mxu0 %v13570_v59  ;;  %v10380_v59 = vld [vmem:[%s12449_s12 + $0x3e0] sm:$0xff] }
 0x80f   :  { %2901 = vmatprep.subr.mxu1 %v10345_v35  ;;  %3051 = vmatpush2.msra.mxu0 %v13572_v58  ;;  %13581 = vst [vmem:[#allocation54_spill] sm:$0xff] %v10380_v59  ;;  %v13582_v58 = vld [vmem:[#allocation64_spill] sm:$0xff]  ;;  %v13609_v35 = vld [vmem:[#allocation99_spill] sm:$0xff] }
 0x810   :  { %2902 = vmatpush2.msra.mxu1 %v10352_v7  ;;  %3052 = vmatprep.subr.mxu0 %v13574_v3  ;;  %v10387_v3 = vld [vmem:[%s12449_s12 + $0x3b8] sm:$0xff]  ;;  %v13606_v7 = vld [vmem:[#allocation93_spill] sm:$0xff] }
 0x811   :  { %2903 = vmatprep.subr.mxu1 %v10359_v32  ;;  %3053 = vmatpush2.msra.mxu0 %v13576_v53  ;;  %13583 = vst [vmem:[#allocation20_spill] sm:$0xff] %v10387_v3  ;;  %v13584_v53 = vld [vmem:[#allocation66_spill] sm:$0xff]  ;;  %v13605_v32 = vld [vmem:[#allocation91_spill] sm:$0xff] }
 0x812   :  { %2904 = vmatpush2.msra.mxu1 %v10366_v47  ;;  %3054 = vmatprep.subr.mxu0 %v13578_v39  ;;  %v10394_v39 = vld [vmem:[%s12449_s12 + $0x3b0] sm:$0xff]  ;;  %v13604_v47 = vld [vmem:[#allocation89_spill] sm:$0xff] }
 0x813   :  { %2905 = vmatprep.subr.mxu1 %v10373_v28  ;;  %3055 = vmatpush2.msra.mxu0 %v13580_v11  ;;  %13585 = vst [vmem:[#allocation55_spill] sm:$0xff] %v10394_v39  ;;  %v13586_v11 = vld [vmem:[#allocation68_spill] sm:$0xff]  ;;  %v13601_v28 = vld [vmem:[#allocation18_spill] sm:$0xff] }
 0x814   :  { %2906 = vmatpush2.msra.mxu1 %v10380_v59  ;;  %3056 = vmatprep.subr.mxu0 %v13582_v58  ;;  %v10401_v58 = vld [vmem:[%s12449_s12 + $0x388] sm:$0xff] }
 0x815   :  { %2907 = vmatprep.subr.mxu1 %v10387_v3  ;;  %3057 = vmatpush2.msra.mxu0 %v13584_v53  ;;  %13587 = vst [vmem:[#allocation56_spill] sm:$0xff] %v10401_v58  ;;  %v13588_v59 = vld [vmem:[#allocation70_spill] sm:$0xff]  ;;  %v10408_v53 = vld [vmem:[%s12449_s12 + $0x380] sm:$0xff] }
 0x816   :  { %2908 = vmatpush2.msra.mxu1 %v10394_v39  ;;  %3058 = vmatprep.subr.mxu0 %v13586_v11  ;;  %13589 = vst [vmem:[#allocation57_spill] sm:$0xff] %v10408_v53  ;;  %v13590_v3 = vld [vmem:[#allocation72_spill] sm:$0xff]  ;;  %v13592_v39 = vld [vmem:[#allocation74_spill] sm:$0xff] }
 0x817   :  { %2909 = vmatprep.subr.mxu1 %v10401_v58  ;;  %3059 = vmatpush2.msra.mxu0 %v13588_v59  ;;  %v10415_v11 = vld [vmem:[%s12449_s12 + $0x358] sm:$0xff]  ;;  %v10422_v59 = vld [vmem:[%s12449_s12 + $0x350] sm:$0xff] }
 0x818   :  { %2910 = vmatpush2.msra.mxu1 %v10408_v53  ;;  %3060 = vmatprep.subr.mxu0 %v13590_v3  ;;  %13591 = vst [vmem:[#allocation58_spill] sm:$0xff] %v10415_v11  ;;  %13593 = vst [vmem:[#allocation59_spill] sm:$0xff] %v10422_v59  ;;  %v13594_v58 = vld [vmem:[#allocation76_spill] sm:$0xff]  ;;  %v10429_v3 = vld [vmem:[%s12449_s12 + $0x328] sm:$0xff] }
 0x819   :  { %2911 = vmatprep.subr.mxu1 %v10415_v11  ;;  %3061 = vmatpush2.msra.mxu0 %v13592_v39  ;;  %13595 = vst [vmem:[#allocation60_spill] sm:$0xff] %v10429_v3  ;;  %v13596_v53 = vld [vmem:[#allocation78_spill] sm:$0xff]  ;;  %v10436_v39 = vld [vmem:[%s12449_s12 + $0x320] sm:$0xff] }
 0x81a   :  { %2912 = vmatpush2.msra.mxu1 %v10422_v59  ;;  %3062 = vmatprep.subr.mxu0 %v13594_v58  ;;  %13597 = vst [vmem:[#allocation61_spill] sm:$0xff] %v10436_v39  ;;  %v13598_v11 = vld [vmem:[#allocation80_spill] sm:$0xff]  ;;  %v13599_v58 = vld [vmem:[#allocation82_spill] sm:$0xff] }
 0x81b   :  { %2913 = vmatprep.subr.mxu1 %v10429_v3  ;;  %3063 = vmatpush2.msra.mxu0 %v13596_v53  ;;  %v13600_v59 = vld [vmem:[#allocation84_spill] sm:$0xff]  ;;  %v13602_v3 = vld [vmem:[#allocation86_spill] sm:$0xff] }
 0x81c   :  { %2914 = vmatpush2.msra.mxu1 %v10436_v39  ;;  %3064 = vmatprep.subr.mxu0 %v13598_v11  ;;  %v13603_v53 = vld [vmem:[#allocation88_spill] sm:$0xff]  ;;  %v13607_v39 = vld [vmem:[#allocation95_spill] sm:$0xff]  ;;  %v13608_v11 = vld [vmem:[#allocation97_spill] sm:$0xff] }
 0x81d   :  { %2916 = vmatmul.mubr.f32.vlgmr.msra.gmra.mxu1 %v9995_v60  ;;  %3073 = vmatprep.subr.mxu1 %v13599_v58  ;;  %v13610_v58 = vld [vmem:[#allocation92_spill] sm:$0xff] }
 0x81e   :  { %3074 = vmatpush1.msra.mxu1 %v13600_v59  ;;  %3065 = vmatpush2.msra.mxu0 %v13601_v28  ;;  %v13611_v59 = vld [vmem:[#allocation94_spill] sm:$0xff]  ;;  %v13612_v28 = vld [vmem:[#allocation96_spill] sm:$0xff] }
 0x81f   :  { %3075 = vmatprep.subr.mxu1 %v13602_v3  ;;  %3144 = vmatprep.subr.mxu0 %v13603_v53  ;;  %v13613_v3 = vld [vmem:[#allocation98_spill] sm:$0xff]  ;;  %v13614_v53 = vld [vmem:[#allocation100_spill] sm:$0xff] }
 0x820   :  { %3076 = vmatpush1.msra.mxu1 %v13604_v47  ;;  %v13615_v47 = vld [vmem:[#allocation101_spill] sm:$0xff] }
 0x821   :  { %3077 = vmatprep.subr.mxu1 %v13605_v32  ;;  %v13616_v32 = vld [vmem:[#allocation102_spill] sm:$0xff] }
 0x822   :  { %3078 = vmatpush1.msra.mxu1 %v13606_v7  ;;  %v13617_v7 = vld [vmem:[#allocation103_spill] sm:$0xff] }
 0x823   :  { %3079 = vmatprep.subr.mxu1 %v13607_v39  ;;  %v13618_v39 = vld [vmem:[#allocation104_spill] sm:$0xff] }
 0x824   :  { %3080 = vmatpush1.msra.mxu1 %v13608_v11  ;;  %v13619_v11 = vld [vmem:[#allocation105_spill] sm:$0xff] }
 0x825   :  { %3081 = vmatprep.subr.mxu1 %v13609_v35  ;;  %v13620_v35 = vld [vmem:[#allocation106_spill] sm:$0xff] }
 0x826   :  { %3082 = vmatpush1.msra.mxu1 %v13610_v58  ;;  %v13621_v58 = vld [vmem:[#allocation107_spill] sm:$0xff] }
 0x827   :  { %3083 = vmatprep.subr.mxu1 %v13611_v59  ;;  %v13622_v59 = vld [vmem:[#allocation108_spill] sm:$0xff] }
 0x828   :  { %3084 = vmatpush1.msra.mxu1 %v13612_v28  ;;  %v13623_v28 = vld [vmem:[#allocation109_spill] sm:$0xff] }
 0x829   :  { %3085 = vmatprep.subr.mxu1 %v13613_v3  ;;  %v13624_v3 = vld [vmem:[#allocation110_spill] sm:$0xff] }
 0x82a   :  { %3086 = vmatpush1.msra.mxu1 %v13614_v53  ;;  %v13625_v53 = vld [vmem:[#allocation111_spill] sm:$0xff] }
 0x82b   :  { %3087 = vmatprep.subr.mxu1 %v13615_v47  ;;  %v13626_v47 = vld [vmem:[#allocation112_spill] sm:$0xff] }
 0x82c   :  { %3088 = vmatpush1.msra.mxu1 %v13616_v32  ;;  %v13627_v32 = vld [vmem:[#allocation113_spill] sm:$0xff] }
 0x82d   :  { %3089 = vmatprep.subr.mxu1 %v13617_v7  ;;  %v13628_v7 = vld [vmem:[#allocation114_spill] sm:$0xff] }
 0x82e   :  { %3090 = vmatpush1.msra.mxu1 %v13618_v39  ;;  %v13629_v39 = vld [vmem:[#allocation115_spill] sm:$0xff] }
 0x82f   :  { %3091 = vmatprep.subr.mxu1 %v13619_v11  ;;  %v13630_v11 = vld [vmem:[#allocation116_spill] sm:$0xff] }
 0x830   :  { %3092 = vmatpush1.msra.mxu1 %v13620_v35  ;;  %v13631_v35 = vld [vmem:[#allocation117_spill] sm:$0xff] }
 0x831   :  { %3093 = vmatprep.subr.mxu1 %v13621_v58  ;;  %v13632_v58 = vld [vmem:[#allocation118_spill] sm:$0xff] }
 0x832   :  { %3094 = vmatpush1.msra.mxu1 %v13622_v59  ;;  %v13633_v59 = vld [vmem:[#allocation119_spill] sm:$0xff] }
 0x833   :  { %3095 = vmatprep.subr.mxu1 %v13623_v28  ;;  %v13634_v28 = vld [vmem:[#allocation120_spill] sm:$0xff] }
 0x834   :  { %3096 = vmatpush1.msra.mxu1 %v13624_v3  ;;  %v13635_v3 = vld [vmem:[#allocation121_spill] sm:$0xff] }
 0x835   :  { %3097 = vmatprep.subr.mxu1 %v13625_v53  ;;  %v13636_v53 = vld [vmem:[#allocation122_spill] sm:$0xff] }
 0x836   :  { %3098 = vmatpush1.msra.mxu1 %v13626_v47  ;;  %v13637_v47 = vld [vmem:[#allocation123_spill] sm:$0xff] }
 0x837   :  { %3099 = vmatprep.subr.mxu1 %v13627_v32  ;;  %v13638_v32 = vld [vmem:[#allocation124_spill] sm:$0xff] }
 0x838   :  { %3100 = vmatpush1.msra.mxu1 %v13628_v7  ;;  %v13639_v7 = vld [vmem:[#allocation125_spill] sm:$0xff] }
 0x839   :  { %3101 = vmatprep.subr.mxu1 %v13629_v39  ;;  %v13640_v39 = vld [vmem:[#allocation126_spill] sm:$0xff] }
 0x83a   :  { %3102 = vmatpush1.msra.mxu1 %v13630_v11  ;;  %v13641_v11 = vld [vmem:[#allocation127_spill] sm:$0xff] }
 0x83b   :  { %3103 = vmatprep.subr.mxu1 %v13631_v35  ;;  %v13642_v35 = vld [vmem:[#allocation128_spill] sm:$0xff] }
 0x83c   :  { %3104 = vmatpush1.msra.mxu1 %v13632_v58  ;;  %v13643_v58 = vld [vmem:[#allocation129_spill] sm:$0xff] }
 0x83d   :  { %3105 = vmatprep.subr.mxu1 %v13633_v59  ;;  %v13644_v59 = vld [vmem:[#allocation130_spill] sm:$0xff] }
 0x83e   :  { %3106 = vmatpush2.msra.mxu1 %v13634_v28  ;;  %v13645_v28 = vld [vmem:[#allocation27_spill] sm:$0xff] }
 0x83f   :  { %3107 = vmatprep.subr.mxu1 %v13635_v3  ;;  %v13646_v3 = vld [vmem:[#allocation83_spill] sm:$0xff] }
 0x840   :  { %3108 = vmatpush2.msra.mxu1 %v13636_v53  ;;  %v13647_v53 = vld [vmem:[#allocation23_spill] sm:$0xff] }
 0x841   :  { %3109 = vmatprep.subr.mxu1 %v13637_v47  ;;  %v13648_v47 = vld [vmem:[#allocation85_spill] sm:$0xff] }
 0x842   :  { %3110 = vmatpush2.msra.mxu1 %v13638_v32  ;;  %v13649_v32 = vld [vmem:[#allocation31_spill] sm:$0xff] }
 0x843   :  { %3111 = vmatprep.subr.mxu1 %v13639_v7  ;;  %v13650_v7 = vld [vmem:[#allocation87_spill] sm:$0xff] }
 0x844   :  { %3112 = vmatpush2.msra.mxu1 %v13640_v39  ;;  %v13651_v39 = vld [vmem:[#allocation32_spill] sm:$0xff] }
 0x845   :  { %3113 = vmatprep.subr.mxu1 %v13641_v11  ;;  %v13652_v11 = vld [vmem:[#allocation90_spill] sm:$0xff] }
 0x846   :  { %3114 = vmatpush2.msra.mxu1 %v13642_v35  ;;  %v13653_v35 = vld [vmem:[#allocation33_spill] sm:$0xff] }
 0x847   :  { %3115 = vmatprep.subr.mxu1 %v13643_v58  ;;  %v13654_v58 = vld [vmem:[#allocation34_spill] sm:$0xff] }
 0x848   :  { %3116 = vmatpush2.msra.mxu1 %v13644_v59  ;;  %v13655_v59 = vld [vmem:[#allocation35_spill] sm:$0xff] }
 0x849   :  { %3117 = vmatprep.subr.mxu1 %v13645_v28  ;;  %v13656_v28 = vld [vmem:[#allocation36_spill] sm:$0xff] }
 0x84a   :  { %3118 = vmatpush2.msra.mxu1 %v13646_v3  ;;  %v13657_v3 = vld [vmem:[#allocation37_spill] sm:$0xff] }
 0x84b   :  { %3119 = vmatprep.subr.mxu1 %v13647_v53  ;;  %v13658_v53 = vld [vmem:[#allocation38_spill] sm:$0xff] }
 0x84c   :  { %3120 = vmatpush2.msra.mxu1 %v13648_v47  ;;  %v13659_v47 = vld [vmem:[#allocation39_spill] sm:$0xff] }
 0x84d   :  { %3121 = vmatprep.subr.mxu1 %v13649_v32  ;;  %v13660_v32 = vld [vmem:[#allocation40_spill] sm:$0xff] }
 0x84e   :  { %3122 = vmatpush2.msra.mxu1 %v13650_v7  ;;  %v13661_v7 = vld [vmem:[#allocation41_spill] sm:$0xff] }
 0x84f   :  { %3123 = vmatprep.subr.mxu1 %v13651_v39  ;;  %v13662_v39 = vld [vmem:[#allocation42_spill] sm:$0xff] }
 0x850   :  { %3124 = vmatpush2.msra.mxu1 %v13652_v11  ;;  %v13663_v11 = vld [vmem:[#allocation43_spill] sm:$0xff] }
 0x851   :  { %3125 = vmatprep.subr.mxu1 %v13653_v35  ;;  %v13664_v35 = vld [vmem:[#allocation44_spill] sm:$0xff] }
 0x852   :  { %3126 = vmatpush2.msra.mxu1 %v13654_v58  ;;  %v10510_v58 = vld [vmem:[%s12449_s12 + $0x2d8] sm:$0xff] }
 0x853   :  { %3127 = vmatprep.subr.mxu1 %v13655_v59  ;;  %13665 = vst [vmem:[#allocation62_spill] sm:$0xff] %v10510_v58 }
 0x854   :  { %3128 = vmatpush2.msra.mxu1 %v13656_v28 }
 0x855   :  { %3129 = vmatprep.subr.mxu1 %v13657_v3  ;;  %v13666_v3 = vld [vmem:[#allocation25_spill] sm:$0xff] }
 0x856   :  { %3130 = vmatpush2.msra.mxu1 %v13658_v53 }
 0x857   :  { %3131 = vmatprep.subr.mxu1 %v13659_v47  ;;  %v13667_v47 = vld [vmem:[#allocation75_spill] sm:$0xff] }
 0x858   :  { %3132 = vmatpush2.msra.mxu1 %v13660_v32 }
 0x859   :  { %3133 = vmatprep.subr.mxu1 %v13661_v7 }
 0x85a   :  { %3134 = vmatpush2.msra.mxu1 %v13662_v39  ;;  %v13668_v39 = vld [vmem:[#allocation67_spill] sm:$0xff] }
 0x85b   :  { %3135 = vmatprep.subr.mxu1 %v13663_v11 }
 0x85c   :  { %3136 = vmatpush2.msra.mxu1 %v13664_v35 }
 0x85d   :  { %3295 = vmatprep.subr.mxu1 %v10510_v58  ;;  %v13670_v58 = vld [vmem:[#allocation79_spill] sm:$0xff] }
 0x89d   :  { %v2775_v59 = vpop.f32.mrf.mxu1  ;;  %v2846_v11 = vpop.f32.mrf.mxu0 }
 0x89e   :  { %v2776_v53 = vadd.f32 %v2775_v59, %v13666_v3  ;;  %v2847_v0 = vadd.f32 %v2846_v11, %v13428_v4  ;;  %v13671_v3 = vld [vmem:[#allocation22_spill] sm:$0xff] }
 0x89f   :  { %v2777_v28 = vpop.f32.mrf.mxu1  ;;  %v2848_v44 = vpop.f32.mrf.mxu0 }
 0x8a0   :  { %v2778_v32 = vadd.f32 %v2777_v28, %v13667_v47  ;;  %v2924_v7 = vrot.slane %v2776_v53, 2  ;;  %v2849_v37 = vadd.f32 %v2848_v44, %v13670_v58  ;;  %v2944_v33 = vrot.slane %v2847_v0, 2  ;;  %v13672_v53 = vld [vmem:[#allocation71_spill] sm:$0xff] }
 0x8a2   :  { %v2925_v63 = vrot.slane %v2778_v32, 2  ;;  %v2928_v46 = vadd.f32 %v2924_v7, %v13668_v39  ;;  %v2945_v59 = vrot.slane %v2849_v37, 2  ;;  %v2948_v28 = vadd.f32 %v2944_v33, %v13671_v3 }
 0x8a4   :  { %v2929_v35 = vadd.f32 %v2925_v63, %v13669_v14  ;;  %v4565_v50 = vmul.f32 -1.442695, %v2928_v46  ;;  %v2949_v32 = vadd.f32 %v2945_v59, %v13672_v53  ;;  %v4567_v47 = vmul.f32 -1.442695, %v2948_v28 }
 0x8a6   :  { %v4566_v42 = vmul.f32 -1.442695, %v2929_v35  ;;  %5104 = vpow2.f32 %v4565_v50  ;;  %v4568_v7 = vmul.f32 -1.442695, %v2949_v32 }
 0x8a8   :  { %5106 = vpow2.f32 %v4566_v42  ;;  %v13673_v42 = vld [vmem:[#allocation81_spill] sm:$0xff] }
 0x8a9   :  { %5108 = vpow2.f32 %v4567_v47 }
 0x8aa   :  { %5110 = vpow2.f32 %v4568_v7  ;;  %v13674_v7 = vld [vmem:[#allocation24_spill] sm:$0xff] }
 0x8b3   :  { %v5105_v39 = vpop.eup %5104 }
 0x8b4   :  { %v2936_v46 = vadd.f32 1.0, %v5105_v39 }
 0x8b5   :  { %v5107_v63 = vpop.eup %5106 }
 0x8b6   :  { %v2937_v14 = vadd.f32 1.0, %v5107_v63  ;;  %5112 = vrcp.f32 %v2936_v46  ;;  %v5109_v50 = vpop.eup %5108  ;;  %v13675_v46 = vld [vmem:[#allocation73_spill] sm:$0xff] }
 0x8b7   :  { %v5111_v11 = vpop.eup %5110  ;;  %v2956_v0 = vadd.f32 1.0, %v5109_v50 }
 0x8b8   :  { %5114 = vrcp.f32 %v2937_v14  ;;  %v2957_v33 = vadd.f32 1.0, %v5111_v11  ;;  %v2980_v11 = vrot.slane %v9995_v60, 2 }
 0x8b9   :  { %5116 = vrcp.f32 %v2956_v0 }
 0x8ba   :  { %5118 = vrcp.f32 %v2957_v33 }
 0x8c3   :  { %v5113_v28 = vpop.eup %5112 }
 0x8c5   :  { %v5115_v39 = vpop.eup %5114 }
 0x8c6   :  { %v5117_v50 = vpop.eup %5116 }
 0x8dd   :  { %v2917_v44 = vpop.f32.mrf.mxu1 }
 0x8de   :  { %v2918_v37 = vadd.f32 %v2917_v44, %v13673_v42  ;;  %v5119_v44 = vpop.eup %5118 }
 0x8df   :  { %v2919_v35 = vpop.f32.mrf.mxu1  ;;  %v2975_v0 = vsub.f32 1.0, %v5119_v44 }
 0x8e0   :  { %v2964_v3 = vrot.slane %v2918_v37, 2  ;;  %v2920_v59 = vadd.f32 %v2919_v35, %v13552_v62  ;;  %v2974_v37 = vsub.f32 1.0, %v5117_v50  ;;  %v2981_v35 = vrot.slane %v9990_v57, 2 }
 0x8e2   :  { %v2968_v47 = vmul.f32 %v5113_v28, %v2964_v3  ;;  %v2965_v32 = vrot.slane %v2920_v59, 2  ;;  %v2984_v59 = vmul.f32 %v5117_v50, %v2980_v11  ;;  %v2985_v62 = vmul.f32 %v5119_v44, %v2981_v35  ;;  %v10830_v50 = vld [vmem:[%s12449_s12 + $0x4e8] sm:$0xff]  ;;  %v13681_v44 = vld [vmem:[#allocation48_spill] sm:$0xff] }
 0x8e3   :  { %13680 = vst [vmem:[#allocation64_spill] sm:$0xff] %v10830_v50  ;;  %v10837_v11 = vld [vmem:[%s12449_s12 + $0x4e0] sm:$0xff]  ;;  %v10844_v35 = vld [vmem:[%s12449_s12 + $0x4b8] sm:$0xff] }
 0x8e4   :  { %v2970_v63 = vadd.f32 %v2968_v47, %v13674_v7  ;;  %v2969_v14 = vmul.f32 %v5115_v39, %v2965_v32  ;;  %13682 = vst [vmem:[#allocation66_spill] sm:$0xff] %v10837_v11  ;;  %13684 = vst [vmem:[#allocation68_spill] sm:$0xff] %v10844_v35 }
 0x8e6   :  { %5120 = vtanh.f32 %v2970_v63  ;;  %v2971_v53 = vadd.f32 %v2969_v14, %v13675_v46  ;;  %v2992_v63 = vpop.permute.xlu0 %2991 }
 0x8e7   :  { %vm2993_vm15 = vcmp.eq.s32.totalorder %v2992_v63, 1  ;;  %v13693_v63 = vld [vmem:[#allocation77_spill] sm:$0xff] }
 0x8e8   :  { %5122 = vtanh.f32 %v2971_v53 }
 0x8f3   :  { %v5121_v42 = vpop.eup %5120 }
 0x8f4   :  { %v2976_v3 = vmul.f32 %v5121_v42, %v2974_v37  ;;  %v13679_v42 = vld [vmem:[#allocation47_spill] sm:$0xff]  ;;  %v13683_v37 = vld [vmem:[#allocation49_spill] sm:$0xff] }
 0x8f5   :  { %v5123_v28 = vpop.eup %5122 }
 0x8f6   :  { %v2977_v33 = vmul.f32 %v5123_v28, %v2975_v0  ;;  %v2986_v47 = vadd.f32 %v2984_v59, %v2976_v3  ;;  %v13685_v0 = vld [vmem:[#allocation50_spill] sm:$0xff]  ;;  %v13687_v59 = vld [vmem:[#allocation51_spill] sm:$0xff] }
 0x8f7   :  { %v10851_v3 = vld [vmem:[%s12449_s12 + $0x4b0] sm:$0xff]  ;;  %v10858_v28 = vld [vmem:[%s12449_s12 + $0x488] sm:$0xff] }
 0x8f8   :  { %v2987_v32 = vadd.f32 %v2985_v62, %v2977_v33  ;;  %v2996_v39 = vrot.slane %v2986_v47, 6  ;;  %v10543_v62 = vld [vmem:[%s12449_s12 + $0x2d0] sm:$0xff]  ;;  %13686 = vst [vmem:[#allocation70_spill] sm:$0xff] %v10851_v3  ;;  %13688 = vst [vmem:[#allocation72_spill] sm:$0xff] %v10858_v28  ;;  %v13689_v33 = vld [vmem:[#allocation52_spill] sm:$0xff] }
 0x8f9   :  { %v10865_v47 = vld [vmem:[%s12449_s12 + $0x480] sm:$0xff] }
 0x8fa   :  { %v2997_v14 = vrot.slane %v2987_v32, 6  ;;  %v10533_v46 = vsel %vm2993_vm15, %v2996_v39, %v9995_v60  ;;  %v10557_v60 = vld [vmem:[%s12449_s12 + $0x2a0] sm:$0xff]  ;;  %13690 = vst [vmem:[#allocation74_spill] sm:$0xff] %v10865_v47  ;;  %v13691_v32 = vld [vmem:[#allocation26_spill] sm:$0xff]  ;;  %v10872_v39 = vld [vmem:[%s12449_s12 + $0x458] sm:$0xff] }
 0x8fb   :  { %13692 = vst [vmem:[#allocation76_spill] sm:$0xff] %v10872_v39 }
 0x8fc   :  { %v10528_v53 = vsel %vm2993_vm15, %v2997_v14, %v9990_v57  ;;  %v10550_v57 = vld [vmem:[%s12449_s12 + $0x2a8] sm:$0xff]  ;;  %v10879_v14 = vld [vmem:[%s12449_s12 + $0x450] sm:$0xff] }
 0x8fd   :  { %3066 = vmatprep.mubr.f32.mxu0 %v10528_v53  ;;  %3137 = vmatprep.mubr.f32.mxu1 %v10528_v53  ;;  %13694 = vst [vmem:[#allocation78_spill] sm:$0xff] %v10879_v14 }
 0x8fe   :  { %3067 = vmatmul.mubr.f32.vlgmr.msra.gmra.mxu0 %v10533_v46  ;;  %3138 = vmatmul.mubr.f32.vlgmr.msra.gmra.mxu1 %v10533_v46 }
 0x8ff   :  { %3145 = vmatpush1.msra.mxu0 %v10002_v51  ;;  %3208 = vmatprep.mubr.f32.mxu0 %v10528_v53  ;;  %v10564_v51 = vld [vmem:[%s12449_s12 + $0x278] sm:$0xff] }
 0x900   :  { %3146 = vmatprep.subr.mxu0 %v10009_v8  ;;  %3296 = vmatpush1.msra.mxu1 %v10543_v62  ;;  %v10571_v8 = vld [vmem:[%s12449_s12 + $0x270] sm:$0xff] }
 0x901   :  { %3147 = vmatpush1.msra.mxu0 %v10016_v13  ;;  %3297 = vmatprep.subr.mxu1 %v10550_v57  ;;  %v10578_v13 = vld [vmem:[%s12449_s12 + $0x248] sm:$0xff] }
 0x902   :  { %3148 = vmatprep.subr.mxu0 %v10023_v48  ;;  %3298 = vmatpush1.msra.mxu1 %v10557_v60  ;;  %v10585_v48 = vld [vmem:[%s12449_s12 + $0x240] sm:$0xff] }
 0x903   :  { %3149 = vmatpush1.msra.mxu0 %v10030_v20  ;;  %3299 = vmatprep.subr.mxu1 %v10564_v51  ;;  %v10592_v20 = vld [vmem:[%s12449_s12 + $0x218] sm:$0xff] }
 0x904   :  { %3150 = vmatprep.subr.mxu0 %v10037_v61  ;;  %3300 = vmatpush1.msra.mxu1 %v10571_v8  ;;  %v10599_v61 = vld [vmem:[%s12449_s12 + $0x210] sm:$0xff] }
 0x905   :  { %3151 = vmatpush1.msra.mxu0 %v10044_v6  ;;  %3301 = vmatprep.subr.mxu1 %v10578_v13  ;;  %v10606_v6 = vld [vmem:[%s12449_s12 + $0x1e8] sm:$0xff] }
 0x906   :  { %3152 = vmatprep.subr.mxu0 %v10051_v52  ;;  %3302 = vmatpush1.msra.mxu1 %v10585_v48  ;;  %v10613_v52 = vld [vmem:[%s12449_s12 + $0x1e0] sm:$0xff] }
 0x907   :  { %3153 = vmatpush1.msra.mxu0 %v10058_v12  ;;  %3303 = vmatprep.subr.mxu1 %v10592_v20  ;;  %v10620_v12 = vld [vmem:[%s12449_s12 + $0x1b8] sm:$0xff] }
 0x908   :  { %3154 = vmatprep.subr.mxu0 %v10065_v1  ;;  %3304 = vmatpush1.msra.mxu1 %v10599_v61  ;;  %v10627_v1 = vld [vmem:[%s12449_s12 + $0x1b0] sm:$0xff] }
 0x909   :  { %3155 = vmatpush1.msra.mxu0 %v10072_v15  ;;  %3305 = vmatprep.subr.mxu1 %v10606_v6  ;;  %v10634_v15 = vld [vmem:[%s12449_s12 + $0x188] sm:$0xff] }
 0x90a   :  { %3156 = vmatprep.subr.mxu0 %v10079_v2  ;;  %3306 = vmatpush1.msra.mxu1 %v10613_v52  ;;  %v10641_v2 = vld [vmem:[%s12449_s12 + $0x180] sm:$0xff] }
 0x90b   :  { %3157 = vmatpush1.msra.mxu0 %v10086_v45  ;;  %3307 = vmatprep.subr.mxu1 %v10620_v12  ;;  %v10648_v45 = vld [vmem:[%s12449_s12 + $0x158] sm:$0xff] }
 0x90c   :  { %3158 = vmatprep.subr.mxu0 %v10093_v56  ;;  %3308 = vmatpush1.msra.mxu1 %v10627_v1  ;;  %v10655_v56 = vld [vmem:[%s12449_s12 + $0x150] sm:$0xff] }
 0x90d   :  { %3159 = vmatpush1.msra.mxu0 %v10100_v16  ;;  %3309 = vmatprep.subr.mxu1 %v10634_v15  ;;  %v10662_v16 = vld [vmem:[%s12449_s12 + $0x128] sm:$0xff] }
 0x90e   :  { %3160 = vmatprep.subr.mxu0 %v10107_v9  ;;  %3310 = vmatpush1.msra.mxu1 %v10641_v2  ;;  %v10669_v9 = vld [vmem:[%s12449_s12 + $0x120] sm:$0xff] }
 0x90f   :  { %3161 = vmatpush1.msra.mxu0 %v10114_v36  ;;  %3311 = vmatprep.subr.mxu1 %v10648_v45  ;;  %v10676_v36 = vld [vmem:[%s12449_s12 + $0xf8] sm:$0xff] }
 0x910   :  { %3162 = vmatprep.subr.mxu0 %v10121_v49  ;;  %3312 = vmatpush1.msra.mxu1 %v10655_v56  ;;  %v10683_v49 = vld [vmem:[%s12449_s12 + $0xf0] sm:$0xff] }
 0x911   :  { %3163 = vmatpush1.msra.mxu0 %v10128_v24  ;;  %3313 = vmatprep.subr.mxu1 %v10662_v16  ;;  %v10690_v24 = vld [vmem:[%s12449_s12 + $0xc8] sm:$0xff] }
 0x912   :  { %3164 = vmatprep.subr.mxu0 %v10135_v5  ;;  %3314 = vmatpush1.msra.mxu1 %v10669_v9  ;;  %v10697_v5 = vld [vmem:[%s12449_s12 + $0xc0] sm:$0xff] }
 0x913   :  { %3165 = vmatpush1.msra.mxu0 %v10142_v10  ;;  %3315 = vmatprep.subr.mxu1 %v10676_v36  ;;  %v10704_v10 = vld [vmem:[%s12449_s12 + $0x98] sm:$0xff] }
 0x914   :  { %3166 = vmatprep.subr.mxu0 %v10149_v40  ;;  %3316 = vmatpush1.msra.mxu1 %v10683_v49  ;;  %v10711_v40 = vld [vmem:[%s12449_s12 + $0x90] sm:$0xff] }
 0x915   :  { %3167 = vmatpush1.msra.mxu0 %v10156_v54  ;;  %3317 = vmatprep.subr.mxu1 %v10690_v24  ;;  %v10718_v54 = vld [vmem:[%s12449_s12 + $0x68] sm:$0xff] }
 0x916   :  { %3168 = vmatprep.subr.mxu0 %v10163_v55  ;;  %3318 = vmatpush1.msra.mxu1 %v10697_v5  ;;  %v10725_v55 = vld [vmem:[%s12449_s12 + $0x60] sm:$0xff] }
 0x917   :  { %3169 = vmatpush1.msra.mxu0 %v10170_v43  ;;  %3319 = vmatprep.subr.mxu1 %v10704_v10  ;;  %v10732_v43 = vld [vmem:[%s12449_s12 + $0x38] sm:$0xff] }
 0x918   :  { %3170 = vmatprep.subr.mxu0 %v10177_v30  ;;  %3320 = vmatpush1.msra.mxu1 %v10711_v40  ;;  %v10739_v30 = vld [vmem:[%s12449_s12 + $0x30] sm:$0xff] }
 0x919   :  { %3171 = vmatpush1.msra.mxu0 %v10184_v17  ;;  %3321 = vmatprep.subr.mxu1 %v10718_v54  ;;  %v10746_v17 = vld [vmem:[%s12449_s12 + $0x8] sm:$0xff] }
 0x91a   :  { %3172 = vmatprep.subr.mxu0 %v10191_v18  ;;  %3322 = vmatpush1.msra.mxu1 %v10725_v55  ;;  %v10753_v18 = vld [vmem:[%s12449_s12] sm:$0xff] }
 0x91b   :  { %3173 = vmatpush1.msra.mxu0 %v10198_v19  ;;  %3323 = vmatprep.subr.mxu1 %v10732_v43  ;;  %v10760_v19 = vld [vmem:[%s12449_s12 + $0x5d8] sm:$0xff] }
 0x91c   :  { %3174 = vmatprep.subr.mxu0 %v10205_v21  ;;  %3324 = vmatpush1.msra.mxu1 %v10739_v30  ;;  %v10767_v21 = vld [vmem:[%s12449_s12 + $0x5d0] sm:$0xff] }
 0x91d   :  { %3175 = vmatpush1.msra.mxu0 %v10212_v22  ;;  %3325 = vmatprep.subr.mxu1 %v10746_v17  ;;  %v10774_v22 = vld [vmem:[%s12449_s12 + $0x5a8] sm:$0xff] }
 0x91e   :  { %3176 = vmatprep.subr.mxu0 %v10219_v41  ;;  %3326 = vmatpush1.msra.mxu1 %v10753_v18  ;;  %v10781_v41 = vld [vmem:[%s12449_s12 + $0x5a0] sm:$0xff] }
 0x91f   :  { %3177 = vmatpush2.msra.mxu0 %v10226_v23  ;;  %3327 = vmatprep.subr.mxu1 %v10760_v19  ;;  %v10788_v23 = vld [vmem:[%s12449_s12 + $0x578] sm:$0xff] }
 0x920   :  { %3178 = vmatprep.subr.mxu0 %v10233_v25  ;;  %3328 = vmatpush2.msra.mxu1 %v10767_v21  ;;  %v10795_v25 = vld [vmem:[%s12449_s12 + $0x570] sm:$0xff] }
 0x921   :  { %3179 = vmatpush2.msra.mxu0 %v10240_v26  ;;  %3329 = vmatprep.subr.mxu1 %v10774_v22  ;;  %v10802_v26 = vld [vmem:[%s12449_s12 + $0x548] sm:$0xff] }
 0x922   :  { %3180 = vmatprep.subr.mxu0 %v10247_v34  ;;  %3330 = vmatpush2.msra.mxu1 %v10781_v41  ;;  %v10809_v34 = vld [vmem:[%s12449_s12 + $0x540] sm:$0xff] }
 0x923   :  { %3181 = vmatpush2.msra.mxu0 %v10254_v27  ;;  %3331 = vmatprep.subr.mxu1 %v10788_v23  ;;  %v13676_v27 = vld [vmem:[#allocation45_spill] sm:$0xff] }
 0x924   :  { %3182 = vmatprep.subr.mxu0 %v10261_v29  ;;  %3332 = vmatpush2.msra.mxu1 %v10795_v25  ;;  %v10816_v29 = vld [vmem:[%s12449_s12 + $0x518] sm:$0xff] }
 0x925   :  { %3183 = vmatpush2.msra.mxu0 %v10268_v31  ;;  %3333 = vmatprep.subr.mxu1 %v10802_v26  ;;  %v13677_v31 = vld [vmem:[#allocation46_spill] sm:$0xff] }
 0x926   :  { %3184 = vmatprep.subr.mxu0 %v10275_v38  ;;  %3334 = vmatpush2.msra.mxu1 %v10809_v34  ;;  %v10823_v38 = vld [vmem:[%s12449_s12 + $0x510] sm:$0xff] }
 0x927   :  { %3185 = vmatpush2.msra.mxu0 %v13676_v27  ;;  %3335 = vmatprep.subr.mxu1 %v10816_v29  ;;  %13678 = vst [vmem:[#allocation63_spill] sm:$0xff] %v10823_v38  ;;  %v13695_v27 = vld [vmem:[#allocation28_spill] sm:$0xff] }
 0x928   :  { %3186 = vmatprep.subr.mxu0 %v13677_v31  ;;  %3336 = vmatpush2.msra.mxu1 %v10823_v38  ;;  %v10886_v31 = vld [vmem:[%s12449_s12 + $0x428] sm:$0xff] }
 0x929   :  { %3187 = vmatpush2.msra.mxu0 %v13679_v42  ;;  %3337 = vmatprep.subr.mxu1 %v10830_v50  ;;  %13696 = vst [vmem:[#allocation80_spill] sm:$0xff] %v10886_v31  ;;  %v13697_v42 = vld [vmem:[#allocation30_spill] sm:$0xff] }
 0x92a   :  { %3188 = vmatprep.subr.mxu0 %v13681_v44  ;;  %3338 = vmatpush2.msra.mxu1 %v10837_v11  ;;  %v10893_v44 = vld [vmem:[%s12449_s12 + $0x420] sm:$0xff] }
 0x92b   :  { %3189 = vmatpush2.msra.mxu0 %v13683_v37  ;;  %3339 = vmatprep.subr.mxu1 %v10844_v35  ;;  %13698 = vst [vmem:[#allocation82_spill] sm:$0xff] %v10893_v44  ;;  %v13699_v37 = vld [vmem:[#allocation19_spill] sm:$0xff] }
 0x92c   :  { %3190 = vmatprep.subr.mxu0 %v13685_v0  ;;  %3340 = vmatpush2.msra.mxu1 %v10851_v3  ;;  %v10900_v0 = vld [vmem:[%s12449_s12 + $0x3f8] sm:$0xff] }
 0x92d   :  { %3191 = vmatpush2.msra.mxu0 %v13687_v59  ;;  %3341 = vmatprep.subr.mxu1 %v10858_v28  ;;  %13700 = vst [vmem:[#allocation84_spill] sm:$0xff] %v10900_v0  ;;  %v13701_v59 = vld [vmem:[#allocation53_spill] sm:$0xff] }
 0x92e   :  { %3192 = vmatprep.subr.mxu0 %v13689_v33  ;;  %3342 = vmatpush2.msra.mxu1 %v10865_v47  ;;  %v10907_v33 = vld [vmem:[%s12449_s12 + $0x3f0] sm:$0xff]  ;;  %v13791_v28 = vld [vmem:[#allocation69_spill] sm:$0xff] }
 0x92f   :  { %3193 = vmatpush2.msra.mxu0 %v13691_v32  ;;  %3343 = vmatprep.subr.mxu1 %v10872_v39  ;;  %13702 = vst [vmem:[#allocation18_spill] sm:$0xff] %v10907_v33  ;;  %v13703_v32 = vld [vmem:[#allocation54_spill] sm:$0xff]  ;;  %v13790_v39 = vld [vmem:[#allocation67_spill] sm:$0xff] }
 0x930   :  { %3194 = vmatprep.subr.mxu0 %v13693_v63  ;;  %3344 = vmatpush2.msra.mxu1 %v10879_v14  ;;  %v10914_v63 = vld [vmem:[%s12449_s12 + $0x3c8] sm:$0xff] }
 0x931   :  { %3195 = vmatpush2.msra.mxu0 %v13695_v27  ;;  %3345 = vmatprep.subr.mxu1 %v10886_v31  ;;  %13704 = vst [vmem:[#allocation86_spill] sm:$0xff] %v10914_v63  ;;  %v13705_v27 = vld [vmem:[#allocation20_spill] sm:$0xff] }
 0x932   :  { %3196 = vmatprep.subr.mxu0 %v13697_v42  ;;  %3346 = vmatpush2.msra.mxu1 %v10893_v44  ;;  %v10921_v42 = vld [vmem:[%s12449_s12 + $0x3c0] sm:$0xff] }
 0x933   :  { %3197 = vmatpush2.msra.mxu0 %v13699_v37  ;;  %3347 = vmatprep.subr.mxu1 %v10900_v0  ;;  %13706 = vst [vmem:[#allocation88_spill] sm:$0xff] %v10921_v42  ;;  %v13707_v37 = vld [vmem:[#allocation55_spill] sm:$0xff] }
 0x934   :  { %3198 = vmatprep.subr.mxu0 %v13701_v59  ;;  %3348 = vmatpush2.msra.mxu1 %v10907_v33  ;;  %v10928_v59 = vld [vmem:[%s12449_s12 + $0x398] sm:$0xff]  ;;  %v13788_v33 = vld [vmem:[#allocation25_spill] sm:$0xff] }
 0x935   :  { %3199 = vmatpush2.msra.mxu0 %v13703_v32  ;;  %3349 = vmatprep.subr.mxu1 %v10914_v63  ;;  %13708 = vst [vmem:[#allocation89_spill] sm:$0xff] %v10928_v59  ;;  %v13709_v32 = vld [vmem:[#allocation56_spill] sm:$0xff]  ;;  %v13711_v63 = vld [vmem:[#allocation57_spill] sm:$0xff]  ;;  %v13789_v0 = vld [vmem:[#allocation75_spill] sm:$0xff] }
 0x936   :  { %3200 = vmatprep.subr.mxu0 %v13705_v27  ;;  %3350 = vmatpush2.msra.mxu1 %v10921_v42  ;;  %v10935_v27 = vld [vmem:[%s12449_s12 + $0x390] sm:$0xff] }
 0x937   :  { %3201 = vmatpush2.msra.mxu0 %v13707_v37  ;;  %3351 = vmatprep.subr.mxu1 %v10928_v59  ;;  %13710 = vst [vmem:[#allocation91_spill] sm:$0xff] %v10935_v27  ;;  %v10942_v37 = vld [vmem:[%s12449_s12 + $0x368] sm:$0xff]  ;;  %v13715_v59 = vld [vmem:[#allocation59_spill] sm:$0xff] }
 0x938   :  { %3202 = vmatprep.subr.mxu0 %v13709_v32  ;;  %3352 = vmatpush2.msra.mxu1 %v10935_v27  ;;  %13712 = vst [vmem:[#allocation93_spill] sm:$0xff] %v10942_v37  ;;  %v13713_v42 = vld [vmem:[#allocation58_spill] sm:$0xff]  ;;  %v10949_v32 = vld [vmem:[%s12449_s12 + $0x360] sm:$0xff] }
 0x939   :  { %3203 = vmatpush2.msra.mxu0 %v13711_v63  ;;  %3353 = vmatprep.subr.mxu1 %v10942_v37  ;;  %13714 = vst [vmem:[#allocation95_spill] sm:$0xff] %v10949_v32  ;;  %v10956_v63 = vld [vmem:[%s12449_s12 + $0x338] sm:$0xff]  ;;  %v13719_v37 = vld [vmem:[#allocation61_spill] sm:$0xff] }
 0x93a   :  { %3204 = vmatprep.subr.mxu0 %v13713_v42  ;;  %3354 = vmatpush2.msra.mxu1 %v10949_v32  ;;  %13716 = vst [vmem:[#allocation97_spill] sm:$0xff] %v10956_v63  ;;  %v13717_v27 = vld [vmem:[#allocation60_spill] sm:$0xff]  ;;  %v10963_v42 = vld [vmem:[%s12449_s12 + $0x330] sm:$0xff] }
 0x93b   :  { %3205 = vmatpush2.msra.mxu0 %v13715_v59  ;;  %3355 = vmatprep.subr.mxu1 %v10956_v63  ;;  %13718 = vst [vmem:[#allocation99_spill] sm:$0xff] %v10963_v42  ;;  %v10970_v59 = vld [vmem:[%s12449_s12 + $0x308] sm:$0xff] }
 0x93c   :  { %3206 = vmatprep.subr.mxu0 %v13717_v27  ;;  %3356 = vmatpush2.msra.mxu1 %v10963_v42  ;;  %13720 = vst [vmem:[#allocation92_spill] sm:$0xff] %v10970_v59  ;;  %v10977_v27 = vld [vmem:[%s12449_s12 + $0x2e8] sm:$0xff]  ;;  %v10995_v42 = vld [vmem:[%s12449_s12 + $0x2b8] sm:$0xff] }
 0x93d   :  { %3207 = vmatpush2.msra.mxu0 %v13719_v37  ;;  %3357 = vmatprep.subr.mxu1 %v10970_v59  ;;  %13721 = vst [vmem:[#allocation94_spill] sm:$0xff] %v10977_v27  ;;  %v10983_v37 = vld [vmem:[%s12449_s12 + $0x2e0] sm:$0xff]  ;;  %13724 = vst [vmem:[#allocation100_spill] sm:$0xff] %v10995_v42 }
 0x93e   :  { %3209 = vmatmul.mubr.f32.vlgmr.msra.gmra.mxu0 %v10533_v46  ;;  %3366 = vmatprep.subr.mxu0 %v10977_v27  ;;  %13722 = vst [vmem:[#allocation96_spill] sm:$0xff] %v10983_v37  ;;  %v10989_v59 = vld [vmem:[%s12449_s12 + $0x300] sm:$0xff]  ;;  %v11001_v27 = vld [vmem:[%s12449_s12 + $0x2f8] sm:$0xff] }
 0x93f   :  { %3367 = vmatpush1.msra.mxu0 %v10983_v37  ;;  %13723 = vst [vmem:[#allocation98_spill] sm:$0xff] %v10989_v59  ;;  %3358 = vmatpush2.msra.mxu1 %v10989_v59  ;;  %13725 = vst [vmem:[#allocation101_spill] sm:$0xff] %v11001_v27  ;;  %v11007_v37 = vld [vmem:[%s12449_s12 + $0x2b0] sm:$0xff]  ;;  %v11013_v59 = vld [vmem:[%s12449_s12 + $0x288] sm:$0xff] }
 0x940   :  { %3368 = vmatprep.subr.mxu0 %v10995_v42  ;;  %3437 = vmatprep.subr.mxu1 %v11001_v27  ;;  %13726 = vst [vmem:[#allocation102_spill] sm:$0xff] %v11007_v37  ;;  %13727 = vst [vmem:[#allocation103_spill] sm:$0xff] %v11013_v59  ;;  %v11019_v42 = vld [vmem:[%s12449_s12 + $0x280] sm:$0xff]  ;;  %v11025_v27 = vld [vmem:[%s12449_s12 + $0x258] sm:$0xff] }
 0x941   :  { %3369 = vmatpush1.msra.mxu0 %v11007_v37  ;;  %13728 = vst [vmem:[#allocation104_spill] sm:$0xff] %v11019_v42  ;;  %13729 = vst [vmem:[#allocation105_spill] sm:$0xff] %v11025_v27  ;;  %v11031_v37 = vld [vmem:[%s12449_s12 + $0x250] sm:$0xff] }
 0x942   :  { %3370 = vmatprep.subr.mxu0 %v11013_v59  ;;  %13730 = vst [vmem:[#allocation106_spill] sm:$0xff] %v11031_v37  ;;  %v11037_v59 = vld [vmem:[%s12449_s12 + $0x228] sm:$0xff] }
 0x943   :  { %3371 = vmatpush1.msra.mxu0 %v11019_v42  ;;  %13731 = vst [vmem:[#allocation107_spill] sm:$0xff] %v11037_v59  ;;  %v11043_v42 = vld [vmem:[%s12449_s12 + $0x220] sm:$0xff] }
 0x944   :  { %3372 = vmatprep.subr.mxu0 %v11025_v27  ;;  %13732 = vst [vmem:[#allocation108_spill] sm:$0xff] %v11043_v42  ;;  %v11049_v27 = vld [vmem:[%s12449_s12 + $0x1f8] sm:$0xff] }
 0x945   :  { %3373 = vmatpush1.msra.mxu0 %v11031_v37  ;;  %13733 = vst [vmem:[#allocation109_spill] sm:$0xff] %v11049_v27  ;;  %v11055_v37 = vld [vmem:[%s12449_s12 + $0x1f0] sm:$0xff] }
 0x946   :  { %3374 = vmatprep.subr.mxu0 %v11037_v59  ;;  %13734 = vst [vmem:[#allocation110_spill] sm:$0xff] %v11055_v37  ;;  %v11061_v59 = vld [vmem:[%s12449_s12 + $0x1c8] sm:$0xff] }
 0x947   :  { %3375 = vmatpush1.msra.mxu0 %v11043_v42  ;;  %13735 = vst [vmem:[#allocation111_spill] sm:$0xff] %v11061_v59  ;;  %v11067_v42 = vld [vmem:[%s12449_s12 + $0x1c0] sm:$0xff] }
 0x948   :  { %3376 = vmatprep.subr.mxu0 %v11049_v27  ;;  %13736 = vst [vmem:[#allocation112_spill] sm:$0xff] %v11067_v42  ;;  %v11073_v27 = vld [vmem:[%s12449_s12 + $0x198] sm:$0xff] }
 0x949   :  { %3377 = vmatpush1.msra.mxu0 %v11055_v37  ;;  %13737 = vst [vmem:[#allocation113_spill] sm:$0xff] %v11073_v27  ;;  %v11079_v37 = vld [vmem:[%s12449_s12 + $0x190] sm:$0xff] }
 0x94a   :  { %3378 = vmatprep.subr.mxu0 %v11061_v59  ;;  %13738 = vst [vmem:[#allocation114_spill] sm:$0xff] %v11079_v37  ;;  %v11085_v59 = vld [vmem:[%s12449_s12 + $0x168] sm:$0xff] }
 0x94b   :  { %3379 = vmatpush1.msra.mxu0 %v11067_v42  ;;  %13739 = vst [vmem:[#allocation115_spill] sm:$0xff] %v11085_v59  ;;  %v11091_v42 = vld [vmem:[%s12449_s12 + $0x160] sm:$0xff] }
 0x94c   :  { %3380 = vmatprep.subr.mxu0 %v11073_v27  ;;  %13740 = vst [vmem:[#allocation116_spill] sm:$0xff] %v11091_v42  ;;  %v11097_v27 = vld [vmem:[%s12449_s12 + $0x138] sm:$0xff] }
 0x94d   :  { %3381 = vmatpush1.msra.mxu0 %v11079_v37  ;;  %13741 = vst [vmem:[#allocation117_spill] sm:$0xff] %v11097_v27  ;;  %v11103_v37 = vld [vmem:[%s12449_s12 + $0x130] sm:$0xff] }
 0x94e   :  { %3382 = vmatprep.subr.mxu0 %v11085_v59  ;;  %13742 = vst [vmem:[#allocation118_spill] sm:$0xff] %v11103_v37  ;;  %v11109_v59 = vld [vmem:[%s12449_s12 + $0x108] sm:$0xff] }
 0x94f   :  { %3383 = vmatpush1.msra.mxu0 %v11091_v42  ;;  %13743 = vst [vmem:[#allocation119_spill] sm:$0xff] %v11109_v59  ;;  %v11115_v42 = vld [vmem:[%s12449_s12 + $0x100] sm:$0xff] }
 0x950   :  { %3384 = vmatprep.subr.mxu0 %v11097_v27  ;;  %13744 = vst [vmem:[#allocation120_spill] sm:$0xff] %v11115_v42  ;;  %v11121_v27 = vld [vmem:[%s12449_s12 + $0xd8] sm:$0xff] }
 0x951   :  { %3385 = vmatpush1.msra.mxu0 %v11103_v37  ;;  %13745 = vst [vmem:[#allocation121_spill] sm:$0xff] %v11121_v27  ;;  %v11127_v37 = vld [vmem:[%s12449_s12 + $0xd0] sm:$0xff] }
 0x952   :  { %3386 = vmatprep.subr.mxu0 %v11109_v59  ;;  %13746 = vst [vmem:[#allocation122_spill] sm:$0xff] %v11127_v37  ;;  %v11133_v59 = vld [vmem:[%s12449_s12 + $0xa8] sm:$0xff] }
 0x953   :  { %3387 = vmatpush1.msra.mxu0 %v11115_v42  ;;  %13747 = vst [vmem:[#allocation123_spill] sm:$0xff] %v11133_v59  ;;  %v11139_v42 = vld [vmem:[%s12449_s12 + $0xa0] sm:$0xff] }
 0x954   :  { %3388 = vmatprep.subr.mxu0 %v11121_v27  ;;  %13748 = vst [vmem:[#allocation124_spill] sm:$0xff] %v11139_v42  ;;  %v11145_v27 = vld [vmem:[%s12449_s12 + $0x78] sm:$0xff] }
 0x955   :  { %3389 = vmatpush1.msra.mxu0 %v11127_v37  ;;  %13749 = vst [vmem:[#allocation125_spill] sm:$0xff] %v11145_v27  ;;  %v11151_v37 = vld [vmem:[%s12449_s12 + $0x70] sm:$0xff] }
 0x956   :  { %3390 = vmatprep.subr.mxu0 %v11133_v59  ;;  %13750 = vst [vmem:[#allocation126_spill] sm:$0xff] %v11151_v37  ;;  %v11157_v59 = vld [vmem:[%s12449_s12 + $0x48] sm:$0xff] }
 0x957   :  { %3391 = vmatpush1.msra.mxu0 %v11139_v42  ;;  %13751 = vst [vmem:[#allocation127_spill] sm:$0xff] %v11157_v59  ;;  %v11163_v42 = vld [vmem:[%s12449_s12 + $0x40] sm:$0xff] }
 0x958   :  { %3392 = vmatprep.subr.mxu0 %v11145_v27  ;;  %13752 = vst [vmem:[#allocation128_spill] sm:$0xff] %v11163_v42  ;;  %v11169_v27 = vld [vmem:[%s12449_s12 + $0x18] sm:$0xff] }
 0x959   :  { %3393 = vmatpush1.msra.mxu0 %v11151_v37  ;;  %13753 = vst [vmem:[#allocation129_spill] sm:$0xff] %v11169_v27  ;;  %v11175_v37 = vld [vmem:[%s12449_s12 + $0x10] sm:$0xff] }
 0x95a   :  { %3394 = vmatprep.subr.mxu0 %v11157_v59  ;;  %13754 = vst [vmem:[#allocation130_spill] sm:$0xff] %v11175_v37  ;;  %v11181_v59 = vld [vmem:[%s12449_s12 + $0x5e8] sm:$0xff] }
 0x95b   :  { %3395 = vmatpush1.msra.mxu0 %v11163_v42  ;;  %13755 = vst [vmem:[#allocation27_spill] sm:$0xff] %v11181_v59  ;;  %v11187_v42 = vld [vmem:[%s12449_s12 + $0x5e0] sm:$0xff] }
 0x95c   :  { %3396 = vmatprep.subr.mxu0 %v11169_v27  ;;  %13756 = vst [vmem:[#allocation83_spill] sm:$0xff] %v11187_v42  ;;  %v11193_v27 = vld [vmem:[%s12449_s12 + $0x5b8] sm:$0xff] }
 0x95d   :  { %3397 = vmatpush1.msra.mxu0 %v11175_v37  ;;  %13757 = vst [vmem:[#allocation23_spill] sm:$0xff] %v11193_v27  ;;  %v11199_v37 = vld [vmem:[%s12449_s12 + $0x5b0] sm:$0xff] }
 0x95e   :  { %3398 = vmatprep.subr.mxu0 %v11181_v59  ;;  %13758 = vst [vmem:[#allocation85_spill] sm:$0xff] %v11199_v37  ;;  %v11205_v59 = vld [vmem:[%s12449_s12 + $0x588] sm:$0xff] }
 0x95f   :  { %3399 = vmatpush2.msra.mxu0 %v11187_v42  ;;  %13759 = vst [vmem:[#allocation31_spill] sm:$0xff] %v11205_v59  ;;  %v11211_v42 = vld [vmem:[%s12449_s12 + $0x580] sm:$0xff] }
 0x960   :  { %3400 = vmatprep.subr.mxu0 %v11193_v27  ;;  %13760 = vst [vmem:[#allocation87_spill] sm:$0xff] %v11211_v42  ;;  %v11217_v27 = vld [vmem:[%s12449_s12 + $0x558] sm:$0xff] }
 0x961   :  { %3401 = vmatpush2.msra.mxu0 %v11199_v37  ;;  %13761 = vst [vmem:[#allocation32_spill] sm:$0xff] %v11217_v27  ;;  %v11223_v37 = vld [vmem:[%s12449_s12 + $0x550] sm:$0xff] }
 0x962   :  { %3402 = vmatprep.subr.mxu0 %v11205_v59  ;;  %13762 = vst [vmem:[#allocation90_spill] sm:$0xff] %v11223_v37  ;;  %v11229_v59 = vld [vmem:[%s12449_s12 + $0x528] sm:$0xff] }
 0x963   :  { %3403 = vmatpush2.msra.mxu0 %v11211_v42  ;;  %13763 = vst [vmem:[#allocation33_spill] sm:$0xff] %v11229_v59  ;;  %v11235_v42 = vld [vmem:[%s12449_s12 + $0x520] sm:$0xff] }
 0x964   :  { %3404 = vmatprep.subr.mxu0 %v11217_v27  ;;  %13764 = vst [vmem:[#allocation34_spill] sm:$0xff] %v11235_v42  ;;  %v11241_v27 = vld [vmem:[%s12449_s12 + $0x4f8] sm:$0xff] }
 0x965   :  { %3405 = vmatpush2.msra.mxu0 %v11223_v37  ;;  %13765 = vst [vmem:[#allocation35_spill] sm:$0xff] %v11241_v27  ;;  %v11247_v37 = vld [vmem:[%s12449_s12 + $0x4f0] sm:$0xff] }
 0x966   :  { %3406 = vmatprep.subr.mxu0 %v11229_v59  ;;  %13766 = vst [vmem:[#allocation36_spill] sm:$0xff] %v11247_v37  ;;  %v11253_v59 = vld [vmem:[%s12449_s12 + $0x4c8] sm:$0xff] }
 0x967   :  { %3407 = vmatpush2.msra.mxu0 %v11235_v42  ;;  %13767 = vst [vmem:[#allocation37_spill] sm:$0xff] %v11253_v59  ;;  %v11259_v42 = vld [vmem:[%s12449_s12 + $0x4c0] sm:$0xff] }
 0x968   :  { %3408 = vmatprep.subr.mxu0 %v11241_v27  ;;  %13768 = vst [vmem:[#allocation38_spill] sm:$0xff] %v11259_v42  ;;  %v11265_v27 = vld [vmem:[%s12449_s12 + $0x498] sm:$0xff] }
 0x969   :  { %3409 = vmatpush2.msra.mxu0 %v11247_v37  ;;  %13769 = vst [vmem:[#allocation39_spill] sm:$0xff] %v11265_v27  ;;  %v11271_v37 = vld [vmem:[%s12449_s12 + $0x490] sm:$0xff] }
 0x96a   :  { %3410 = vmatprep.subr.mxu0 %v11253_v59  ;;  %13770 = vst [vmem:[#allocation40_spill] sm:$0xff] %v11271_v37  ;;  %v11277_v59 = vld [vmem:[%s12449_s12 + $0x468] sm:$0xff] }
 0x96b   :  { %3411 = vmatpush2.msra.mxu0 %v11259_v42  ;;  %13771 = vst [vmem:[#allocation41_spill] sm:$0xff] %v11277_v59  ;;  %v11283_v42 = vld [vmem:[%s12449_s12 + $0x460] sm:$0xff] }
 0x96c   :  { %3412 = vmatprep.subr.mxu0 %v11265_v27  ;;  %13772 = vst [vmem:[#allocation42_spill] sm:$0xff] %v11283_v42  ;;  %v11289_v27 = vld [vmem:[%s12449_s12 + $0x438] sm:$0xff] }
 0x96d   :  { %3413 = vmatpush2.msra.mxu0 %v11271_v37  ;;  %13773 = vst [vmem:[#allocation43_spill] sm:$0xff] %v11289_v27  ;;  %v11295_v37 = vld [vmem:[%s12449_s12 + $0x430] sm:$0xff] }
 0x96e   :  { %3414 = vmatprep.subr.mxu0 %v11277_v59  ;;  %13774 = vst [vmem:[#allocation44_spill] sm:$0xff] %v11295_v37  ;;  %v11301_v59 = vld [vmem:[%s12449_s12 + $0x408] sm:$0xff] }
 0x96f   :  { %3415 = vmatpush2.msra.mxu0 %v11283_v42  ;;  %13775 = vst [vmem:[#allocation79_spill] sm:$0xff] %v11301_v59  ;;  %v11307_v42 = vld [vmem:[%s12449_s12 + $0x400] sm:$0xff] }
 0x970   :  { %3416 = vmatprep.subr.mxu0 %v11289_v27  ;;  %13776 = vst [vmem:[#allocation24_spill] sm:$0xff] %v11307_v42  ;;  %v11313_v27 = vld [vmem:[%s12449_s12 + $0x3d8] sm:$0xff] }
 0x971   :  { %3417 = vmatpush2.msra.mxu0 %v11295_v37  ;;  %13777 = vst [vmem:[#allocation45_spill] sm:$0xff] %v11313_v27  ;;  %v11319_v37 = vld [vmem:[%s12449_s12 + $0x3d0] sm:$0xff] }
 0x972   :  { %3418 = vmatprep.subr.mxu0 %v11301_v59  ;;  %13778 = vst [vmem:[#allocation46_spill] sm:$0xff] %v11319_v37  ;;  %v11325_v59 = vld [vmem:[%s12449_s12 + $0x3a8] sm:$0xff] }
 0x973   :  { %3419 = vmatpush2.msra.mxu0 %v11307_v42  ;;  %13779 = vst [vmem:[#allocation47_spill] sm:$0xff] %v11325_v59  ;;  %v11331_v42 = vld [vmem:[%s12449_s12 + $0x3a0] sm:$0xff] }
 0x974   :  { %3420 = vmatprep.subr.mxu0 %v11313_v27  ;;  %13780 = vst [vmem:[#allocation48_spill] sm:$0xff] %v11331_v42  ;;  %v11337_v27 = vld [vmem:[%s12449_s12 + $0x378] sm:$0xff] }
 0x975   :  { %3421 = vmatpush2.msra.mxu0 %v11319_v37  ;;  %13781 = vst [vmem:[#allocation49_spill] sm:$0xff] %v11337_v27  ;;  %v11343_v37 = vld [vmem:[%s12449_s12 + $0x370] sm:$0xff] }
 0x976   :  { %3422 = vmatprep.subr.mxu0 %v11325_v59  ;;  %13782 = vst [vmem:[#allocation50_spill] sm:$0xff] %v11343_v37  ;;  %v11349_v59 = vld [vmem:[%s12449_s12 + $0x348] sm:$0xff] }
 0x977   :  { %3423 = vmatpush2.msra.mxu0 %v11331_v42  ;;  %13783 = vst [vmem:[#allocation51_spill] sm:$0xff] %v11349_v59  ;;  %v11355_v42 = vld [vmem:[%s12449_s12 + $0x340] sm:$0xff] }
 0x978   :  { %3424 = vmatprep.subr.mxu0 %v11337_v27  ;;  %13784 = vst [vmem:[#allocation52_spill] sm:$0xff] %v11355_v42  ;;  %v11361_v27 = vld [vmem:[%s12449_s12 + $0x318] sm:$0xff] }
 0x979   :  { %3425 = vmatpush2.msra.mxu0 %v11343_v37  ;;  %13785 = vst [vmem:[#allocation26_spill] sm:$0xff] %v11361_v27  ;;  %v11367_v37 = vld [vmem:[%s12449_s12 + $0x310] sm:$0xff] }
 0x97a   :  { %3426 = vmatprep.subr.mxu0 %v11349_v59  ;;  %13786 = vst [vmem:[#allocation77_spill] sm:$0xff] %v11367_v37  ;;  %v13787_v59 = vld [vmem:[#allocation62_spill] sm:$0xff] }
 0x97b   :  { %3427 = vmatpush2.msra.mxu0 %v11355_v42 }
 0x97c   :  { %3428 = vmatprep.subr.mxu0 %v11361_v27 }
 0x97d   :  { %3429 = vmatpush2.msra.mxu0 %v11367_v37 }
 0x97e   :  { %3588 = vmatprep.subr.mxu0 %v13787_v59 }
 0x9be   :  { %v3068_v63 = vpop.f32.mrf.mxu0  ;;  %v3139_v27 = vpop.f32.mrf.mxu1 }
 0x9bf   :  { %v3069_v42 = vadd.f32 %v3068_v63, %v13788_v33  ;;  %v3140_v50 = vadd.f32 %v3139_v27, %v13428_v4  ;;  %v13792_v33 = vld [vmem:[#allocation22_spill] sm:$0xff]  ;;  %v13794_v27 = vld [vmem:[#allocation81_spill] sm:$0xff] }
 0x9c0   :  { %v3070_v32 = vpop.f32.mrf.mxu0  ;;  %v3141_v11 = vpop.f32.mrf.mxu1 }
 0x9c1   :  { %v3071_v44 = vadd.f32 %v3070_v32, %v13789_v0  ;;  %v3217_v31 = vrot.slane %v3069_v42, 4  ;;  %v3142_v59 = vadd.f32 %v3141_v11, %v13670_v58  ;;  %v3237_v38 = vrot.slane %v3140_v50, 4  ;;  %v13793_v42 = vld [vmem:[#allocation71_spill] sm:$0xff] }
 0x9c3   :  { %v3218_v14 = vrot.slane %v3071_v44, 4  ;;  %v3221_v47 = vadd.f32 %v3217_v31, %v13790_v39  ;;  %v3238_v63 = vrot.slane %v3142_v59, 4  ;;  %v3241_v32 = vadd.f32 %v3237_v38, %v13792_v33 }
 0x9c5   :  { %v3222_v3 = vadd.f32 %v3218_v14, %v13791_v28  ;;  %v4569_v35 = vmul.f32 -1.442695, %v3221_v47  ;;  %v3242_v44 = vadd.f32 %v3238_v63, %v13793_v42  ;;  %v4571_v0 = vmul.f32 -1.442695, %v3241_v32  ;;  %v13795_v63 = vld [vmem:[#allocation29_spill] sm:$0xff] }
 0x9c7   :  { %v4570_v37 = vmul.f32 -1.442695, %v3222_v3  ;;  %5124 = vpow2.f32 %v4569_v35  ;;  %v4572_v31 = vmul.f32 -1.442695, %v3242_v44 }
 0x9c9   :  { %5126 = vpow2.f32 %v4570_v37 }
 0x9ca   :  { %5128 = vpow2.f32 %v4571_v0 }
 0x9cb   :  { %5130 = vpow2.f32 %v4572_v31 }
 0x9d4   :  { %v5125_v39 = vpop.eup %5124 }
 0x9d5   :  { %v3229_v47 = vadd.f32 1.0, %v5125_v39 }
 0x9d6   :  { %v5127_v14 = vpop.eup %5126 }
 0x9d7   :  { %v3230_v28 = vadd.f32 1.0, %v5127_v14  ;;  %5132 = vrcp.f32 %v3229_v47  ;;  %v5129_v35 = vpop.eup %5128  ;;  %v13796_v14 = vld [vmem:[#allocation73_spill] sm:$0xff] }
 0x9d8   :  { %v5131_v3 = vpop.eup %5130  ;;  %v3249_v50 = vadd.f32 1.0, %v5129_v35 }
 0x9d9   :  { %5134 = vrcp.f32 %v3230_v28  ;;  %v3250_v38 = vadd.f32 1.0, %v5131_v3  ;;  %v3273_v3 = vrot.slane %v10533_v46, 4 }
 0x9da   :  { %5136 = vrcp.f32 %v3249_v50 }
 0x9db   :  { %5138 = vrcp.f32 %v3250_v38 }
 0x9e4   :  { %v5133_v44 = vpop.eup %5132 }
 0x9e6   :  { %v5135_v39 = vpop.eup %5134 }
 0x9e7   :  { %v5137_v35 = vpop.eup %5136 }
 0x9fe   :  { %v3210_v11 = vpop.f32.mrf.mxu0 }
 0x9ff   :  { %v3211_v37 = vadd.f32 %v3210_v11, %v13794_v27  ;;  %v5139_v11 = vpop.eup %5138 }
 0xa00   :  { %v3212_v59 = vpop.f32.mrf.mxu0  ;;  %v3268_v50 = vsub.f32 1.0, %v5139_v11 }
 0xa01   :  { %v3257_v33 = vrot.slane %v3211_v37, 4  ;;  %v3213_v32 = vadd.f32 %v3212_v59, %v13795_v63  ;;  %v3267_v37 = vsub.f32 1.0, %v5137_v35  ;;  %v3274_v59 = vrot.slane %v10528_v53, 4 }
 0xa03   :  { %v3261_v0 = vmul.f32 %v5133_v44, %v3257_v33  ;;  %v3258_v42 = vrot.slane %v3213_v32, 4  ;;  %v3277_v32 = vmul.f32 %v5137_v35, %v3273_v3  ;;  %v3278_v63 = vmul.f32 %v5139_v11, %v3274_v59  ;;  %v13799_v35 = vld [vmem:[#allocation63_spill] sm:$0xff]  ;;  %v13801_v11 = vld [vmem:[#allocation64_spill] sm:$0xff]  ;;  %v13803_v3 = vld [vmem:[#allocation66_spill] sm:$0xff] }
 0xa04   :  { %v13805_v59 = vld [vmem:[#allocation68_spill] sm:$0xff] }
 0xa05   :  { %v3263_v31 = vadd.f32 %v3261_v0, %v13674_v7  ;;  %v3262_v28 = vmul.f32 %v5135_v39, %v3258_v42 }
 0xa07   :  { %5140 = vtanh.f32 %v3263_v31  ;;  %v3264_v47 = vadd.f32 %v3262_v28, %v13796_v14  ;;  %v3285_v31 = vpop.permute.xlu1 %3284 }
 0xa08   :  { %vm3286_vm1 = vcmp.eq.s32.totalorder %v3285_v31, 1  ;;  %v11741_v31 = vld [vmem:[%s12449_s12 + $0x448] sm:$0xff] }
 0xa09   :  { %5142 = vtanh.f32 %v3264_v47  ;;  %13814 = vst [vmem:[#allocation58_spill] sm:$0xff] %v11741_v31 }
 0xa14   :  { %v5141_v27 = vpop.eup %5140 }
 0xa15   :  { %v3269_v33 = vmul.f32 %v5141_v27, %v3267_v37  ;;  %v11398_v27 = vld [vmem:[%s12449_s12 + $0x2f0] sm:$0xff] }
 0xa16   :  { %v5143_v44 = vpop.eup %5142  ;;  %v11706_v37 = vld [vmem:[%s12449_s12 + $0x4d0] sm:$0xff] }
 0xa17   :  { %v3270_v38 = vmul.f32 %v5143_v44, %v3268_v50  ;;  %v3279_v0 = vadd.f32 %v3277_v32, %v3269_v33  ;;  %13804 = vst [vmem:[#allocation54_spill] sm:$0xff] %v11706_v37  ;;  %v11713_v50 = vld [vmem:[%s12449_s12 + $0x4a8] sm:$0xff]  ;;  %v11720_v32 = vld [vmem:[%s12449_s12 + $0x4a0] sm:$0xff] }
 0xa18   :  { %13806 = vst [vmem:[#allocation20_spill] sm:$0xff] %v11713_v50  ;;  %v13807_v33 = vld [vmem:[#allocation70_spill] sm:$0xff]  ;;  %13808 = vst [vmem:[#allocation55_spill] sm:$0xff] %v11720_v32  ;;  %v13809_v44 = vld [vmem:[#allocation72_spill] sm:$0xff] }
 0xa19   :  { %v3280_v42 = vadd.f32 %v3278_v63, %v3270_v38  ;;  %v3289_v39 = vrot.slane %v3279_v0, 4  ;;  %v11419_v63 = vld [vmem:[%s12449_s12 + $0x298] sm:$0xff]  ;;  %v13811_v0 = vld [vmem:[#allocation74_spill] sm:$0xff] }
 0xa1a   :  { %v11727_v38 = vld [vmem:[%s12449_s12 + $0x478] sm:$0xff] }
 0xa1b   :  { %v3290_v28 = vrot.slane %v3280_v42, 4  ;;  %v11391_v14 = vsel %vm3286_vm1, %v3289_v39, %v10533_v46  ;;  %v11412_v46 = vld [vmem:[%s12449_s12 + $0x2c0] sm:$0xff]  ;;  %13810 = vst [vmem:[#allocation56_spill] sm:$0xff] %v11727_v38  ;;  %v11734_v42 = vld [vmem:[%s12449_s12 + $0x470] sm:$0xff] }
 0xa1c   :  { %13812 = vst [vmem:[#allocation57_spill] sm:$0xff] %v11734_v42  ;;  %v13813_v39 = vld [vmem:[#allocation76_spill] sm:$0xff] }
 0xa1d   :  { %v11386_v47 = vsel %vm3286_vm1, %v3290_v28, %v10528_v53  ;;  %v11405_v53 = vld [vmem:[%s12449_s12 + $0x2c8] sm:$0xff] }
 0xa1e   :  { %3359 = vmatprep.mubr.f32.mxu1 %v11386_v47  ;;  %3430 = vmatprep.mubr.f32.mxu0 %v11386_v47  ;;  %v13815_v28 = vld [vmem:[#allocation78_spill] sm:$0xff] }
 0xa1f   :  { %3360 = vmatmul.mubr.f32.vlgmr.msra.gmra.mxu1 %v11391_v14  ;;  %3431 = vmatmul.mubr.f32.vlgmr.msra.gmra.mxu0 %v11391_v14 }
 0xa20   :  { %3438 = vmatpush1.msra.mxu1 %v11398_v27  ;;  %3501 = vmatprep.mubr.f32.mxu1 %v11386_v47 }
 0xa21   :  { %3439 = vmatprep.subr.mxu1 %v11405_v53  ;;  %3589 = vmatpush1.msra.mxu0 %v10543_v62  ;;  %v11426_v62 = vld [vmem:[%s12449_s12 + $0x290] sm:$0xff] }
 0xa22   :  { %3440 = vmatpush1.msra.mxu1 %v11412_v46  ;;  %3590 = vmatprep.subr.mxu0 %v10550_v57  ;;  %v11433_v57 = vld [vmem:[%s12449_s12 + $0x268] sm:$0xff] }
 0xa23   :  { %3441 = vmatprep.subr.mxu1 %v11419_v63  ;;  %3591 = vmatpush1.msra.mxu0 %v10557_v60  ;;  %v11440_v60 = vld [vmem:[%s12449_s12 + $0x260] sm:$0xff] }
 0xa24   :  { %3442 = vmatpush1.msra.mxu1 %v11426_v62  ;;  %3592 = vmatprep.subr.mxu0 %v10564_v51  ;;  %v11447_v51 = vld [vmem:[%s12449_s12 + $0x238] sm:$0xff] }
 0xa25   :  { %3443 = vmatprep.subr.mxu1 %v11433_v57  ;;  %3593 = vmatpush1.msra.mxu0 %v10571_v8  ;;  %v11454_v8 = vld [vmem:[%s12449_s12 + $0x230] sm:$0xff] }
 0xa26   :  { %3444 = vmatpush1.msra.mxu1 %v11440_v60  ;;  %3594 = vmatprep.subr.mxu0 %v10578_v13  ;;  %v11461_v13 = vld [vmem:[%s12449_s12 + $0x208] sm:$0xff] }
 0xa27   :  { %3445 = vmatprep.subr.mxu1 %v11447_v51  ;;  %3595 = vmatpush1.msra.mxu0 %v10585_v48  ;;  %v11468_v48 = vld [vmem:[%s12449_s12 + $0x200] sm:$0xff] }
 0xa28   :  { %3446 = vmatpush1.msra.mxu1 %v11454_v8  ;;  %3596 = vmatprep.subr.mxu0 %v10592_v20  ;;  %v11475_v20 = vld [vmem:[%s12449_s12 + $0x1d8] sm:$0xff] }
 0xa29   :  { %3447 = vmatprep.subr.mxu1 %v11461_v13  ;;  %3597 = vmatpush1.msra.mxu0 %v10599_v61  ;;  %v11482_v61 = vld [vmem:[%s12449_s12 + $0x1d0] sm:$0xff] }
 0xa2a   :  { %3448 = vmatpush1.msra.mxu1 %v11468_v48  ;;  %3598 = vmatprep.subr.mxu0 %v10606_v6  ;;  %v11489_v6 = vld [vmem:[%s12449_s12 + $0x1a8] sm:$0xff] }
 0xa2b   :  { %3449 = vmatprep.subr.mxu1 %v11475_v20  ;;  %3599 = vmatpush1.msra.mxu0 %v10613_v52  ;;  %v11496_v52 = vld [vmem:[%s12449_s12 + $0x1a0] sm:$0xff] }
 0xa2c   :  { %3450 = vmatpush1.msra.mxu1 %v11482_v61  ;;  %3600 = vmatprep.subr.mxu0 %v10620_v12  ;;  %v11503_v12 = vld [vmem:[%s12449_s12 + $0x178] sm:$0xff] }
 0xa2d   :  { %3451 = vmatprep.subr.mxu1 %v11489_v6  ;;  %3601 = vmatpush1.msra.mxu0 %v10627_v1  ;;  %v11510_v1 = vld [vmem:[%s12449_s12 + $0x170] sm:$0xff] }
 0xa2e   :  { %3452 = vmatpush1.msra.mxu1 %v11496_v52  ;;  %3602 = vmatprep.subr.mxu0 %v10634_v15  ;;  %v11517_v15 = vld [vmem:[%s12449_s12 + $0x148] sm:$0xff] }
 0xa2f   :  { %3453 = vmatprep.subr.mxu1 %v11503_v12  ;;  %3603 = vmatpush1.msra.mxu0 %v10641_v2  ;;  %v11524_v2 = vld [vmem:[%s12449_s12 + $0x140] sm:$0xff] }
 0xa30   :  { %3454 = vmatpush1.msra.mxu1 %v11510_v1  ;;  %3604 = vmatprep.subr.mxu0 %v10648_v45  ;;  %v11531_v45 = vld [vmem:[%s12449_s12 + $0x118] sm:$0xff] }
 0xa31   :  { %3455 = vmatprep.subr.mxu1 %v11517_v15  ;;  %3605 = vmatpush1.msra.mxu0 %v10655_v56  ;;  %v11538_v56 = vld [vmem:[%s12449_s12 + $0x110] sm:$0xff] }
 0xa32   :  { %3456 = vmatpush1.msra.mxu1 %v11524_v2  ;;  %3606 = vmatprep.subr.mxu0 %v10662_v16  ;;  %v11545_v16 = vld [vmem:[%s12449_s12 + $0xe8] sm:$0xff] }
 0xa33   :  { %3457 = vmatprep.subr.mxu1 %v11531_v45  ;;  %3607 = vmatpush1.msra.mxu0 %v10669_v9  ;;  %v11552_v9 = vld [vmem:[%s12449_s12 + $0xe0] sm:$0xff] }
 0xa34   :  { %3458 = vmatpush1.msra.mxu1 %v11538_v56  ;;  %3608 = vmatprep.subr.mxu0 %v10676_v36  ;;  %v11559_v36 = vld [vmem:[%s12449_s12 + $0xb8] sm:$0xff] }
 0xa35   :  { %3459 = vmatprep.subr.mxu1 %v11545_v16  ;;  %3609 = vmatpush1.msra.mxu0 %v10683_v49  ;;  %v11566_v49 = vld [vmem:[%s12449_s12 + $0xb0] sm:$0xff] }
 0xa36   :  { %3460 = vmatpush1.msra.mxu1 %v11552_v9  ;;  %3610 = vmatprep.subr.mxu0 %v10690_v24  ;;  %v11573_v24 = vld [vmem:[%s12449_s12 + $0x88] sm:$0xff] }
 0xa37   :  { %3461 = vmatprep.subr.mxu1 %v11559_v36  ;;  %3611 = vmatpush1.msra.mxu0 %v10697_v5  ;;  %v11580_v5 = vld [vmem:[%s12449_s12 + $0x80] sm:$0xff] }
 0xa38   :  { %3462 = vmatpush1.msra.mxu1 %v11566_v49  ;;  %3612 = vmatprep.subr.mxu0 %v10704_v10  ;;  %v11587_v10 = vld [vmem:[%s12449_s12 + $0x58] sm:$0xff] }
 0xa39   :  { %3463 = vmatprep.subr.mxu1 %v11573_v24  ;;  %3613 = vmatpush1.msra.mxu0 %v10711_v40  ;;  %v11594_v40 = vld [vmem:[%s12449_s12 + $0x50] sm:$0xff] }
 0xa3a   :  { %3464 = vmatpush1.msra.mxu1 %v11580_v5  ;;  %3614 = vmatprep.subr.mxu0 %v10718_v54  ;;  %v11601_v54 = vld [vmem:[%s12449_s12 + $0x28] sm:$0xff] }
 0xa3b   :  { %3465 = vmatprep.subr.mxu1 %v11587_v10  ;;  %3615 = vmatpush1.msra.mxu0 %v10725_v55  ;;  %v11608_v55 = vld [vmem:[%s12449_s12 + $0x20] sm:$0xff] }
 0xa3c   :  { %3466 = vmatpush1.msra.mxu1 %v11594_v40  ;;  %3616 = vmatprep.subr.mxu0 %v10732_v43  ;;  %v11615_v43 = vld [vmem:[%s12449_s12 + $0x5f8] sm:$0xff] }
 0xa3d   :  { %3467 = vmatprep.subr.mxu1 %v11601_v54  ;;  %3617 = vmatpush1.msra.mxu0 %v10739_v30  ;;  %v11622_v30 = vld [vmem:[%s12449_s12 + $0x5f0] sm:$0xff] }
 0xa3e   :  { %3468 = vmatpush1.msra.mxu1 %v11608_v55  ;;  %3618 = vmatprep.subr.mxu0 %v10746_v17  ;;  %v11629_v17 = vld [vmem:[%s12449_s12 + $0x5c8] sm:$0xff] }
 0xa3f   :  { %3469 = vmatprep.subr.mxu1 %v11615_v43  ;;  %3619 = vmatpush1.msra.mxu0 %v10753_v18  ;;  %v11636_v18 = vld [vmem:[%s12449_s12 + $0x5c0] sm:$0xff] }
 0xa40   :  { %3470 = vmatpush2.msra.mxu1 %v11622_v30  ;;  %3620 = vmatprep.subr.mxu0 %v10760_v19  ;;  %v11643_v19 = vld [vmem:[%s12449_s12 + $0x598] sm:$0xff] }
 0xa41   :  { %3471 = vmatprep.subr.mxu1 %v11629_v17  ;;  %3621 = vmatpush2.msra.mxu0 %v10767_v21  ;;  %v11650_v21 = vld [vmem:[%s12449_s12 + $0x590] sm:$0xff] }
 0xa42   :  { %3472 = vmatpush2.msra.mxu1 %v11636_v18  ;;  %3622 = vmatprep.subr.mxu0 %v10774_v22  ;;  %v11657_v22 = vld [vmem:[%s12449_s12 + $0x568] sm:$0xff] }
 0xa43   :  { %3473 = vmatprep.subr.mxu1 %v11643_v19  ;;  %3623 = vmatpush2.msra.mxu0 %v10781_v41  ;;  %v11664_v41 = vld [vmem:[%s12449_s12 + $0x560] sm:$0xff] }
 0xa44   :  { %3474 = vmatpush2.msra.mxu1 %v11650_v21  ;;  %3624 = vmatprep.subr.mxu0 %v10788_v23  ;;  %v11671_v23 = vld [vmem:[%s12449_s12 + $0x538] sm:$0xff] }
 0xa45   :  { %3475 = vmatprep.subr.mxu1 %v11657_v22  ;;  %3625 = vmatpush2.msra.mxu0 %v10795_v25  ;;  %v11678_v25 = vld [vmem:[%s12449_s12 + $0x530] sm:$0xff] }
 0xa46   :  { %3476 = vmatpush2.msra.mxu1 %v11664_v41  ;;  %3626 = vmatprep.subr.mxu0 %v10802_v26  ;;  %13797 = vst [vmem:[#allocation28_spill] sm:$0xff] %v11678_v25  ;;  %v11685_v26 = vld [vmem:[%s12449_s12 + $0x508] sm:$0xff] }
 0xa47   :  { %3477 = vmatprep.subr.mxu1 %v11671_v23  ;;  %3627 = vmatpush2.msra.mxu0 %v10809_v34  ;;  %13798 = vst [vmem:[#allocation30_spill] sm:$0xff] %v11685_v26  ;;  %v11692_v34 = vld [vmem:[%s12449_s12 + $0x500] sm:$0xff] }
 0xa48   :  { %3478 = vmatpush2.msra.mxu1 %v11678_v25  ;;  %3628 = vmatprep.subr.mxu0 %v10816_v29  ;;  %13800 = vst [vmem:[#allocation19_spill] sm:$0xff] %v11692_v34  ;;  %v11699_v29 = vld [vmem:[%s12449_s12 + $0x4d8] sm:$0xff] }
 0xa49   :  { %3479 = vmatprep.subr.mxu1 %v11685_v26  ;;  %3629 = vmatpush2.msra.mxu0 %v13799_v35  ;;  %13802 = vst [vmem:[#allocation53_spill] sm:$0xff] %v11699_v29  ;;  %v11748_v35 = vld [vmem:[%s12449_s12 + $0x440] sm:$0xff] }
 0xa4a   :  { %3480 = vmatpush2.msra.mxu1 %v11692_v34  ;;  %3630 = vmatprep.subr.mxu0 %v13801_v11  ;;  %13816 = vst [vmem:[#allocation59_spill] sm:$0xff] %v11748_v35  ;;  %v13817_v11 = vld [vmem:[#allocation80_spill] sm:$0xff] }
 0xa4b   :  { %3481 = vmatprep.subr.mxu1 %v11699_v29  ;;  %3631 = vmatpush2.msra.mxu0 %v13803_v3  ;;  %v11755_v3 = vld [vmem:[%s12449_s12 + $0x418] sm:$0xff] }
 0xa4c   :  { %3482 = vmatpush2.msra.mxu1 %v11706_v37  ;;  %3632 = vmatprep.subr.mxu0 %v13805_v59  ;;  %13818 = vst [vmem:[#allocation60_spill] sm:$0xff] %v11755_v3  ;;  %v13819_v59 = vld [vmem:[#allocation82_spill] sm:$0xff] }
 0xa4d   :  { %3483 = vmatprep.subr.mxu1 %v11713_v50  ;;  %3633 = vmatpush2.msra.mxu0 %v13807_v33  ;;  %v11762_v33 = vld [vmem:[%s12449_s12 + $0x410] sm:$0xff]  ;;  %v13912_v50 = vld [vmem:[#allocation69_spill] sm:$0xff] }
 0xa4e   :  { %3484 = vmatpush2.msra.mxu1 %v11720_v32  ;;  %3634 = vmatprep.subr.mxu0 %v13809_v44  ;;  %13820 = vst [vmem:[#allocation61_spill] sm:$0xff] %v11762_v33  ;;  %v13821_v44 = vld [vmem:[#allocation84_spill] sm:$0xff] }
 0xa4f   :  { %3485 = vmatprep.subr.mxu1 %v11727_v38  ;;  %3635 = vmatpush2.msra.mxu0 %v13811_v0  ;;  %v11769_v0 = vld [vmem:[%s12449_s12 + $0x3e8] sm:$0xff] }
 0xa50   :  { %3486 = vmatpush2.msra.mxu1 %v11734_v42  ;;  %3636 = vmatprep.subr.mxu0 %v13813_v39  ;;  %13822 = vst [vmem:[#allocation62_spill] sm:$0xff] %v11769_v0  ;;  %v13823_v39 = vld [vmem:[#allocation18_spill] sm:$0xff]  ;;  %v13852_v42 = vld [vmem:[#allocation107_spill] sm:$0xff] }
 0xa51   :  { %3487 = vmatprep.subr.mxu1 %v11741_v31  ;;  %3637 = vmatpush2.msra.mxu0 %v13815_v28  ;;  %v11776_v28 = vld [vmem:[%s12449_s12 + $0x3e0] sm:$0xff] }
 0xa52   :  { %3488 = vmatpush2.msra.mxu1 %v11748_v35  ;;  %3638 = vmatprep.subr.mxu0 %v13817_v11  ;;  %13824 = vst [vmem:[#allocation63_spill] sm:$0xff] %v11776_v28  ;;  %v13825_v11 = vld [vmem:[#allocation86_spill] sm:$0xff]  ;;  %v13848_v35 = vld [vmem:[#allocation103_spill] sm:$0xff]  ;;  %v13849_v31 = vld [vmem:[#allocation104_spill] sm:$0xff] }
 0xa53   :  { %3489 = vmatprep.subr.mxu1 %v11755_v3  ;;  %3639 = vmatpush2.msra.mxu0 %v13819_v59  ;;  %v11783_v59 = vld [vmem:[%s12449_s12 + $0x3b8] sm:$0xff]  ;;  %v13847_v3 = vld [vmem:[#allocation102_spill] sm:$0xff] }
 0xa54   :  { %3490 = vmatpush2.msra.mxu1 %v11762_v33  ;;  %3640 = vmatprep.subr.mxu0 %v13821_v44  ;;  %13826 = vst [vmem:[#allocation64_spill] sm:$0xff] %v11783_v59  ;;  %v13827_v44 = vld [vmem:[#allocation88_spill] sm:$0xff]  ;;  %v13844_v33 = vld [vmem:[#allocation98_spill] sm:$0xff] }
 0xa55   :  { %3491 = vmatprep.subr.mxu1 %v11769_v0  ;;  %3641 = vmatpush2.msra.mxu0 %v13823_v39  ;;  %v11790_v39 = vld [vmem:[%s12449_s12 + $0x3b0] sm:$0xff]  ;;  %v13829_v0 = vld [vmem:[#allocation89_spill] sm:$0xff] }
 0xa56   :  { %3492 = vmatpush2.msra.mxu1 %v11776_v28  ;;  %3642 = vmatprep.subr.mxu0 %v13825_v11  ;;  %13828 = vst [vmem:[#allocation66_spill] sm:$0xff] %v11790_v39  ;;  %v11797_v11 = vld [vmem:[%s12449_s12 + $0x388] sm:$0xff]  ;;  %v13831_v28 = vld [vmem:[#allocation91_spill] sm:$0xff] }
 0xa57   :  { %3493 = vmatprep.subr.mxu1 %v11783_v59  ;;  %3643 = vmatpush2.msra.mxu0 %v13827_v44  ;;  %13830 = vst [vmem:[#allocation68_spill] sm:$0xff] %v11797_v11  ;;  %v11804_v44 = vld [vmem:[%s12449_s12 + $0x380] sm:$0xff] }
 0xa58   :  { %3494 = vmatpush2.msra.mxu1 %v11790_v39  ;;  %3644 = vmatprep.subr.mxu0 %v13829_v0  ;;  %13832 = vst [vmem:[#allocation70_spill] sm:$0xff] %v11804_v44  ;;  %v13833_v59 = vld [vmem:[#allocation93_spill] sm:$0xff]  ;;  %v11811_v0 = vld [vmem:[%s12449_s12 + $0x358] sm:$0xff] }
 0xa59   :  { %3495 = vmatprep.subr.mxu1 %v11797_v11  ;;  %3645 = vmatpush2.msra.mxu0 %v13831_v28  ;;  %13834 = vst [vmem:[#allocation72_spill] sm:$0xff] %v11811_v0  ;;  %v13835_v39 = vld [vmem:[#allocation95_spill] sm:$0xff]  ;;  %v13837_v11 = vld [vmem:[#allocation97_spill] sm:$0xff] }
 0xa5a   :  { %3496 = vmatpush2.msra.mxu1 %v11804_v44  ;;  %3646 = vmatprep.subr.mxu0 %v13833_v59  ;;  %v11818_v28 = vld [vmem:[%s12449_s12 + $0x350] sm:$0xff]  ;;  %v11825_v59 = vld [vmem:[%s12449_s12 + $0x328] sm:$0xff] }
 0xa5b   :  { %3497 = vmatprep.subr.mxu1 %v11811_v0  ;;  %3647 = vmatpush2.msra.mxu0 %v13835_v39  ;;  %13836 = vst [vmem:[#allocation74_spill] sm:$0xff] %v11818_v28  ;;  %13838 = vst [vmem:[#allocation76_spill] sm:$0xff] %v11825_v59  ;;  %v13839_v44 = vld [vmem:[#allocation99_spill] sm:$0xff]  ;;  %v11832_v39 = vld [vmem:[%s12449_s12 + $0x320] sm:$0xff] }
 0xa5c   :  { %3498 = vmatpush2.msra.mxu1 %v11818_v28  ;;  %3648 = vmatprep.subr.mxu0 %v13837_v11  ;;  %13840 = vst [vmem:[#allocation78_spill] sm:$0xff] %v11832_v39  ;;  %v13841_v0 = vld [vmem:[#allocation92_spill] sm:$0xff]  ;;  %v13842_v11 = vld [vmem:[#allocation94_spill] sm:$0xff] }
 0xa5d   :  { %3499 = vmatprep.subr.mxu1 %v11825_v59  ;;  %3649 = vmatpush2.msra.mxu0 %v13839_v44  ;;  %v13843_v28 = vld [vmem:[#allocation96_spill] sm:$0xff]  ;;  %v13846_v44 = vld [vmem:[#allocation101_spill] sm:$0xff] }
 0xa5e   :  { %3500 = vmatpush2.msra.mxu1 %v11832_v39  ;;  %3650 = vmatprep.subr.mxu0 %v13841_v0  ;;  %v13845_v59 = vld [vmem:[#allocation100_spill] sm:$0xff]  ;;  %v13850_v39 = vld [vmem:[#allocation105_spill] sm:$0xff]  ;;  %v13851_v0 = vld [vmem:[#allocation106_spill] sm:$0xff] }
 0xa5f   :  { %3502 = vmatmul.mubr.f32.vlgmr.msra.gmra.mxu1 %v11391_v14  ;;  %3659 = vmatprep.subr.mxu1 %v13842_v11  ;;  %v13853_v11 = vld [vmem:[#allocation108_spill] sm:$0xff] }
 0xa60   :  { %3660 = vmatpush1.msra.mxu1 %v13843_v28  ;;  %3651 = vmatpush2.msra.mxu0 %v13844_v33  ;;  %v13854_v28 = vld [vmem:[#allocation109_spill] sm:$0xff]  ;;  %v13855_v33 = vld [vmem:[#allocation110_spill] sm:$0xff] }
 0xa61   :  { %3661 = vmatprep.subr.mxu1 %v13845_v59  ;;  %3730 = vmatprep.subr.mxu0 %v13846_v44  ;;  %v13856_v59 = vld [vmem:[#allocation111_spill] sm:$0xff]  ;;  %v13857_v44 = vld [vmem:[#allocation112_spill] sm:$0xff] }
 0xa62   :  { %3662 = vmatpush1.msra.mxu1 %v13847_v3  ;;  %v13858_v3 = vld [vmem:[#allocation113_spill] sm:$0xff] }
 0xa63   :  { %3663 = vmatprep.subr.mxu1 %v13848_v35  ;;  %v13859_v35 = vld [vmem:[#allocation114_spill] sm:$0xff] }
 0xa64   :  { %3664 = vmatpush1.msra.mxu1 %v13849_v31  ;;  %v13860_v31 = vld [vmem:[#allocation115_spill] sm:$0xff] }
 0xa65   :  { %3665 = vmatprep.subr.mxu1 %v13850_v39  ;;  %v13861_v39 = vld [vmem:[#allocation116_spill] sm:$0xff] }
 0xa66   :  { %3666 = vmatpush1.msra.mxu1 %v13851_v0  ;;  %v13862_v0 = vld [vmem:[#allocation117_spill] sm:$0xff] }
 0xa67   :  { %3667 = vmatprep.subr.mxu1 %v13852_v42  ;;  %v13863_v42 = vld [vmem:[#allocation118_spill] sm:$0xff] }
 0xa68   :  { %3668 = vmatpush1.msra.mxu1 %v13853_v11  ;;  %v13864_v11 = vld [vmem:[#allocation119_spill] sm:$0xff] }
 0xa69   :  { %3669 = vmatprep.subr.mxu1 %v13854_v28  ;;  %v13865_v28 = vld [vmem:[#allocation120_spill] sm:$0xff] }
 0xa6a   :  { %3670 = vmatpush1.msra.mxu1 %v13855_v33  ;;  %v13866_v33 = vld [vmem:[#allocation121_spill] sm:$0xff] }
 0xa6b   :  { %3671 = vmatprep.subr.mxu1 %v13856_v59  ;;  %v13867_v59 = vld [vmem:[#allocation122_spill] sm:$0xff] }
 0xa6c   :  { %3672 = vmatpush1.msra.mxu1 %v13857_v44  ;;  %v13868_v44 = vld [vmem:[#allocation123_spill] sm:$0xff] }
 0xa6d   :  { %3673 = vmatprep.subr.mxu1 %v13858_v3  ;;  %v13869_v3 = vld [vmem:[#allocation124_spill] sm:$0xff] }
 0xa6e   :  { %3674 = vmatpush1.msra.mxu1 %v13859_v35  ;;  %v13870_v35 = vld [vmem:[#allocation125_spill] sm:$0xff] }
 0xa6f   :  { %3675 = vmatprep.subr.mxu1 %v13860_v31  ;;  %v13871_v31 = vld [vmem:[#allocation126_spill] sm:$0xff] }
 0xa70   :  { %3676 = vmatpush1.msra.mxu1 %v13861_v39  ;;  %v13872_v39 = vld [vmem:[#allocation127_spill] sm:$0xff] }
 0xa71   :  { %3677 = vmatprep.subr.mxu1 %v13862_v0  ;;  %v13873_v0 = vld [vmem:[#allocation128_spill] sm:$0xff] }
 0xa72   :  { %3678 = vmatpush1.msra.mxu1 %v13863_v42  ;;  %v13874_v42 = vld [vmem:[#allocation129_spill] sm:$0xff] }
 0xa73   :  { %3679 = vmatprep.subr.mxu1 %v13864_v11  ;;  %v13875_v11 = vld [vmem:[#allocation130_spill] sm:$0xff] }
 0xa74   :  { %3680 = vmatpush1.msra.mxu1 %v13865_v28  ;;  %v13876_v28 = vld [vmem:[#allocation27_spill] sm:$0xff] }
 0xa75   :  { %3681 = vmatprep.subr.mxu1 %v13866_v33  ;;  %v13877_v33 = vld [vmem:[#allocation83_spill] sm:$0xff] }
 0xa76   :  { %3682 = vmatpush1.msra.mxu1 %v13867_v59  ;;  %v13878_v59 = vld [vmem:[#allocation23_spill] sm:$0xff] }
 0xa77   :  { %3683 = vmatprep.subr.mxu1 %v13868_v44  ;;  %v13879_v44 = vld [vmem:[#allocation85_spill] sm:$0xff] }
 0xa78   :  { %3684 = vmatpush1.msra.mxu1 %v13869_v3  ;;  %v13880_v3 = vld [vmem:[#allocation31_spill] sm:$0xff] }
 0xa79   :  { %3685 = vmatprep.subr.mxu1 %v13870_v35  ;;  %v13881_v35 = vld [vmem:[#allocation87_spill] sm:$0xff] }
 0xa7a   :  { %3686 = vmatpush1.msra.mxu1 %v13871_v31  ;;  %v13882_v31 = vld [vmem:[#allocation32_spill] sm:$0xff] }
 0xa7b   :  { %3687 = vmatprep.subr.mxu1 %v13872_v39  ;;  %v13883_v39 = vld [vmem:[#allocation90_spill] sm:$0xff] }
 0xa7c   :  { %3688 = vmatpush1.msra.mxu1 %v13873_v0  ;;  %v13884_v0 = vld [vmem:[#allocation33_spill] sm:$0xff] }
 0xa7d   :  { %3689 = vmatprep.subr.mxu1 %v13874_v42  ;;  %v13885_v42 = vld [vmem:[#allocation34_spill] sm:$0xff] }
 0xa7e   :  { %3690 = vmatpush1.msra.mxu1 %v13875_v11  ;;  %v13886_v11 = vld [vmem:[#allocation35_spill] sm:$0xff] }
 0xa7f   :  { %3691 = vmatprep.subr.mxu1 %v13876_v28  ;;  %v13887_v28 = vld [vmem:[#allocation36_spill] sm:$0xff] }
 0xa80   :  { %3692 = vmatpush2.msra.mxu1 %v13877_v33  ;;  %v13888_v33 = vld [vmem:[#allocation37_spill] sm:$0xff] }
 0xa81   :  { %3693 = vmatprep.subr.mxu1 %v13878_v59  ;;  %v13889_v59 = vld [vmem:[#allocation38_spill] sm:$0xff] }
 0xa82   :  { %3694 = vmatpush2.msra.mxu1 %v13879_v44  ;;  %v13890_v44 = vld [vmem:[#allocation39_spill] sm:$0xff] }
 0xa83   :  { %3695 = vmatprep.subr.mxu1 %v13880_v3  ;;  %v13891_v3 = vld [vmem:[#allocation40_spill] sm:$0xff] }
 0xa84   :  { %3696 = vmatpush2.msra.mxu1 %v13881_v35  ;;  %v13892_v35 = vld [vmem:[#allocation41_spill] sm:$0xff] }
 0xa85   :  { %3697 = vmatprep.subr.mxu1 %v13882_v31  ;;  %v13893_v31 = vld [vmem:[#allocation42_spill] sm:$0xff] }
 0xa86   :  { %3698 = vmatpush2.msra.mxu1 %v13883_v39  ;;  %v13894_v39 = vld [vmem:[#allocation43_spill] sm:$0xff] }
 0xa87   :  { %3699 = vmatprep.subr.mxu1 %v13884_v0  ;;  %v13895_v0 = vld [vmem:[#allocation44_spill] sm:$0xff] }
 0xa88   :  { %3700 = vmatpush2.msra.mxu1 %v13885_v42  ;;  %v13896_v42 = vld [vmem:[#allocation79_spill] sm:$0xff] }
 0xa89   :  { %3701 = vmatprep.subr.mxu1 %v13886_v11  ;;  %v13897_v11 = vld [vmem:[#allocation24_spill] sm:$0xff] }
 0xa8a   :  { %3702 = vmatpush2.msra.mxu1 %v13887_v28  ;;  %v13898_v28 = vld [vmem:[#allocation45_spill] sm:$0xff] }
 0xa8b   :  { %3703 = vmatprep.subr.mxu1 %v13888_v33  ;;  %v13899_v33 = vld [vmem:[#allocation46_spill] sm:$0xff] }
 0xa8c   :  { %3704 = vmatpush2.msra.mxu1 %v13889_v59  ;;  %v13900_v59 = vld [vmem:[#allocation47_spill] sm:$0xff] }
 0xa8d   :  { %3705 = vmatprep.subr.mxu1 %v13890_v44  ;;  %v13901_v44 = vld [vmem:[#allocation48_spill] sm:$0xff] }
 0xa8e   :  { %3706 = vmatpush2.msra.mxu1 %v13891_v3  ;;  %v13902_v3 = vld [vmem:[#allocation49_spill] sm:$0xff] }
 0xa8f   :  { %3707 = vmatprep.subr.mxu1 %v13892_v35  ;;  %v13903_v35 = vld [vmem:[#allocation50_spill] sm:$0xff] }
 0xa90   :  { %3708 = vmatpush2.msra.mxu1 %v13893_v31  ;;  %v13904_v31 = vld [vmem:[#allocation51_spill] sm:$0xff] }
 0xa91   :  { %3709 = vmatprep.subr.mxu1 %v13894_v39  ;;  %v13905_v39 = vld [vmem:[#allocation52_spill] sm:$0xff] }
 0xa92   :  { %3710 = vmatpush2.msra.mxu1 %v13895_v0  ;;  %v13906_v0 = vld [vmem:[#allocation26_spill] sm:$0xff] }
 0xa93   :  { %3711 = vmatprep.subr.mxu1 %v13896_v42  ;;  %v13907_v42 = vld [vmem:[#allocation77_spill] sm:$0xff] }
 0xa94   :  { %3712 = vmatpush2.msra.mxu1 %v13897_v11  ;;  %v11906_v11 = vld [vmem:[%s12452_s15 + $0xf8] sm:$0xff] }
 0xa95   :  { %3713 = vmatprep.subr.mxu1 %v13898_v28  ;;  %13908 = vst [vmem:[#allocation80_spill] sm:$0xff] %v11906_v11 }
 0xa96   :  { %3714 = vmatpush2.msra.mxu1 %v13899_v33 }
 0xa97   :  { %3715 = vmatprep.subr.mxu1 %v13900_v59  ;;  %v13909_v59 = vld [vmem:[#allocation25_spill] sm:$0xff] }
 0xa98   :  { %3716 = vmatpush2.msra.mxu1 %v13901_v44 }
 0xa99   :  { %3717 = vmatprep.subr.mxu1 %v13902_v3  ;;  %v13910_v3 = vld [vmem:[#allocation75_spill] sm:$0xff] }
 0xa9a   :  { %3718 = vmatpush2.msra.mxu1 %v13903_v35 }
 0xa9b   :  { %3719 = vmatprep.subr.mxu1 %v13904_v31 }
 0xa9c   :  { %3720 = vmatpush2.msra.mxu1 %v13905_v39  ;;  %v13911_v39 = vld [vmem:[#allocation67_spill] sm:$0xff] }
 0xa9d   :  { %3721 = vmatprep.subr.mxu1 %v13906_v0 }
 0xa9e   :  { %3722 = vmatpush2.msra.mxu1 %v13907_v42 }
 0xa9f   :  { %4620 = vmatprep.subr.mxu1 %v11906_v11 }
 0xadf   :  { %v3361_v28 = vpop.f32.mrf.mxu1  ;;  %v3432_v0 = vpop.f32.mrf.mxu0 }
 0xae0   :  { %v3362_v44 = vadd.f32 %v3361_v28, %v13909_v59  ;;  %v3433_v34 = vadd.f32 %v3432_v0, %v13428_v4  ;;  %v13913_v59 = vld [vmem:[#allocation22_spill] sm:$0xff] }
 0xae1   :  { %v3363_v33 = vpop.f32.mrf.mxu1  ;;  %v3434_v29 = vpop.f32.mrf.mxu0 }
 0xae2   :  { %v3364_v35 = vadd.f32 %v3363_v33, %v13910_v3  ;;  %v3510_v31 = vrot.slane %v3362_v44, 6  ;;  %v3435_v11 = vadd.f32 %v3434_v29, %v13670_v58  ;;  %v3530_v25 = vrot.slane %v3433_v34, 6  ;;  %v13914_v44 = vld [vmem:[#allocation71_spill] sm:$0xff] }
 0xae4   :  { %v3511_v38 = vrot.slane %v3364_v35, 6  ;;  %v3514_v32 = vadd.f32 %v3510_v31, %v13911_v39  ;;  %v3531_v28 = vrot.slane %v3435_v11, 6  ;;  %v3534_v33 = vadd.f32 %v3530_v25, %v13913_v59 }
 0xae6   :  { %v3515_v42 = vadd.f32 %v3511_v38, %v13912_v50  ;;  %v4573_v37 = vmul.f32 -1.442695, %v3514_v32  ;;  %v3535_v35 = vadd.f32 %v3531_v28, %v13914_v44  ;;  %v4575_v3 = vmul.f32 -1.442695, %v3534_v33  ;;  %v13916_v28 = vld [vmem:[#allocation29_spill] sm:$0xff] }
 0xae8   :  { %v4574_v26 = vmul.f32 -1.442695, %v3515_v42  ;;  %5144 = vpow2.f32 %v4573_v37  ;;  %v4576_v31 = vmul.f32 -1.442695, %v3535_v35 }
 0xaea   :  { %5146 = vpow2.f32 %v4574_v26  ;;  %v13915_v26 = vld [vmem:[#allocation81_spill] sm:$0xff] }
 0xaeb   :  { %5148 = vpow2.f32 %v4575_v3 }
 0xaec   :  { %5150 = vpow2.f32 %v4576_v31 }
 0xaf5   :  { %v5145_v39 = vpop.eup %5144 }
 0xaf6   :  { %v3522_v32 = vadd.f32 1.0, %v5145_v39 }
 0xaf7   :  { %v5147_v38 = vpop.eup %5146 }
 0xaf8   :  { %v3523_v50 = vadd.f32 1.0, %v5147_v38  ;;  %5152 = vrcp.f32 %v3522_v32  ;;  %v5149_v37 = vpop.eup %5148  ;;  %v13917_v38 = vld [vmem:[#allocation73_spill] sm:$0xff] }
 0xaf9   :  { %v5151_v0 = vpop.eup %5150  ;;  %v3542_v34 = vadd.f32 1.0, %v5149_v37 }
 0xafa   :  { %5154 = vrcp.f32 %v3523_v50  ;;  %v3543_v25 = vadd.f32 1.0, %v5151_v0  ;;  %v3566_v0 = vrot.slane %v11391_v14, 6 }
 0xafb   :  { %5156 = vrcp.f32 %v3542_v34 }
 0xafc   :  { %5158 = vrcp.f32 %v3543_v25 }
 0xb05   :  { %v5153_v35 = vpop.eup %5152 }
 0xb07   :  { %v5155_v39 = vpop.eup %5154 }
 0xb08   :  { %v5157_v37 = vpop.eup %5156 }
 0xb1f   :  { %v3503_v29 = vpop.f32.mrf.mxu1 }
 0xb20   :  { %v3504_v11 = vadd.f32 %v3503_v29, %v13915_v26  ;;  %v5159_v29 = vpop.eup %5158 }
 0xb21   :  { %v3505_v42 = vpop.f32.mrf.mxu1  ;;  %v3561_v34 = vsub.f32 1.0, %v5159_v29 }
 0xb22   :  { %v3550_v59 = vrot.slane %v3504_v11, 6  ;;  %v3506_v33 = vadd.f32 %v3505_v42, %v13916_v28  ;;  %v3560_v11 = vsub.f32 1.0, %v5157_v37  ;;  %v3567_v42 = vrot.slane %v11386_v47, 6 }
 0xb24   :  { %v3554_v3 = vmul.f32 %v5153_v35, %v3550_v59  ;;  %v3551_v44 = vrot.slane %v3506_v33, 6  ;;  %v3570_v33 = vmul.f32 %v5157_v37, %v3566_v0  ;;  %v3571_v28 = vmul.f32 %v5159_v29, %v3567_v42  ;;  %v13918_v37 = vld [vmem:[#allocation21_spill] sm:$0xff]  ;;  %v13935_v42 = vld [vmem:[#allocation63_spill] sm:$0xff] }
 0xb25   :  { %v11976_v29 = vld [vmem:[%s12452_s15 + $0x60] sm:$0xff] }
 0xb26   :  { %v3556_v31 = vadd.f32 %v3554_v3, %v13674_v7  ;;  %v3555_v50 = vmul.f32 %v5155_v39, %v3551_v44  ;;  %v3578_v44 = vpop.permute.xlu0 %3577  ;;  %v13933_v0 = vld [vmem:[#allocation61_spill] sm:$0xff] }
 0xb27   :  { %vm3579_vm2 = vcmp.eq.s32.totalorder %v3578_v44, 1  ;;  %v13942_v44 = vld [vmem:[#allocation76_spill] sm:$0xff] }
 0xb28   :  { %5160 = vtanh.f32 %v3556_v31  ;;  %v3557_v32 = vadd.f32 %v3555_v50, %v13917_v38  ;;  %v11929_v38 = vld [vmem:[%s12452_s15 + $0x78] sm:$0xff] }
 0xb2a   :  { %5162 = vtanh.f32 %v3557_v32 }
 0xb35   :  { %v5161_v26 = vpop.eup %5160 }
 0xb36   :  { %v3562_v59 = vmul.f32 %v5161_v26, %v3560_v11  ;;  %v13934_v11 = vld [vmem:[#allocation62_spill] sm:$0xff] }
 0xb37   :  { %v5163_v35 = vpop.eup %5162 }
 0xb38   :  { %v3563_v25 = vmul.f32 %v5163_v35, %v3561_v34  ;;  %v3572_v3 = vadd.f32 %v3570_v33, %v3562_v59  ;;  %v13936_v34 = vld [vmem:[#allocation64_spill] sm:$0xff]  ;;  %v13937_v59 = vld [vmem:[#allocation66_spill] sm:$0xff] }
 0xb39   :  { %v13938_v33 = vld [vmem:[#allocation68_spill] sm:$0xff]  ;;  %v13939_v35 = vld [vmem:[#allocation70_spill] sm:$0xff] }
 0xb3a   :  { %v3573_v39 = vadd.f32 %v3571_v28, %v3563_v25  ;;  %v3582_v31 = vrot.slane %v3572_v3, 2  ;;  %v11948_v28 = vld [vmem:[%s12452_s15 + $0x70] sm:$0xff]  ;;  %v13940_v25 = vld [vmem:[#allocation72_spill] sm:$0xff] }
 0xb3b   :  { %v13941_v3 = vld [vmem:[#allocation74_spill] sm:$0xff] }
 0xb3c   :  { %v3583_v50 = vrot.slane %v3573_v39, 2  ;;  %v11934_v26 = vsel %vm3579_vm2, %v3582_v31, %v11391_v14  ;;  %v11955_v14 = vld [vmem:[%s12452_s15 + $0xe8] sm:$0xff]  ;;  %v13944_v31 = vld [vmem:[#allocation80_spill] sm:$0xff] }
 0xb3d   :  { %v13943_v39 = vld [vmem:[#allocation78_spill] sm:$0xff] }
 0xb3e   :  { %v11924_v32 = vsel %vm3579_vm2, %v3583_v50, %v11386_v47  ;;  %v11941_v47 = vld [vmem:[%s12452_s15 + $0xf0] sm:$0xff]  ;;  %v4061_v50 = vld [vmem:[%s12454_s17 + $0xf8] sm:$0xff] }
 0xb3f   :  { %3652 = vmatprep.mubr.f32.mxu0 %v11924_v32  ;;  %3723 = vmatprep.mubr.f32.mxu1 %v11924_v32 }
 0xb40   :  { %3653 = vmatmul.mubr.f32.vlgmr.msra.gmra.mxu0 %v11934_v26  ;;  %3724 = vmatmul.mubr.f32.vlgmr.msra.gmra.mxu1 %v11934_v26 }
 0xb41   :  { %3731 = vmatpush1.msra.mxu0 %v11398_v27  ;;  %4621 = vmatpush3.msra.mxu1 %v11929_v38  ;;  %v11962_v27 = vld [vmem:[%s12452_s15 + $0x68] sm:$0xff] }
 0xb42   :  { %3732 = vmatprep.subr.mxu0 %v11405_v53  ;;  %3794 = vmatprep.mubr.f32.mxu0 %v11924_v32  ;;  %v11969_v53 = vld [vmem:[%s12452_s15 + $0xe0] sm:$0xff] }
 0xb43   :  { %4622 = vmatprep.subr.mxu1 %v11941_v47  ;;  %3954 = vmatprep.mubr.f32.mxu1 %v13918_v37  ;;  %v4056_v37 = vld [vmem:[%s12454_s17 + $0xd0] sm:$0xff] }
 0xb44   :  { %3733 = vmatpush1.msra.mxu0 %v11412_v46  ;;  %4623 = vmatpush3.msra.mxu1 %v11948_v28  ;;  %v11983_v46 = vld [vmem:[%s12452_s15 + $0xd8] sm:$0xff] }
 0xb45   :  { %3734 = vmatprep.subr.mxu0 %v11419_v63  ;;  %4624 = vmatprep.subr.mxu1 %v11955_v14  ;;  %v11990_v63 = vld [vmem:[%s12452_s15 + $0x58] sm:$0xff] }
 0xb46   :  { %3735 = vmatpush1.msra.mxu0 %v11426_v62  ;;  %4625 = vmatpush3.msra.mxu1 %v11962_v27  ;;  %v11997_v62 = vld [vmem:[%s12452_s15 + $0xd0] sm:$0xff] }
 0xb47   :  { %3736 = vmatprep.subr.mxu0 %v11433_v57  ;;  %4626 = vmatprep.subr.mxu1 %v11969_v53  ;;  %v12004_v57 = vld [vmem:[%s12452_s15 + $0x50] sm:$0xff] }
 0xb48   :  { %3737 = vmatpush1.msra.mxu0 %v11440_v60  ;;  %4627 = vmatpush3.msra.mxu1 %v11976_v29  ;;  %v12011_v60 = vld [vmem:[%s12452_s15 + $0xc8] sm:$0xff] }
 0xb49   :  { %3738 = vmatprep.subr.mxu0 %v11447_v51  ;;  %4628 = vmatprep.subr.mxu1 %v11983_v46  ;;  %v12018_v51 = vld [vmem:[%s12452_s15 + $0x48] sm:$0xff] }
 0xb4a   :  { %3739 = vmatpush1.msra.mxu0 %v11454_v8  ;;  %4629 = vmatpush3.msra.mxu1 %v11990_v63  ;;  %v12025_v8 = vld [vmem:[%s12452_s15 + $0xc0] sm:$0xff] }
 0xb4b   :  { %3740 = vmatprep.subr.mxu0 %v11461_v13  ;;  %4630 = vmatprep.subr.mxu1 %v11997_v62  ;;  %v12032_v13 = vld [vmem:[%s12452_s15 + $0x40] sm:$0xff] }
 0xb4c   :  { %3741 = vmatpush1.msra.mxu0 %v11468_v48  ;;  %4631 = vmatpush3.msra.mxu1 %v12004_v57  ;;  %v12039_v48 = vld [vmem:[%s12452_s15 + $0xb8] sm:$0xff] }
 0xb4d   :  { %3742 = vmatprep.subr.mxu0 %v11475_v20  ;;  %4632 = vmatprep.subr.mxu1 %v12011_v60  ;;  %v12046_v20 = vld [vmem:[%s12452_s15 + $0x38] sm:$0xff] }
 0xb4e   :  { %3743 = vmatpush1.msra.mxu0 %v11482_v61  ;;  %4633 = vmatpush3.msra.mxu1 %v12018_v51  ;;  %v12053_v61 = vld [vmem:[%s12452_s15 + $0xb0] sm:$0xff] }
 0xb4f   :  { %3744 = vmatprep.subr.mxu0 %v11489_v6  ;;  %4634 = vmatprep.subr.mxu1 %v12025_v8  ;;  %v12060_v6 = vld [vmem:[%s12452_s15 + $0x30] sm:$0xff] }
 0xb50   :  { %3745 = vmatpush1.msra.mxu0 %v11496_v52  ;;  %4635 = vmatpush3.msra.mxu1 %v12032_v13  ;;  %v12067_v52 = vld [vmem:[%s12452_s15 + $0xa8] sm:$0xff] }
 0xb51   :  { %3746 = vmatprep.subr.mxu0 %v11503_v12  ;;  %4636 = vmatprep.subr.mxu1 %v12039_v48  ;;  %v12074_v12 = vld [vmem:[%s12452_s15 + $0x28] sm:$0xff] }
 0xb52   :  { %3747 = vmatpush1.msra.mxu0 %v11510_v1  ;;  %4637 = vmatpush3.msra.mxu1 %v12046_v20  ;;  %v12081_v1 = vld [vmem:[%s12452_s15 + $0xa0] sm:$0xff] }
 0xb53   :  { %3748 = vmatprep.subr.mxu0 %v11517_v15  ;;  %4638 = vmatprep.subr.mxu1 %v12053_v61  ;;  %v12088_v15 = vld [vmem:[%s12452_s15 + $0x20] sm:$0xff] }
 0xb54   :  { %3749 = vmatpush1.msra.mxu0 %v11524_v2  ;;  %4639 = vmatpush3.msra.mxu1 %v12060_v6  ;;  %v12095_v2 = vld [vmem:[%s12452_s15 + $0x98] sm:$0xff] }
 0xb55   :  { %3750 = vmatprep.subr.mxu0 %v11531_v45  ;;  %4640 = vmatprep.subr.mxu1 %v12067_v52  ;;  %v12102_v45 = vld [vmem:[%s12452_s15 + $0x18] sm:$0xff] }
 0xb56   :  { %3751 = vmatpush1.msra.mxu0 %v11538_v56  ;;  %4641 = vmatpush3.msra.mxu1 %v12074_v12  ;;  %v12109_v56 = vld [vmem:[%s12452_s15 + $0x90] sm:$0xff] }
 0xb57   :  { %3752 = vmatprep.subr.mxu0 %v11545_v16  ;;  %4642 = vmatprep.subr.mxu1 %v12081_v1  ;;  %v12116_v16 = vld [vmem:[%s12452_s15 + $0x10] sm:$0xff] }
 0xb58   :  { %3753 = vmatpush1.msra.mxu0 %v11552_v9  ;;  %4643 = vmatpush3.msra.mxu1 %v12088_v15  ;;  %v12123_v9 = vld [vmem:[%s12452_s15 + $0x88] sm:$0xff] }
 0xb59   :  { %3754 = vmatprep.subr.mxu0 %v11559_v36  ;;  %4644 = vmatprep.subr.mxu1 %v12095_v2  ;;  %v12130_v36 = vld [vmem:[%s12452_s15 + $0x8] sm:$0xff] }
 0xb5a   :  { %3755 = vmatpush1.msra.mxu0 %v11566_v49  ;;  %4645 = vmatpush3.msra.mxu1 %v12102_v45  ;;  %v12137_v49 = vld [vmem:[%s12452_s15 + $0x80] sm:$0xff] }
 0xb5b   :  { %3756 = vmatprep.subr.mxu0 %v11573_v24  ;;  %4646 = vmatprep.subr.mxu1 %v12109_v56  ;;  %v12144_v24 = vld [vmem:[%s12452_s15] sm:$0xff] }
 0xb5c   :  { %3757 = vmatpush1.msra.mxu0 %v11580_v5  ;;  %4647 = vmatpush3.msra.mxu1 %v12116_v16  ;;  %v13919_v5 = vld [vmem:[#allocation65_spill] sm:$0xff] }
 0xb5d   :  { %3758 = vmatprep.subr.mxu0 %v11587_v10  ;;  %4648 = vmatprep.subr.mxu1 %v12123_v9  ;;  %v13920_v10 = vmov 0.0  }
 0xb5e   :  { %3759 = vmatpush1.msra.mxu0 %v11594_v40  ;;  %4649 = vmatpush3.msra.mxu1 %v12130_v36  ;;  %v13921_v40 = vld [vmem:[#allocation28_spill] sm:$0xff] }
 0xb5f   :  { %3760 = vmatprep.subr.mxu0 %v11601_v54  ;;  %4650 = vmatprep.subr.mxu1 %v12137_v49  ;;  %v13922_v54 = vld [vmem:[#allocation30_spill] sm:$0xff] }
 0xb60   :  { %3761 = vmatpush1.msra.mxu0 %v11608_v55  ;;  %4651 = vmatpush3.msra.mxu1 %v12144_v24  ;;  %v13923_v55 = vld [vmem:[#allocation19_spill] sm:$0xff] }
 0xb61   :  { %3762 = vmatprep.subr.mxu0 %v11615_v43  ;;  %3955 = vmatmul.mubr.f32.vlgmr.msra.gmra.mxu1 %v13919_v5  ;;  %v13924_v43 = vld [vmem:[#allocation53_spill] sm:$0xff] }
 0xb62   :  { %3763 = vmatpush2.msra.mxu0 %v11622_v30  ;;  %4761 = vmatprep.subr.mxu1 %v13920_v10  ;;  %v13925_v30 = vld [vmem:[#allocation54_spill] sm:$0xff] }
 0xb63   :  { %3764 = vmatprep.subr.mxu0 %v11629_v17  ;;  %4793 = vmatprep.mubr.msk.f32.mxu1 %vm5921_vm0, %v13920_v10  ;;  %v13926_v17 = vld [vmem:[#allocation20_spill] sm:$0xff] }
 0xb64   :  { %3765 = vmatpush2.msra.mxu0 %v11636_v18  ;;  %v13927_v18 = vld [vmem:[#allocation55_spill] sm:$0xff]  ;;  %4762 = vmatpush3.msra.mxu1 %v4061_v50 }
 0xb65   :  { %3766 = vmatprep.subr.mxu0 %v11643_v19  ;;  %v13928_v19 = vld [vmem:[#allocation56_spill] sm:$0xff]  ;;  %4763 = vmatprep.subr.mxu1 %v13920_v10 }
 0xb66   :  { %3767 = vmatpush2.msra.mxu0 %v11650_v21  ;;  %v13929_v21 = vld [vmem:[#allocation57_spill] sm:$0xff] }
 0xb67   :  { %3768 = vmatprep.subr.mxu0 %v11657_v22  ;;  %v13930_v22 = vld [vmem:[#allocation58_spill] sm:$0xff] }
 0xb68   :  { %3769 = vmatpush2.msra.mxu0 %v11664_v41  ;;  %v13931_v41 = vld [vmem:[#allocation59_spill] sm:$0xff] }
 0xb69   :  { %3770 = vmatprep.subr.mxu0 %v11671_v23  ;;  %v13932_v23 = vld [vmem:[#allocation60_spill] sm:$0xff] }
 0xb6a   :  { %3771 = vmatpush2.msra.mxu0 %v13921_v40 }
 0xb6b   :  { %3772 = vmatprep.subr.mxu0 %v13922_v54 }
 0xb6c   :  { %3773 = vmatpush2.msra.mxu0 %v13923_v55 }
 0xb6d   :  { %3774 = vmatprep.subr.mxu0 %v13924_v43  ;;  %v13949_v43 = vld [vmem:[#allocation22_spill] sm:$0xff] }
 0xb6e   :  { %3775 = vmatpush2.msra.mxu0 %v13925_v30 }
 0xb6f   :  { %3776 = vmatprep.subr.mxu0 %v13926_v17  ;;  %v13950_v17 = vld [vmem:[#allocation71_spill] sm:$0xff] }
 0xb70   :  { %3777 = vmatpush2.msra.mxu0 %v13927_v18 }
 0xb71   :  { %3778 = vmatprep.subr.mxu0 %v13928_v19 }
 0xb72   :  { %3779 = vmatpush2.msra.mxu0 %v13929_v21 }
 0xb73   :  { %3780 = vmatprep.subr.mxu0 %v13930_v22 }
 0xb74   :  { %3781 = vmatpush2.msra.mxu0 %v13931_v41 }
 0xb75   :  { %3782 = vmatprep.subr.mxu0 %v13932_v23 }
 0xb76   :  { %3783 = vmatpush2.msra.mxu0 %v13933_v0 }
 0xb77   :  { %3784 = vmatprep.subr.mxu0 %v13934_v11 }
 0xb78   :  { %3785 = vmatpush2.msra.mxu0 %v13935_v42 }
 0xb79   :  { %3786 = vmatprep.subr.mxu0 %v13936_v34 }
 0xb7a   :  { %3787 = vmatpush2.msra.mxu0 %v13937_v59  ;;  %v13951_v59 = vld [vmem:[#allocation81_spill] sm:$0xff] }
 0xb7b   :  { %3788 = vmatprep.subr.mxu0 %v13938_v33 }
 0xb7c   :  { %3789 = vmatpush2.msra.mxu0 %v13939_v35 }
 0xb7d   :  { %3790 = vmatprep.subr.mxu0 %v13940_v25 }
 0xb7e   :  { %3791 = vmatpush2.msra.mxu0 %v13941_v3 }
 0xb7f   :  { %3792 = vmatprep.subr.mxu0 %v13942_v44  ;;  %v13952_v44 = vld [vmem:[#allocation29_spill] sm:$0xff] }
 0xb80   :  { %3793 = vmatpush2.msra.mxu0 %v13943_v39 }
 0xb81   :  { %3795 = vmatmul.mubr.f32.vlgmr.msra.gmra.mxu0 %v11934_v26  ;;  %4655 = vmatprep.subr.mxu0 %v13944_v31 }
 0xb82   :  { %4656 = vmatpush3.msra.mxu0 %v11929_v38  ;;  %v4060_v38 = vld [vmem:[%s12454_s17 + $0xf0] sm:$0xff] }
 0xb83   :  { %4657 = vmatprep.subr.mxu0 %v11941_v47  ;;  %4764 = vmatpush3.msra.mxu1 %v4060_v38  ;;  %v4059_v47 = vld [vmem:[%s12454_s17 + $0xe8] sm:$0xff] }
 0xb84   :  { %4658 = vmatpush3.msra.mxu0 %v11948_v28  ;;  %4765 = vmatprep.subr.mxu1 %v13920_v10  ;;  %v4058_v28 = vld [vmem:[%s12454_s17 + $0xe0] sm:$0xff] }
 0xb85   :  { %4659 = vmatprep.subr.mxu0 %v11955_v14  ;;  %4766 = vmatpush3.msra.mxu1 %v4059_v47  ;;  %v4057_v14 = vld [vmem:[%s12454_s17 + $0xd8] sm:$0xff]  ;;  %v13953_v47 = vld [vmem:[#allocation73_spill] sm:$0xff] }
 0xb86   :  { %4660 = vmatpush3.msra.mxu0 %v11962_v27  ;;  %4767 = vmatprep.subr.mxu1 %v13920_v10  ;;  %v4055_v27 = vld [vmem:[%s12454_s17 + $0xc8] sm:$0xff] }
 0xb87   :  { %4661 = vmatprep.subr.mxu0 %v11969_v53  ;;  %4768 = vmatpush3.msra.mxu1 %v4058_v28  ;;  %v4054_v53 = vld [vmem:[%s12454_s17 + $0xc0] sm:$0xff] }
 0xb88   :  { %4662 = vmatpush3.msra.mxu0 %v11976_v29  ;;  %4769 = vmatprep.subr.mxu1 %v13920_v10  ;;  %v4053_v29 = vld [vmem:[%s12454_s17 + $0xb8] sm:$0xff] }
 0xb89   :  { %4663 = vmatprep.subr.mxu0 %v11983_v46  ;;  %4770 = vmatpush3.msra.mxu1 %v4057_v14  ;;  %v4052_v46 = vld [vmem:[%s12454_s17 + $0xb0] sm:$0xff] }
 0xb8a   :  { %4664 = vmatpush3.msra.mxu0 %v11990_v63  ;;  %4771 = vmatprep.subr.mxu1 %v13920_v10  ;;  %v4051_v63 = vld [vmem:[%s12454_s17 + $0xa8] sm:$0xff] }
 0xb8b   :  { %4665 = vmatprep.subr.mxu0 %v11997_v62  ;;  %4772 = vmatpush3.msra.mxu1 %v4056_v37  ;;  %v4050_v62 = vld [vmem:[%s12454_s17 + $0xa0] sm:$0xff] }
 0xb8c   :  { %4666 = vmatpush3.msra.mxu0 %v12004_v57  ;;  %4773 = vmatprep.subr.mxu1 %v13920_v10  ;;  %v4049_v57 = vld [vmem:[%s12454_s17 + $0x98] sm:$0xff] }
 0xb8d   :  { %4667 = vmatprep.subr.mxu0 %v12011_v60  ;;  %4774 = vmatpush3.msra.mxu1 %v4055_v27  ;;  %v4048_v60 = vld [vmem:[%s12454_s17 + $0x90] sm:$0xff] }
 0xb8e   :  { %4668 = vmatpush3.msra.mxu0 %v12018_v51  ;;  %4775 = vmatprep.subr.mxu1 %v13920_v10  ;;  %v4047_v51 = vld [vmem:[%s12454_s17 + $0x88] sm:$0xff] }
 0xb8f   :  { %4669 = vmatprep.subr.mxu0 %v12025_v8  ;;  %4776 = vmatpush3.msra.mxu1 %v4054_v53  ;;  %v4046_v8 = vld [vmem:[%s12454_s17 + $0x80] sm:$0xff] }
 0xb90   :  { %4670 = vmatpush3.msra.mxu0 %v12032_v13  ;;  %4777 = vmatprep.subr.mxu1 %v13920_v10 }
 0xb91   :  { %4671 = vmatprep.subr.mxu0 %v12039_v48  ;;  %4778 = vmatpush3.msra.mxu1 %v4053_v29 }
 0xb92   :  { %4672 = vmatpush3.msra.mxu0 %v12046_v20  ;;  %4779 = vmatprep.subr.mxu1 %v13920_v10  ;;  %v13945_v20 = vld [vmem:[#allocation25_spill] sm:$0xff] }
 0xb93   :  { %4673 = vmatprep.subr.mxu0 %v12053_v61  ;;  %4780 = vmatpush3.msra.mxu1 %v4052_v46 }
 0xb94   :  { %4674 = vmatpush3.msra.mxu0 %v12060_v6  ;;  %4781 = vmatprep.subr.mxu1 %v13920_v10  ;;  %v13946_v6 = vld [vmem:[#allocation75_spill] sm:$0xff] }
 0xb95   :  { %4675 = vmatprep.subr.mxu0 %v12067_v52  ;;  %4782 = vmatpush3.msra.mxu1 %v4051_v63 }
 0xb96   :  { %4676 = vmatpush3.msra.mxu0 %v12074_v12  ;;  %4783 = vmatprep.subr.mxu1 %v13920_v10  ;;  %v13947_v12 = vld [vmem:[#allocation67_spill] sm:$0xff] }
 0xb97   :  { %4677 = vmatprep.subr.mxu0 %v12081_v1  ;;  %4784 = vmatpush3.msra.mxu1 %v4050_v62 }
 0xb98   :  { %4678 = vmatpush3.msra.mxu0 %v12088_v15  ;;  %4785 = vmatprep.subr.mxu1 %v13920_v10 }
 0xb99   :  { %4679 = vmatprep.subr.mxu0 %v12095_v2  ;;  %4786 = vmatpush3.msra.mxu1 %v4049_v57  ;;  %v13948_v2 = vld [vmem:[#allocation69_spill] sm:$0xff]  ;;  %v3847_v57 = vpop.permute.xlu1 %3846 }
 0xb9a   :  { %4680 = vmatpush3.msra.mxu0 %v12102_v45  ;;  %4787 = vmatprep.subr.mxu1 %v13920_v10  ;;  %vm3848_vm3 = vcmp.eq.s32.totalorder %v3847_v57, 1 }
 0xb9b   :  { %4681 = vmatprep.subr.mxu0 %v12109_v56  ;;  %4788 = vmatpush3.msra.mxu1 %v4048_v60 }
 0xb9c   :  { %4682 = vmatpush3.msra.mxu0 %v12116_v16  ;;  %4789 = vmatprep.subr.mxu1 %v13920_v10 }
 0xb9d   :  { %4683 = vmatprep.subr.mxu0 %v12123_v9  ;;  %4790 = vmatpush3.msra.mxu1 %v4047_v51 }
 0xb9e   :  { %4684 = vmatpush3.msra.mxu0 %v12130_v36  ;;  %4791 = vmatprep.subr.mxu1 %v13920_v10 }
 0xb9f   :  { %4685 = vmatprep.subr.mxu0 %v12137_v49  ;;  %4792 = vmatpush3.msra.mxu1 %v4046_v8  ;;  %v12290_v49 = vld [vmem:[#allocation10] ss:$0 sm:$0xff] }
 0xba0   :  { %4686 = vmatpush3.msra.mxu0 %v12144_v24  ;;  %4831 = vmatprep.subr.mxu1 %v13920_v10 }
 0xba1   :  { %4796 = vmatprep.subr.mxu0 %v13920_v10 }
 0xc00   :  { %v3654_v13 = vpop.f32.mrf.mxu0  ;;  %v3725_v15 = vpop.f32.mrf.mxu1 }
 0xc01   :  { %v3655_v61 = vadd.f32 %v3654_v13, %v13945_v20  ;;  %v3726_v5 = vadd.f32 %v3725_v15, %v13428_v4  ;;  %v4045_v20 = vld [vmem:[%s12454_s17 + $0x78] sm:$0xff] }
 0xc02   :  { %v3656_v48 = vpop.f32.mrf.mxu0  ;;  %v3727_v16 = vpop.f32.mrf.mxu1  ;;  %v4037_v15 = vld [vmem:[%s12454_s17 + $0x38] sm:$0xff] }
 0xc03   :  { %v3657_v52 = vadd.f32 %v3656_v48, %v13946_v6  ;;  %v3801_v1 = vadd.f32 %v3655_v61, %v13947_v12  ;;  %v3728_v54 = vadd.f32 %v3727_v16, %v13670_v58  ;;  %v3815_v30 = vadd.f32 %v3726_v5, %v13949_v43  ;;  %v4044_v61 = vld [vmem:[%s12454_s17 + $0x70] sm:$0xff]  ;;  %v4041_v6 = vld [vmem:[%s12454_s17 + $0x58] sm:$0xff]  ;;  %v4039_v12 = vld [vmem:[%s12454_s17 + $0x48] sm:$0xff] }
 0xc04   :  { %v4033_v16 = vld [vmem:[%s12454_s17 + $0x18] sm:$0xff]  ;;  %v4221_v5 = vld [vmem:[%s12456_s19 + $0x50] sm:$0x1f] }
 0xc05   :  { %v3802_v45 = vadd.f32 %v3657_v52, %v13948_v2  ;;  %v4577_v56 = vmul.f32 -1.442695, %v3801_v1  ;;  %v3816_v18 = vadd.f32 %v3728_v54, %v13950_v17  ;;  %v4579_v19 = vmul.f32 -1.442695, %v3815_v30  ;;  %v4040_v52 = vld [vmem:[%s12454_s17 + $0x50] sm:$0xff]  ;;  %v4038_v1 = vld [vmem:[%s12454_s17 + $0x40] sm:$0xff] }
 0xc06   :  { %v4036_v2 = vld [vmem:[%s12454_s17 + $0x30] sm:$0xff]  ;;  %v4219_v54 = vld [vmem:[%s12456_s19 + $0x40] sm:$0xff]  ;;  %v4216_v30 = vld [vmem:[%s12456_s19 + $0x28] sm:$0xff] }
 0xc07   :  { %v4578_v9 = vmul.f32 -1.442695, %v3802_v45  ;;  %5164 = vpow2.f32 %v4577_v56  ;;  %v4580_v21 = vmul.f32 -1.442695, %v3816_v18  ;;  %v4035_v45 = vld [vmem:[%s12454_s17 + $0x28] sm:$0xff]  ;;  %v4034_v56 = vld [vmem:[%s12454_s17 + $0x20] sm:$0xff] }
 0xc08   :  { %v4217_v43 = vld [vmem:[%s12456_s19 + $0x30] sm:$0xff]  ;;  %v4215_v17 = vld [vmem:[%s12456_s19 + $0x20] sm:$0xff] }
 0xc09   :  { %5166 = vpow2.f32 %v4578_v9  ;;  %v4032_v9 = vld [vmem:[%s12454_s17 + $0x10] sm:$0xff] }
 0xc0a   :  { %5168 = vpow2.f32 %v4579_v19 }
 0xc0b   :  { %5170 = vpow2.f32 %v4580_v21 }
 0xc14   :  { %v5165_v22 = vpop.eup %5164 }
 0xc15   :  { %v3809_v4 = vadd.f32 1.0, %v5165_v22 }
 0xc16   :  { %v5167_v41 = vpop.eup %5166 }
 0xc17   :  { %v3810_v23 = vadd.f32 1.0, %v5167_v41  ;;  %5172 = vrcp.f32 %v3809_v4  ;;  %v5169_v58 = vpop.eup %5168 }
 0xc18   :  { %v5171_v0 = vpop.eup %5170  ;;  %v3823_v11 = vadd.f32 1.0, %v5169_v58  ;;  %v4213_v58 = vld [vmem:[%s12456_s19 + $0x10] sm:$0xff] }
 0xc19   :  { %5174 = vrcp.f32 %v3810_v23  ;;  %v3824_v34 = vadd.f32 1.0, %v5171_v0  ;;  %v4214_v23 = vld [vmem:[%s12456_s19 + $0x18] sm:$0xff]  ;;  %v4211_v0 = vld [vmem:[%s12456_s19] sm:$0xff] }
 0xc1a   :  { %5176 = vrcp.f32 %v3823_v11  ;;  %v4311_v11 = vld [vmem:[%s12458_s21 + $0x18] sm:$0xf] }
 0xc1b   :  { %5178 = vrcp.f32 %v3824_v34  ;;  %v4582_v34 = vld [vmem:[#allocation11] ss:$0 sm:$0xff] }
 0xc21   :  { %v4652_v36 = vpop.f32.mrf.mxu1 }
 0xc23   :  { %v4653_v24 = vpop.f32.mrf.mxu1 }
 0xc24   :  { %v4654_v40 = vadd.f32 %v4653_v24, %v4652_v36  ;;  %v5173_v35 = vpop.eup %5172  ;;  %v4031_v36 = vld [vmem:[%s12454_s17 + $0x8] sm:$0xff]  ;;  %v4030_v24 = vld [vmem:[%s12454_s17] sm:$0xff] }
 0xc26   :  { %v3957_v55 = vadd.f32 %v4654_v40, %v12290_v49  ;;  %v5175_v31 = vpop.eup %5174  ;;  %v4220_v40 = vld [vmem:[%s12456_s19 + $0x48] sm:$0xff] }
 0xc27   :  { %v5177_v14 = vpop.eup %5176 }
 0xc28   :  { %4794 = vmatmul.mubr.f32.vlgmr.msra.gmra.mxu1 %v3957_v55  ;;  %v5179_v37 = vpop.eup %5178  ;;  %v3835_v27 = vsub.f32 1.0, %v5177_v14  ;;  %v3839_v62 = vmul.f32 %v5177_v14, %v11934_v26  ;;  %v4218_v55 = vld [vmem:[%s12456_s19 + $0x38] sm:$0xff]  ;;  %v4586_v14 = vld [vmem:[#allocation2] ss:$0 sm:$0xff] }
 0xc29   :  { %4853 = vmatprep.mubr.msk.f32.mxu1 %vm5921_vm0, %v13920_v10  ;;  %v3836_v29 = vsub.f32 1.0, %v5179_v37  ;;  %v3840_v51 = vmul.f32 %v5179_v37, %v11924_v32  ;;  %4832 = vmatpush3.msk.msra.mxu1 %vm4233_vm4, %v4221_v5 }
 0xc2a   :  { %4833 = vmatprep.subr.mxu1 %v13920_v10 }
 0xc2b   :  { %4834 = vmatpush3.msra.mxu1 %v4220_v40 }
 0xc2c   :  { %4835 = vmatprep.subr.mxu1 %v13920_v10 }
 0xc2d   :  { %4836 = vmatpush3.msra.mxu1 %v4219_v54 }
 0xc2e   :  { %4837 = vmatprep.subr.mxu1 %v13920_v10 }
 0xc2f   :  { %4838 = vmatpush3.msra.mxu1 %v4218_v55 }
 0xc30   :  { %4839 = vmatprep.subr.mxu1 %v13920_v10 }
 0xc31   :  { %4840 = vmatpush3.msra.mxu1 %v4217_v43 }
 0xc32   :  { %4841 = vmatprep.subr.mxu1 %v13920_v10 }
 0xc33   :  { %4842 = vmatpush3.msra.mxu1 %v4216_v30 }
 0xc34   :  { %4843 = vmatprep.subr.mxu1 %v13920_v10 }
 0xc35   :  { %4844 = vmatpush3.msra.mxu1 %v4215_v17 }
 0xc36   :  { %4845 = vmatprep.subr.mxu1 %v13920_v10 }
 0xc37   :  { %4846 = vmatpush3.msra.mxu1 %v4214_v23 }
 0xc38   :  { %4847 = vmatprep.subr.mxu1 %v13920_v10 }
 0xc39   :  { %4848 = vmatpush3.msra.mxu1 %v4213_v58 }
 0xc3a   :  { %4849 = vmatprep.subr.mxu1 %v13920_v10 }
 0xc41   :  { %v3796_v42 = vpop.f32.mrf.mxu0 }
 0xc42   :  { %v3797_v33 = vadd.f32 %v3796_v42, %v13951_v59 }
 0xc43   :  { %v3798_v25 = vpop.f32.mrf.mxu0 }
 0xc44   :  { %v3829_v3 = vmul.f32 %v5173_v35, %v3797_v33  ;;  %v3799_v39 = vadd.f32 %v3798_v25, %v13952_v44  ;;  %v4309_v44 = vld [vmem:[%s12458_s21 + $0x8] sm:$0xff] }
 0xc46   :  { %v3831_v50 = vadd.f32 %v3829_v3, %v13674_v7  ;;  %v3830_v38 = vmul.f32 %v5175_v31, %v3799_v39  ;;  %v4310_v3 = vld [vmem:[%s12458_s21 + $0x10] sm:$0xff]  ;;  %v4308_v39 = vld [vmem:[%s12458_s21] sm:$0xff]  ;;  %v4583_v31 = vld [vmem:[#allocation13] ss:$0 sm:$0xff] }
 0xc48   :  { %5180 = vtanh.f32 %v3831_v50  ;;  %v3832_v28 = vadd.f32 %v3830_v38, %v13953_v47 }
 0xc4a   :  { %5182 = vtanh.f32 %v3832_v28 }
 0xc55   :  { %v5181_v53 = vpop.eup %5180 }
 0xc56   :  { %v3837_v46 = vmul.f32 %v5181_v53, %v3835_v27 }
 0xc57   :  { %v5183_v63 = vpop.eup %5182 }
 0xc58   :  { %v3838_v60 = vmul.f32 %v5183_v63, %v3836_v29  ;;  %v3841_v8 = vadd.f32 %v3839_v62, %v3837_v46 }
 0xc5a   :  { %v3842_v7 = vadd.f32 %v3840_v51, %v3838_v60  ;;  %v3849_v48 = vsel %vm3848_vm3, %v3841_v8, %v11934_v26  ;;  %v4042_v26 = vld [vmem:[%s12454_s17 + $0x60] sm:$0xff] }
 0xc5c   :  { %v3850_v13 = vsel %vm3848_vm3, %v3842_v7, %v11924_v32  ;;  %v4043_v32 = vld [vmem:[%s12454_s17 + $0x68] sm:$0xff] }
 0xc5d   :  { %4024 = vmatprep.mubr.f32.mxu0 %v3850_v13 }
 0xc5e   :  { %4025 = vmatmul.mubr.f32.vlgmr.msra.gmra.mxu0 %v3849_v48 }
 0xc5f   :  { %4828 = vmatprep.mubr.msk.f32.mxu0 %vm5921_vm0, %v13920_v10  ;;  %4797 = vmatpush3.msra.mxu0 %v4045_v20 }
 0xc60   :  { %4798 = vmatprep.subr.mxu0 %v13920_v10 }
 0xc61   :  { %4799 = vmatpush3.msra.mxu0 %v4044_v61 }
 0xc62   :  { %4800 = vmatprep.subr.mxu0 %v13920_v10 }
 0xc63   :  { %4801 = vmatpush3.msra.mxu0 %v4043_v32 }
 0xc64   :  { %4802 = vmatprep.subr.mxu0 %v13920_v10 }
 0xc65   :  { %4803 = vmatpush3.msra.mxu0 %v4042_v26 }
 0xc66   :  { %4804 = vmatprep.subr.mxu0 %v13920_v10 }
 0xc67   :  { %4805 = vmatpush3.msra.mxu0 %v4041_v6 }
 0xc68   :  { %4806 = vmatprep.subr.mxu0 %v13920_v10 }
 0xc69   :  { %4807 = vmatpush3.msra.mxu0 %v4040_v52 }
 0xc6a   :  { %4808 = vmatprep.subr.mxu0 %v13920_v10 }
 0xc6b   :  { %4809 = vmatpush3.msra.mxu0 %v4039_v12 }
 0xc6c   :  { %4810 = vmatprep.subr.mxu0 %v13920_v10 }
 0xc6d   :  { %4811 = vmatpush3.msra.mxu0 %v4038_v1 }
 0xc6e   :  { %4812 = vmatprep.subr.mxu0 %v13920_v10 }
 0xc6f   :  { %4813 = vmatpush3.msra.mxu0 %v4037_v15 }
 0xc70   :  { %4814 = vmatprep.subr.mxu0 %v13920_v10 }
 0xc71   :  { %4815 = vmatpush3.msra.mxu0 %v4036_v2 }
 0xc72   :  { %4816 = vmatprep.subr.mxu0 %v13920_v10 }
 0xc73   :  { %4817 = vmatpush3.msra.mxu0 %v4035_v45 }
 0xc74   :  { %4818 = vmatprep.subr.mxu0 %v13920_v10 }
 0xc75   :  { %4819 = vmatpush3.msra.mxu0 %v4034_v56 }
 0xc76   :  { %4820 = vmatprep.subr.mxu0 %v13920_v10 }
 0xc77   :  { %4821 = vmatpush3.msra.mxu0 %v4033_v16 }
 0xc78   :  { %4822 = vmatprep.subr.mxu0 %v13920_v10 }
 0xc79   :  { %4823 = vmatpush3.msra.mxu0 %v4032_v9 }
 0xc7a   :  { %4824 = vmatprep.subr.mxu0 %v13920_v10 }
 0xc7b   :  { %4825 = vmatpush3.msra.mxu0 %v4031_v36 }
 0xc7c   :  { %4826 = vmatprep.subr.mxu0 %v13920_v10 }
 0xc7d   :  { %4827 = vmatpush3.msra.mxu0 %v4030_v24 }
 0xc7e   :  { %4856 = vmatprep.subr.mxu0 %v13920_v10 }
 0xce8   :  { %v4128_v18 = vpop.f32.mrf.mxu1 }
 0xcea   :  { %v4795_v19 = vpop.f32.mrf.mxu1 }
 0xd1e   :  { %v4687_v21 = vpop.f32.mrf.mxu0 }
 0xd20   :  { %v4688_v22 = vpop.f32.mrf.mxu0 }
 0xd21   :  { %v4689_v41 = vadd.f32 %v4688_v22, %v4687_v21 }
 0xd23   :  { %v4027_v4 = vadd.f32 %v4689_v41, %v12290_v49  ;;  %v4212_v49 = vld [vmem:[%s12456_s19 + $0x8] sm:$0xff] }
 0xd24   :  { %4850 = vmatpush3.msra.mxu1 %v4212_v49 }
 0xd25   :  { %4829 = vmatmul.mubr.f32.vlgmr.msra.gmra.mxu0 %v4027_v4  ;;  %4851 = vmatprep.subr.mxu1 %v13920_v10 }
 0xd26   :  { %4864 = vmatprep.mubr.msk.f32.mxu0 %vm5921_vm0, %v13920_v10  ;;  %4852 = vmatpush3.msra.mxu1 %v4211_v0  ;;  %vm4323_vm0 = vcmask 1043456  }
 0xd27   :  { %4857 = vmatpush3.msk.msra.mxu0 %vm4323_vm0, %v4311_v11 }
 0xd28   :  { %4858 = vmatprep.subr.mxu0 %v13920_v10 }
 0xd29   :  { %4859 = vmatpush3.msra.mxu0 %v4310_v3 }
 0xd2a   :  { %4860 = vmatprep.subr.mxu0 %v13920_v10 }
 0xd2b   :  { %4861 = vmatpush3.msra.mxu0 %v4309_v44 }
 0xd2c   :  { %4862 = vmatprep.subr.mxu0 %v13920_v10 }
 0xd2d   :  { %4863 = vmatpush3.msra.mxu0 %v4308_v39 }
 0xde5   :  { %v4198_v42 = vpop.f32.mrf.mxu0 }
 0xde6   :  { %v4199_v59 = vadd.f32 %v4198_v42, %v4128_v18 }
 0xde7   :  { %v4830_v33 = vpop.f32.mrf.mxu0 }
 0xde8   :  { %v4209_v35 = vadd.f32 %v4582_v34, %v4199_v59 }
 0xdea   :  { %v4210_v25 = vmax.f32 %v4209_v35, 0.0 }
 0xdec   :  { %4854 = vmatmul.mubr.msk.f32.vlgmr.msra.gmra.mxu1 %vm4229_vm5, %v4210_v25 }
 0xeac   :  { %v4303_v50 = vpop.f32.mrf.mxu1 }
 0xead   :  { %v4304_v38 = vadd.f32 %v4583_v31, %v4303_v50 }
 0xeae   :  { %v4855_v47 = vpop.f32.mrf.mxu1 }
 0xeaf   :  { %v4307_v28 = vmax.f32 %v4304_v38, 0.0 }
 0xeb1   :  { %4865 = vmatmul.mubr.msk.f32.vlgmr.msra.gmra.mxu0 %vm4319_vm6, %v4307_v28 }
 0xf71   :  { %v4393_v37 = vpop.f32.mrf.mxu0 }
 0xf72   :  { %v4394_v27 = vadd.f32 %v4586_v14, %v4393_v37 }
 0xf73   :  { %v4866_v53 = vpop.f32.mrf.mxu0 }
 0xf74   :  { %4398 = vst.msk [vmem:[%s12460_s23] sm:$0x3] %vm4397_vm7, %v4394_v27 }
 0xf75   :  { %4403 = vsyncpa [#allocation4], 1 }
 0xf76   :  { %4404 = vsyncpa [#allocation6], 1 }
 0xf77   :  { %4405 = vsyncpa [#allocation9], 1 }
 0xf78   :  { %4406 = vsyncpa [#allocation12], 1 }

</bundles_post_ra>
